<compile_context>
chip_gen: v6e
topology: v6e:2x2x1
jax: 0.10.0
libtpu: 0.0.40
codegen_flags: <defaults>
</compile_context>

<pallas_src>
import jax
import jax.numpy as jnp
from jax import lax
from jax.experimental import pallas as pl
from jax.experimental.pallas import tpu as pltpu

_PAD = 3                 # spatial halo = max dilation
_DILATIONS = (1, 2, 3)   # hidden_conv1 / hidden_conv2 / hidden_conv3


# ----------------------------- Pallas kernel --------------------------------

def _mfb_fused_kernel(x1_ref, x2_ref, x3_ref, dww_ref, dwb_ref,
                      w1_ref, b1_ref, w2_ref, b2_ref, o_ref):
    # x*_ref : (1, H+6, W+6, Cp) spatially padded NHWC split (Cp lane-dense)
    # dww_ref: (3, 3, 3, Cp)     BN-scale-folded depthwise weights [d, ky, kx, c]
    # dwb_ref: (3, Cp)           folded per-channel bias (conv bias + BN shift)
    # w1_ref : (Cp, Cp)          fc1 weight, (in, out) layout
    # b1_ref : (1, Cp)           fc1 bias
    # w2_ref : (3, Cp, Cp)       fc2 weight per radix chunk, (in, out) layout
    # b2_ref : (3, Cp)           fc2 bias per radix chunk
    # o_ref  : (1, H, W, Cp)
    H, W, Cp = o_ref.shape[1], o_ref.shape[2], o_ref.shape[3]
    x_refs = (x1_ref, x2_ref, x3_ref)

    dww = dww_ref[...]
    dwb = dwb_ref[...]

    # --- multi-scale depthwise 3x3 (dilation 1/2/3) + folded BN + ReLU ------
    ms = []
    for k, d in enumerate(_DILATIONS):
        xk = x_refs[k]
        acc = jnp.zeros((H, W, Cp), jnp.float32)
        for ky in range(3):
            r0 = _PAD + (ky - 1) * d
            for kx in range(3):
                c0 = _PAD + (kx - 1) * d
                tap = xk[0, r0:r0 + H, c0:c0 + W, :]          # (H, W, Cp)
                acc = acc + tap * dww[k, ky, kx, :]
        ms.append(jnp.maximum(acc + dwb[k, :], 0.0))

    # --- global average pool of the raw splits (pre-conv), as in the module --
    s = (x1_ref[0, _PAD:_PAD + H, _PAD:_PAD + W, :]
         + x2_ref[0, _PAD:_PAD + H, _PAD:_PAD + W, :]
         + x3_ref[0, _PAD:_PAD + H, _PAD:_PAD + W, :])
    gap = jnp.sum(s, axis=(0, 1))[None, :] * (1.0 / (H * W))   # (1, Cp)

    # --- fc1 + ReLU, fc2, softmax over the radix axis ------------------------
    g = jnp.maximum(
        jnp.dot(gap, w1_ref[...], preferred_element_type=jnp.float32)
        + b1_ref[...], 0.0)                                    # (1, Cp)
    b2 = b2_ref[...]
    zs = [jnp.dot(g, w2_ref[r], preferred_element_type=jnp.float32)
          + b2[r, :][None, :] for r in range(3)]               # (1, Cp) each
    zmax = jnp.maximum(jnp.maximum(zs[0], zs[1]), zs[2])
    es = [jnp.exp(z - zmax) for z in zs]
    inv_denom = 1.0 / (es[0] + es[1] + es[2])

    # --- attention-weighted sum of the multi-scale branches ------------------
    out = jnp.zeros((H, W, Cp), jnp.float32)
    for k in range(3):
        attn_k = (es[k] * inv_denom).reshape(1, 1, Cp)
        out = out + attn_k * ms[k]
    o_ref[0] = out.astype(o_ref.dtype)


def _mfb_pallas_call(x1p, x2p, x3p, dww, dwb, w1t, b1, w2t, b2, H, W):
    B, Hp, Wp, Cp = x1p.shape
    xspec = pl.BlockSpec((1, Hp, Wp, Cp), lambda b: (b, 0, 0, 0))
    return pl.pallas_call(
        _mfb_fused_kernel,
        out_shape=jax.ShapeDtypeStruct((B, H, W, Cp), jnp.float32),
        grid_spec=pltpu.PrefetchScalarGridSpec(
            num_scalar_prefetch=0,
            grid=(B,),
            in_specs=[
                xspec, xspec, xspec,
                pl.BlockSpec((3, 3, 3, Cp), lambda b: (0, 0, 0, 0)),
                pl.BlockSpec((3, Cp), lambda b: (0, 0)),
                pl.BlockSpec((Cp, Cp), lambda b: (0, 0)),
                pl.BlockSpec((1, Cp), lambda b: (0, 0)),
                pl.BlockSpec((3, Cp, Cp), lambda b: (0, 0, 0)),
                pl.BlockSpec((3, Cp), lambda b: (0, 0)),
            ],
            out_specs=pl.BlockSpec((1, H, W, Cp), lambda b: (b, 0, 0, 0)),
        ),
        compiler_params=pltpu.CompilerParams(
            dimension_semantics=("parallel",)),
    )(x1p, x2p, x3p, dww, dwb, w1t, b1, w2t, b2)


# ------------------------------ JAX wrapper ----------------------------------

def mfb_forward(x, dw_w, dw_b, bn_gamma, bn_beta, bn_mean, bn_var,
                fc1_w, fc1_b, fc2_w, fc2_b, eps=1e-5):
    """MFB / SplAtConv2d forward (radix=3, groups=1, norm=None, eval-mode BN).

    x:     (B, 3*C, H, W)  NCHW, same interface as the PyTorch module
    dw_w:  (3, C, 1, 3, 3) depthwise conv weights of hidden_conv{1,2,3}[idx]
    dw_b:  (3, C)          depthwise conv biases
    bn_*:  (3, C)          BatchNorm2d affine params / running stats per branch
    fc1_w: (C, C, 1, 1),   fc1_b: (C,)
    fc2_w: (3*C, C, 1, 1), fc2_b: (3*C,)
    returns (B, C, H, W)
    """
    B, C3, H, W = x.shape
    C = C3 // 3
    Cp = pl.cdiv(C, 128) * 128         # lane-dense channel padding
    cpad = Cp - C

    x = x.astype(jnp.float32)

    # splits -> NHWC, +/-3 spatial halo (max dilation), channel pad to Cp
    xs = []
    for k in range(3):
        xk = jnp.transpose(x[:, k * C:(k + 1) * C], (0, 2, 3, 1))
        xk = jnp.pad(xk, ((0, 0), (_PAD, _PAD), (_PAD, _PAD), (0, cpad)))
        xs.append(xk)

    # Fold eval-mode BN into the depthwise weights / bias.
    dww_list, dwb_list = [], []
    for k in range(3):
        scale = bn_gamma[k] / jnp.sqrt(bn_var[k] + eps)            # (C,)
        wk = jnp.transpose(dw_w[k].reshape(C, 3, 3), (1, 2, 0))    # (3, 3, C)
        dww_list.append(jnp.pad(wk * scale[None, None, :],
                                ((0, 0), (0, 0), (0, cpad))))
        beff = (dw_b[k] - bn_mean[k]) * scale + bn_beta[k]
        dwb_list.append(jnp.pad(beff, (0, cpad)))
    dww = jnp.stack(dww_list).astype(jnp.float32)                  # (3, 3, 3, Cp)
    dwb = jnp.stack(dwb_list).astype(jnp.float32)                  # (3, Cp)

    # fc1 / fc2 (1x1 convs == dense), (in, out) layout, lane-padded.
    w1t = jnp.pad(fc1_w.reshape(C, C).T,
                  ((0, cpad), (0, cpad))).astype(jnp.float32)      # (Cp, Cp)
    b1 = jnp.pad(fc1_b, (0, cpad)).reshape(1, Cp).astype(jnp.float32)
    w2t = jnp.transpose(fc2_w.reshape(3, C, C), (0, 2, 1))         # (3, in, out)
    w2t = jnp.pad(w2t, ((0, 0), (0, cpad), (0, cpad))).astype(jnp.float32)
    b2 = jnp.pad(fc2_b.reshape(3, C), ((0, 0), (0, cpad))).astype(jnp.float32)

    out = _mfb_pallas_call(xs[0], xs[1], xs[2], dww, dwb, w1t, b1, w2t, b2, H, W)
    out = out[..., :C]                                             # drop lane pad
    # NCHW to match the PyTorch interface.
    # TODO(synk): keep NHWC end-to-end if the consumer allows it (saves a transpose).
    return jnp.transpose(out, (0, 3, 1, 2))


# --------------------------- reference (plain JAX) ---------------------------

def _reference(x, dw_w, dw_b, bn_gamma, bn_beta, bn_mean, bn_var,
               fc1_w, fc1_b, fc2_w, fc2_b, eps=1e-5):
    B, C3, H, W = x.shape
    C = C3 // 3
    splits = [x[:, k * C:(k + 1) * C] for k in range(3)]
    ms = []
    for k, d in enumerate(_DILATIONS):
        y = lax.conv_general_dilated(
            splits[k], dw_w[k], window_strides=(1, 1),
            padding=((d, d), (d, d)), rhs_dilation=(d, d),
            dimension_numbers=("NCHW", "OIHW", "NCHW"),
            feature_group_count=C)
        y = y + dw_b[k].reshape(1, -1, 1, 1)
        scale = (bn_gamma[k] / jnp.sqrt(bn_var[k] + eps)).reshape(1, -1, 1, 1)
        y = (y - bn_mean[k].reshape(1, -1, 1, 1)) * scale \
            + bn_beta[k].reshape(1, -1, 1, 1)
        ms.append(jnp.maximum(y, 0.0))
    gap = jnp.mean(splits[0] + splits[1] + splits[2], axis=(2, 3))     # (B, C)
    g = jnp.maximum(gap @ fc1_w.reshape(C, C).T + fc1_b, 0.0)
    z = g @ fc2_w.reshape(3 * C, C).T + fc2_b                          # (B, 3C)
    a = jax.nn.softmax(z.reshape(B, 3, C), axis=1)                     # (B, 3, C)
    return sum(a[:, k][:, :, None, None] * ms[k] for k in range(3))


# --------------------------------- main ---------------------------------------

if __name__ == "__main__":
    key = jax.random.PRNGKey(0)
    keys = jax.random.split(key, 11)

    # hidden_dims[0] = 16, idx = 0  =>  C = 16, cat_feat has 3*C channels.
    B, C, H, W = 2, 16, 16, 16
    C3 = 3 * C

    x = jax.random.normal(keys[0], (B, C3, H, W), dtype=jnp.float32)
    dw_w = 0.3 * jax.random.normal(keys[1], (3, C, 1, 3, 3), dtype=jnp.float32)
    dw_b = 0.1 * jax.random.normal(keys[2], (3, C), dtype=jnp.float32)
    bn_gamma = 1.0 + 0.1 * jax.random.normal(keys[3], (3, C), dtype=jnp.float32)
    bn_beta = 0.1 * jax.random.normal(keys[4], (3, C), dtype=jnp.float32)
    bn_mean = 0.1 * jax.random.normal(keys[5], (3, C), dtype=jnp.float32)
    bn_var = jnp.abs(1.0 + 0.1 * jax.random.normal(keys[6], (3, C),
                                                   dtype=jnp.float32))
    fc1_w = 0.2 * jax.random.normal(keys[7], (C, C, 1, 1), dtype=jnp.float32)
    fc1_b = 0.1 * jax.random.normal(keys[8], (C,), dtype=jnp.float32)
    fc2_w = 0.2 * jax.random.normal(keys[9], (3 * C, C, 1, 1), dtype=jnp.float32)
    fc2_b = 0.1 * jax.random.normal(keys[10], (3 * C,), dtype=jnp.float32)

    fwd = jax.jit(mfb_forward)
    out = jax.block_until_ready(
        fwd(x, dw_w, dw_b, bn_gamma, bn_beta, bn_mean, bn_var,
            fc1_w, fc1_b, fc2_w, fc2_b))

    ref = _reference(x, dw_w, dw_b, bn_gamma, bn_beta, bn_mean, bn_var,
                     fc1_w, fc1_b, fc2_w, fc2_b)
    assert out.shape == (B, C, H, W)
    max_err = jnp.max(jnp.abs(out - ref))
    assert jnp.allclose(out, ref, atol=1e-4, rtol=1e-4), f"max err {max_err}"

    print("KERNEL_OK")
</pallas_src>

<mosaic_0001>
module attributes {stable_mosaic.version = 11 : i64} {
  func.func @_mfb_fused_kernel(%arg0: i32, %arg1: memref<1x22x22x128xf32, #tpu.memory_space<vmem>>, %arg2: memref<1x22x22x128xf32, #tpu.memory_space<vmem>>, %arg3: memref<1x22x22x128xf32, #tpu.memory_space<vmem>>, %arg4: memref<3x3x3x128xf32, #tpu.memory_space<vmem>>, %arg5: memref<3x128xf32, #tpu.memory_space<vmem>>, %arg6: memref<128x128xf32, #tpu.memory_space<vmem>>, %arg7: memref<1x128xf32, #tpu.memory_space<vmem>>, %arg8: memref<3x128x128xf32, #tpu.memory_space<vmem>>, %arg9: memref<3x128xf32, #tpu.memory_space<vmem>>, %arg10: memref<1x16x16x128xf32, #tpu.memory_space<vmem>>) attributes {dimension_semantics = [#tpu.dimension_semantics<parallel>], iteration_bounds = array<i64: 2>, scalar_prefetch = 0 : i64, scratch_operands = 0 : i64, tpu.core_type = #tpu.core_type<tc>, window_params = [{transform_indices = @transform_0, window_bounds = array<i64: 1, 22, 22, 128>}, {transform_indices = @transform_1, window_bounds = array<i64: 1, 22, 22, 128>}, {transform_indices = @transform_2, window_bounds = array<i64: 1, 22, 22, 128>}, {pipeline_mode = #tpu.pipeline_mode<synchronous>, transform_indices = @transform_3, window_bounds = array<i64: 3, 3, 3, 128>}, {pipeline_mode = #tpu.pipeline_mode<synchronous>, transform_indices = @transform_4, window_bounds = array<i64: 3, 128>}, {pipeline_mode = #tpu.pipeline_mode<synchronous>, transform_indices = @transform_5, window_bounds = array<i64: 128, 128>}, {pipeline_mode = #tpu.pipeline_mode<synchronous>, transform_indices = @transform_6, window_bounds = array<i64: 1, 128>}, {pipeline_mode = #tpu.pipeline_mode<synchronous>, transform_indices = @transform_7, window_bounds = array<i64: 3, 128, 128>}, {pipeline_mode = #tpu.pipeline_mode<synchronous>, transform_indices = @transform_8, window_bounds = array<i64: 3, 128>}, {transform_indices = @transform_9, window_bounds = array<i64: 1, 16, 16, 128>}]} {
    %c0 = arith.constant 0 : index
    %c0_0 = arith.constant 0 : index
    %c0_1 = arith.constant 0 : index
    %c0_2 = arith.constant 0 : index
    %0 = vector.load %arg4[%c0, %c0_0, %c0_1, %c0_2] : memref<3x3x3x128xf32, #tpu.memory_space<vmem>>, vector<3x3x3x128xf32>
    %c0_3 = arith.constant 0 : index
    %c0_4 = arith.constant 0 : index
    %1 = vector.load %arg5[%c0_3, %c0_4] : memref<3x128xf32, #tpu.memory_space<vmem>>, vector<3x128xf32>
    %cst = arith.constant 0.000000e+00 : f32
    %2 = vector.broadcast %cst : f32 to vector<16x16x128xf32>
    %c0_5 = arith.constant 0 : index
    %c2 = arith.constant 2 : index
    %c2_6 = arith.constant 2 : index
    %c0_7 = arith.constant 0 : index
    %3 = vector.load %arg1[%c0_5, %c2, %c2_6, %c0_7] : memref<1x22x22x128xf32, #tpu.memory_space<vmem>>, vector<1x16x16x128xf32>
    %4 = vector.shape_cast %3 : vector<1x16x16x128xf32> to vector<16x16x128xf32>
    %5 = vector.extract_strided_slice %0 {offsets = [0, 0, 0, 0], sizes = [1, 1, 1, 128], strides = [1, 1, 1, 1]} : vector<3x3x3x128xf32> to vector<1x1x1x128xf32>
    %6 = vector.shape_cast %5 : vector<1x1x1x128xf32> to vector<128xf32>
    %7 = vector.shape_cast %6 : vector<128xf32> to vector<1x1x128xf32>
    %8 = vector.broadcast %7 : vector<1x1x128xf32> to vector<16x16x128xf32>
    %9 = arith.mulf %4, %8 : vector<16x16x128xf32>
    %10 = arith.addf %2, %9 : vector<16x16x128xf32>
    %c0_8 = arith.constant 0 : index
    %c2_9 = arith.constant 2 : index
    %c3 = arith.constant 3 : index
    %c0_10 = arith.constant 0 : index
    %11 = vector.load %arg1[%c0_8, %c2_9, %c3, %c0_10] : memref<1x22x22x128xf32, #tpu.memory_space<vmem>>, vector<1x16x16x128xf32>
    %12 = vector.shape_cast %11 : vector<1x16x16x128xf32> to vector<16x16x128xf32>
    %13 = vector.extract_strided_slice %0 {offsets = [0, 0, 1, 0], sizes = [1, 1, 1, 128], strides = [1, 1, 1, 1]} : vector<3x3x3x128xf32> to vector<1x1x1x128xf32>
    %14 = vector.shape_cast %13 : vector<1x1x1x128xf32> to vector<128xf32>
    %15 = vector.shape_cast %14 : vector<128xf32> to vector<1x1x128xf32>
    %16 = vector.broadcast %15 : vector<1x1x128xf32> to vector<16x16x128xf32>
    %17 = arith.mulf %12, %16 : vector<16x16x128xf32>
    %18 = arith.addf %10, %17 : vector<16x16x128xf32>
    %c0_11 = arith.constant 0 : index
    %c2_12 = arith.constant 2 : index
    %c4 = arith.constant 4 : index
    %c0_13 = arith.constant 0 : index
    %19 = vector.load %arg1[%c0_11, %c2_12, %c4, %c0_13] : memref<1x22x22x128xf32, #tpu.memory_space<vmem>>, vector<1x16x16x128xf32>
    %20 = vector.shape_cast %19 : vector<1x16x16x128xf32> to vector<16x16x128xf32>
    %21 = vector.extract_strided_slice %0 {offsets = [0, 0, 2, 0], sizes = [1, 1, 1, 128], strides = [1, 1, 1, 1]} : vector<3x3x3x128xf32> to vector<1x1x1x128xf32>
    %22 = vector.shape_cast %21 : vector<1x1x1x128xf32> to vector<128xf32>
    %23 = vector.shape_cast %22 : vector<128xf32> to vector<1x1x128xf32>
    %24 = vector.broadcast %23 : vector<1x1x128xf32> to vector<16x16x128xf32>
    %25 = arith.mulf %20, %24 : vector<16x16x128xf32>
    %26 = arith.addf %18, %25 : vector<16x16x128xf32>
    %c0_14 = arith.constant 0 : index
    %c3_15 = arith.constant 3 : index
    %c2_16 = arith.constant 2 : index
    %c0_17 = arith.constant 0 : index
    %27 = vector.load %arg1[%c0_14, %c3_15, %c2_16, %c0_17] : memref<1x22x22x128xf32, #tpu.memory_space<vmem>>, vector<1x16x16x128xf32>
    %28 = vector.shape_cast %27 : vector<1x16x16x128xf32> to vector<16x16x128xf32>
    %29 = vector.extract_strided_slice %0 {offsets = [0, 1, 0, 0], sizes = [1, 1, 1, 128], strides = [1, 1, 1, 1]} : vector<3x3x3x128xf32> to vector<1x1x1x128xf32>
    %30 = vector.shape_cast %29 : vector<1x1x1x128xf32> to vector<128xf32>
    %31 = vector.shape_cast %30 : vector<128xf32> to vector<1x1x128xf32>
    %32 = vector.broadcast %31 : vector<1x1x128xf32> to vector<16x16x128xf32>
    %33 = arith.mulf %28, %32 : vector<16x16x128xf32>
    %34 = arith.addf %26, %33 : vector<16x16x128xf32>
    %c0_18 = arith.constant 0 : index
    %c3_19 = arith.constant 3 : index
    %c3_20 = arith.constant 3 : index
    %c0_21 = arith.constant 0 : index
    %35 = vector.load %arg1[%c0_18, %c3_19, %c3_20, %c0_21] : memref<1x22x22x128xf32, #tpu.memory_space<vmem>>, vector<1x16x16x128xf32>
    %36 = vector.shape_cast %35 : vector<1x16x16x128xf32> to vector<16x16x128xf32>
    %37 = vector.extract_strided_slice %0 {offsets = [0, 1, 1, 0], sizes = [1, 1, 1, 128], strides = [1, 1, 1, 1]} : vector<3x3x3x128xf32> to vector<1x1x1x128xf32>
    %38 = vector.shape_cast %37 : vector<1x1x1x128xf32> to vector<128xf32>
    %39 = vector.shape_cast %38 : vector<128xf32> to vector<1x1x128xf32>
    %40 = vector.broadcast %39 : vector<1x1x128xf32> to vector<16x16x128xf32>
    %41 = arith.mulf %36, %40 : vector<16x16x128xf32>
    %42 = arith.addf %34, %41 : vector<16x16x128xf32>
    %c0_22 = arith.constant 0 : index
    %c3_23 = arith.constant 3 : index
    %c4_24 = arith.constant 4 : index
    %c0_25 = arith.constant 0 : index
    %43 = vector.load %arg1[%c0_22, %c3_23, %c4_24, %c0_25] : memref<1x22x22x128xf32, #tpu.memory_space<vmem>>, vector<1x16x16x128xf32>
    %44 = vector.shape_cast %43 : vector<1x16x16x128xf32> to vector<16x16x128xf32>
    %45 = vector.extract_strided_slice %0 {offsets = [0, 1, 2, 0], sizes = [1, 1, 1, 128], strides = [1, 1, 1, 1]} : vector<3x3x3x128xf32> to vector<1x1x1x128xf32>
    %46 = vector.shape_cast %45 : vector<1x1x1x128xf32> to vector<128xf32>
    %47 = vector.shape_cast %46 : vector<128xf32> to vector<1x1x128xf32>
    %48 = vector.broadcast %47 : vector<1x1x128xf32> to vector<16x16x128xf32>
    %49 = arith.mulf %44, %48 : vector<16x16x128xf32>
    %50 = arith.addf %42, %49 : vector<16x16x128xf32>
    %c0_26 = arith.constant 0 : index
    %c4_27 = arith.constant 4 : index
    %c2_28 = arith.constant 2 : index
    %c0_29 = arith.constant 0 : index
    %51 = vector.load %arg1[%c0_26, %c4_27, %c2_28, %c0_29] : memref<1x22x22x128xf32, #tpu.memory_space<vmem>>, vector<1x16x16x128xf32>
    %52 = vector.shape_cast %51 : vector<1x16x16x128xf32> to vector<16x16x128xf32>
    %53 = vector.extract_strided_slice %0 {offsets = [0, 2, 0, 0], sizes = [1, 1, 1, 128], strides = [1, 1, 1, 1]} : vector<3x3x3x128xf32> to vector<1x1x1x128xf32>
    %54 = vector.shape_cast %53 : vector<1x1x1x128xf32> to vector<128xf32>
    %55 = vector.shape_cast %54 : vector<128xf32> to vector<1x1x128xf32>
    %56 = vector.broadcast %55 : vector<1x1x128xf32> to vector<16x16x128xf32>
    %57 = arith.mulf %52, %56 : vector<16x16x128xf32>
    %58 = arith.addf %50, %57 : vector<16x16x128xf32>
    %c0_30 = arith.constant 0 : index
    %c4_31 = arith.constant 4 : index
    %c3_32 = arith.constant 3 : index
    %c0_33 = arith.constant 0 : index
    %59 = vector.load %arg1[%c0_30, %c4_31, %c3_32, %c0_33] : memref<1x22x22x128xf32, #tpu.memory_space<vmem>>, vector<1x16x16x128xf32>
    %60 = vector.shape_cast %59 : vector<1x16x16x128xf32> to vector<16x16x128xf32>
    %61 = vector.extract_strided_slice %0 {offsets = [0, 2, 1, 0], sizes = [1, 1, 1, 128], strides = [1, 1, 1, 1]} : vector<3x3x3x128xf32> to vector<1x1x1x128xf32>
    %62 = vector.shape_cast %61 : vector<1x1x1x128xf32> to vector<128xf32>
    %63 = vector.shape_cast %62 : vector<128xf32> to vector<1x1x128xf32>
    %64 = vector.broadcast %63 : vector<1x1x128xf32> to vector<16x16x128xf32>
    %65 = arith.mulf %60, %64 : vector<16x16x128xf32>
    %66 = arith.addf %58, %65 : vector<16x16x128xf32>
    %c0_34 = arith.constant 0 : index
    %c4_35 = arith.constant 4 : index
    %c4_36 = arith.constant 4 : index
    %c0_37 = arith.constant 0 : index
    %67 = vector.load %arg1[%c0_34, %c4_35, %c4_36, %c0_37] : memref<1x22x22x128xf32, #tpu.memory_space<vmem>>, vector<1x16x16x128xf32>
    %68 = vector.shape_cast %67 : vector<1x16x16x128xf32> to vector<16x16x128xf32>
    %69 = vector.extract_strided_slice %0 {offsets = [0, 2, 2, 0], sizes = [1, 1, 1, 128], strides = [1, 1, 1, 1]} : vector<3x3x3x128xf32> to vector<1x1x1x128xf32>
    %70 = vector.shape_cast %69 : vector<1x1x1x128xf32> to vector<128xf32>
    %71 = vector.shape_cast %70 : vector<128xf32> to vector<1x1x128xf32>
    %72 = vector.broadcast %71 : vector<1x1x128xf32> to vector<16x16x128xf32>
    %73 = arith.mulf %68, %72 : vector<16x16x128xf32>
    %74 = arith.addf %66, %73 : vector<16x16x128xf32>
    %75 = vector.extract_strided_slice %1 {offsets = [0, 0], sizes = [1, 128], strides = [1, 1]} : vector<3x128xf32> to vector<1x128xf32>
    %76 = vector.shape_cast %75 : vector<1x128xf32> to vector<128xf32>
    %77 = vector.shape_cast %76 : vector<128xf32> to vector<1x1x128xf32>
    %78 = vector.broadcast %77 : vector<1x1x128xf32> to vector<16x16x128xf32>
    %79 = arith.addf %74, %78 : vector<16x16x128xf32>
    %cst_38 = arith.constant 0.000000e+00 : f32
    %80 = vector.broadcast %cst_38 : f32 to vector<16x16x128xf32>
    %81 = arith.maximumf %79, %80 : vector<16x16x128xf32>
    %cst_39 = arith.constant 0.000000e+00 : f32
    %82 = vector.broadcast %cst_39 : f32 to vector<16x16x128xf32>
    %c0_40 = arith.constant 0 : index
    %c1 = arith.constant 1 : index
    %c1_41 = arith.constant 1 : index
    %c0_42 = arith.constant 0 : index
    %83 = vector.load %arg2[%c0_40, %c1, %c1_41, %c0_42] : memref<1x22x22x128xf32, #tpu.memory_space<vmem>>, vector<1x16x16x128xf32>
    %84 = vector.shape_cast %83 : vector<1x16x16x128xf32> to vector<16x16x128xf32>
    %85 = vector.extract_strided_slice %0 {offsets = [1, 0, 0, 0], sizes = [1, 1, 1, 128], strides = [1, 1, 1, 1]} : vector<3x3x3x128xf32> to vector<1x1x1x128xf32>
    %86 = vector.shape_cast %85 : vector<1x1x1x128xf32> to vector<128xf32>
    %87 = vector.shape_cast %86 : vector<128xf32> to vector<1x1x128xf32>
    %88 = vector.broadcast %87 : vector<1x1x128xf32> to vector<16x16x128xf32>
    %89 = arith.mulf %84, %88 : vector<16x16x128xf32>
    %90 = arith.addf %82, %89 : vector<16x16x128xf32>
    %c0_43 = arith.constant 0 : index
    %c1_44 = arith.constant 1 : index
    %c3_45 = arith.constant 3 : index
    %c0_46 = arith.constant 0 : index
    %91 = vector.load %arg2[%c0_43, %c1_44, %c3_45, %c0_46] : memref<1x22x22x128xf32, #tpu.memory_space<vmem>>, vector<1x16x16x128xf32>
    %92 = vector.shape_cast %91 : vector<1x16x16x128xf32> to vector<16x16x128xf32>
    %93 = vector.extract_strided_slice %0 {offsets = [1, 0, 1, 0], sizes = [1, 1, 1, 128], strides = [1, 1, 1, 1]} : vector<3x3x3x128xf32> to vector<1x1x1x128xf32>
    %94 = vector.shape_cast %93 : vector<1x1x1x128xf32> to vector<128xf32>
    %95 = vector.shape_cast %94 : vector<128xf32> to vector<1x1x128xf32>
    %96 = vector.broadcast %95 : vector<1x1x128xf32> to vector<16x16x128xf32>
    %97 = arith.mulf %92, %96 : vector<16x16x128xf32>
    %98 = arith.addf %90, %97 : vector<16x16x128xf32>
    %c0_47 = arith.constant 0 : index
    %c1_48 = arith.constant 1 : index
    %c5 = arith.constant 5 : index
    %c0_49 = arith.constant 0 : index
    %99 = vector.load %arg2[%c0_47, %c1_48, %c5, %c0_49] : memref<1x22x22x128xf32, #tpu.memory_space<vmem>>, vector<1x16x16x128xf32>
    %100 = vector.shape_cast %99 : vector<1x16x16x128xf32> to vector<16x16x128xf32>
    %101 = vector.extract_strided_slice %0 {offsets = [1, 0, 2, 0], sizes = [1, 1, 1, 128], strides = [1, 1, 1, 1]} : vector<3x3x3x128xf32> to vector<1x1x1x128xf32>
    %102 = vector.shape_cast %101 : vector<1x1x1x128xf32> to vector<128xf32>
    %103 = vector.shape_cast %102 : vector<128xf32> to vector<1x1x128xf32>
    %104 = vector.broadcast %103 : vector<1x1x128xf32> to vector<16x16x128xf32>
    %105 = arith.mulf %100, %104 : vector<16x16x128xf32>
    %106 = arith.addf %98, %105 : vector<16x16x128xf32>
    %c0_50 = arith.constant 0 : index
    %c3_51 = arith.constant 3 : index
    %c1_52 = arith.constant 1 : index
    %c0_53 = arith.constant 0 : index
    %107 = vector.load %arg2[%c0_50, %c3_51, %c1_52, %c0_53] : memref<1x22x22x128xf32, #tpu.memory_space<vmem>>, vector<1x16x16x128xf32>
    %108 = vector.shape_cast %107 : vector<1x16x16x128xf32> to vector<16x16x128xf32>
    %109 = vector.extract_strided_slice %0 {offsets = [1, 1, 0, 0], sizes = [1, 1, 1, 128], strides = [1, 1, 1, 1]} : vector<3x3x3x128xf32> to vector<1x1x1x128xf32>
    %110 = vector.shape_cast %109 : vector<1x1x1x128xf32> to vector<128xf32>
    %111 = vector.shape_cast %110 : vector<128xf32> to vector<1x1x128xf32>
    %112 = vector.broadcast %111 : vector<1x1x128xf32> to vector<16x16x128xf32>
    %113 = arith.mulf %108, %112 : vector<16x16x128xf32>
    %114 = arith.addf %106, %113 : vector<16x16x128xf32>
    %c0_54 = arith.constant 0 : index
    %c3_55 = arith.constant 3 : index
    %c3_56 = arith.constant 3 : index
    %c0_57 = arith.constant 0 : index
    %115 = vector.load %arg2[%c0_54, %c3_55, %c3_56, %c0_57] : memref<1x22x22x128xf32, #tpu.memory_space<vmem>>, vector<1x16x16x128xf32>
    %116 = vector.shape_cast %115 : vector<1x16x16x128xf32> to vector<16x16x128xf32>
    %117 = vector.extract_strided_slice %0 {offsets = [1, 1, 1, 0], sizes = [1, 1, 1, 128], strides = [1, 1, 1, 1]} : vector<3x3x3x128xf32> to vector<1x1x1x128xf32>
    %118 = vector.shape_cast %117 : vector<1x1x1x128xf32> to vector<128xf32>
    %119 = vector.shape_cast %118 : vector<128xf32> to vector<1x1x128xf32>
    %120 = vector.broadcast %119 : vector<1x1x128xf32> to vector<16x16x128xf32>
    %121 = arith.mulf %116, %120 : vector<16x16x128xf32>
    %122 = arith.addf %114, %121 : vector<16x16x128xf32>
    %c0_58 = arith.constant 0 : index
    %c3_59 = arith.constant 3 : index
    %c5_60 = arith.constant 5 : index
    %c0_61 = arith.constant 0 : index
    %123 = vector.load %arg2[%c0_58, %c3_59, %c5_60, %c0_61] : memref<1x22x22x128xf32, #tpu.memory_space<vmem>>, vector<1x16x16x128xf32>
    %124 = vector.shape_cast %123 : vector<1x16x16x128xf32> to vector<16x16x128xf32>
    %125 = vector.extract_strided_slice %0 {offsets = [1, 1, 2, 0], sizes = [1, 1, 1, 128], strides = [1, 1, 1, 1]} : vector<3x3x3x128xf32> to vector<1x1x1x128xf32>
    %126 = vector.shape_cast %125 : vector<1x1x1x128xf32> to vector<128xf32>
    %127 = vector.shape_cast %126 : vector<128xf32> to vector<1x1x128xf32>
    %128 = vector.broadcast %127 : vector<1x1x128xf32> to vector<16x16x128xf32>
    %129 = arith.mulf %124, %128 : vector<16x16x128xf32>
    %130 = arith.addf %122, %129 : vector<16x16x128xf32>
    %c0_62 = arith.constant 0 : index
    %c5_63 = arith.constant 5 : index
    %c1_64 = arith.constant 1 : index
    %c0_65 = arith.constant 0 : index
    %131 = vector.load %arg2[%c0_62, %c5_63, %c1_64, %c0_65] : memref<1x22x22x128xf32, #tpu.memory_space<vmem>>, vector<1x16x16x128xf32>
    %132 = vector.shape_cast %131 : vector<1x16x16x128xf32> to vector<16x16x128xf32>
    %133 = vector.extract_strided_slice %0 {offsets = [1, 2, 0, 0], sizes = [1, 1, 1, 128], strides = [1, 1, 1, 1]} : vector<3x3x3x128xf32> to vector<1x1x1x128xf32>
    %134 = vector.shape_cast %133 : vector<1x1x1x128xf32> to vector<128xf32>
    %135 = vector.shape_cast %134 : vector<128xf32> to vector<1x1x128xf32>
    %136 = vector.broadcast %135 : vector<1x1x128xf32> to vector<16x16x128xf32>
    %137 = arith.mulf %132, %136 : vector<16x16x128xf32>
    %138 = arith.addf %130, %137 : vector<16x16x128xf32>
    %c0_66 = arith.constant 0 : index
    %c5_67 = arith.constant 5 : index
    %c3_68 = arith.constant 3 : index
    %c0_69 = arith.constant 0 : index
    %139 = vector.load %arg2[%c0_66, %c5_67, %c3_68, %c0_69] : memref<1x22x22x128xf32, #tpu.memory_space<vmem>>, vector<1x16x16x128xf32>
    %140 = vector.shape_cast %139 : vector<1x16x16x128xf32> to vector<16x16x128xf32>
    %141 = vector.extract_strided_slice %0 {offsets = [1, 2, 1, 0], sizes = [1, 1, 1, 128], strides = [1, 1, 1, 1]} : vector<3x3x3x128xf32> to vector<1x1x1x128xf32>
    %142 = vector.shape_cast %141 : vector<1x1x1x128xf32> to vector<128xf32>
    %143 = vector.shape_cast %142 : vector<128xf32> to vector<1x1x128xf32>
    %144 = vector.broadcast %143 : vector<1x1x128xf32> to vector<16x16x128xf32>
    %145 = arith.mulf %140, %144 : vector<16x16x128xf32>
    %146 = arith.addf %138, %145 : vector<16x16x128xf32>
    %c0_70 = arith.constant 0 : index
    %c5_71 = arith.constant 5 : index
    %c5_72 = arith.constant 5 : index
    %c0_73 = arith.constant 0 : index
    %147 = vector.load %arg2[%c0_70, %c5_71, %c5_72, %c0_73] : memref<1x22x22x128xf32, #tpu.memory_space<vmem>>, vector<1x16x16x128xf32>
    %148 = vector.shape_cast %147 : vector<1x16x16x128xf32> to vector<16x16x128xf32>
    %149 = vector.extract_strided_slice %0 {offsets = [1, 2, 2, 0], sizes = [1, 1, 1, 128], strides = [1, 1, 1, 1]} : vector<3x3x3x128xf32> to vector<1x1x1x128xf32>
    %150 = vector.shape_cast %149 : vector<1x1x1x128xf32> to vector<128xf32>
    %151 = vector.shape_cast %150 : vector<128xf32> to vector<1x1x128xf32>
    %152 = vector.broadcast %151 : vector<1x1x128xf32> to vector<16x16x128xf32>
    %153 = arith.mulf %148, %152 : vector<16x16x128xf32>
    %154 = arith.addf %146, %153 : vector<16x16x128xf32>
    %155 = vector.extract_strided_slice %1 {offsets = [1, 0], sizes = [1, 128], strides = [1, 1]} : vector<3x128xf32> to vector<1x128xf32>
    %156 = vector.shape_cast %155 : vector<1x128xf32> to vector<128xf32>
    %157 = vector.shape_cast %156 : vector<128xf32> to vector<1x1x128xf32>
    %158 = vector.broadcast %157 : vector<1x1x128xf32> to vector<16x16x128xf32>
    %159 = arith.addf %154, %158 : vector<16x16x128xf32>
    %cst_74 = arith.constant 0.000000e+00 : f32
    %160 = vector.broadcast %cst_74 : f32 to vector<16x16x128xf32>
    %161 = arith.maximumf %159, %160 : vector<16x16x128xf32>
    %cst_75 = arith.constant 0.000000e+00 : f32
    %162 = vector.broadcast %cst_75 : f32 to vector<16x16x128xf32>
    %c0_76 = arith.constant 0 : index
    %c0_77 = arith.constant 0 : index
    %c0_78 = arith.constant 0 : index
    %c0_79 = arith.constant 0 : index
    %163 = vector.load %arg3[%c0_76, %c0_77, %c0_78, %c0_79] : memref<1x22x22x128xf32, #tpu.memory_space<vmem>>, vector<1x16x16x128xf32>
    %164 = vector.shape_cast %163 : vector<1x16x16x128xf32> to vector<16x16x128xf32>
    %165 = vector.extract_strided_slice %0 {offsets = [2, 0, 0, 0], sizes = [1, 1, 1, 128], strides = [1, 1, 1, 1]} : vector<3x3x3x128xf32> to vector<1x1x1x128xf32>
    %166 = vector.shape_cast %165 : vector<1x1x1x128xf32> to vector<128xf32>
    %167 = vector.shape_cast %166 : vector<128xf32> to vector<1x1x128xf32>
    %168 = vector.broadcast %167 : vector<1x1x128xf32> to vector<16x16x128xf32>
    %169 = arith.mulf %164, %168 : vector<16x16x128xf32>
    %170 = arith.addf %162, %169 : vector<16x16x128xf32>
    %c0_80 = arith.constant 0 : index
    %c0_81 = arith.constant 0 : index
    %c3_82 = arith.constant 3 : index
    %c0_83 = arith.constant 0 : index
    %171 = vector.load %arg3[%c0_80, %c0_81, %c3_82, %c0_83] : memref<1x22x22x128xf32, #tpu.memory_space<vmem>>, vector<1x16x16x128xf32>
    %172 = vector.shape_cast %171 : vector<1x16x16x128xf32> to vector<16x16x128xf32>
    %173 = vector.extract_strided_slice %0 {offsets = [2, 0, 1, 0], sizes = [1, 1, 1, 128], strides = [1, 1, 1, 1]} : vector<3x3x3x128xf32> to vector<1x1x1x128xf32>
    %174 = vector.shape_cast %173 : vector<1x1x1x128xf32> to vector<128xf32>
    %175 = vector.shape_cast %174 : vector<128xf32> to vector<1x1x128xf32>
    %176 = vector.broadcast %175 : vector<1x1x128xf32> to vector<16x16x128xf32>
    %177 = arith.mulf %172, %176 : vector<16x16x128xf32>
    %178 = arith.addf %170, %177 : vector<16x16x128xf32>
    %c0_84 = arith.constant 0 : index
    %c0_85 = arith.constant 0 : index
    %c6 = arith.constant 6 : index
    %c0_86 = arith.constant 0 : index
    %179 = vector.load %arg3[%c0_84, %c0_85, %c6, %c0_86] : memref<1x22x22x128xf32, #tpu.memory_space<vmem>>, vector<1x16x16x128xf32>
    %180 = vector.shape_cast %179 : vector<1x16x16x128xf32> to vector<16x16x128xf32>
    %181 = vector.extract_strided_slice %0 {offsets = [2, 0, 2, 0], sizes = [1, 1, 1, 128], strides = [1, 1, 1, 1]} : vector<3x3x3x128xf32> to vector<1x1x1x128xf32>
    %182 = vector.shape_cast %181 : vector<1x1x1x128xf32> to vector<128xf32>
    %183 = vector.shape_cast %182 : vector<128xf32> to vector<1x1x128xf32>
    %184 = vector.broadcast %183 : vector<1x1x128xf32> to vector<16x16x128xf32>
    %185 = arith.mulf %180, %184 : vector<16x16x128xf32>
    %186 = arith.addf %178, %185 : vector<16x16x128xf32>
    %c0_87 = arith.constant 0 : index
    %c3_88 = arith.constant 3 : index
    %c0_89 = arith.constant 0 : index
    %c0_90 = arith.constant 0 : index
    %187 = vector.load %arg3[%c0_87, %c3_88, %c0_89, %c0_90] : memref<1x22x22x128xf32, #tpu.memory_space<vmem>>, vector<1x16x16x128xf32>
    %188 = vector.shape_cast %187 : vector<1x16x16x128xf32> to vector<16x16x128xf32>
    %189 = vector.extract_strided_slice %0 {offsets = [2, 1, 0, 0], sizes = [1, 1, 1, 128], strides = [1, 1, 1, 1]} : vector<3x3x3x128xf32> to vector<1x1x1x128xf32>
    %190 = vector.shape_cast %189 : vector<1x1x1x128xf32> to vector<128xf32>
    %191 = vector.shape_cast %190 : vector<128xf32> to vector<1x1x128xf32>
    %192 = vector.broadcast %191 : vector<1x1x128xf32> to vector<16x16x128xf32>
    %193 = arith.mulf %188, %192 : vector<16x16x128xf32>
    %194 = arith.addf %186, %193 : vector<16x16x128xf32>
    %c0_91 = arith.constant 0 : index
    %c3_92 = arith.constant 3 : index
    %c3_93 = arith.constant 3 : index
    %c0_94 = arith.constant 0 : index
    %195 = vector.load %arg3[%c0_91, %c3_92, %c3_93, %c0_94] : memref<1x22x22x128xf32, #tpu.memory_space<vmem>>, vector<1x16x16x128xf32>
    %196 = vector.shape_cast %195 : vector<1x16x16x128xf32> to vector<16x16x128xf32>
    %197 = vector.extract_strided_slice %0 {offsets = [2, 1, 1, 0], sizes = [1, 1, 1, 128], strides = [1, 1, 1, 1]} : vector<3x3x3x128xf32> to vector<1x1x1x128xf32>
    %198 = vector.shape_cast %197 : vector<1x1x1x128xf32> to vector<128xf32>
    %199 = vector.shape_cast %198 : vector<128xf32> to vector<1x1x128xf32>
    %200 = vector.broadcast %199 : vector<1x1x128xf32> to vector<16x16x128xf32>
    %201 = arith.mulf %196, %200 : vector<16x16x128xf32>
    %202 = arith.addf %194, %201 : vector<16x16x128xf32>
    %c0_95 = arith.constant 0 : index
    %c3_96 = arith.constant 3 : index
    %c6_97 = arith.constant 6 : index
    %c0_98 = arith.constant 0 : index
    %203 = vector.load %arg3[%c0_95, %c3_96, %c6_97, %c0_98] : memref<1x22x22x128xf32, #tpu.memory_space<vmem>>, vector<1x16x16x128xf32>
    %204 = vector.shape_cast %203 : vector<1x16x16x128xf32> to vector<16x16x128xf32>
    %205 = vector.extract_strided_slice %0 {offsets = [2, 1, 2, 0], sizes = [1, 1, 1, 128], strides = [1, 1, 1, 1]} : vector<3x3x3x128xf32> to vector<1x1x1x128xf32>
    %206 = vector.shape_cast %205 : vector<1x1x1x128xf32> to vector<128xf32>
    %207 = vector.shape_cast %206 : vector<128xf32> to vector<1x1x128xf32>
    %208 = vector.broadcast %207 : vector<1x1x128xf32> to vector<16x16x128xf32>
    %209 = arith.mulf %204, %208 : vector<16x16x128xf32>
    %210 = arith.addf %202, %209 : vector<16x16x128xf32>
    %c0_99 = arith.constant 0 : index
    %c6_100 = arith.constant 6 : index
    %c0_101 = arith.constant 0 : index
    %c0_102 = arith.constant 0 : index
    %211 = vector.load %arg3[%c0_99, %c6_100, %c0_101, %c0_102] : memref<1x22x22x128xf32, #tpu.memory_space<vmem>>, vector<1x16x16x128xf32>
    %212 = vector.shape_cast %211 : vector<1x16x16x128xf32> to vector<16x16x128xf32>
    %213 = vector.extract_strided_slice %0 {offsets = [2, 2, 0, 0], sizes = [1, 1, 1, 128], strides = [1, 1, 1, 1]} : vector<3x3x3x128xf32> to vector<1x1x1x128xf32>
    %214 = vector.shape_cast %213 : vector<1x1x1x128xf32> to vector<128xf32>
    %215 = vector.shape_cast %214 : vector<128xf32> to vector<1x1x128xf32>
    %216 = vector.broadcast %215 : vector<1x1x128xf32> to vector<16x16x128xf32>
    %217 = arith.mulf %212, %216 : vector<16x16x128xf32>
    %218 = arith.addf %210, %217 : vector<16x16x128xf32>
    %c0_103 = arith.constant 0 : index
    %c6_104 = arith.constant 6 : index
    %c3_105 = arith.constant 3 : index
    %c0_106 = arith.constant 0 : index
    %219 = vector.load %arg3[%c0_103, %c6_104, %c3_105, %c0_106] : memref<1x22x22x128xf32, #tpu.memory_space<vmem>>, vector<1x16x16x128xf32>
    %220 = vector.shape_cast %219 : vector<1x16x16x128xf32> to vector<16x16x128xf32>
    %221 = vector.extract_strided_slice %0 {offsets = [2, 2, 1, 0], sizes = [1, 1, 1, 128], strides = [1, 1, 1, 1]} : vector<3x3x3x128xf32> to vector<1x1x1x128xf32>
    %222 = vector.shape_cast %221 : vector<1x1x1x128xf32> to vector<128xf32>
    %223 = vector.shape_cast %222 : vector<128xf32> to vector<1x1x128xf32>
    %224 = vector.broadcast %223 : vector<1x1x128xf32> to vector<16x16x128xf32>
    %225 = arith.mulf %220, %224 : vector<16x16x128xf32>
    %226 = arith.addf %218, %225 : vector<16x16x128xf32>
    %c0_107 = arith.constant 0 : index
    %c6_108 = arith.constant 6 : index
    %c6_109 = arith.constant 6 : index
    %c0_110 = arith.constant 0 : index
    %227 = vector.load %arg3[%c0_107, %c6_108, %c6_109, %c0_110] : memref<1x22x22x128xf32, #tpu.memory_space<vmem>>, vector<1x16x16x128xf32>
    %228 = vector.shape_cast %227 : vector<1x16x16x128xf32> to vector<16x16x128xf32>
    %229 = vector.extract_strided_slice %0 {offsets = [2, 2, 2, 0], sizes = [1, 1, 1, 128], strides = [1, 1, 1, 1]} : vector<3x3x3x128xf32> to vector<1x1x1x128xf32>
    %230 = vector.shape_cast %229 : vector<1x1x1x128xf32> to vector<128xf32>
    %231 = vector.shape_cast %230 : vector<128xf32> to vector<1x1x128xf32>
    %232 = vector.broadcast %231 : vector<1x1x128xf32> to vector<16x16x128xf32>
    %233 = arith.mulf %228, %232 : vector<16x16x128xf32>
    %234 = arith.addf %226, %233 : vector<16x16x128xf32>
    %235 = vector.extract_strided_slice %1 {offsets = [2, 0], sizes = [1, 128], strides = [1, 1]} : vector<3x128xf32> to vector<1x128xf32>
    %236 = vector.shape_cast %235 : vector<1x128xf32> to vector<128xf32>
    %237 = vector.shape_cast %236 : vector<128xf32> to vector<1x1x128xf32>
    %238 = vector.broadcast %237 : vector<1x1x128xf32> to vector<16x16x128xf32>
    %239 = arith.addf %234, %238 : vector<16x16x128xf32>
    %cst_111 = arith.constant 0.000000e+00 : f32
    %240 = vector.broadcast %cst_111 : f32 to vector<16x16x128xf32>
    %241 = arith.maximumf %239, %240 : vector<16x16x128xf32>
    %c0_112 = arith.constant 0 : index
    %c3_113 = arith.constant 3 : index
    %c3_114 = arith.constant 3 : index
    %c0_115 = arith.constant 0 : index
    %242 = vector.load %arg1[%c0_112, %c3_113, %c3_114, %c0_115] : memref<1x22x22x128xf32, #tpu.memory_space<vmem>>, vector<1x16x16x128xf32>
    %243 = vector.shape_cast %242 : vector<1x16x16x128xf32> to vector<16x16x128xf32>
    %c0_116 = arith.constant 0 : index
    %c3_117 = arith.constant 3 : index
    %c3_118 = arith.constant 3 : index
    %c0_119 = arith.constant 0 : index
    %244 = vector.load %arg2[%c0_116, %c3_117, %c3_118, %c0_119] : memref<1x22x22x128xf32, #tpu.memory_space<vmem>>, vector<1x16x16x128xf32>
    %245 = vector.shape_cast %244 : vector<1x16x16x128xf32> to vector<16x16x128xf32>
    %246 = arith.addf %243, %245 : vector<16x16x128xf32>
    %c0_120 = arith.constant 0 : index
    %c3_121 = arith.constant 3 : index
    %c3_122 = arith.constant 3 : index
    %c0_123 = arith.constant 0 : index
    %247 = vector.load %arg3[%c0_120, %c3_121, %c3_122, %c0_123] : memref<1x22x22x128xf32, #tpu.memory_space<vmem>>, vector<1x16x16x128xf32>
    %248 = vector.shape_cast %247 : vector<1x16x16x128xf32> to vector<16x16x128xf32>
    %249 = arith.addf %246, %248 : vector<16x16x128xf32>
    %cst_124 = arith.constant dense<0.000000e+00> : vector<128xf32>
    %250 = vector.multi_reduction <add>, %249, %cst_124 [0, 1] : vector<16x16x128xf32> to vector<128xf32>
    %251 = vector.shape_cast %250 : vector<128xf32> to vector<1x128xf32>
    %cst_125 = arith.constant 3.906250e-03 : f32
    %252 = vector.broadcast %cst_125 : f32 to vector<1x128xf32>
    %253 = arith.mulf %251, %252 : vector<1x128xf32>
    %c0_126 = arith.constant 0 : index
    %c0_127 = arith.constant 0 : index
    %254 = vector.load %arg6[%c0_126, %c0_127] : memref<128x128xf32, #tpu.memory_space<vmem>>, vector<128x128xf32>
    %cst_128 = arith.constant dense<0.000000e+00> : vector<1x128xf32>
    %255 = tpu.matmul %253, %254, %cst_128 {dimension_numbers = #tpu.dot_dimension_numbers<[1], [0], [0], [1], [0, 0, 1, 1], [], []>} : vector<1x128xf32>, vector<128x128xf32>, vector<1x128xf32> -> vector<1x128xf32>
    %c0_129 = arith.constant 0 : index
    %c0_130 = arith.constant 0 : index
    %256 = vector.load %arg7[%c0_129, %c0_130] : memref<1x128xf32, #tpu.memory_space<vmem>>, vector<1x128xf32>
    %257 = arith.addf %255, %256 : vector<1x128xf32>
    %cst_131 = arith.constant 0.000000e+00 : f32
    %258 = vector.broadcast %cst_131 : f32 to vector<1x128xf32>
    %259 = arith.maximumf %257, %258 : vector<1x128xf32>
    %c0_132 = arith.constant 0 : index
    %c0_133 = arith.constant 0 : index
    %260 = vector.load %arg9[%c0_132, %c0_133] : memref<3x128xf32, #tpu.memory_space<vmem>>, vector<3x128xf32>
    %c0_134 = arith.constant 0 : index
    %c0_135 = arith.constant 0 : index
    %c0_136 = arith.constant 0 : index
    %261 = vector.load %arg8[%c0_134, %c0_135, %c0_136] : memref<3x128x128xf32, #tpu.memory_space<vmem>>, vector<1x128x128xf32>
    %262 = vector.shape_cast %261 : vector<1x128x128xf32> to vector<128x128xf32>
    %cst_137 = arith.constant dense<0.000000e+00> : vector<1x128xf32>
    %263 = tpu.matmul %259, %262, %cst_137 {dimension_numbers = #tpu.dot_dimension_numbers<[1], [0], [0], [1], [0, 0, 1, 1], [], []>} : vector<1x128xf32>, vector<128x128xf32>, vector<1x128xf32> -> vector<1x128xf32>
    %264 = vector.extract_strided_slice %260 {offsets = [0, 0], sizes = [1, 128], strides = [1, 1]} : vector<3x128xf32> to vector<1x128xf32>
    %265 = vector.shape_cast %264 : vector<1x128xf32> to vector<128xf32>
    %266 = vector.shape_cast %265 : vector<128xf32> to vector<1x128xf32>
    %267 = arith.addf %263, %266 : vector<1x128xf32>
    %c1_138 = arith.constant 1 : index
    %c0_139 = arith.constant 0 : index
    %c0_140 = arith.constant 0 : index
    %268 = vector.load %arg8[%c1_138, %c0_139, %c0_140] : memref<3x128x128xf32, #tpu.memory_space<vmem>>, vector<1x128x128xf32>
    %269 = vector.shape_cast %268 : vector<1x128x128xf32> to vector<128x128xf32>
    %cst_141 = arith.constant dense<0.000000e+00> : vector<1x128xf32>
    %270 = tpu.matmul %259, %269, %cst_141 {dimension_numbers = #tpu.dot_dimension_numbers<[1], [0], [0], [1], [0, 0, 1, 1], [], []>} : vector<1x128xf32>, vector<128x128xf32>, vector<1x128xf32> -> vector<1x128xf32>
    %271 = vector.extract_strided_slice %260 {offsets = [1, 0], sizes = [1, 128], strides = [1, 1]} : vector<3x128xf32> to vector<1x128xf32>
    %272 = vector.shape_cast %271 : vector<1x128xf32> to vector<128xf32>
    %273 = vector.shape_cast %272 : vector<128xf32> to vector<1x128xf32>
    %274 = arith.addf %270, %273 : vector<1x128xf32>
    %c2_142 = arith.constant 2 : index
    %c0_143 = arith.constant 0 : index
    %c0_144 = arith.constant 0 : index
    %275 = vector.load %arg8[%c2_142, %c0_143, %c0_144] : memref<3x128x128xf32, #tpu.memory_space<vmem>>, vector<1x128x128xf32>
    %276 = vector.shape_cast %275 : vector<1x128x128xf32> to vector<128x128xf32>
    %cst_145 = arith.constant dense<0.000000e+00> : vector<1x128xf32>
    %277 = tpu.matmul %259, %276, %cst_145 {dimension_numbers = #tpu.dot_dimension_numbers<[1], [0], [0], [1], [0, 0, 1, 1], [], []>} : vector<1x128xf32>, vector<128x128xf32>, vector<1x128xf32> -> vector<1x128xf32>
    %278 = vector.extract_strided_slice %260 {offsets = [2, 0], sizes = [1, 128], strides = [1, 1]} : vector<3x128xf32> to vector<1x128xf32>
    %279 = vector.shape_cast %278 : vector<1x128xf32> to vector<128xf32>
    %280 = vector.shape_cast %279 : vector<128xf32> to vector<1x128xf32>
    %281 = arith.addf %277, %280 : vector<1x128xf32>
    %282 = arith.maximumf %267, %274 : vector<1x128xf32>
    %283 = arith.maximumf %282, %281 : vector<1x128xf32>
    %284 = arith.subf %267, %283 : vector<1x128xf32>
    %285 = math.exp %284 : vector<1x128xf32>
    %286 = arith.subf %274, %283 : vector<1x128xf32>
    %287 = math.exp %286 : vector<1x128xf32>
    %288 = arith.subf %281, %283 : vector<1x128xf32>
    %289 = math.exp %288 : vector<1x128xf32>
    %290 = arith.addf %285, %287 : vector<1x128xf32>
    %291 = arith.addf %290, %289 : vector<1x128xf32>
    %cst_146 = arith.constant 1.000000e+00 : f32
    %292 = vector.broadcast %cst_146 : f32 to vector<1x128xf32>
    %293 = arith.divf %292, %291 : vector<1x128xf32>
    %cst_147 = arith.constant 0.000000e+00 : f32
    %294 = vector.broadcast %cst_147 : f32 to vector<16x16x128xf32>
    %295 = arith.mulf %285, %293 : vector<1x128xf32>
    %296 = vector.shape_cast %295 : vector<1x128xf32> to vector<1x1x128xf32>
    %297 = vector.broadcast %296 : vector<1x1x128xf32> to vector<16x16x128xf32>
    %298 = arith.mulf %297, %81 : vector<16x16x128xf32>
    %299 = arith.addf %294, %298 : vector<16x16x128xf32>
    %300 = arith.mulf %287, %293 : vector<1x128xf32>
    %301 = vector.shape_cast %300 : vector<1x128xf32> to vector<1x1x128xf32>
    %302 = vector.broadcast %301 : vector<1x1x128xf32> to vector<16x16x128xf32>
    %303 = arith.mulf %302, %161 : vector<16x16x128xf32>
    %304 = arith.addf %299, %303 : vector<16x16x128xf32>
    %305 = arith.mulf %289, %293 : vector<1x128xf32>
    %306 = vector.shape_cast %305 : vector<1x128xf32> to vector<1x1x128xf32>
    %307 = vector.broadcast %306 : vector<1x1x128xf32> to vector<16x16x128xf32>
    %308 = arith.mulf %307, %241 : vector<16x16x128xf32>
    %309 = arith.addf %304, %308 : vector<16x16x128xf32>
    %c0_148 = arith.constant 0 : index
    %c0_149 = arith.constant 0 : index
    %c0_150 = arith.constant 0 : index
    %c0_151 = arith.constant 0 : index
    %310 = vector.load %arg10[%c0_148, %c0_149, %c0_150, %c0_151] : memref<1x16x16x128xf32, #tpu.memory_space<vmem>>, vector<1x16x16x128xf32>
    %311 = vector.shape_cast %310 : vector<1x16x16x128xf32> to vector<16x16x128xf32>
    %312 = vector.shape_cast %309 : vector<16x16x128xf32> to vector<1x16x16x128xf32>
    tpu.vector_store %arg10[%c0_148, %c0_149, %c0_150, %c0_151], %312 {strides = array<i32>} : memref<1x16x16x128xf32, #tpu.memory_space<vmem>>, vector<1x16x16x128xf32>,
    return
  }
  func.func @transform_0(%arg0: i32) -> (i32, i32, i32, i32) {
    %c0_i32 = arith.constant 0 : i32
    %c0_i32_0 = arith.constant 0 : i32
    %c0_i32_1 = arith.constant 0 : i32
    %c0_i32_2 = arith.constant 0 : i32
    return %arg0, %c0_i32, %c0_i32_0, %c0_i32_1 : i32, i32, i32, i32
  }
  func.func @transform_1(%arg0: i32) -> (i32, i32, i32, i32) {
    %c0_i32 = arith.constant 0 : i32
    %c0_i32_0 = arith.constant 0 : i32
    %c0_i32_1 = arith.constant 0 : i32
    %c0_i32_2 = arith.constant 0 : i32
    return %arg0, %c0_i32, %c0_i32_0, %c0_i32_1 : i32, i32, i32, i32
  }
  func.func @transform_2(%arg0: i32) -> (i32, i32, i32, i32) {
    %c0_i32 = arith.constant 0 : i32
    %c0_i32_0 = arith.constant 0 : i32
    %c0_i32_1 = arith.constant 0 : i32
    %c0_i32_2 = arith.constant 0 : i32
    return %arg0, %c0_i32, %c0_i32_0, %c0_i32_1 : i32, i32, i32, i32
  }
  func.func @transform_3(%arg0: i32) -> (i32, i32, i32, i32) {
    %c0_i32 = arith.constant 0 : i32
    %c0_i32_0 = arith.constant 0 : i32
    %c0_i32_1 = arith.constant 0 : i32
    %c0_i32_2 = arith.constant 0 : i32
    %c0_i32_3 = arith.constant 0 : i32
    return %c0_i32, %c0_i32_0, %c0_i32_1, %c0_i32_2 : i32, i32, i32, i32
  }
  func.func @transform_4(%arg0: i32) -> (i32, i32) {
    %c0_i32 = arith.constant 0 : i32
    %c0_i32_0 = arith.constant 0 : i32
    %c0_i32_1 = arith.constant 0 : i32
    return %c0_i32, %c0_i32_0 : i32, i32
  }
  func.func @transform_5(%arg0: i32) -> (i32, i32) {
    %c0_i32 = arith.constant 0 : i32
    %c0_i32_0 = arith.constant 0 : i32
    %c0_i32_1 = arith.constant 0 : i32
    return %c0_i32, %c0_i32_0 : i32, i32
  }
  func.func @transform_6(%arg0: i32) -> (i32, i32) {
    %c0_i32 = arith.constant 0 : i32
    %c0_i32_0 = arith.constant 0 : i32
    %c0_i32_1 = arith.constant 0 : i32
    return %c0_i32, %c0_i32_0 : i32, i32
  }
  func.func @transform_7(%arg0: i32) -> (i32, i32, i32) {
    %c0_i32 = arith.constant 0 : i32
    %c0_i32_0 = arith.constant 0 : i32
    %c0_i32_1 = arith.constant 0 : i32
    %c0_i32_2 = arith.constant 0 : i32
    return %c0_i32, %c0_i32_0, %c0_i32_1 : i32, i32, i32
  }
  func.func @transform_8(%arg0: i32) -> (i32, i32) {
    %c0_i32 = arith.constant 0 : i32
    %c0_i32_0 = arith.constant 0 : i32
    %c0_i32_1 = arith.constant 0 : i32
    return %c0_i32, %c0_i32_0 : i32, i32
  }
  func.func @transform_9(%arg0: i32) -> (i32, i32, i32, i32) {
    %c0_i32 = arith.constant 0 : i32
    %c0_i32_0 = arith.constant 0 : i32
    %c0_i32_1 = arith.constant 0 : i32
    %c0_i32_2 = arith.constant 0 : i32
    return %arg0, %c0_i32, %c0_i32_0, %c0_i32_1 : i32, i32, i32, i32
  }
}

</mosaic_0001>

<bundles_post_ra>
// kernel: mfb_forward.1
= control target key start
LH: loop header
LB: loop body
LE: loop exit
PB: predicated region body
PF: predicated region fallthrough
CT: control target
= control target key end

     0   :  { %s5262_s30 = smov 0   ;;  %s11484_s0 = inlined_call_operand.vmem [shape: f32[2,22,22,128], index: 0, kind: input, shape index: {}]   ;;  %s11485_s1 = inlined_call_operand.vmem [shape: f32[2,22,22,128], index: 1, kind: input, shape index: {}]   ;;  %s11486_s2 = inlined_call_operand.vmem [shape: f32[2,22,22,128], index: 2, kind: input, shape index: {}]   ;;  %s11487_s3 = inlined_call_operand.vmem [shape: f32[3,3,3,128], index: 3, kind: input, shape index: {}]   ;;  %s11488_s4 = inlined_call_operand.vmem [shape: f32[3,128], index: 4, kind: input, shape index: {}]   ;;  %s11489_s5 = inlined_call_operand.vmem [shape: f32[128,128], index: 5, kind: input, shape index: {}]   ;;  %s11490_s6 = inlined_call_operand.vmem [shape: f32[1,128], index: 6, kind: input, shape index: {}]   ;;  %s11491_s7 = inlined_call_operand.vmem [shape: f32[3,128,128], index: 7, kind: input, shape index: {}]   ;;  %s11492_s8 = inlined_call_operand.vmem [shape: f32[3,128], index: 8, kind: input, shape index: {}]   ;;  %s11493_s9 = inlined_call_operand.vmem [shape: f32[2,16,16,128], index: 9, kind: output, shape index: {}]  }
   0x1 LB: > { %s4084_s10 = sadd.s32 4294967295, %s5208_s30   ;;  %p4088_p0 = scmp.ge.s32.totalorder %s5208_s30, 1  ;;  %s5208_s30 = sphi %s5262_s30, %s19_s30  }
   0x2   : > { %p307_p1 = scmp.lt.s32.totalorder %s5208_s30, 3 }
   0x4   : > { %p308_p2 = pnand %p4088_p0, %p307_p1 }
   0x6   : > { %311 = sbr.rel (%p308_p2) target bundleno = 738 (0x2e2), region = 56 }
   0xb   : > { %v3412_v0 = vld [vmem:[%s11489_s5 + $0x78] sm:$0xff]  ;;  %v11494_v1 = vmov 0.0   ;;  %v3411_v2 = vld [vmem:[%s11489_s5 + $0x70] sm:$0xff]  ;;  %vm5211_vm0 = vmmov 0   ;;  %v3410_v3 = vld [vmem:[%s11489_s5 + $0x68] sm:$0xff]  ;;  %p353_p3 = scmp.lt.s32.totalorder %s4084_s10, 1 }
   0xc   : > { %4965 = vmatprep.subr.mxu0 %v11494_v1  ;;  %4997 = vmatprep.mubr.msk.f32.mxu0 %vm5211_vm0, %v11494_v1  ;;  %v3409_v4 = vld [vmem:[%s11489_s5 + $0x60] sm:$0xff]  ;;  %v3408_v5 = vld [vmem:[%s11489_s5 + $0x58] sm:$0xff]  ;;  %v3407_v6 = vld [vmem:[%s11489_s5 + $0x50] sm:$0xff] }
   0xd   : > { %4966 = vmatpush3.msra.mxu0 %v3412_v0  ;;  %5000 = vmatprep.subr.mxu1 %v11494_v1  ;;  %v3406_v7 = vld [vmem:[%s11489_s5 + $0x48] sm:$0xff]  ;;  %v3405_v8 = vld [vmem:[%s11489_s5 + $0x40] sm:$0xff]  ;;  %v3404_v9 = vld [vmem:[%s11489_s5 + $0x38] sm:$0xff]  ;;  %s13321_s10 = smov (!%p353_p3, %s4084_s10), 1 }
   0xe   : > { %4967 = vmatprep.subr.mxu0 %v11494_v1  ;;  %5032 = vmatprep.mubr.msk.f32.mxu1 %vm5211_vm0, %v11494_v1  ;;  %v3403_v10 = vld [vmem:[%s11489_s5 + $0x30] sm:$0xff]  ;;  %v3402_v11 = vld [vmem:[%s11489_s5 + $0x28] sm:$0xff]  ;;  %v3401_v12 = vld [vmem:[%s11489_s5 + $0x20] sm:$0xff]  ;;  %s5105_s14 = smul.u32 528, %s13321_s10 }
   0xf   : > { %4968 = vmatpush3.msra.mxu0 %v3411_v2  ;;  %v3400_v13 = vld [vmem:[%s11489_s5 + $0x18] sm:$0xff]  ;;  %v3399_v14 = vld [vmem:[%s11489_s5 + $0x10] sm:$0xff]  ;;  %v3398_v15 = vld [vmem:[%s11489_s5 + $0x8] sm:$0xff] }
  0x10   : > { %4969 = vmatprep.subr.mxu0 %v11494_v1  ;;  %v3397_v16 = vld [vmem:[%s11489_s5] sm:$0xff]  ;;  %v3501_v17 = vld [vmem:[%s11491_s7 + $0x78] sm:$0xff]  ;;  %v3500_v18 = vld [vmem:[%s11491_s7 + $0x70] sm:$0xff]  ;;  %s5406_s17 = scalar_lea.vmem %s11484_s0, %s5105_s14  ;;  %s5411_s20 = scalar_lea.vmem %s11485_s1, %s5105_s14 }
  0x11   : > { %4970 = vmatpush3.msra.mxu0 %v3410_v3  ;;  %5001 = vmatpush3.msra.mxu1 %v3501_v17  ;;  %v3499_v19 = vld [vmem:[%s11491_s7 + $0x68] sm:$0xff]  ;;  %v3498_v20 = vld [vmem:[%s11491_s7 + $0x60] sm:$0xff]  ;;  %v3497_v21 = vld [vmem:[%s11491_s7 + $0x58] sm:$0xff]  ;;  %s5424_s23 = scalar_lea.vmem %s11486_s2, %s5105_s14 }
  0x12   : > { %4971 = vmatprep.subr.mxu0 %v11494_v1  ;;  %5002 = vmatprep.subr.mxu1 %v11494_v1  ;;  %v3496_v22 = vld [vmem:[%s11491_s7 + $0x50] sm:$0xff]  ;;  %v3495_v23 = vld [vmem:[%s11491_s7 + $0x48] sm:$0xff]  ;;  %v3494_v24 = vld [vmem:[%s11491_s7 + $0x40] sm:$0xff] }
  0x13   : > { %4972 = vmatpush3.msra.mxu0 %v3409_v4  ;;  %5003 = vmatpush3.msra.mxu1 %v3500_v18  ;;  %v3493_v25 = vld [vmem:[%s11491_s7 + $0x38] sm:$0xff]  ;;  %v3492_v26 = vld [vmem:[%s11491_s7 + $0x30] sm:$0xff]  ;;  %v3491_v27 = vld [vmem:[%s11491_s7 + $0x28] sm:$0xff] }
  0x14   : > { %4973 = vmatprep.subr.mxu0 %v11494_v1  ;;  %5004 = vmatprep.subr.mxu1 %v11494_v1  ;;  %v3490_v28 = vld [vmem:[%s11491_s7 + $0x20] sm:$0xff]  ;;  %v3489_v29 = vld [vmem:[%s11491_s7 + $0x18] sm:$0xff]  ;;  %v3488_v30 = vld [vmem:[%s11491_s7 + $0x10] sm:$0xff] }
  0x15   : > { %4974 = vmatpush3.msra.mxu0 %v3408_v5  ;;  %5005 = vmatpush3.msra.mxu1 %v3499_v19  ;;  %v5414_v31 = vld [vmem:[%s5406_s17 + $0x4b] sm:$0xff]  ;;  %v5417_v32 = vld [vmem:[%s5406_s17 + $0x53] sm:$0xff]  ;;  %v5427_v35 = vld [vmem:[%s5406_s17 + $0x63] sm:$0xff] }
  0x16   : > { %4975 = vmatprep.subr.mxu0 %v11494_v1  ;;  %5006 = vmatprep.subr.mxu1 %v11494_v1  ;;  %v4418_v33 = vld [vmem:[%s5411_s20 + $0x4b] sm:$0xff]  ;;  %v4419_v34 = vld [vmem:[%s5411_s20 + $0x53] sm:$0xff]  ;;  %v4420_v36 = vld [vmem:[%s5411_s20 + $0x63] sm:$0xff] }
  0x17   : > { %4976 = vmatpush3.msra.mxu0 %v3407_v6  ;;  %5007 = vmatpush3.msra.mxu1 %v3498_v20  ;;  %v5431_v37 = vld [vmem:[%s5406_s17 + $0x6b] sm:$0xff]  ;;  %v3295_v38 = vadd.f32 %v4418_v33, %v5414_v31  ;;  %v3296_v39 = vadd.f32 %v4419_v34, %v5417_v32  ;;  %v2432_v42 = vld [vmem:[%s5424_s23 + $0x53] sm:$0xff]  ;;  %v3297_v43 = vadd.f32 %v4420_v36, %v5427_v35  ;;  %v5440_v44 = vld [vmem:[%s5406_s17 + $0x7b] sm:$0xff] }
  0x18   : > { %4977 = vmatprep.subr.mxu0 %v11494_v1  ;;  %5008 = vmatprep.subr.mxu1 %v11494_v1  ;;  %v4421_v40 = vld [vmem:[%s5411_s20 + $0x6b] sm:$0xff]  ;;  %v4422_v45 = vld [vmem:[%s5411_s20 + $0x7b] sm:$0xff]  ;;  %v2433_v46 = vld [vmem:[%s5424_s23 + $0x63] sm:$0xff] }
  0x19   : > { %4978 = vmatpush3.msra.mxu0 %v3406_v7  ;;  %5009 = vmatpush3.msra.mxu1 %v3497_v21  ;;  %v2431_v41 = vld [vmem:[%s5424_s23 + $0x4b] sm:$0xff]  ;;  %v3298_v47 = vadd.f32 %v4421_v40, %v5431_v37  ;;  %v3328_v49 = vadd.f32 %v3296_v39, %v2432_v42  ;;  %v5446_v50 = vld [vmem:[%s5406_s17 + $0x83] sm:$0xff]  ;;  %v3299_v53 = vadd.f32 %v4422_v45, %v5440_v44  ;;  %v5452_v55 = vld [vmem:[%s5406_s17 + $0x93] sm:$0xff] }
  0x1a   : > { %4979 = vmatprep.subr.mxu0 %v11494_v1  ;;  %5010 = vmatprep.subr.mxu1 %v11494_v1  ;;  %v3327_v48 = vadd.f32 %v3295_v38, %v2431_v41  ;;  %v4423_v51 = vld [vmem:[%s5411_s20 + $0x83] sm:$0xff]  ;;  %v2434_v52 = vld [vmem:[%s5424_s23 + $0x6b] sm:$0xff]  ;;  %v3329_v54 = vadd.f32 %v3297_v43, %v2433_v46  ;;  %v4424_v56 = vld [vmem:[%s5411_s20 + $0x93] sm:$0xff] }
  0x1b   : > { %4980 = vmatpush3.msra.mxu0 %v3405_v8  ;;  %5011 = vmatpush3.msra.mxu1 %v3496_v22  ;;  %v2435_v57 = vld [vmem:[%s5424_s23 + $0x7b] sm:$0xff]  ;;  %v3300_v58 = vadd.f32 %v4423_v51, %v5446_v50  ;;  %v3330_v59 = vadd.f32 %v3298_v47, %v2434_v52  ;;  %v2436_v63 = vld [vmem:[%s5424_s23 + $0x83] sm:$0xff]  ;;  %v3301_v0 = vadd.f32 %v4424_v56, %v5452_v55  ;;  %v5464_v4 = vld [vmem:[%s5406_s17 + $0xab] sm:$0xff] }
  0x1c   : > { %4981 = vmatprep.subr.mxu0 %v11494_v1  ;;  %5012 = vmatprep.subr.mxu1 %v11494_v1  ;;  %v3359_v60 = vadd.f32 %v3328_v49, %v3327_v48  ;;  %v5458_v61 = vld [vmem:[%s5406_s17 + $0x9b] sm:$0xff]  ;;  %v3331_v2 = vadd.f32 %v3299_v53, %v2435_v57  ;;  %v4426_v5 = vld [vmem:[%s5411_s20 + $0xab] sm:$0xff]  ;;  %v2437_v6 = vld [vmem:[%s5424_s23 + $0x93] sm:$0xff] }
  0x1d   : > { %4982 = vmatpush3.msra.mxu0 %v3404_v9  ;;  %5013 = vmatpush3.msra.mxu1 %v3495_v23  ;;  %v4425_v62 = vld [vmem:[%s5411_s20 + $0x9b] sm:$0xff]  ;;  %v3332_v8 = vadd.f32 %v3300_v58, %v2436_v63  ;;  %v4428_v17 = vld [vmem:[%s5411_s20 + $0xc3] sm:$0xff]  ;;  %v2439_v18 = vld [vmem:[%s5424_s23 + $0xab] sm:$0xff] }
  0x1e   : > { %4983 = vmatprep.subr.mxu0 %v11494_v1  ;;  %5014 = vmatprep.subr.mxu1 %v11494_v1  ;;  %v3360_v3 = vadd.f32 %v3359_v60, %v3329_v54  ;;  %v3302_v7 = vadd.f32 %v4425_v62, %v5458_v61  ;;  %v5482_v22 = vld [vmem:[%s5406_s17 + $0xcb] sm:$0xff]  ;;  %v5494_v38 = vld [vmem:[%s5406_s17 + $0xe3] sm:$0xff]  ;;  %v5500_v45 = vld [vmem:[%s5406_s17 + $0xf3] sm:$0xff] }
  0x1f   : > { %4984 = vmatpush3.msra.mxu0 %v3403_v10  ;;  %5015 = vmatpush3.msra.mxu1 %v3494_v24  ;;  %v5470_v10 = vld [vmem:[%s5406_s17 + $0xb3] sm:$0xff]  ;;  %11906 = vst [vmem:[#allocation3_spill] sm:$0xff] %v5482_v22  ;;  %v4429_v23 = vld [vmem:[%s5411_s20 + $0xcb] sm:$0xff]  ;;  %11908 = vst [vmem:[#allocation5_spill] sm:$0xff] %v5494_v38 }
  0x20   : > { %4985 = vmatprep.subr.mxu0 %v11494_v1  ;;  %5016 = vmatprep.subr.mxu1 %v11494_v1  ;;  %v3361_v9 = vadd.f32 %v3360_v3, %v3330_v59  ;;  %v2440_v24 = vld [vmem:[%s5424_s23 + $0xb3] sm:$0xff]  ;;  %v3306_v33 = vadd.f32 %v4429_v23, %v5482_v22  ;;  %v4431_v39 = vld [vmem:[%s5411_s20 + $0xe3] sm:$0xff]  ;;  %v2442_v40 = vld [vmem:[%s5424_s23 + $0xcb] sm:$0xff]  ;;  %11909 = vst [vmem:[#allocation6_spill] sm:$0xff] %v5500_v45 }
  0x21   : > { %4986 = vmatpush3.msra.mxu0 %v3402_v11  ;;  %5017 = vmatpush3.msra.mxu1 %v3493_v25  ;;  %v4427_v11 = vld [vmem:[%s5411_s20 + $0xb3] sm:$0xff]  ;;  %v2443_v47 = vld [vmem:[%s5424_s23 + $0xdb] sm:$0xff]  ;;  %v3308_v48 = vadd.f32 %v4431_v39, %v5494_v38  ;;  %v2444_v54 = vld [vmem:[%s5424_s23 + $0xe3] sm:$0xff] }
  0x22   : > { %4987 = vmatprep.subr.mxu0 %v11494_v1  ;;  %5018 = vmatprep.subr.mxu1 %v11494_v1  ;;  %v3304_v19 = vadd.f32 %v4427_v11, %v5470_v10  ;;  %v4432_v46 = vld [vmem:[%s5411_s20 + $0xf3] sm:$0xff]  ;;  %v3338_v49 = vadd.f32 %v3306_v33, %v2442_v40  ;;  %v5506_v52 = vld [vmem:[%s5406_s17 + $0xfb] sm:$0xff]  ;;  %v5512_v59 = vld [vmem:[%s5406_s17 + $0x10b] sm:$0xff] }
  0x23   : > { %4988 = vmatpush3.msra.mxu0 %v3401_v12  ;;  %5019 = vmatpush3.msra.mxu1 %v3492_v26  ;;  %v2438_v12 = vld [vmem:[%s5424_s23 + $0x9b] sm:$0xff]  ;;  %11910 = vst [vmem:[#allocation7_spill] sm:$0xff] %v5506_v52  ;;  %v3309_v56 = vadd.f32 %v4432_v46, %v5500_v45  ;;  %11911 = vst [vmem:[#allocation8_spill] sm:$0xff] %v5512_v59  ;;  %v4434_v60 = vld [vmem:[%s5411_s20 + $0x10b] sm:$0xff] }
  0x24   : > { %4989 = vmatprep.subr.mxu0 %v11494_v1  ;;  %5020 = vmatprep.subr.mxu1 %v11494_v1  ;;  %v3334_v20 = vadd.f32 %v3302_v7, %v2438_v12  ;;  %v3336_v34 = vadd.f32 %v3304_v19, %v2440_v24  ;;  %v4433_v53 = vld [vmem:[%s5411_s20 + $0xfb] sm:$0xff]  ;;  %v2445_v62 = vld [vmem:[%s5424_s23 + $0xf3] sm:$0xff]  ;;  %v3311_v7 = vadd.f32 %v4434_v60, %v5512_v59  ;;  %v5524_v11 = vld [vmem:[%s5406_s17 + $0x123] sm:$0xff] }
  0x25   : > { %4990 = vmatpush3.msra.mxu0 %v3400_v13  ;;  %5021 = vmatpush3.msra.mxu1 %v3491_v27  ;;  %v3303_v13 = vadd.f32 %v4426_v5, %v5464_v4  ;;  %v3310_v63 = vadd.f32 %v4433_v53, %v5506_v52  ;;  %v5518_v3 = vld [vmem:[%s5406_s17 + $0x113] sm:$0xff]  ;;  %11913 = vst [vmem:[#allocation10_spill] sm:$0xff] %v5524_v11  ;;  %v4436_v12 = vld [vmem:[%s5411_s20 + $0x123] sm:$0xff]  ;;  %v4437_v19 = vld [vmem:[%s5411_s20 + $0x12b] sm:$0xff] }
  0x26   : > { %4991 = vmatprep.subr.mxu0 %v11494_v1  ;;  %5022 = vmatprep.subr.mxu1 %v11494_v1  ;;  %11912 = vst [vmem:[#allocation9_spill] sm:$0xff] %v5518_v3  ;;  %v4435_v5 = vld [vmem:[%s5411_s20 + $0x113] sm:$0xff]  ;;  %v2450_v39 = vld [vmem:[%s5424_s23 + $0x12b] sm:$0xff]  ;;  %v5554_v53 = vld [vmem:[%s5406_s17 + $0x15b] sm:$0xff] }
  0x27   : > { %4992 = vmatpush3.msra.mxu0 %v3399_v14  ;;  %5023 = vmatpush3.msra.mxu1 %v3490_v28  ;;  %v3333_v14 = vadd.f32 %v3301_v0, %v2437_v6  ;;  %v3335_v26 = vadd.f32 %v3303_v13, %v2439_v18  ;;  %v5488_v28 = vld [vmem:[%s5406_s17 + $0xdb] sm:$0xff]  ;;  %v3340_v0 = vadd.f32 %v3308_v48, %v2444_v54  ;;  %v2447_v13 = vld [vmem:[%s5424_s23 + $0x10b] sm:$0xff]  ;;  %v4440_v46 = vld [vmem:[%s5411_s20 + $0x153] sm:$0xff] }
  0x28   : > { %4993 = vmatprep.subr.mxu0 %v11494_v1  ;;  %5024 = vmatprep.subr.mxu1 %v11494_v1  ;;  %11907 = vst [vmem:[#allocation4_spill] sm:$0xff] %v5488_v28  ;;  %v2446_v6 = vld [vmem:[%s5424_s23 + $0xfb] sm:$0xff]  ;;  %v5530_v18 = vld [vmem:[%s5406_s17 + $0x12b] sm:$0xff]  ;;  %v3343_v23 = vadd.f32 %v3311_v7, %v2447_v13  ;;  %11918 = vst [vmem:[#allocation15_spill] sm:$0xff] %v5554_v53 }
  0x29   : > { %4994 = vmatpush3.msra.mxu0 %v3398_v15  ;;  %5025 = vmatpush3.msra.mxu1 %v3489_v29  ;;  %v3362_v15 = vadd.f32 %v3361_v9, %v3331_v2  ;;  %v4430_v29 = vld [vmem:[%s5411_s20 + $0xdb] sm:$0xff]  ;;  %11914 = vst [vmem:[#allocation11_spill] sm:$0xff] %v5530_v18  ;;  %v5566_v7 = vld [vmem:[%s5406_s17 + $0x173] sm:$0xff] }
  0x2a   : > { %4995 = vmatprep.subr.mxu0 %v11494_v1  ;;  %5026 = vmatprep.subr.mxu1 %v11494_v1  ;;  %v3307_v41 = vadd.f32 %v4430_v29, %v5488_v28  ;;  %v3314_v29 = vadd.f32 %v4437_v19, %v5530_v18  ;;  %v4441_v54 = vld [vmem:[%s5411_s20 + $0x15b] sm:$0xff]  ;;  %11920 = vst [vmem:[#allocation17_spill] sm:$0xff] %v5566_v7  ;;  %v2455_v19 = vld [vmem:[%s5424_s23 + $0x16b] sm:$0xff] }
  0x2b   : > { %4996 = vmatpush3.msra.mxu0 %v3397_v16  ;;  %5027 = vmatpush3.msra.mxu1 %v3488_v30  ;;  %v5476_v16 = vld [vmem:[%s5406_s17 + $0xc3] sm:$0xff]  ;;  %v3363_v21 = vadd.f32 %v3362_v15, %v3332_v8  ;;  %v3341_v8 = vadd.f32 %v3309_v56, %v2445_v62  ;;  %v3342_v15 = vadd.f32 %v3310_v63, %v2446_v6  ;;  %v5560_v62 = vld [vmem:[%s5406_s17 + $0x16b] sm:$0xff] }
  0x2c   : > { %5035 = vmatprep.subr.mxu0 %v11494_v1  ;;  %5028 = vmatprep.subr.mxu1 %v11494_v1  ;;  %11905 = vst [vmem:[#allocation2_spill] sm:$0xff] %v5476_v16  ;;  %v3305_v25 = vadd.f32 %v4428_v17, %v5476_v16  ;;  %v2441_v30 = vld [vmem:[%s5424_s23 + $0xc3] sm:$0xff]  ;;  %v3339_v57 = vadd.f32 %v3307_v41, %v2443_v47  ;;  %v2451_v47 = vld [vmem:[%s5424_s23 + $0x13b] sm:$0xff]  ;;  %11919 = vst [vmem:[#allocation16_spill] sm:$0xff] %v5560_v62 }
  0x2d   : > { %v3364_v27 = vadd.f32 %v3363_v21, %v3333_v14  ;;  %v3312_v14 = vadd.f32 %v4435_v5, %v5518_v3  ;;  %v3313_v21 = vadd.f32 %v4436_v12, %v5524_v11  ;;  %v2452_v56 = vld [vmem:[%s5424_s23 + $0x143] sm:$0xff]  ;;  %v4442_v63 = vld [vmem:[%s5411_s20 + $0x16b] sm:$0xff] }
  0x2e   : > { %v3337_v42 = vadd.f32 %v3305_v25, %v2441_v30  ;;  %v5536_v25 = vld [vmem:[%s5406_s17 + $0x13b] sm:$0xff]  ;;  %v3319_v12 = vadd.f32 %v4442_v63, %v5560_v62 }
  0x2f   : > { %v3365_v36 = vadd.f32 %v3364_v27, %v3334_v20  ;;  %v2448_v20 = vld [vmem:[%s5424_s23 + $0x113] sm:$0xff]  ;;  %11915 = vst [vmem:[#allocation12_spill] sm:$0xff] %v5536_v25  ;;  %v2449_v27 = vld [vmem:[%s5424_s23 + $0x123] sm:$0xff] }
  0x30   : > { %v3344_v30 = vadd.f32 %v3312_v14, %v2448_v20  ;;  %v3345_v41 = vadd.f32 %v3313_v21, %v2449_v27  ;;  %v2456_v27 = vld [vmem:[%s5424_s23 + $0x173] sm:$0xff]  ;;  %v5690_v1 = vld [vmem:[%s5406_s17 + $0xe2] sm:$0xff] }
  0x31   : > { %v3366_v43 = vadd.f32 %v3365_v36, %v3335_v26  ;;  %v4438_v26 = vld [vmem:[%s5411_s20 + $0x13b] sm:$0xff]  ;;  %v4439_v36 = vld [vmem:[%s5411_s20 + $0x143] sm:$0xff]  ;;  %11938 = vst [vmem:[#allocation35_spill] sm:$0xff] %v5690_v1 }
  0x32   : > { %v3315_v40 = vadd.f32 %v4438_v26, %v5536_v25  ;;  %v4445_v26 = vld [vmem:[%s5411_s20 + $0x18b] sm:$0xff] }
  0x33   : > { %v3367_v51 = vadd.f32 %v3366_v43, %v3336_v34  ;;  %v5542_v34 = vld [vmem:[%s5406_s17 + $0x143] sm:$0xff]  ;;  %v5548_v43 = vld [vmem:[%s5406_s17 + $0x153] sm:$0xff] }
  0x34   : > { %11916 = vst [vmem:[#allocation13_spill] sm:$0xff] %v5542_v34  ;;  %11917 = vst [vmem:[#allocation14_spill] sm:$0xff] %v5548_v43  ;;  %v3316_v48 = vadd.f32 %v4439_v36, %v5542_v34  ;;  %v5584_v36 = vld [vmem:[%s5406_s17 + $0x19b] sm:$0xff] }
  0x35   : > { %v3368_v58 = vadd.f32 %v3367_v51, %v3337_v42  ;;  %11923 = vst [vmem:[#allocation20_spill] sm:$0xff] %v5584_v36 }
  0x36   : > { %v3348_v5 = vadd.f32 %v3316_v48, %v2452_v56  ;;  %v4539_v48 = vld [vmem:[%s5411_s20 + $0x1a3] sm:$0xff] }
  0x37   : > { %v3369_v2 = vadd.f32 %v3368_v58, %v3338_v49  ;;  %v3346_v49 = vadd.f32 %v3314_v29, %v2450_v39  ;;  %v3347_v58 = vadd.f32 %v3315_v40, %v2451_v47  ;;  %v4538_v39 = vld [vmem:[%s5411_s20 + $0x19b] sm:$0xff]  ;;  %v4728_v40 = vld [vmem:[%s5424_s23 + $0x183] sm:$0xff] }
  0x38   : > { %v5590_v47 = vld [vmem:[%s5406_s17 + $0x1a3] sm:$0xff] }
  0x39   : > { %v3370_v9 = vadd.f32 %v3369_v2, %v3339_v57  ;;  %v3317_v57 = vadd.f32 %v4440_v46, %v5548_v43  ;;  %v3318_v2 = vadd.f32 %v4441_v54, %v5554_v53  ;;  %11924 = vst [vmem:[#allocation21_spill] sm:$0xff] %v5590_v47  ;;  %v3324_v63 = vadd.f32 %v4539_v48, %v5590_v47  ;;  %v373_v48 = vld [vmem:[%s11487_s3] sm:$0x7]  ;;  %v5750_v47 = vld [vmem:[%s5406_s17 + $0x12a] sm:$0xff] }
  0x3a   : > { %11951 = vst [vmem:[#allocation48_spill] sm:$0xff] %v5750_v47 }
  0x3b   : > { %v3371_v17 = vadd.f32 %v3370_v9, %v3340_v0  ;;  %v2453_v0 = vld [vmem:[%s5424_s23 + $0x153] sm:$0xff]  ;;  %v2454_v9 = vld [vmem:[%s5424_s23 + $0x15b] sm:$0xff] }
  0x3c   : > { %v3349_v13 = vadd.f32 %v3317_v57, %v2453_v0  ;;  %v3350_v21 = vadd.f32 %v3318_v2, %v2454_v9  ;;  %v5596_v57 = vld [vmem:[%s5406_s17 + $0x1b3] sm:$0xff] }
  0x3d   : > { %v3372_v24 = vadd.f32 %v3371_v17, %v3341_v8  ;;  %v4443_v8 = vld [vmem:[%s5411_s20 + $0x173] sm:$0xff]  ;;  %v4444_v17 = vld [vmem:[%s5411_s20 + $0x183] sm:$0xff]  ;;  %11925 = vst [vmem:[#allocation22_spill] sm:$0xff] %v5596_v57 }
  0x3e   : > { %v3320_v20 = vadd.f32 %v4443_v8, %v5566_v7  ;;  %v4731_v8 = vld [vmem:[%s5424_s23 + $0x1a3] sm:$0xff] }
  0x3f   : > { %v3373_v33 = vadd.f32 %v3372_v24, %v3342_v15  ;;  %v5572_v15 = vld [vmem:[%s5406_s17 + $0x183] sm:$0xff]  ;;  %v5578_v24 = vld [vmem:[%s5406_s17 + $0x18b] sm:$0xff] }
  0x40   : > { %11921 = vst [vmem:[#allocation18_spill] sm:$0xff] %v5572_v15  ;;  %11922 = vst [vmem:[#allocation19_spill] sm:$0xff] %v5578_v24  ;;  %v3321_v29 = vadd.f32 %v4444_v17, %v5572_v15  ;;  %v5798_v15 = vld [vmem:[%s5406_s17 + $0x16a] sm:$0xff] }
  0x41   : > { %v3374_v42 = vadd.f32 %v3373_v33, %v3343_v23  ;;  %11964 = vst [vmem:[#allocation60_spill] sm:$0xff] %v5798_v15 }
  0x42   : > { %v3353_v54 = vadd.f32 %v4728_v40, %v3321_v29 }
  0x43   : > { %v3375_v51 = vadd.f32 %v3374_v42, %v3344_v30  ;;  %v3351_v30 = vadd.f32 %v3319_v12, %v2455_v19  ;;  %v3352_v42 = vadd.f32 %v3320_v20, %v2456_v27  ;;  %v3356_v19 = vadd.f32 %v4731_v8, %v3324_v63  ;;  %v4094_v63 = vld [vmem:[%s5406_s17 + $0x32] sm:$0xff] }
  0x44   : > { %v4097_v8 = vld [vmem:[%s5406_s17 + $0x52] sm:$0xff] }
  0x45   : > { %v3376_v60 = vadd.f32 %v3375_v51, %v3345_v41  ;;  %v3322_v41 = vadd.f32 %v4445_v26, %v5578_v24  ;;  %v3323_v51 = vadd.f32 %v4538_v39, %v5584_v36  ;;  %v5756_v36 = vld [vmem:[%s5406_s17 + $0x142] sm:$0xff]  ;;  %v5776_v24 = vld [vmem:[%s5406_s17 + $0x15a] sm:$0xff] }
  0x46   : > { %11953 = vst [vmem:[#allocation50_spill] sm:$0xff] %v5756_v36  ;;  %11959 = vst [vmem:[#allocation55_spill] sm:$0xff] %v5776_v24 }
  0x47   : > { %v3377_v6 = vadd.f32 %v3376_v60, %v3346_v49  ;;  %v4729_v49 = vld [vmem:[%s5424_s23 + $0x18b] sm:$0xff]  ;;  %v4730_v60 = vld [vmem:[%s5424_s23 + $0x19b] sm:$0xff] }
  0x48   : > { %v3354_v0 = vadd.f32 %v4729_v49, %v3322_v41  ;;  %v3355_v12 = vadd.f32 %v4730_v60, %v3323_v51  ;;  %v374_v51 = vld [vmem:[%s11487_s3 + $0x4] sm:$0x7]  ;;  %v375_v60 = vld [vmem:[%s11487_s3 + $0x8] sm:$0x7] }
  0x49   : > { %v3378_v14 = vadd.f32 %v3377_v6, %v3347_v58  ;;  %v4540_v58 = vld [vmem:[%s5411_s20 + $0x1b3] sm:$0xff]  ;;  %v4541_v6 = vld [vmem:[%s5411_s20 + $0x1bb] sm:$0xff] }
  0x4a   : > { %v3325_v9 = vadd.f32 %v4540_v58, %v5596_v57  ;;  %v5729_v57 = vld [vmem:[%s5406_s17 + $0x122] sm:$0xff] }
  0x4b   : > { %v3379_v23 = vadd.f32 %v3378_v14, %v3348_v5  ;;  %v5602_v5 = vld [vmem:[%s5406_s17 + $0x1bb] sm:$0xff]  ;;  %v4732_v14 = vld [vmem:[%s5424_s23 + $0x1b3] sm:$0xff]  ;;  %11946 = vst [vmem:[#allocation43_spill] sm:$0xff] %v5729_v57 }
  0x4c   : > { %11926 = vst [vmem:[#allocation23_spill] sm:$0xff] %v5602_v5  ;;  %v3326_v17 = vadd.f32 %v4541_v6, %v5602_v5  ;;  %v4096_v6 = vld [vmem:[%s5406_s17 + $0x4a] sm:$0xff]  ;;  %v5726_v5 = vld [vmem:[%s5406_s17 + $0x112] sm:$0xff] }
  0x4d   : > { %v3380_v33 = vadd.f32 %v3379_v23, %v3349_v13  ;;  %v3357_v23 = vadd.f32 %v4732_v14, %v3325_v9  ;;  %v4098_v9 = vld [vmem:[%s5406_s17 + $0x62] sm:$0xff]  ;;  %v4099_v14 = vld [vmem:[%s5406_s17 + $0x6a] sm:$0xff]  ;;  %11945 = vst [vmem:[#allocation42_spill] sm:$0xff] %v5726_v5 }
  0x4f   : > { %v3381_v46 = vadd.f32 %v3380_v33, %v3350_v21  ;;  %v4733_v21 = vld [vmem:[%s5424_s23 + $0x1bb] sm:$0xff] }
  0x50   : > { %v3358_v27 = vadd.f32 %v4733_v21, %v3326_v17  ;;  %v4100_v17 = vld [vmem:[%s5406_s17 + $0x7a] sm:$0xff] }
  0x51   : > { %v3382_v56 = vadd.f32 %v3381_v46, %v3351_v30  ;;  %v416_v30 = vlaneseq }
  0x53   : > { %v3383_v2 = vadd.f32 %v3382_v56, %v3352_v42  ;;  %v417_v40 = vshrl.u32 %v416_v30, 7 }
  0x55   : > { %v3384_v13 = vadd.f32 %v3383_v2, %v3353_v54  ;;  %v5610_v46 = vsub.s32 0, %v417_v40  ;;  %v5618_v54 = vsub.s32 1, %v417_v40  ;;  %v5620_v56 = vsub.s32 2, %v417_v40  ;;  %v5666_v40 = vld [vmem:[%s5406_s17 + $0xb2] sm:$0xff] }
  0x57   : > { %v3385_v20 = vadd.f32 %v3384_v13, %v3354_v0  ;;  %11927 = vst [vmem:[#allocation24_spill] sm:$0xff] %v5610_v46  ;;  %11928 = vst [vmem:[#allocation25_spill] sm:$0xff] %v5618_v54  ;;  %v4095_v0 = vld [vmem:[%s5406_s17 + $0x3a] sm:$0xff]  ;;  %v5628_v2 = vrot.slane %v373_v48, %v5610_v46  ;;  %v5645_v21 = vrot.slane %v374_v51, %v5618_v54 }
  0x58   : > { %11929 = vst [vmem:[#allocation26_spill] sm:$0xff] %v5620_v56  ;;  %v5660_v30 = vrot.slane %v374_v51, %v5620_v56 }
  0x59   : > { %v3386_v26 = vadd.f32 %v3385_v20, %v3355_v12  ;;  %v5634_v12 = vrot.slane %v374_v51, %v5610_v46  ;;  %v5642_v20 = vrot.slane %v373_v48, %v5618_v54  ;;  %11931 = vst [vmem:[#allocation28_spill] sm:$0xff] %v5645_v21  ;;  %v5681_v51 = vrot.slane %v375_v60, %v5618_v54 }
  0x5a   : > { %11933 = vst [vmem:[#allocation30_spill] sm:$0xff] %v5660_v30  ;;  %v5826_v7 = vmul.f32 %v5726_v5, %v5628_v2  ;;  %v5849_v5 = vld [vmem:[%s5406_s17 + $0x1a2] sm:$0xff] }
  0x5b   : > { %v3387_v29 = vadd.f32 %v3386_v26, %v3356_v19  ;;  %11930 = vst [vmem:[#allocation27_spill] sm:$0xff] %v5634_v12  ;;  %v5639_v19 = vld [vmem:[%s5406_s17 + $0x82] sm:$0xff]  ;;  %v5651_v26 = vld [vmem:[%s5406_s17 + $0x9a] sm:$0xff]  ;;  %11935 = vst [vmem:[#allocation32_spill] sm:$0xff] %v5681_v51  ;;  %v5723_v30 = vmul.f32 %v4097_v8, %v5634_v12 }
  0x5c   : > { %v5711_v51 = vld [vmem:[%s5406_s17 + $0x10a] sm:$0xff]  ;;  %v5733_v21 = vmul.f32 %v5639_v19, %v5628_v2  ;;  %11973 = vst [vmem:[#allocation69_spill] sm:$0xff] %v5849_v5 }
  0x5d   : > { %v3388_v33 = vadd.f32 %v3387_v29, %v3357_v23  ;;  %v5648_v23 = vld [vmem:[%s5406_s17 + $0x92] sm:$0xff]  ;;  %v5657_v29 = vrot.slane %v373_v48, %v5620_v56  ;;  %v5678_v48 = vmul.f32 %v4095_v0, %v5628_v2  ;;  %v5699_v0 = vmul.f32 %v4096_v6, %v5634_v12  ;;  %11942 = vst [vmem:[#allocation39_spill] sm:$0xff] %v5711_v51 }
  0x5e   : > { %11944 = vst [vmem:[#allocation41_spill] sm:$0xff] %v5723_v30  ;;  %11947 = vst [vmem:[#allocation44_spill] sm:$0xff] %v5733_v21  ;;  %v4876_v30 = vld [vmem:[%s11491_s7 + $0xf0] sm:$0xff]  ;;  %v5753_v21 = vld [vmem:[%s5406_s17 + $0x13a] sm:$0xff] }
  0x5f   : > { %v3389_v39 = vadd.f32 %v3388_v33, %v3358_v27  ;;  %v5654_v27 = vld [vmem:[%s5406_s17 + $0xaa] sm:$0xff]  ;;  %11932 = vst [vmem:[#allocation29_spill] sm:$0xff] %v5657_v29  ;;  %v5663_v33 = vrot.slane %v375_v60, %v5610_v46  ;;  %v5693_v46 = vmul.f32 %v4096_v6, %v5628_v2  ;;  %11939 = vst [vmem:[#allocation36_spill] sm:$0xff] %v5699_v0 }
  0x60   : > { %v5717_v6 = vmul.f32 %v4099_v14, %v5628_v2  ;;  %v5737_v0 = vmul.f32 %v5648_v23, %v5628_v2  ;;  %v5741_v29 = vmul.f32 %v5651_v26, %v5628_v2  ;;  %11952 = vst [vmem:[#allocation49_spill] sm:$0xff] %v5753_v21 }
  0x61   : > { %v3390_v41 = vrot.slane %v3389_v39, 4  ;;  %11934 = vst [vmem:[#allocation31_spill] sm:$0xff] %v5663_v33  ;;  %v5714_v33 = vmul.f32 %v4098_v9, %v5628_v2 }
  0x62   : > { %11948 = vst [vmem:[#allocation45_spill] sm:$0xff] %v5737_v0  ;;  %11949 = vst [vmem:[#allocation46_spill] sm:$0xff] %v5741_v29  ;;  %v5760_v29 = vmul.f32 %v5654_v27, %v5628_v2  ;;  %v5773_v0 = vld [vmem:[%s5406_s17 + $0x152] sm:$0xff] }
  0x63   : > { %v3391_v42 = vadd.f32 %v3390_v41, %v3389_v39  ;;  %v5669_v41 = vld [vmem:[%s5406_s17 + $0xc2] sm:$0xff]  ;;  %11958 = vst [vmem:[#allocation54_spill] sm:$0xff] %v5773_v0 }
  0x64   : > { %11954 = vst [vmem:[#allocation51_spill] sm:$0xff] %v5760_v29 }
  0x65   : > { %v3392_v49 = vrot.slane %v3391_v42, 2 }
  0x67   : > { %v3393_v58 = vadd.f32 %v3392_v49, %v3391_v42  ;;  %v5672_v42 = vld [vmem:[%s5406_s17 + $0xca] sm:$0xff]  ;;  %v5675_v49 = vmul.f32 %v4094_v63, %v5628_v2  ;;  %v5696_v63 = vmul.f32 %v4097_v8, %v5628_v2  ;;  %v5744_v8 = vmul.f32 %v4098_v9, %v5634_v12 }
  0x68   : > { %v5768_v9 = vmul.f32 %v5669_v41, %v5628_v2  ;;  %v5780_v29 = vmul.f32 %v5672_v42, %v5628_v2 }
  0x69   : > { %v3394_v13 = vrot.slane %v3393_v58, 1  ;;  %11950 = vst [vmem:[#allocation47_spill] sm:$0xff] %v5744_v8  ;;  %v11957_v8 = vmov 0.0  }
  0x6a   : > { %11956 = vst [vmem:[#allocation53_spill] sm:$0xff] %v5768_v9  ;;  %11960 = vst [vmem:[#allocation56_spill] sm:$0xff] %v5780_v29  ;;  %v5788_v9 = vmul.f32 %v5690_v1, %v5628_v2  ;;  %v5801_v29 = vld [vmem:[%s5406_s17 + $0x172] sm:$0xff] }
  0x6b   : > { %v3395_v39 = vadd.f32 %v3394_v13, %v3393_v58  ;;  %v5684_v58 = vrot.slane %v375_v60, %v5620_v56  ;;  %v5687_v13 = vld [vmem:[%s5406_s17 + $0xda] sm:$0xff]  ;;  %v5705_v56 = vld [vmem:[%s5406_s17 + $0xf2] sm:$0xff]  ;;  %11965 = vst [vmem:[#allocation61_spill] sm:$0xff] %v5801_v29 }
  0x6c   : > { %11937 = vst [vmem:[#allocation34_spill] sm:$0xff] %v5687_v13  ;;  %v4877_v60 = vld [vmem:[%s11491_s7 + $0xf8] sm:$0xff]  ;;  %11940 = vst [vmem:[#allocation37_spill] sm:$0xff] %v5705_v56  ;;  %v5808_v1 = vmul.f32 %v5705_v56, %v5628_v2  ;;  %v5830_v56 = vmul.f32 %v5729_v57, %v5628_v2  ;;  %v5853_v57 = vmul.f32 %v5753_v21, %v5628_v2 }
  0x6d   : > { %11936 = vst [vmem:[#allocation33_spill] sm:$0xff] %v5684_v58  ;;  %v3396_v54 = vmul.f32 0.00390625, %v3395_v39  ;;  %v5708_v58 = vld [vmem:[%s5406_s17 + $0xfa] sm:$0xff]  ;;  %v5720_v39 = vmul.f32 %v4100_v17, %v5628_v2  ;;  %11962 = vst [vmem:[#allocation58_spill] sm:$0xff] %v5788_v9  ;;  %v5819_v9 = vmul.f32 %v4100_v17, %v5634_v12  ;;  %v5839_v17 = vmul.f32 %v5639_v19, %v5634_v12 }
  0x6e   : > { %11941 = vst [vmem:[#allocation38_spill] sm:$0xff] %v5708_v58  ;;  %11969 = vst [vmem:[#allocation65_spill] sm:$0xff] %v5830_v56  ;;  %v5861_v19 = vmul.f32 %v5773_v0, %v5628_v2  ;;  %v5870_v56 = vmul.f32 %v5776_v24, %v5628_v2  ;;  %v5874_v21 = vmul.f32 %v5798_v15, %v5628_v2  ;;  %v6195_v24 = vld [vmem:[%s5406_s17 + $0x154] sm:$0xff] }
  0x6f   : > { %11943 = vst [vmem:[#allocation40_spill] sm:$0xff] %v5720_v39  ;;  %4998 = vmatmul.mubr.f32.vlgmr.msra.gmra.mxu0 %v3396_v54  ;;  %v5764_v54 = vmul.f32 %v5666_v40, %v5628_v2  ;;  %v4875_v39 = vld [vmem:[%s11491_s7 + $0xe8] sm:$0xff]  ;;  %11967 = vst [vmem:[#allocation63_spill] sm:$0xff] %v5819_v9  ;;  %v5846_v9 = vld [vmem:[%s5406_s17 + $0x19a] sm:$0xff]  ;;  %v5882_v0 = vmul.f32 %v5651_v26, %v5634_v12  ;;  %v5899_v26 = vmul.f32 %v5654_v27, %v5634_v12 }
  0x70   : > { %5036 = vmatpush3.msra.mxu0 %v4877_v60  ;;  %5067 = vmatprep.mubr.msk.f32.mxu0 %vm5211_vm0, %v11957_v8  ;;  %v5791_v60 = vmul.f32 %v4099_v14, %v5634_v12  ;;  %v5812_v14 = vmul.f32 %v5708_v58, %v5628_v2  ;;  %v5834_v58 = vmul.f32 %v5750_v47, %v5628_v2  ;;  %v4872_v27 = vld [vmem:[%s11491_s7 + $0xd0] sm:$0xff] }
  0x71   : > { %11955 = vst [vmem:[#allocation52_spill] sm:$0xff] %v5764_v54  ;;  %v5784_v54 = vmul.f32 %v5687_v13, %v5628_v2  ;;  %5037 = vmatprep.subr.mxu0 %v11957_v8  ;;  %v5804_v13 = vld [vmem:[%s5406_s17 + $0x182] sm:$0xff]  ;;  %11971 = vst [vmem:[#allocation67_spill] sm:$0xff] %v5839_v17  ;;  %v5857_v47 = vmul.f32 %v5756_v36, %v5628_v2  ;;  %v5878_v36 = vmul.f32 %v5801_v29, %v5628_v2 }
  0x72   : > { %11963 = vst [vmem:[#allocation59_spill] sm:$0xff] %v5791_v60  ;;  %11966 = vst [vmem:[#allocation62_spill] sm:$0xff] %v5804_v13  ;;  %v5816_v60 = vmul.f32 %v5711_v51, %v5628_v2  ;;  %5038 = vmatpush3.msra.mxu0 %v4876_v30  ;;  %v4126_v51 = vld [vmem:[%s5406_s17 + $0x33] sm:$0xff]  ;;  %v4874_v30 = vld [vmem:[%s11491_s7 + $0xe0] sm:$0xff]  ;;  %v5907_v15 = vmul.f32 %v5849_v5, %v5628_v2 }
  0x73   : > { %11961 = vst [vmem:[#allocation57_spill] sm:$0xff] %v5784_v54  ;;  %v5822_v54 = vld [vmem:[%s5406_s17 + $0x18a] sm:$0xff]  ;;  %11970 = vst [vmem:[#allocation66_spill] sm:$0xff] %v5834_v58  ;;  %5039 = vmatprep.subr.mxu0 %v11957_v8  ;;  %v4127_v17 = vld [vmem:[%s5406_s17 + $0x3b] sm:$0xff]  ;;  %v5866_v58 = vmul.f32 %v5648_v23, %v5634_v12  ;;  %v520_v29 = vmul.f32 %v4126_v51, %v5642_v20  ;;  %v522_v51 = vmul.f32 %v5414_v31, %v5642_v20 }
  0x74   : > { %11968 = vst [vmem:[#allocation64_spill] sm:$0xff] %v5822_v54  ;;  %11972 = vst [vmem:[#allocation68_spill] sm:$0xff] %v5846_v9  ;;  %5040 = vmatpush3.msra.mxu0 %v4875_v39  ;;  %v4873_v23 = vld [vmem:[%s11491_s7 + $0xd8] sm:$0xff]  ;;  %v5890_v39 = vmul.f32 %v5804_v13, %v5628_v2  ;;  %v521_v13 = vmul.f32 %v4127_v17, %v5642_v20  ;;  %v5926_v17 = vmul.f32 %v5669_v41, %v5634_v12 }
  0x75   : > { %11974 = vst [vmem:[#allocation70_spill] sm:$0xff] %v5866_v58  ;;  %11975 = vst [vmem:[#allocation71_spill] sm:$0xff] %v5882_v0  ;;  %5041 = vmatprep.subr.mxu0 %v11957_v8  ;;  %v5894_v58 = vmul.f32 %v5822_v54, %v5628_v2  ;;  %v5903_v0 = vmul.f32 %v5846_v9, %v5628_v2  ;;  %v5912_v54 = vmul.f32 %v5666_v40, %v5634_v12  ;;  %v6109_v9 = vld [vmem:[%s5406_s17 + $0xac] sm:$0xff] }
  0x76   : > { %11976 = vst [vmem:[#allocation72_spill] sm:$0xff] %v5899_v26  ;;  %5042 = vmatpush3.msra.mxu0 %v4874_v30  ;;  %v523_v30 = vmul.f32 %v5417_v32, %v5642_v20  ;;  %v524_v2 = vmul.f32 %v5427_v35, %v5642_v20  ;;  %11978 = vst [vmem:[#allocation74_spill] sm:$0xff] %v5926_v17  ;;  %v525_v40 = vmul.f32 %v5431_v37, %v5642_v20  ;;  %v4871_v35 = vld [vmem:[%s11491_s7 + $0xc8] sm:$0xff]  ;;  %v11992_v26 = vld [vmem:[#allocation56_spill] sm:$0xff] }
  0x77   : > { %11977 = vst [vmem:[#allocation73_spill] sm:$0xff] %v5912_v54  ;;  %5043 = vmatprep.subr.mxu0 %v11957_v8  ;;  %v526_v54 = vmul.f32 %v5440_v44, %v5642_v20  ;;  %v527_v31 = vmul.f32 %v5446_v50, %v5642_v20  ;;  %v5936_v32 = vmul.f32 %v5672_v42, %v5634_v12  ;;  %12031 = vst [vmem:[#allocation96_spill] sm:$0xff] %v6195_v24  ;;  %v6198_v12 = vld [vmem:[%s5406_s17 + $0x15c] sm:$0xff] }
  0x78   : > { %5044 = vmatpush3.msra.mxu0 %v4873_v23  ;;  %v528_v41 = vmul.f32 %v5452_v55, %v5642_v20  ;;  %v529_v37 = vmul.f32 %v5458_v61, %v5642_v20  ;;  %v530_v44 = vmul.f32 %v5464_v4, %v5642_v20  ;;  %v5949_v50 = vadd.f32 %v520_v29, %v5675_v49  ;;  %v4870_v61 = vld [vmem:[%s11491_s7 + $0xc0] sm:$0xff] }
  0x79   : > { %11979 = vst [vmem:[#allocation75_spill] sm:$0xff] %v5936_v32  ;;  %5045 = vmatprep.subr.mxu0 %v11957_v8  ;;  %v531_v42 = vmul.f32 %v5470_v10, %v5642_v20  ;;  %v532_v23 = vmul.f32 %v5476_v16, %v5642_v20  ;;  %v533_v32 = vmul.f32 %v5482_v22, %v5642_v20  ;;  %12032 = vst [vmem:[#allocation97_spill] sm:$0xff] %v6198_v12 }
  0x7a   : > { %5046 = vmatpush3.msra.mxu0 %v4872_v27  ;;  %v5958_v55 = vadd.f32 %v521_v13, %v5678_v48  ;;  %v534_v4 = vmul.f32 %v5488_v28, %v5642_v20  ;;  %v535_v10 = vmul.f32 %v5494_v38, %v5642_v20  ;;  %v536_v29 = vmul.f32 %v5500_v45, %v5642_v20  ;;  %v11984_v45 = vld [vmem:[#allocation20_spill] sm:$0xff] }
  0x7b   : > { %5047 = vmatprep.subr.mxu0 %v11957_v8  ;;  %v5971_v49 = vadd.f32 %v522_v51, %v5693_v46  ;;  %v537_v48 = vmul.f32 %v5506_v52, %v5642_v20  ;;  %v538_v13 = vmul.f32 %v5512_v59, %v5642_v20  ;;  %v539_v27 = vmul.f32 %v5518_v3, %v5642_v20  ;;  %v4869_v46 = vld [vmem:[%s11491_s7 + $0xb8] sm:$0xff] }
  0x7c   : > { %5048 = vmatpush3.msra.mxu0 %v4871_v35  ;;  %v5980_v28 = vadd.f32 %v523_v30, %v5696_v63  ;;  %v540_v51 = vmul.f32 %v5524_v11, %v5642_v20  ;;  %v541_v35 = vmul.f32 %v5530_v18, %v5642_v20  ;;  %v542_v59 = vmul.f32 %v5536_v25, %v5642_v20  ;;  %v11982_v18 = vld [vmem:[#allocation40_spill] sm:$0xff] }
  0x7d   : > { %5049 = vmatprep.subr.mxu0 %v11957_v8  ;;  %v5993_v3 = vadd.f32 %v524_v2, %v5714_v33  ;;  %v543_v63 = vmul.f32 %v5542_v34, %v5642_v20  ;;  %v544_v30 = vmul.f32 %v5548_v43, %v5642_v20  ;;  %v545_v52 = vmul.f32 %v5554_v53, %v5642_v20  ;;  %v4868_v33 = vld [vmem:[%s11491_s7 + $0xb0] sm:$0xff]  ;;  %v11981_v43 = vld [vmem:[#allocation18_spill] sm:$0xff] }
  0x7e   : > { %5050 = vmatpush3.msra.mxu0 %v4870_v61  ;;  %v6002_v11 = vadd.f32 %v525_v40, %v5717_v6  ;;  %v546_v2 = vmul.f32 %v5560_v62, %v5642_v20  ;;  %v11980_v61 = vld [vmem:[#allocation17_spill] sm:$0xff]  ;;  %v548_v25 = vmul.f32 %v11981_v43, %v5642_v20  ;;  %v6015_v53 = vadd.f32 %v526_v54, %v11982_v18  ;;  %v11983_v6 = vld [vmem:[#allocation19_spill] sm:$0xff] }
  0x7f   : > { %5051 = vmatprep.subr.mxu0 %v11957_v8  ;;  %v547_v34 = vmul.f32 %v11980_v61, %v5642_v20  ;;  %v549_v40 = vmul.f32 %v11983_v6, %v5642_v20  ;;  %v550_v38 = vmul.f32 %v11984_v45, %v5642_v20  ;;  %v11985_v62 = vld [vmem:[#allocation21_spill] sm:$0xff]  ;;  %v11986_v61 = vld [vmem:[#allocation44_spill] sm:$0xff]  ;;  %v4867_v18 = vld [vmem:[%s11491_s7 + $0xa8] sm:$0xff]  ;;  %v6046_v5 = vadd.f32 %v533_v32, %v11992_v26 }
  0x80   : > { %5052 = vmatpush3.msra.mxu0 %v4869_v46  ;;  %v551_v22 = vmul.f32 %v11985_v62, %v5642_v20  ;;  %v6024_v16 = vadd.f32 %v527_v31, %v11986_v61  ;;  %v11987_v54 = vld [vmem:[#allocation45_spill] sm:$0xff]  ;;  %v11988_v6 = vld [vmem:[#allocation46_spill] sm:$0xff]  ;;  %v11989_v45 = vld [vmem:[#allocation51_spill] sm:$0xff]  ;;  %v6067_v32 = vadd.f32 %v536_v29, %v5808_v1 }
  0x81   : > { %5053 = vmatprep.subr.mxu0 %v11957_v8  ;;  %v6031_v46 = vadd.f32 %v528_v41, %v11987_v54  ;;  %v6034_v43 = vadd.f32 %v529_v37, %v11988_v6  ;;  %v6037_v17 = vadd.f32 %v530_v44, %v11989_v45  ;;  %v11990_v20 = vld [vmem:[#allocation52_spill] sm:$0xff]  ;;  %v11991_v31 = vld [vmem:[#allocation53_spill] sm:$0xff]  ;;  %v11994_v6 = vld [vmem:[#allocation58_spill] sm:$0xff] }
  0x82   : > { %v6040_v62 = vadd.f32 %v531_v42, %v11990_v20  ;;  %5054 = vmatpush3.msra.mxu0 %v4868_v33  ;;  %v6043_v61 = vadd.f32 %v532_v23, %v11991_v31  ;;  %v11993_v41 = vld [vmem:[#allocation57_spill] sm:$0xff]  ;;  %v6052_v45 = vadd.f32 %v535_v10, %v11994_v6  ;;  %v6057_v54 = vld [vmem:[%s5406_s17 + $0x4c] sm:$0xff]  ;;  %v4866_v26 = vld [vmem:[%s11491_s7 + $0xa0] sm:$0xff]  ;;  %v6070_v23 = vadd.f32 %v537_v48, %v5812_v14 }
  0x83   : > { %v6049_v37 = vadd.f32 %v534_v4, %v11993_v41  ;;  %v4158_v44 = vld [vmem:[%s5406_s17 + $0x34] sm:$0xff]  ;;  %v4159_v42 = vld [vmem:[%s5406_s17 + $0x3c] sm:$0xff]  ;;  %11995 = vst [vmem:[#allocation40_spill] sm:$0xff] %v6057_v54  ;;  %5055 = vmatprep.subr.mxu0 %v11957_v8  ;;  %v6073_v4 = vadd.f32 %v538_v13, %v5816_v60  ;;  %v6076_v10 = vadd.f32 %v539_v27, %v5826_v7  ;;  %v6079_v20 = vld [vmem:[%s5406_s17 + $0x64] sm:$0xff] }
  0x84   : > { %v6060_v33 = vld [vmem:[%s5406_s17 + $0x54] sm:$0xff]  ;;  %11997 = vst [vmem:[#allocation45_spill] sm:$0xff] %v6079_v20  ;;  %v6082_v31 = vld [vmem:[%s5406_s17 + $0x6c] sm:$0xff]  ;;  %v6085_v41 = vld [vmem:[%s5406_s17 + $0x7c] sm:$0xff]  ;;  %5056 = vmatpush3.msra.mxu0 %v4867_v18  ;;  %v6097_v7 = vadd.f32 %v542_v59, %v5853_v57  ;;  %v6100_v48 = vadd.f32 %v543_v63, %v5857_v47  ;;  %v6116_v59 = vadd.f32 %v544_v30, %v5861_v19 }
  0x85   : > { %11996 = vst [vmem:[#allocation44_spill] sm:$0xff] %v6060_v33  ;;  %11998 = vst [vmem:[#allocation46_spill] sm:$0xff] %v6082_v31  ;;  %v6088_v6 = vld [vmem:[%s5406_s17 + $0x84] sm:$0xff]  ;;  %v12001_v1 = vld [vmem:[#allocation65_spill] sm:$0xff]  ;;  %5057 = vmatprep.subr.mxu0 %v11957_v8  ;;  %v6119_v47 = vadd.f32 %v545_v52, %v5870_v56  ;;  %v6122_v57 = vadd.f32 %v546_v2, %v5874_v21  ;;  %v6137_v19 = vadd.f32 %v548_v25, %v5890_v39 }
  0x86   : > { %11999 = vst [vmem:[#allocation51_spill] sm:$0xff] %v6085_v41  ;;  %12000 = vst [vmem:[#allocation52_spill] sm:$0xff] %v6088_v6  ;;  %v6091_v14 = vadd.f32 %v540_v51, %v12001_v1  ;;  %v12002_v60 = vld [vmem:[#allocation66_spill] sm:$0xff]  ;;  %v6103_v13 = vld [vmem:[%s5406_s17 + $0x94] sm:$0xff]  ;;  %5058 = vmatpush3.msra.mxu0 %v4866_v26  ;;  %v6140_v52 = vadd.f32 %v549_v40, %v5894_v58  ;;  %v6143_v56 = vadd.f32 %v550_v38, %v5903_v0 }
  0x87   : > { %v6094_v29 = vadd.f32 %v541_v35, %v12002_v60  ;;  %12004 = vst [vmem:[#allocation56_spill] sm:$0xff] %v6097_v7  ;;  %12005 = vst [vmem:[#allocation57_spill] sm:$0xff] %v6100_v48  ;;  %v6106_v27 = vld [vmem:[%s5406_s17 + $0x9c] sm:$0xff]  ;;  %v6125_v35 = vadd.f32 %v547_v34, %v5878_v36  ;;  %v6128_v63 = vld [vmem:[%s5406_s17 + $0xb4] sm:$0xff]  ;;  %v6146_v34 = vadd.f32 %v551_v22, %v5907_v15  ;;  %5059 = vmatprep.subr.mxu0 %v11957_v8 }
  0x88   : > { %12006 = vst [vmem:[#allocation58_spill] sm:$0xff] %v6103_v13  ;;  %12007 = vst [vmem:[#allocation65_spill] sm:$0xff] %v6106_v27  ;;  %v4865_v51 = vld [vmem:[%s11491_s7 + $0x98] sm:$0xff]  ;;  %v6131_v18 = vld [vmem:[%s5406_s17 + $0xc4] sm:$0xff] }
  0x89   : > { %12003 = vst [vmem:[#allocation53_spill] sm:$0xff] %v6094_v29  ;;  %12008 = vst [vmem:[#allocation66_spill] sm:$0xff] %v6109_v9  ;;  %v6134_v1 = vld [vmem:[%s5406_s17 + $0xcc] sm:$0xff]  ;;  %v6149_v36 = vld [vmem:[%s5406_s17 + $0xdc] sm:$0xff]  ;;  %5060 = vmatpush3.msra.mxu0 %v4865_v51 }
  0x8a   : > { %12009 = vst [vmem:[#allocation76_spill] sm:$0xff] %v6116_v59  ;;  %12010 = vst [vmem:[#allocation77_spill] sm:$0xff] %v6119_v47  ;;  %v6152_v21 = vld [vmem:[%s5406_s17 + $0xe4] sm:$0xff]  ;;  %v6155_v30 = vld [vmem:[%s5406_s17 + $0xf4] sm:$0xff]  ;;  %5061 = vmatprep.subr.mxu0 %v11957_v8 }
  0x8b   : > { %12011 = vst [vmem:[#allocation78_spill] sm:$0xff] %v6122_v57  ;;  %12012 = vst [vmem:[#allocation79_spill] sm:$0xff] %v6125_v35  ;;  %v6159_v25 = vld [vmem:[%s5406_s17 + $0xfc] sm:$0xff]  ;;  %v6162_v58 = vld [vmem:[%s5406_s17 + $0x10c] sm:$0xff] }
  0x8c   : > { %12013 = vst [vmem:[#allocation80_spill] sm:$0xff] %v6128_v63  ;;  %12014 = vst [vmem:[#allocation81_spill] sm:$0xff] %v6131_v18  ;;  %v6165_v38 = vld [vmem:[%s5406_s17 + $0x114] sm:$0xff]  ;;  %v6174_v40 = vld [vmem:[%s5406_s17 + $0x124] sm:$0xff] }
  0x8d   : > { %12015 = vst [vmem:[#allocation82_spill] sm:$0xff] %v6134_v1  ;;  %12016 = vst [vmem:[#allocation83_spill] sm:$0xff] %v6137_v19  ;;  %v12026_v0 = vld [vmem:[#allocation29_spill] sm:$0xff]  ;;  %v6177_v26 = vld [vmem:[%s5406_s17 + $0x12c] sm:$0xff] }
  0x8e   : > { %12017 = vst [vmem:[#allocation84_spill] sm:$0xff] %v6140_v52  ;;  %12018 = vst [vmem:[#allocation85_spill] sm:$0xff] %v6143_v56  ;;  %v620_v22 = vmul.f32 %v4158_v44, %v12026_v0  ;;  %v621_v15 = vmul.f32 %v4159_v42, %v12026_v0  ;;  %v622_v39 = vmul.f32 %v6057_v54, %v12026_v0  ;;  %v6180_v60 = vld [vmem:[%s5406_s17 + $0x13c] sm:$0xff]  ;;  %v6209_v8 = vld [vmem:[%s5406_s17 + $0x16c] sm:$0xff] }
  0x8f   : > { %12019 = vst [vmem:[#allocation86_spill] sm:$0xff] %v6146_v34  ;;  %12020 = vst [vmem:[#allocation87_spill] sm:$0xff] %v6149_v36  ;;  %v623_v2 = vmul.f32 %v6060_v33, %v12026_v0  ;;  %v624_v44 = vmul.f32 %v6079_v20, %v12026_v0  ;;  %v625_v42 = vmul.f32 %v6082_v31, %v12026_v0  ;;  %v6192_v33 = vld [vmem:[%s5406_s17 + $0x144] sm:$0xff]  ;;  %v6212_v34 = vld [vmem:[%s5406_s17 + $0x174] sm:$0xff] }
  0x90   : > { %12021 = vst [vmem:[#allocation88_spill] sm:$0xff] %v6152_v21  ;;  %12022 = vst [vmem:[#allocation89_spill] sm:$0xff] %v6155_v30  ;;  %v626_v54 = vmul.f32 %v6085_v41, %v12026_v0  ;;  %v627_v51 = vmul.f32 %v6088_v6, %v12026_v0  ;;  %v628_v31 = vmul.f32 %v6103_v13, %v12026_v0  ;;  %v6215_v56 = vld [vmem:[%s5406_s17 + $0x184] sm:$0xff]  ;;  %v6226_v19 = vld [vmem:[%s5406_s17 + $0x18c] sm:$0xff] }
  0x91   : > { %12023 = vst [vmem:[#allocation90_spill] sm:$0xff] %v6159_v25  ;;  %12024 = vst [vmem:[#allocation91_spill] sm:$0xff] %v6162_v58  ;;  %v629_v41 = vmul.f32 %v6106_v27, %v12026_v0  ;;  %v630_v6 = vmul.f32 %v6109_v9, %v12026_v0  ;;  %v631_v20 = vmul.f32 %v6128_v63, %v12026_v0  ;;  %v6229_v63 = vld [vmem:[%s5406_s17 + $0x19c] sm:$0xff]  ;;  %v6232_v35 = vld [vmem:[%s5406_s17 + $0x1a4] sm:$0xff] }
  0x92   : > { %12025 = vst [vmem:[#allocation92_spill] sm:$0xff] %v6165_v38  ;;  %12027 = vst [vmem:[#allocation29_spill] sm:$0xff] %v6174_v40  ;;  %v632_v52 = vmul.f32 %v6131_v18, %v12026_v0  ;;  %v633_v13 = vmul.f32 %v6134_v1, %v12026_v0  ;;  %v634_v27 = vmul.f32 %v6149_v36, %v12026_v0 }
  0x93   : > { %12028 = vst [vmem:[#allocation93_spill] sm:$0xff] %v6177_v26  ;;  %12029 = vst [vmem:[#allocation94_spill] sm:$0xff] %v6180_v60  ;;  %v635_v9 = vmul.f32 %v6152_v21, %v12026_v0  ;;  %v636_v57 = vmul.f32 %v6155_v30, %v12026_v0  ;;  %v637_v18 = vmul.f32 %v6159_v25, %v12026_v0 }
  0x94   : > { %12030 = vst [vmem:[#allocation95_spill] sm:$0xff] %v6192_v33  ;;  %12033 = vst [vmem:[#allocation98_spill] sm:$0xff] %v6209_v8  ;;  %v638_v1 = vmul.f32 %v6162_v58, %v12026_v0  ;;  %v639_v36 = vmul.f32 %v6165_v38, %v12026_v0  ;;  %v640_v21 = vmul.f32 %v6174_v40, %v12026_v0 }
  0x95   : > { %12034 = vst [vmem:[#allocation99_spill] sm:$0xff] %v6212_v34  ;;  %12035 = vst [vmem:[#allocation100_spill] sm:$0xff] %v6215_v56  ;;  %v641_v47 = vmul.f32 %v6177_v26, %v12026_v0  ;;  %v642_v59 = vmul.f32 %v6180_v60, %v12026_v0  ;;  %v643_v30 = vmul.f32 %v6192_v33, %v12026_v0 }
  0x96   : > { %12036 = vst [vmem:[#allocation101_spill] sm:$0xff] %v6226_v19  ;;  %12037 = vst [vmem:[#allocation102_spill] sm:$0xff] %v6229_v63  ;;  %v644_v25 = vmul.f32 %v6195_v24, %v12026_v0  ;;  %v645_v58 = vmul.f32 %v6198_v12, %v12026_v0  ;;  %v646_v38 = vmul.f32 %v6209_v8, %v12026_v0 }
  0x97   : > { %12038 = vst [vmem:[#allocation103_spill] sm:$0xff] %v6232_v35  ;;  %v647_v40 = vmul.f32 %v6212_v34, %v12026_v0  ;;  %v648_v26 = vmul.f32 %v6215_v56, %v12026_v0  ;;  %v649_v60 = vmul.f32 %v6226_v19, %v12026_v0  ;;  %v650_v33 = vmul.f32 %v6229_v63, %v12026_v0 }
  0x98   : > { %v651_v24 = vmul.f32 %v6232_v35, %v12026_v0  ;;  %v652_v12 = vadd.f32 %v620_v22, %v5949_v50  ;;  %v653_v48 = vadd.f32 %v621_v15, %v5958_v55  ;;  %v654_v8 = vadd.f32 %v622_v39, %v5971_v49  ;;  %v6307_v15 = vld [vmem:[%s5406_s17 + $0x1b2] sm:$0xff]  ;;  %v6310_v39 = vld [vmem:[%s5406_s17 + $0x1ba] sm:$0xff]  ;;  %v12076_v35 = vld [vmem:[#allocation59_spill] sm:$0xff] }
  0x99   : > { %v655_v34 = vadd.f32 %v623_v2, %v5980_v28  ;;  %v656_v7 = vadd.f32 %v624_v44, %v5993_v3  ;;  %v657_v56 = vadd.f32 %v625_v42, %v6002_v11  ;;  %v658_v19 = vadd.f32 %v626_v54, %v6015_v53  ;;  %v12039_v54 = vld [vmem:[#allocation53_spill] sm:$0xff]  ;;  %v12060_v44 = vld [vmem:[#allocation48_spill] sm:$0xff] }
  0x9a   : > { %v659_v29 = vadd.f32 %v627_v51, %v6024_v16  ;;  %v660_v63 = vadd.f32 %v628_v31, %v6031_v46  ;;  %v661_v0 = vadd.f32 %v629_v41, %v6034_v43  ;;  %v662_v50 = vadd.f32 %v630_v6, %v6037_v17  ;;  %v12042_v31 = vld [vmem:[#allocation76_spill] sm:$0xff]  ;;  %v12044_v41 = vld [vmem:[#allocation78_spill] sm:$0xff]  ;;  %v12045_v6 = vld [vmem:[#allocation79_spill] sm:$0xff]  ;;  %12055 = vst [vmem:[#allocation53_spill] sm:$0xff] %v6307_v15 }
  0x9b   : > { %v663_v55 = vadd.f32 %v631_v20, %v6040_v62  ;;  %v664_v49 = vadd.f32 %v632_v52, %v6043_v61  ;;  %v665_v28 = vadd.f32 %v633_v13, %v6046_v5  ;;  %v666_v3 = vadd.f32 %v634_v27, %v6049_v37  ;;  %v12040_v61 = vld [vmem:[#allocation56_spill] sm:$0xff]  ;;  %v12041_v20 = vld [vmem:[#allocation57_spill] sm:$0xff]  ;;  %v12046_v13 = vld [vmem:[#allocation83_spill] sm:$0xff] }
  0x9c   : > { %v667_v11 = vadd.f32 %v635_v9, %v6052_v45  ;;  %v668_v53 = vadd.f32 %v636_v57, %v6067_v32  ;;  %v669_v16 = vadd.f32 %v637_v18, %v6070_v23  ;;  %v670_v46 = vadd.f32 %v638_v1, %v6073_v4  ;;  %v12043_v45 = vld [vmem:[#allocation77_spill] sm:$0xff]  ;;  %v12047_v27 = vld [vmem:[#allocation84_spill] sm:$0xff]  ;;  %v12050_v52 = vld [vmem:[#allocation27_spill] sm:$0xff]  ;;  %12056 = vst [vmem:[#allocation56_spill] sm:$0xff] %v6310_v39 }
  0x9d   : > { %v671_v43 = vadd.f32 %v639_v36, %v6076_v10  ;;  %v672_v17 = vadd.f32 %v640_v21, %v6091_v14  ;;  %v673_v62 = vadd.f32 %v641_v47, %v12039_v54  ;;  %v674_v5 = vadd.f32 %v642_v59, %v12040_v61  ;;  %v12048_v57 = vld [vmem:[#allocation85_spill] sm:$0xff]  ;;  %v12049_v47 = vld [vmem:[#allocation86_spill] sm:$0xff]  ;;  %v12052_v21 = vld [vmem:[#allocation35_spill] sm:$0xff] }
  0x9e   : > { %v675_v37 = vadd.f32 %v643_v30, %v12041_v20  ;;  %v676_v9 = vadd.f32 %v644_v25, %v12042_v31  ;;  %v677_v32 = vadd.f32 %v645_v58, %v12043_v45  ;;  %v678_v23 = vadd.f32 %v646_v38, %v12044_v41  ;;  %v12051_v59 = vld [vmem:[#allocation34_spill] sm:$0xff]  ;;  %v12053_v25 = vld [vmem:[#allocation37_spill] sm:$0xff]  ;;  %v12064_v41 = vld [vmem:[#allocation55_spill] sm:$0xff] }
  0x9f   : > { %v679_v4 = vadd.f32 %v647_v40, %v12045_v6  ;;  %v680_v10 = vadd.f32 %v648_v26, %v12046_v13  ;;  %v681_v14 = vadd.f32 %v649_v60, %v12047_v27  ;;  %v682_v18 = vadd.f32 %v650_v33, %v12048_v57  ;;  %v12054_v38 = vld [vmem:[#allocation38_spill] sm:$0xff]  ;;  %v12057_v33 = vld [vmem:[#allocation39_spill] sm:$0xff]  ;;  %v12061_v51 = vld [vmem:[#allocation49_spill] sm:$0xff] }
  0xa0   : > { %v683_v1 = vadd.f32 %v651_v24, %v12049_v47  ;;  %v733_v36 = vmul.f32 %v12051_v59, %v12050_v52  ;;  %v734_v30 = vmul.f32 %v12052_v21, %v12050_v52  ;;  %v735_v58 = vmul.f32 %v12053_v25, %v12050_v52  ;;  %v12058_v24 = vld [vmem:[#allocation42_spill] sm:$0xff]  ;;  %v12059_v26 = vld [vmem:[#allocation43_spill] sm:$0xff]  ;;  %v12065_v13 = vld [vmem:[#allocation60_spill] sm:$0xff] }
  0xa1   : > { %v736_v22 = vmul.f32 %v12054_v38, %v12050_v52  ;;  %v737_v2 = vmul.f32 %v12057_v33, %v12050_v52  ;;  %v738_v40 = vmul.f32 %v12058_v24, %v12050_v52  ;;  %v739_v60 = vmul.f32 %v12059_v26, %v12050_v52  ;;  %v12062_v61 = vld [vmem:[#allocation50_spill] sm:$0xff]  ;;  %v12066_v57 = vld [vmem:[#allocation61_spill] sm:$0xff]  ;;  %v12068_v25 = vld [vmem:[#allocation64_spill] sm:$0xff] }
  0xa2   : > { %v740_v42 = vmul.f32 %v12060_v44, %v12050_v52  ;;  %v741_v54 = vmul.f32 %v12061_v51, %v12050_v52  ;;  %v742_v20 = vmul.f32 %v12062_v61, %v12050_v52  ;;  %v12063_v31 = vld [vmem:[#allocation54_spill] sm:$0xff]  ;;  %v744_v6 = vmul.f32 %v12064_v41, %v12050_v52  ;;  %v12069_v33 = vld [vmem:[#allocation68_spill] sm:$0xff]  ;;  %v12070_v26 = vld [vmem:[#allocation69_spill] sm:$0xff] }
  0xa3   : > { %v743_v45 = vmul.f32 %v12063_v31, %v12050_v52  ;;  %v745_v27 = vmul.f32 %v12065_v13, %v12050_v52  ;;  %v746_v47 = vmul.f32 %v12066_v57, %v12050_v52  ;;  %v12067_v59 = vld [vmem:[#allocation62_spill] sm:$0xff]  ;;  %v748_v38 = vmul.f32 %v12068_v25, %v12050_v52  ;;  %v12071_v31 = vld [vmem:[#allocation36_spill] sm:$0xff]  ;;  %v12073_v13 = vld [vmem:[#allocation41_spill] sm:$0xff] }
  0xa4   : > { %v747_v21 = vmul.f32 %v12067_v59, %v12050_v52  ;;  %v749_v24 = vmul.f32 %v12069_v33, %v12050_v52  ;;  %v750_v44 = vmul.f32 %v12070_v26, %v12050_v52  ;;  %v751_v51 = vmul.f32 %v6307_v15, %v12050_v52  ;;  %v12075_v59 = vld [vmem:[#allocation47_spill] sm:$0xff] }
  0xa5   : > { %v752_v61 = vmul.f32 %v6310_v39, %v12050_v52  ;;  %v6345_v41 = vadd.f32 %v12071_v31, %v652_v12  ;;  %v6348_v57 = vadd.f32 %v12073_v13, %v653_v48  ;;  %v6351_v25 = vadd.f32 %v12075_v59, %v654_v8  ;;  %v12077_v26 = vld [vmem:[#allocation63_spill] sm:$0xff]  ;;  %v12079_v12 = vld [vmem:[#allocation70_spill] sm:$0xff]  ;;  %v12081_v48 = vld [vmem:[#allocation72_spill] sm:$0xff] }
  0xa6   : > { %v6354_v33 = vadd.f32 %v12076_v35, %v655_v34  ;;  %v6357_v15 = vadd.f32 %v12077_v26, %v656_v7  ;;  %v12078_v39 = vld [vmem:[#allocation67_spill] sm:$0xff]  ;;  %v6363_v31 = vadd.f32 %v12079_v12, %v658_v19  ;;  %v12082_v8 = vld [vmem:[#allocation73_spill] sm:$0xff]  ;;  %v12083_v35 = vld [vmem:[#allocation74_spill] sm:$0xff]  ;;  %v6384_v19 = vadd.f32 %v735_v58, %v666_v3 }
  0xa7   : > { %12072 = vst [vmem:[#allocation57_spill] sm:$0xff] %v6345_v41  ;;  %12074 = vst [vmem:[#allocation76_spill] sm:$0xff] %v6348_v57  ;;  %v6360_v52 = vadd.f32 %v12078_v39, %v657_v56  ;;  %v12080_v41 = vld [vmem:[#allocation71_spill] sm:$0xff]  ;;  %v6369_v57 = vadd.f32 %v12081_v48, %v660_v63  ;;  %v6372_v59 = vadd.f32 %v12082_v8, %v661_v0  ;;  %v5128_v58 = vld [vmem:[%s5406_s17 + $0x7b] sm:$0xff] }
  0xa8   : > { %v6366_v13 = vadd.f32 %v12080_v41, %v659_v29  ;;  %v6375_v34 = vadd.f32 %v12083_v35, %v662_v50  ;;  %v12084_v7 = vld [vmem:[#allocation75_spill] sm:$0xff]  ;;  %v6380_v56 = vadd.f32 %v733_v36, %v664_v49  ;;  %v6382_v39 = vadd.f32 %v734_v30, %v665_v28  ;;  %v5125_v36 = vld [vmem:[%s5406_s17 + $0x53] sm:$0xff]  ;;  %v12098_v12 = vld [vmem:[#allocation6_spill] sm:$0xff] }
  0xa9   : > { %v6378_v26 = vadd.f32 %v12084_v7, %v663_v55  ;;  %v6386_v29 = vadd.f32 %v736_v22, %v667_v11  ;;  %v6388_v41 = vadd.f32 %v737_v2, %v668_v53  ;;  %v6390_v63 = vadd.f32 %v738_v40, %v669_v16  ;;  %v5127_v30 = vld [vmem:[%s5406_s17 + $0x6b] sm:$0xff]  ;;  %v5129_v22 = vld [vmem:[%s5406_s17 + $0x83] sm:$0xff]  ;;  %v5130_v2 = vld [vmem:[%s5406_s17 + $0x93] sm:$0xff] }
  0xaa   : > { %v6392_v0 = vadd.f32 %v739_v60, %v670_v46  ;;  %v6394_v50 = vadd.f32 %v740_v42, %v671_v43  ;;  %v6396_v55 = vadd.f32 %v741_v54, %v672_v17  ;;  %v6398_v49 = vadd.f32 %v742_v20, %v673_v62  ;;  %v5131_v60 = vld [vmem:[%s5406_s17 + $0x9b] sm:$0xff]  ;;  %v5132_v54 = vld [vmem:[%s5406_s17 + $0xab] sm:$0xff] }
  0xab   : > { %v6400_v28 = vadd.f32 %v743_v45, %v674_v5  ;;  %v6402_v3 = vadd.f32 %v744_v6, %v675_v37  ;;  %v6404_v11 = vadd.f32 %v745_v27, %v676_v9  ;;  %v6406_v53 = vadd.f32 %v746_v47, %v677_v32  ;;  %v5124_v37 = vld [vmem:[%s5406_s17 + $0x4b] sm:$0xff]  ;;  %v5133_v45 = vld [vmem:[%s5406_s17 + $0xb3] sm:$0xff]  ;;  %v12094_v27 = vld [vmem:[#allocation2_spill] sm:$0xff] }
  0xac   : > { %v6408_v16 = vadd.f32 %v747_v21, %v678_v23  ;;  %v6410_v46 = vadd.f32 %v748_v38, %v679_v4  ;;  %v6412_v43 = vadd.f32 %v749_v24, %v680_v10  ;;  %v6414_v17 = vadd.f32 %v750_v44, %v681_v14  ;;  %v12093_v9 = vld [vmem:[#allocation28_spill] sm:$0xff]  ;;  %v5126_v4 = vld [vmem:[%s5406_s17 + $0x63] sm:$0xff] }
  0xad   : > { %12085 = vst [vmem:[#allocation77_spill] sm:$0xff] %v6404_v11  ;;  %12086 = vst [vmem:[#allocation78_spill] sm:$0xff] %v6406_v53  ;;  %v6416_v62 = vadd.f32 %v751_v51, %v682_v18  ;;  %v6418_v5 = vadd.f32 %v752_v61, %v683_v1  ;;  %v821_v32 = vmul.f32 %v5124_v37, %v12093_v9  ;;  %v12095_v21 = vld [vmem:[#allocation3_spill] sm:$0xff]  ;;  %v12096_v24 = vld [vmem:[#allocation4_spill] sm:$0xff] }
  0xae   : > { %12087 = vst [vmem:[#allocation79_spill] sm:$0xff] %v6408_v16  ;;  %12088 = vst [vmem:[#allocation83_spill] sm:$0xff] %v6410_v46  ;;  %v822_v23 = vmul.f32 %v5125_v36, %v12093_v9  ;;  %v823_v10 = vmul.f32 %v5126_v4, %v12093_v9  ;;  %v824_v14 = vmul.f32 %v5127_v30, %v12093_v9  ;;  %v12097_v51 = vld [vmem:[#allocation5_spill] sm:$0xff]  ;;  %v12099_v8 = vld [vmem:[#allocation7_spill] sm:$0xff] }
  0xaf   : > { %12089 = vst [vmem:[#allocation84_spill] sm:$0xff] %v6412_v43  ;;  %12090 = vst [vmem:[#allocation85_spill] sm:$0xff] %v6414_v17  ;;  %v825_v18 = vmul.f32 %v5128_v58, %v12093_v9  ;;  %v826_v1 = vmul.f32 %v5129_v22, %v12093_v9  ;;  %v827_v40 = vmul.f32 %v5130_v2, %v12093_v9  ;;  %v12100_v7 = vld [vmem:[#allocation8_spill] sm:$0xff]  ;;  %v12101_v36 = vld [vmem:[#allocation9_spill] sm:$0xff] }
  0xb0   : > { %12091 = vst [vmem:[#allocation86_spill] sm:$0xff] %v6416_v62  ;;  %12092 = vst [vmem:[#allocation27_spill] sm:$0xff] %v6418_v5  ;;  %v828_v42 = vmul.f32 %v5131_v60, %v12093_v9  ;;  %v829_v20 = vmul.f32 %v5132_v54, %v12093_v9  ;;  %v830_v6 = vmul.f32 %v5133_v45, %v12093_v9  ;;  %v12102_v30 = vld [vmem:[#allocation10_spill] sm:$0xff]  ;;  %v12103_v22 = vld [vmem:[#allocation11_spill] sm:$0xff] }
  0xb1   : > { %v831_v47 = vmul.f32 %v12094_v27, %v12093_v9  ;;  %v832_v38 = vmul.f32 %v12095_v21, %v12093_v9  ;;  %v833_v44 = vmul.f32 %v12096_v24, %v12093_v9  ;;  %v834_v61 = vmul.f32 %v12097_v51, %v12093_v9  ;;  %v12104_v60 = vld [vmem:[#allocation12_spill] sm:$0xff]  ;;  %v12105_v45 = vld [vmem:[#allocation13_spill] sm:$0xff]  ;;  %v12106_v21 = vld [vmem:[#allocation14_spill] sm:$0xff] }
  0xb2   : > { %v835_v48 = vmul.f32 %v12098_v12, %v12093_v9  ;;  %v836_v35 = vmul.f32 %v12099_v8, %v12093_v9  ;;  %v837_v37 = vmul.f32 %v12100_v7, %v12093_v9  ;;  %v838_v4 = vmul.f32 %v12101_v36, %v12093_v9  ;;  %v12107_v51 = vld [vmem:[#allocation15_spill] sm:$0xff]  ;;  %v12108_v8 = vld [vmem:[#allocation16_spill] sm:$0xff]  ;;  %v12109_v36 = vld [vmem:[#allocation17_spill] sm:$0xff] }
  0xb3   : > { %v839_v58 = vmul.f32 %v12102_v30, %v12093_v9  ;;  %v840_v2 = vmul.f32 %v12103_v22, %v12093_v9  ;;  %v841_v54 = vmul.f32 %v12104_v60, %v12093_v9  ;;  %v842_v27 = vmul.f32 %v12105_v45, %v12093_v9  ;;  %v12110_v22 = vld [vmem:[#allocation18_spill] sm:$0xff]  ;;  %v12111_v60 = vld [vmem:[#allocation19_spill] sm:$0xff]  ;;  %v12112_v45 = vld [vmem:[#allocation20_spill] sm:$0xff] }
  0xb4   : > { %v843_v24 = vmul.f32 %v12106_v21, %v12093_v9  ;;  %v844_v12 = vmul.f32 %v12107_v51, %v12093_v9  ;;  %v845_v7 = vmul.f32 %v12108_v8, %v12093_v9  ;;  %v846_v30 = vmul.f32 %v12109_v36, %v12093_v9  ;;  %v12113_v21 = vld [vmem:[#allocation21_spill] sm:$0xff]  ;;  %v12114_v51 = vld [vmem:[#allocation22_spill] sm:$0xff]  ;;  %v12115_v8 = vld [vmem:[#allocation23_spill] sm:$0xff] }
  0xb5   : > { %v847_v5 = vmul.f32 %v12110_v22, %v12093_v9  ;;  %v848_v62 = vmul.f32 %v12111_v60, %v12093_v9  ;;  %v849_v17 = vmul.f32 %v12112_v45, %v12093_v9  ;;  %v850_v43 = vmul.f32 %v12113_v21, %v12093_v9  ;;  %v12116_v53 = vld [vmem:[#allocation57_spill] sm:$0xff]  ;;  %v12117_v11 = vld [vmem:[#allocation76_spill] sm:$0xff] }
  0xb6   : > { %v851_v46 = vmul.f32 %v12114_v51, %v12093_v9  ;;  %v852_v16 = vmul.f32 %v12115_v8, %v12093_v9  ;;  %v6485_v36 = vadd.f32 %v821_v32, %v12116_v53  ;;  %v6488_v22 = vadd.f32 %v822_v23, %v12117_v11  ;;  %v12144_v8 = vld [vmem:[#allocation66_spill] sm:$0xff] }
  0xb7   : > { %v6491_v60 = vadd.f32 %v823_v10, %v6351_v25  ;;  %v6494_v45 = vadd.f32 %v824_v14, %v6354_v33  ;;  %v6497_v21 = vadd.f32 %v825_v18, %v6357_v15  ;;  %v6500_v51 = vadd.f32 %v826_v1, %v6360_v52  ;;  %v4864_v25 = vld [vmem:[%s11491_s7 + $0x90] sm:$0xff]  ;;  %v12121_v18 = vld [vmem:[#allocation78_spill] sm:$0xff] }
  0xb8   : > { %v6503_v9 = vadd.f32 %v827_v40, %v6363_v31  ;;  %v6506_v53 = vadd.f32 %v828_v42, %v6366_v13  ;;  %v6512_v11 = vadd.f32 %v829_v20, %v6369_v57  ;;  %v6515_v33 = vadd.f32 %v830_v6, %v6372_v59  ;;  %5062 = vmatpush3.msra.mxu0 %v4864_v25  ;;  %v3487_v31 = vld [vmem:[%s11491_s7 + $0x8] sm:$0xff] }
  0xb9   : > { %v6518_v15 = vadd.f32 %v831_v47, %v6375_v34  ;;  %v6521_v52 = vadd.f32 %v832_v38, %v6378_v26  ;;  %v6527_v13 = vadd.f32 %v833_v44, %v6380_v56  ;;  %v6530_v57 = vadd.f32 %v834_v61, %v6382_v39  ;;  %5029 = vmatpush3.msra.mxu1 %v3487_v31  ;;  %v4863_v26 = vld [vmem:[%s11491_s7 + $0x88] sm:$0xff]  ;;  %v3486_v39 = vld [vmem:[%s11491_s7] sm:$0xff]  ;;  %v12145_v31 = vld [vmem:[#allocation80_spill] sm:$0xff] }
  0xba   : > { %v6533_v59 = vadd.f32 %v835_v48, %v6384_v19  ;;  %v12118_v34 = vmov 0.0   ;;  %v6540_v32 = vadd.f32 %v836_v35, %v6386_v29  ;;  %v6543_v23 = vadd.f32 %v837_v37, %v6388_v41  ;;  %v4862_v41 = vld [vmem:[%s11491_s7 + $0x80] sm:$0xff]  ;;  %v12123_v40 = vld [vmem:[#allocation79_spill] sm:$0xff]  ;;  %v12136_v37 = vld [vmem:[#allocation40_spill] sm:$0xff] }
  0xbb   : > { %5063 = vmatprep.subr.mxu0 %v12118_v34  ;;  %v6546_v56 = vadd.f32 %v838_v4, %v6390_v63  ;;  %5030 = vmatprep.subr.mxu1 %v12118_v34  ;;  %v6553_v19 = vadd.f32 %v839_v58, %v6392_v0  ;;  %v6556_v10 = vadd.f32 %v840_v2, %v6394_v50  ;;  %v12119_v50 = vld [vmem:[#allocation77_spill] sm:$0xff]  ;;  %v12131_v38 = vld [vmem:[#allocation86_spill] sm:$0xff]  ;;  %v12133_v61 = vld [vmem:[#allocation27_spill] sm:$0xff] }
  0xbc   : > { %5064 = vmatpush3.msra.mxu0 %v4863_v26  ;;  %v6559_v29 = vadd.f32 %v841_v54, %v6396_v55  ;;  %5031 = vmatpush3.msra.mxu1 %v3486_v39  ;;  %v6566_v63 = vadd.f32 %v842_v27, %v6398_v49  ;;  %v6569_v14 = vadd.f32 %v843_v24, %v6400_v28  ;;  %v12125_v49 = vld [vmem:[#allocation83_spill] sm:$0xff]  ;;  %v12127_v28 = vld [vmem:[#allocation84_spill] sm:$0xff]  ;;  %v12135_v35 = vld [vmem:[#allocation30_spill] sm:$0xff] }
  0xbd   : > { %5065 = vmatprep.subr.mxu0 %v12118_v34  ;;  %v6572_v0 = vadd.f32 %v844_v12, %v6402_v3  ;;  %5070 = vmatprep.subr.mxu1 %v12118_v34  ;;  %v6576_v55 = vadd.f32 %v845_v7, %v12119_v50  ;;  %v6579_v1 = vadd.f32 %v846_v30, %v12121_v18  ;;  %v12129_v3 = vld [vmem:[#allocation85_spill] sm:$0xff]  ;;  %v12142_v24 = vld [vmem:[#allocation58_spill] sm:$0xff]  ;;  %v12160_v34 = vld [vmem:[#allocation96_spill] sm:$0xff] }
  0xbe   : > { %5066 = vmatpush3.msra.mxu0 %v4862_v41  ;;  %v6582_v42 = vadd.f32 %v847_v5, %v12123_v40  ;;  %v6585_v20 = vadd.f32 %v848_v62, %v12125_v49  ;;  %v6588_v6 = vadd.f32 %v849_v17, %v12127_v28  ;;  %v6591_v47 = vadd.f32 %v850_v43, %v12129_v3  ;;  %v12137_v5 = vld [vmem:[#allocation44_spill] sm:$0xff]  ;;  %v12138_v58 = vld [vmem:[#allocation45_spill] sm:$0xff]  ;;  %v12139_v43 = vld [vmem:[#allocation46_spill] sm:$0xff] }
  0xbf   : > { %12120 = vst [vmem:[#allocation34_spill] sm:$0xff] %v6576_v55  ;;  %12122 = vst [vmem:[#allocation35_spill] sm:$0xff] %v6579_v1  ;;  %v6594_v44 = vadd.f32 %v851_v46, %v12131_v38  ;;  %v6597_v48 = vadd.f32 %v852_v16, %v12133_v61  ;;  %v921_v4 = vmul.f32 %v12136_v37, %v12135_v35  ;;  %v12140_v46 = vld [vmem:[#allocation51_spill] sm:$0xff]  ;;  %v12141_v16 = vld [vmem:[#allocation52_spill] sm:$0xff] }
  0xc0   : > { %12124 = vst [vmem:[#allocation37_spill] sm:$0xff] %v6582_v42  ;;  %12126 = vst [vmem:[#allocation38_spill] sm:$0xff] %v6585_v20  ;;  %v922_v62 = vmul.f32 %v12137_v5, %v12135_v35  ;;  %v923_v17 = vmul.f32 %v12138_v58, %v12135_v35  ;;  %v924_v2 = vmul.f32 %v12139_v43, %v12135_v35  ;;  %v12143_v7 = vld [vmem:[#allocation65_spill] sm:$0xff]  ;;  %v12147_v50 = vld [vmem:[#allocation82_spill] sm:$0xff] }
  0xc1   : > { %12128 = vst [vmem:[#allocation39_spill] sm:$0xff] %v6588_v6  ;;  %12130 = vst [vmem:[#allocation42_spill] sm:$0xff] %v6591_v47  ;;  %v925_v54 = vmul.f32 %v12140_v46, %v12135_v35  ;;  %v926_v27 = vmul.f32 %v12141_v16, %v12135_v35  ;;  %v927_v12 = vmul.f32 %v12142_v24, %v12135_v35  ;;  %v12146_v39 = vld [vmem:[#allocation81_spill] sm:$0xff]  ;;  %v12148_v40 = vld [vmem:[#allocation87_spill] sm:$0xff] }
  0xc2   : > { %12132 = vst [vmem:[#allocation43_spill] sm:$0xff] %v6594_v44  ;;  %12134 = vst [vmem:[#allocation48_spill] sm:$0xff] %v6597_v48  ;;  %v928_v30 = vmul.f32 %v12143_v7, %v12135_v35  ;;  %v929_v25 = vmul.f32 %v12144_v8, %v12135_v35  ;;  %v930_v26 = vmul.f32 %v12145_v31, %v12135_v35  ;;  %v12149_v28 = vld [vmem:[#allocation88_spill] sm:$0xff]  ;;  %v12150_v38 = vld [vmem:[#allocation89_spill] sm:$0xff] }
  0xc3   : > { %v931_v41 = vmul.f32 %v12146_v39, %v12135_v35  ;;  %v932_v18 = vmul.f32 %v12147_v50, %v12135_v35  ;;  %v933_v49 = vmul.f32 %v12148_v40, %v12135_v35  ;;  %v934_v3 = vmul.f32 %v12149_v28, %v12135_v35  ;;  %v12151_v37 = vld [vmem:[#allocation90_spill] sm:$0xff]  ;;  %v6632_v58 = vld [vmem:[%s5406_s17 + $0x1b4] sm:$0xff]  ;;  %v12154_v46 = vld [vmem:[#allocation91_spill] sm:$0xff] }
  0xc4   : > { %v935_v61 = vmul.f32 %v12150_v38, %v12135_v35  ;;  %v936_v5 = vmul.f32 %v12151_v37, %v12135_v35  ;;  %12152 = vst [vmem:[#allocation49_spill] sm:$0xff] %v6632_v58  ;;  %v6635_v43 = vld [vmem:[%s5406_s17 + $0x1bc] sm:$0xff]  ;;  %v937_v16 = vmul.f32 %v12154_v46, %v12135_v35  ;;  %v12155_v24 = vld [vmem:[#allocation92_spill] sm:$0xff]  ;;  %v12159_v38 = vld [vmem:[#allocation95_spill] sm:$0xff]  ;;  %v943_v48 = vmul.f32 %v12160_v34, %v12135_v35 }
  0xc5   : > { %12153 = vst [vmem:[#allocation50_spill] sm:$0xff] %v6635_v43  ;;  %v938_v7 = vmul.f32 %v12155_v24, %v12135_v35  ;;  %v12156_v8 = vld [vmem:[#allocation29_spill] sm:$0xff]  ;;  %v12158_v40 = vld [vmem:[#allocation94_spill] sm:$0xff]  ;;  %v942_v37 = vmul.f32 %v12159_v38, %v12135_v35  ;;  %v12167_v34 = vld [vmem:[#allocation103_spill] sm:$0xff] }
  0xc6   : > { %v939_v31 = vmul.f32 %v12156_v8, %v12135_v35  ;;  %v12157_v39 = vld [vmem:[#allocation93_spill] sm:$0xff]  ;;  %v941_v28 = vmul.f32 %v12158_v40, %v12135_v35  ;;  %v12162_v24 = vld [vmem:[#allocation98_spill] sm:$0xff]  ;;  %v12163_v8 = vld [vmem:[#allocation99_spill] sm:$0xff]  ;;  %v950_v55 = vmul.f32 %v12167_v34, %v12135_v35  ;;  %v6682_v34 = vadd.f32 %v925_v54, %v6497_v21 }
  0xc7   : > { %v940_v50 = vmul.f32 %v12157_v39, %v12135_v35  ;;  %v12161_v46 = vld [vmem:[#allocation97_spill] sm:$0xff]  ;;  %v945_v47 = vmul.f32 %v12162_v24, %v12135_v35  ;;  %v946_v6 = vmul.f32 %v12163_v8, %v12135_v35  ;;  %v12164_v39 = vld [vmem:[#allocation100_spill] sm:$0xff]  ;;  %v12166_v38 = vld [vmem:[#allocation102_spill] sm:$0xff]  ;;  %v952_v24 = vmul.f32 %v6635_v43, %v12135_v35 }
  0xc8   : > { %v944_v44 = vmul.f32 %v12161_v46, %v12135_v35  ;;  %v947_v20 = vmul.f32 %v12164_v39, %v12135_v35  ;;  %v12165_v40 = vld [vmem:[#allocation101_spill] sm:$0xff]  ;;  %v949_v1 = vmul.f32 %v12166_v38, %v12135_v35  ;;  %v951_v46 = vmul.f32 %v6632_v58, %v12135_v35  ;;  %v4292_v54 = vld [vmem:[%s5406_s17 + $0xaa] sm:$0xff]  ;;  %v4310_v43 = vld [vmem:[%s5406_s17 + $0x182] sm:$0xff] }
  0xc9   : > { %v948_v42 = vmul.f32 %v12165_v40, %v12135_v35  ;;  %v6670_v8 = vadd.f32 %v921_v4, %v6485_v36  ;;  %v6673_v39 = vadd.f32 %v922_v62, %v6488_v22  ;;  %v6676_v40 = vadd.f32 %v923_v17, %v6491_v60  ;;  %v4286_v4 = vld [vmem:[%s5406_s17 + $0x62] sm:$0xff]  ;;  %v4288_v62 = vld [vmem:[%s5406_s17 + $0x7a] sm:$0xff] }
  0xca   : > { %v6679_v38 = vadd.f32 %v924_v2, %v6494_v45  ;;  %v6685_v35 = vadd.f32 %v926_v27, %v6500_v51  ;;  %v6688_v36 = vadd.f32 %v927_v12, %v6503_v9  ;;  %v6691_v22 = vadd.f32 %v928_v30, %v6506_v53  ;;  %v4291_v2 = vld [vmem:[%s5406_s17 + $0x9a] sm:$0xff]  ;;  %v4294_v12 = vld [vmem:[%s5406_s17 + $0xc2] sm:$0xff]  ;;  %v4295_v30 = vld [vmem:[%s5406_s17 + $0xca] sm:$0xff] }
  0xcb   : > { %v6694_v60 = vadd.f32 %v929_v25, %v6512_v11  ;;  %v6697_v45 = vadd.f32 %v930_v26, %v6515_v33  ;;  %v6700_v21 = vadd.f32 %v931_v41, %v6518_v15  ;;  %v6703_v51 = vadd.f32 %v932_v18, %v6521_v52  ;;  %v4287_v15 = vld [vmem:[%s5406_s17 + $0x6a] sm:$0xff]  ;;  %v4289_v52 = vld [vmem:[%s5406_s17 + $0x82] sm:$0xff] }
  0xcc   : > { %v6706_v9 = vadd.f32 %v933_v49, %v6527_v13  ;;  %v6709_v53 = vadd.f32 %v934_v3, %v6530_v57  ;;  %v6712_v11 = vadd.f32 %v935_v61, %v6533_v59  ;;  %v6715_v33 = vadd.f32 %v936_v5, %v6540_v32  ;;  %v4290_v32 = vld [vmem:[%s5406_s17 + $0x92] sm:$0xff]  ;;  %v12170_v25 = vld [vmem:[#allocation34_spill] sm:$0xff]  ;;  %v12172_v26 = vld [vmem:[#allocation35_spill] sm:$0xff] }
  0xcd   : > { %v6722_v17 = vadd.f32 %v937_v16, %v6543_v23  ;;  %v6725_v13 = vadd.f32 %v938_v7, %v6546_v56  ;;  %v6728_v57 = vadd.f32 %v939_v31, %v6553_v19  ;;  %v6731_v59 = vadd.f32 %v940_v50, %v6556_v10  ;;  %v4293_v10 = vld [vmem:[%s5406_s17 + $0xb2] sm:$0xff]  ;;  %v12176_v41 = vld [vmem:[#allocation38_spill] sm:$0xff]  ;;  %v12178_v3 = vld [vmem:[#allocation39_spill] sm:$0xff] }
  0xce   : > { %v6737_v27 = vadd.f32 %v941_v28, %v6559_v29  ;;  %v6740_v23 = vadd.f32 %v942_v37, %v6566_v63  ;;  %v6743_v56 = vadd.f32 %v943_v48, %v6569_v14  ;;  %v6746_v19 = vadd.f32 %v944_v44, %v6572_v0  ;;  %v12174_v14 = vld [vmem:[#allocation37_spill] sm:$0xff]  ;;  %v4297_v18 = vld [vmem:[%s5406_s17 + $0xe2] sm:$0xff]  ;;  %v4300_v31 = vld [vmem:[%s5406_s17 + $0x10a] sm:$0xff] }
  0xcf   : > { %v6752_v29 = vadd.f32 %v945_v47, %v12170_v25  ;;  %v6755_v63 = vadd.f32 %v946_v6, %v12172_v26  ;;  %v6758_v48 = vadd.f32 %v947_v20, %v12174_v14  ;;  %v6761_v0 = vadd.f32 %v948_v42, %v12176_v41  ;;  %v4296_v44 = vld [vmem:[%s5406_s17 + $0xda] sm:$0xff]  ;;  %v4298_v49 = vld [vmem:[%s5406_s17 + $0xf2] sm:$0xff]  ;;  %v12182_v6 = vld [vmem:[#allocation43_spill] sm:$0xff] }
  0xd0   : > { %12168 = vst [vmem:[#allocation54_spill] sm:$0xff] %v6743_v56  ;;  %12169 = vst [vmem:[#allocation55_spill] sm:$0xff] %v6746_v19  ;;  %v6767_v61 = vadd.f32 %v949_v1, %v12178_v3  ;;  %v12180_v47 = vld [vmem:[#allocation42_spill] sm:$0xff]  ;;  %v6773_v16 = vadd.f32 %v951_v46, %v12182_v6  ;;  %v12184_v20 = vld [vmem:[#allocation48_spill] sm:$0xff] }
  0xd1   : > { %12171 = vst [vmem:[#allocation60_spill] sm:$0xff] %v6752_v29  ;;  %12173 = vst [vmem:[#allocation61_spill] sm:$0xff] %v6755_v63  ;;  %v6770_v5 = vadd.f32 %v950_v55, %v12180_v47  ;;  %v6776_v7 = vadd.f32 %v952_v24, %v12184_v20  ;;  %v4299_v42 = vld [vmem:[%s5406_s17 + $0xfa] sm:$0xff]  ;;  %v4301_v50 = vld [vmem:[%s5406_s17 + $0x112] sm:$0xff] }
  0xd2   : > { %12175 = vst [vmem:[#allocation62_spill] sm:$0xff] %v6758_v48  ;;  %12177 = vst [vmem:[#allocation64_spill] sm:$0xff] %v6761_v0  ;;  %v4302_v28 = vld [vmem:[%s5406_s17 + $0x122] sm:$0xff]  ;;  %v4303_v37 = vld [vmem:[%s5406_s17 + $0x12a] sm:$0xff] }
  0xd3   : > { %12179 = vst [vmem:[#allocation68_spill] sm:$0xff] %v6767_v61  ;;  %12181 = vst [vmem:[#allocation69_spill] sm:$0xff] %v6770_v5  ;;  %v4304_v1 = vld [vmem:[%s5406_s17 + $0x13a] sm:$0xff]  ;;  %v12186_v25 = vld [vmem:[#allocation31_spill] sm:$0xff] }
  0xd4   : > { %12183 = vst [vmem:[#allocation36_spill] sm:$0xff] %v6773_v16  ;;  %12185 = vst [vmem:[#allocation41_spill] sm:$0xff] %v6776_v7  ;;  %v1022_v26 = vmul.f32 %v4286_v4, %v12186_v25  ;;  %v1023_v55 = vmul.f32 %v4287_v15, %v12186_v25  ;;  %v1024_v14 = vmul.f32 %v4288_v62, %v12186_v25  ;;  %v4305_v24 = vld [vmem:[%s5406_s17 + $0x142] sm:$0xff]  ;;  %v4306_v41 = vld [vmem:[%s5406_s17 + $0x152] sm:$0xff] }
  0xd5   : > { %v1025_v46 = vmul.f32 %v4289_v52, %v12186_v25  ;;  %v4307_v3 = vld [vmem:[%s5406_s17 + $0x15a] sm:$0xff]  ;;  %v1026_v47 = vmul.f32 %v4290_v32, %v12186_v25  ;;  %v1027_v6 = vmul.f32 %v4291_v2, %v12186_v25  ;;  %v1028_v20 = vmul.f32 %v4292_v54, %v12186_v25  ;;  %v4308_v15 = vld [vmem:[%s5406_s17 + $0x16a] sm:$0xff]  ;;  %v4309_v62 = vld [vmem:[%s5406_s17 + $0x172] sm:$0xff] }
  0xd6   : > { %v1029_v4 = vmul.f32 %v4293_v10, %v12186_v25  ;;  %v1030_v52 = vmul.f32 %v4294_v12, %v12186_v25  ;;  %v1031_v58 = vmul.f32 %v4295_v30, %v12186_v25  ;;  %v1032_v7 = vmul.f32 %v4296_v44, %v12186_v25  ;;  %v4311_v32 = vld [vmem:[%s5406_s17 + $0x18a] sm:$0xff]  ;;  %v4312_v5 = vld [vmem:[%s5406_s17 + $0x19a] sm:$0xff]  ;;  %v4313_v2 = vld [vmem:[%s5406_s17 + $0x1a2] sm:$0xff] }
  0xd7   : > { %v1033_v16 = vmul.f32 %v4297_v18, %v12186_v25  ;;  %v1034_v54 = vmul.f32 %v4298_v49, %v12186_v25  ;;  %v1035_v61 = vmul.f32 %v4299_v42, %v12186_v25  ;;  %v1036_v10 = vmul.f32 %v4300_v31, %v12186_v25  ;;  %v4316_v48 = vld [vmem:[%s5406_s17 + $0x1ca] sm:$0xff]  ;;  %v4317_v63 = vld [vmem:[%s5406_s17 + $0x1d2] sm:$0xff] }
  0xd8   : > { %v1037_v0 = vmul.f32 %v4301_v50, %v12186_v25  ;;  %v1038_v12 = vmul.f32 %v4302_v28, %v12186_v25  ;;  %v1039_v30 = vmul.f32 %v4303_v37, %v12186_v25  ;;  %v1040_v44 = vmul.f32 %v4304_v1, %v12186_v25  ;;  %v12187_v1 = vld [vmem:[#allocation53_spill] sm:$0xff] }
  0xd9   : > { %v1041_v18 = vmul.f32 %v4305_v24, %v12186_v25  ;;  %v1042_v29 = vmul.f32 %v4306_v41, %v12186_v25  ;;  %v1043_v49 = vmul.f32 %v4307_v3, %v12186_v25  ;;  %v1044_v42 = vmul.f32 %v4308_v15, %v12186_v25  ;;  %v12188_v24 = vld [vmem:[#allocation56_spill] sm:$0xff] }
  0xda   : > { %v1045_v31 = vmul.f32 %v4309_v62, %v12186_v25  ;;  %v1046_v50 = vmul.f32 %v4310_v43, %v12186_v25  ;;  %v1047_v19 = vmul.f32 %v4311_v32, %v12186_v25  ;;  %v1048_v28 = vmul.f32 %v4312_v5, %v12186_v25 }
  0xdb   : > { %v1049_v37 = vmul.f32 %v4313_v2, %v12186_v25  ;;  %v1050_v56 = vmul.f32 %v12187_v1, %v12186_v25  ;;  %v1051_v41 = vmul.f32 %v12188_v24, %v12186_v25  ;;  %v1052_v3 = vmul.f32 %v4316_v48, %v12186_v25  ;;  %v4328_v2 = vld [vmem:[%s5406_s17 + $0xdb] sm:$0xff]  ;;  %v4334_v1 = vld [vmem:[%s5406_s17 + $0x123] sm:$0xff]  ;;  %v4335_v24 = vld [vmem:[%s5406_s17 + $0x12b] sm:$0xff] }
  0xdc   : > { %v1053_v15 = vmul.f32 %v4317_v63, %v12186_v25  ;;  %v6830_v62 = vadd.f32 %v1022_v26, %v6670_v8  ;;  %v6833_v43 = vadd.f32 %v1023_v55, %v6673_v39  ;;  %v6836_v5 = vadd.f32 %v1024_v14, %v6676_v40  ;;  %v4326_v14 = vld [vmem:[%s5406_s17 + $0xc3] sm:$0xff] }
  0xdd   : > { %v6839_v32 = vadd.f32 %v1025_v46, %v6679_v38  ;;  %v6842_v48 = vadd.f32 %v1026_v47, %v6682_v34  ;;  %v6845_v63 = vadd.f32 %v1027_v6, %v6685_v35  ;;  %v6848_v8 = vadd.f32 %v1028_v20, %v6688_v36  ;;  %v4327_v46 = vld [vmem:[%s5406_s17 + $0xcb] sm:$0xff]  ;;  %v12197_v6 = vld [vmem:[#allocation62_spill] sm:$0xff] }
  0xde   : > { %v6851_v39 = vadd.f32 %v1029_v4, %v6691_v22  ;;  %v6854_v40 = vadd.f32 %v1030_v52, %v6694_v60  ;;  %v6857_v38 = vadd.f32 %v1031_v58, %v6697_v45  ;;  %v6860_v34 = vadd.f32 %v1032_v7, %v6700_v21  ;;  %v4318_v45 = vld [vmem:[%s5406_s17 + $0x63] sm:$0xff]  ;;  %v4319_v21 = vld [vmem:[%s5406_s17 + $0x6b] sm:$0xff]  ;;  %v4320_v7 = vld [vmem:[%s5406_s17 + $0x7b] sm:$0xff] }
  0xdf   : > { %v6863_v35 = vadd.f32 %v1033_v16, %v6703_v51  ;;  %v6866_v36 = vadd.f32 %v1034_v54, %v6706_v9  ;;  %v6869_v22 = vadd.f32 %v1035_v61, %v6709_v53  ;;  %v6872_v60 = vadd.f32 %v1036_v10, %v6712_v11  ;;  %v4321_v51 = vld [vmem:[%s5406_s17 + $0x83] sm:$0xff]  ;;  %v4324_v61 = vld [vmem:[%s5406_s17 + $0xab] sm:$0xff]  ;;  %v4330_v10 = vld [vmem:[%s5406_s17 + $0xf3] sm:$0xff] }
  0xe0   : > { %v6875_v58 = vadd.f32 %v1037_v0, %v6715_v33  ;;  %v6882_v16 = vadd.f32 %v1038_v12, %v6722_v17  ;;  %v6885_v9 = vadd.f32 %v1039_v30, %v6725_v13  ;;  %v6888_v53 = vadd.f32 %v1040_v44, %v6728_v57  ;;  %v4322_v33 = vld [vmem:[%s5406_s17 + $0x93] sm:$0xff]  ;;  %v4323_v0 = vld [vmem:[%s5406_s17 + $0x9b] sm:$0xff]  ;;  %v12191_v57 = vld [vmem:[#allocation55_spill] sm:$0xff] }
  0xe1   : > { %v6891_v11 = vadd.f32 %v1041_v18, %v6731_v59  ;;  %v6897_v25 = vadd.f32 %v1042_v29, %v6737_v27  ;;  %v6900_v17 = vadd.f32 %v1043_v49, %v6740_v23  ;;  %v12189_v13 = vld [vmem:[#allocation54_spill] sm:$0xff]  ;;  %v6906_v55 = vadd.f32 %v1045_v31, %v12191_v57  ;;  %v4325_v59 = vld [vmem:[%s5406_s17 + $0xb3] sm:$0xff] }
  0xe2   : > { %v6903_v26 = vadd.f32 %v1044_v42, %v12189_v13  ;;  %v12193_v47 = vld [vmem:[#allocation60_spill] sm:$0xff]  ;;  %v12195_v29 = vld [vmem:[#allocation61_spill] sm:$0xff]  ;;  %v6918_v20 = vadd.f32 %v1048_v28, %v12197_v6  ;;  %v4329_v54 = vld [vmem:[%s5406_s17 + $0xe3] sm:$0xff] }
  0xe3   : > { %12192 = vst [vmem:[#allocation59_spill] sm:$0xff] %v6906_v55  ;;  %v6912_v27 = vadd.f32 %v1046_v50, %v12193_v47  ;;  %v6915_v23 = vadd.f32 %v1047_v19, %v12195_v29  ;;  %v12199_v4 = vld [vmem:[#allocation64_spill] sm:$0xff]  ;;  %v12203_v44 = vld [vmem:[#allocation69_spill] sm:$0xff] }
  0xe4   : > { %12190 = vst [vmem:[#allocation47_spill] sm:$0xff] %v6903_v26  ;;  %12198 = vst [vmem:[#allocation70_spill] sm:$0xff] %v6918_v20  ;;  %v6921_v52 = vadd.f32 %v1049_v37, %v12199_v4  ;;  %v12201_v12 = vld [vmem:[#allocation68_spill] sm:$0xff]  ;;  %v6930_v18 = vadd.f32 %v1051_v41, %v12203_v44  ;;  %v12207_v42 = vld [vmem:[#allocation41_spill] sm:$0xff] }
  0xe5   : > { %12194 = vst [vmem:[#allocation63_spill] sm:$0xff] %v6912_v27  ;;  %12196 = vst [vmem:[#allocation67_spill] sm:$0xff] %v6915_v23  ;;  %v6927_v30 = vadd.f32 %v1050_v56, %v12201_v12  ;;  %v12205_v19 = vld [vmem:[#allocation36_spill] sm:$0xff]  ;;  %v6936_v31 = vadd.f32 %v1053_v15, %v12207_v42  ;;  %v4331_v50 = vld [vmem:[%s5406_s17 + $0xfb] sm:$0xff] }
  0xe6   : > { %12200 = vst [vmem:[#allocation71_spill] sm:$0xff] %v6921_v52  ;;  %12204 = vst [vmem:[#allocation73_spill] sm:$0xff] %v6930_v18  ;;  %v6933_v49 = vadd.f32 %v1052_v3, %v12205_v19  ;;  %v4332_v28 = vld [vmem:[%s5406_s17 + $0x10b] sm:$0xff]  ;;  %v4333_v37 = vld [vmem:[%s5406_s17 + $0x113] sm:$0xff] }
  0xe7   : > { %12202 = vst [vmem:[#allocation72_spill] sm:$0xff] %v6927_v30  ;;  %12208 = vst [vmem:[#allocation75_spill] sm:$0xff] %v6936_v31  ;;  %v4336_v56 = vld [vmem:[%s5406_s17 + $0x13b] sm:$0xff]  ;;  %v12209_v13 = vld [vmem:[#allocation32_spill] sm:$0xff] }
  0xe8   : > { %12206 = vst [vmem:[#allocation74_spill] sm:$0xff] %v6933_v49  ;;  %v1122_v57 = vmul.f32 %v4318_v45, %v12209_v13  ;;  %v1123_v41 = vmul.f32 %v4319_v21, %v12209_v13  ;;  %v1124_v47 = vmul.f32 %v4320_v7, %v12209_v13  ;;  %v1125_v3 = vmul.f32 %v4321_v51, %v12209_v13  ;;  %v4337_v15 = vld [vmem:[%s5406_s17 + $0x143] sm:$0xff]  ;;  %v4338_v29 = vld [vmem:[%s5406_s17 + $0x153] sm:$0xff]  ;;  %v4339_v6 = vld [vmem:[%s5406_s17 + $0x15b] sm:$0xff] }
  0xe9   : > { %v1126_v4 = vmul.f32 %v4322_v33, %v12209_v13  ;;  %v1127_v12 = vmul.f32 %v4323_v0, %v12209_v13  ;;  %v1128_v44 = vmul.f32 %v4324_v61, %v12209_v13  ;;  %v1129_v45 = vmul.f32 %v4325_v59, %v12209_v13  ;;  %v4340_v21 = vld [vmem:[%s5406_s17 + $0x16b] sm:$0xff]  ;;  %v4341_v7 = vld [vmem:[%s5406_s17 + $0x173] sm:$0xff]  ;;  %v4342_v19 = vld [vmem:[%s5406_s17 + $0x183] sm:$0xff] }
  0xea   : > { %v1130_v51 = vmul.f32 %v4326_v14, %v12209_v13  ;;  %v1131_v42 = vmul.f32 %v4327_v46, %v12209_v13  ;;  %v1132_v31 = vmul.f32 %v4328_v2, %v12209_v13  ;;  %v1133_v49 = vmul.f32 %v4329_v54, %v12209_v13  ;;  %v4343_v33 = vld [vmem:[%s5406_s17 + $0x18b] sm:$0xff]  ;;  %v4344_v18 = vld [vmem:[%s5406_s17 + $0x19b] sm:$0xff]  ;;  %v4345_v0 = vld [vmem:[%s5406_s17 + $0x1a3] sm:$0xff] }
  0xeb   : > { %v1134_v61 = vmul.f32 %v4330_v10, %v12209_v13  ;;  %v1135_v30 = vmul.f32 %v4331_v50, %v12209_v13  ;;  %v1136_v59 = vmul.f32 %v4332_v28, %v12209_v13  ;;  %v1137_v52 = vmul.f32 %v4333_v37, %v12209_v13  ;;  %v4348_v20 = vld [vmem:[%s5406_s17 + $0x1cb] sm:$0xff]  ;;  %v4349_v14 = vld [vmem:[%s5406_s17 + $0x1d3] sm:$0xff] }
  0xec   : > { %v1138_v46 = vmul.f32 %v4334_v1, %v12209_v13  ;;  %v1139_v2 = vmul.f32 %v4335_v24, %v12209_v13  ;;  %v1140_v54 = vmul.f32 %v4336_v56, %v12209_v13  ;;  %v1141_v23 = vmul.f32 %v4337_v15, %v12209_v13  ;;  %v5134_v26 = vld [vmem:[%s5406_s17 + $0x1b3] sm:$0xff]  ;;  %v5135_v15 = vld [vmem:[%s5406_s17 + $0x1bb] sm:$0xff] }
  0xed   : > { %v1142_v10 = vmul.f32 %v4338_v29, %v12209_v13  ;;  %v1143_v50 = vmul.f32 %v4339_v6, %v12209_v13  ;;  %v1144_v28 = vmul.f32 %v4340_v21, %v12209_v13  ;;  %v1145_v27 = vmul.f32 %v4341_v7, %v12209_v13 }
  0xee   : > { %v1146_v37 = vmul.f32 %v4342_v19, %v12209_v13  ;;  %v1147_v55 = vmul.f32 %v4343_v33, %v12209_v13  ;;  %v1148_v1 = vmul.f32 %v4344_v18, %v12209_v13  ;;  %v1149_v24 = vmul.f32 %v4345_v0, %v12209_v13  ;;  %v4360_v33 = vld [vmem:[%s5406_s17 + $0xdc] sm:$0xff]  ;;  %v4361_v0 = vld [vmem:[%s5406_s17 + $0xe4] sm:$0xff] }
  0xef   : > { %v1150_v56 = vmul.f32 %v5134_v26, %v12209_v13  ;;  %v1151_v29 = vmul.f32 %v5135_v15, %v12209_v13  ;;  %v1152_v6 = vmul.f32 %v4348_v20, %v12209_v13  ;;  %v1153_v21 = vmul.f32 %v4349_v14, %v12209_v13  ;;  %v4367_v15 = vld [vmem:[%s5406_s17 + $0x12c] sm:$0xff] }
  0xf0   : > { %v6990_v7 = vadd.f32 %v1122_v57, %v6830_v62  ;;  %v6993_v19 = vadd.f32 %v1123_v41, %v6833_v43  ;;  %v6996_v18 = vadd.f32 %v1124_v47, %v6836_v5  ;;  %v6999_v26 = vadd.f32 %v1125_v3, %v6839_v32  ;;  %v4350_v57 = vld [vmem:[%s5406_s17 + $0x64] sm:$0xff] }
  0xf1   : > { %v7002_v20 = vadd.f32 %v1126_v4, %v6842_v48  ;;  %v7005_v13 = vadd.f32 %v1127_v12, %v6845_v63  ;;  %v7008_v62 = vadd.f32 %v1128_v44, %v6848_v8  ;;  %v7011_v43 = vadd.f32 %v1129_v45, %v6851_v39  ;;  %v4359_v4 = vld [vmem:[%s5406_s17 + $0xcc] sm:$0xff]  ;;  %v12219_v45 = vld [vmem:[#allocation70_spill] sm:$0xff] }
  0xf2   : > { %v7014_v5 = vadd.f32 %v1130_v51, %v6854_v40  ;;  %v7017_v32 = vadd.f32 %v1131_v42, %v6857_v38  ;;  %v7020_v48 = vadd.f32 %v1132_v31, %v6860_v34  ;;  %v7023_v63 = vadd.f32 %v1133_v49, %v6863_v35  ;;  %v4351_v34 = vld [vmem:[%s5406_s17 + $0x6c] sm:$0xff]  ;;  %v4352_v31 = vld [vmem:[%s5406_s17 + $0x7c] sm:$0xff]  ;;  %v4353_v35 = vld [vmem:[%s5406_s17 + $0x84] sm:$0xff] }
  0xf3   : > { %v7026_v8 = vadd.f32 %v1134_v61, %v6866_v36  ;;  %v7029_v39 = vadd.f32 %v1135_v30, %v6869_v22  ;;  %v7032_v40 = vadd.f32 %v1136_v59, %v6872_v60  ;;  %v7035_v38 = vadd.f32 %v1137_v52, %v6875_v58  ;;  %v4354_v58 = vld [vmem:[%s5406_s17 + $0x94] sm:$0xff]  ;;  %v4355_v52 = vld [vmem:[%s5406_s17 + $0x9c] sm:$0xff]  ;;  %v4356_v30 = vld [vmem:[%s5406_s17 + $0xac] sm:$0xff] }
  0xf4   : > { %v7042_v49 = vadd.f32 %v1138_v46, %v6882_v16  ;;  %v7045_v36 = vadd.f32 %v1139_v2, %v6885_v9  ;;  %v7048_v22 = vadd.f32 %v1140_v54, %v6888_v53  ;;  %v7051_v60 = vadd.f32 %v1141_v23, %v6891_v11  ;;  %v12211_v9 = vld [vmem:[#allocation47_spill] sm:$0xff]  ;;  %v4357_v11 = vld [vmem:[%s5406_s17 + $0xb4] sm:$0xff] }
  0xf5   : > { %v7057_v41 = vadd.f32 %v1142_v10, %v6897_v25  ;;  %v7060_v16 = vadd.f32 %v1143_v50, %v6900_v17  ;;  %v7063_v47 = vadd.f32 %v1144_v28, %v12211_v9  ;;  %v12213_v53 = vld [vmem:[#allocation59_spill] sm:$0xff]  ;;  %v7078_v51 = vadd.f32 %v1148_v1, %v12219_v45  ;;  %v4362_v61 = vld [vmem:[%s5406_s17 + $0xf4] sm:$0xff]  ;;  %v4363_v28 = vld [vmem:[%s5406_s17 + $0xfc] sm:$0xff] }
  0xf6   : > { %v7066_v3 = vadd.f32 %v1145_v27, %v12213_v53  ;;  %v4358_v23 = vld [vmem:[%s5406_s17 + $0xc4] sm:$0xff]  ;;  %v12223_v59 = vld [vmem:[#allocation72_spill] sm:$0xff]  ;;  %v12225_v46 = vld [vmem:[#allocation73_spill] sm:$0xff] }
  0xf7   : > { %12210 = vst [vmem:[#allocation28_spill] sm:$0xff] %v7060_v16  ;;  %12212 = vst [vmem:[#allocation2_spill] sm:$0xff] %v7063_v47  ;;  %v12215_v12 = vld [vmem:[#allocation63_spill] sm:$0xff]  ;;  %v7087_v14 = vadd.f32 %v1150_v56, %v12223_v59  ;;  %v7090_v2 = vadd.f32 %v1151_v29, %v12225_v46  ;;  %v4365_v1 = vld [vmem:[%s5406_s17 + $0x114] sm:$0xff] }
  0xf8   : > { %12214 = vst [vmem:[#allocation3_spill] sm:$0xff] %v7066_v3  ;;  %v7072_v25 = vadd.f32 %v1146_v37, %v12215_v12  ;;  %v12217_v44 = vld [vmem:[#allocation67_spill] sm:$0xff]  ;;  %12220 = vst [vmem:[#allocation6_spill] sm:$0xff] %v7078_v51  ;;  %v4368_v56 = vld [vmem:[%s5406_s17 + $0x13c] sm:$0xff] }
  0xf9   : > { %v7075_v17 = vadd.f32 %v1147_v55, %v12217_v44  ;;  %v12221_v42 = vld [vmem:[#allocation71_spill] sm:$0xff]  ;;  %12224 = vst [vmem:[#allocation8_spill] sm:$0xff] %v7087_v14  ;;  %12226 = vst [vmem:[#allocation9_spill] sm:$0xff] %v7090_v2  ;;  %v12227_v55 = vld [vmem:[#allocation74_spill] sm:$0xff] }
  0xfa   : > { %12216 = vst [vmem:[#allocation4_spill] sm:$0xff] %v7072_v25  ;;  %v7081_v27 = vadd.f32 %v1149_v24, %v12221_v42  ;;  %v7093_v54 = vadd.f32 %v1152_v6, %v12227_v55  ;;  %v12229_v10 = vld [vmem:[#allocation75_spill] sm:$0xff]  ;;  %v12231_v9 = vld [vmem:[#allocation33_spill] sm:$0xff] }
  0xfb   : > { %12218 = vst [vmem:[#allocation5_spill] sm:$0xff] %v7075_v17  ;;  %v7096_v50 = vadd.f32 %v1153_v21, %v12229_v10  ;;  %v4364_v37 = vld [vmem:[%s5406_s17 + $0x10c] sm:$0xff]  ;;  %v4366_v24 = vld [vmem:[%s5406_s17 + $0x124] sm:$0xff]  ;;  %v1222_v53 = vmul.f32 %v4350_v57, %v12231_v9  ;;  %v1223_v29 = vmul.f32 %v4351_v34, %v12231_v9  ;;  %v1224_v12 = vmul.f32 %v4352_v31, %v12231_v9  ;;  %v4370_v44 = vld [vmem:[%s5406_s17 + $0x154] sm:$0xff] }
  0xfc   : > { %12222 = vst [vmem:[#allocation7_spill] sm:$0xff] %v7081_v27  ;;  %12228 = vst [vmem:[#allocation10_spill] sm:$0xff] %v7093_v54  ;;  %v1225_v6 = vmul.f32 %v4353_v35, %v12231_v9  ;;  %v4369_v21 = vld [vmem:[%s5406_s17 + $0x144] sm:$0xff]  ;;  %v4371_v45 = vld [vmem:[%s5406_s17 + $0x15c] sm:$0xff]  ;;  %v1226_v42 = vmul.f32 %v4354_v58, %v12231_v9  ;;  %v1227_v59 = vmul.f32 %v4355_v52, %v12231_v9 }
  0xfd   : > { %12230 = vst [vmem:[#allocation11_spill] sm:$0xff] %v7096_v50  ;;  %v1228_v46 = vmul.f32 %v4356_v30, %v12231_v9  ;;  %v1229_v57 = vmul.f32 %v4357_v11, %v12231_v9  ;;  %v4372_v34 = vld [vmem:[%s5406_s17 + $0x16c] sm:$0xff]  ;;  %v4373_v31 = vld [vmem:[%s5406_s17 + $0x174] sm:$0xff]  ;;  %v4374_v55 = vld [vmem:[%s5406_s17 + $0x184] sm:$0xff]  ;;  %v1230_v35 = vmul.f32 %v4358_v23, %v12231_v9  ;;  %v1231_v10 = vmul.f32 %v4359_v4, %v12231_v9 }
  0xfe   : > { %v1232_v50 = vmul.f32 %v4360_v33, %v12231_v9  ;;  %v1233_v54 = vmul.f32 %v4361_v0, %v12231_v9  ;;  %v4375_v58 = vld [vmem:[%s5406_s17 + $0x18c] sm:$0xff]  ;;  %v4376_v2 = vld [vmem:[%s5406_s17 + $0x19c] sm:$0xff]  ;;  %v4377_v52 = vld [vmem:[%s5406_s17 + $0x1a4] sm:$0xff]  ;;  %v1234_v30 = vmul.f32 %v4362_v61, %v12231_v9  ;;  %v1235_v14 = vmul.f32 %v4363_v28, %v12231_v9 }
  0xff   : > { %v1236_v11 = vmul.f32 %v4364_v37, %v12231_v9  ;;  %v1237_v27 = vmul.f32 %v4365_v1, %v12231_v9  ;;  %v4380_v51 = vld [vmem:[%s5406_s17 + $0x1cc] sm:$0xff]  ;;  %v4381_v17 = vld [vmem:[%s5406_s17 + $0x1d4] sm:$0xff]  ;;  %v1238_v23 = vmul.f32 %v4366_v24, %v12231_v9  ;;  %v1239_v4 = vmul.f32 %v4367_v15, %v12231_v9 }
 0x100   : > { %v1240_v33 = vmul.f32 %v4368_v56, %v12231_v9  ;;  %v1241_v0 = vmul.f32 %v4369_v21, %v12231_v9  ;;  %v1242_v25 = vmul.f32 %v4370_v44, %v12231_v9  ;;  %v1243_v61 = vmul.f32 %v4371_v45, %v12231_v9  ;;  %v12232_v56 = vld [vmem:[#allocation49_spill] sm:$0xff]  ;;  %v12233_v21 = vld [vmem:[#allocation50_spill] sm:$0xff] }
 0x101   : > { %v1244_v28 = vmul.f32 %v4372_v34, %v12231_v9  ;;  %v1245_v37 = vmul.f32 %v4373_v31, %v12231_v9  ;;  %v1246_v1 = vmul.f32 %v4374_v55, %v12231_v9  ;;  %v1247_v3 = vmul.f32 %v4375_v58, %v12231_v9 }
 0x102   : > { %v1248_v24 = vmul.f32 %v4376_v2, %v12231_v9  ;;  %v1249_v15 = vmul.f32 %v4377_v52, %v12231_v9  ;;  %v1250_v47 = vmul.f32 %v12232_v56, %v12231_v9  ;;  %v1251_v44 = vmul.f32 %v12233_v21, %v12231_v9 }
 0x103   : > { %v1252_v45 = vmul.f32 %v4380_v51, %v12231_v9  ;;  %v1253_v34 = vmul.f32 %v4381_v17, %v12231_v9  ;;  %v1254_v31 = vadd.f32 %v1222_v53, %v6990_v7  ;;  %v1255_v55 = vadd.f32 %v1223_v29, %v6993_v19  ;;  %v7160_v17 = vld [vmem:[%s11488_s4] sm:$0x7] }
 0x104   : > { %v1256_v58 = vadd.f32 %v1224_v12, %v6996_v18  ;;  %v1257_v2 = vadd.f32 %v1225_v6, %v6999_v26  ;;  %v1258_v52 = vadd.f32 %v1226_v42, %v7002_v20  ;;  %v1259_v16 = vadd.f32 %v1227_v59, %v7005_v13  ;;  %12234 = vst [vmem:[#allocation12_spill] sm:$0xff] %v7160_v17  ;;  %v12242_v29 = vld [vmem:[#allocation6_spill] sm:$0xff]  ;;  %v12244_v6 = vld [vmem:[#allocation8_spill] sm:$0xff]  ;;  %v12245_v59 = vld [vmem:[#allocation9_spill] sm:$0xff] }
 0x105   : > { %v1260_v56 = vadd.f32 %v1228_v46, %v7008_v62  ;;  %v1261_v21 = vadd.f32 %v1229_v57, %v7011_v43  ;;  %v1262_v7 = vadd.f32 %v1230_v35, %v7014_v5  ;;  %v1263_v19 = vadd.f32 %v1231_v10, %v7017_v32  ;;  %v12246_v57 = vld [vmem:[#allocation10_spill] sm:$0xff]  ;;  %v12247_v10 = vld [vmem:[#allocation11_spill] sm:$0xff] }
 0x106   : > { %v1264_v18 = vadd.f32 %v1232_v50, %v7020_v48  ;;  %v1265_v26 = vadd.f32 %v1233_v54, %v7023_v63  ;;  %v1266_v20 = vadd.f32 %v1234_v30, %v7026_v8  ;;  %v1267_v13 = vadd.f32 %v1235_v14, %v7029_v39  ;;  %v376_v48 = vld [vmem:[%s11487_s3 + $0xc] sm:$0x7]  ;;  %v12235_v8 = vld [vmem:[#allocation28_spill] sm:$0xff]  ;;  %v12236_v14 = vld [vmem:[#allocation2_spill] sm:$0xff] }
 0x107   : > { %v1268_v62 = vadd.f32 %v1236_v11, %v7032_v40  ;;  %v1269_v43 = vadd.f32 %v1237_v27, %v7035_v38  ;;  %v1270_v51 = vadd.f32 %v1238_v23, %v7042_v49  ;;  %v1271_v9 = vadd.f32 %v1239_v4, %v7045_v36  ;;  %v12237_v54 = vld [vmem:[#allocation24_spill] sm:$0xff]  ;;  %v12239_v36 = vld [vmem:[#allocation3_spill] sm:$0xff]  ;;  %v12241_v50 = vld [vmem:[#allocation5_spill] sm:$0xff] }
 0x108   : > { %v1272_v5 = vadd.f32 %v1240_v33, %v7048_v22  ;;  %v1273_v32 = vadd.f32 %v1241_v0, %v7051_v60  ;;  %v1274_v63 = vadd.f32 %v1242_v25, %v7057_v41  ;;  %v1275_v39 = vadd.f32 %v1243_v61, %v12235_v8  ;;  %v7185_v49 = vld [vmem:[%s11487_s3 + $0x10] sm:$0x7]  ;;  %v12243_v25 = vld [vmem:[#allocation7_spill] sm:$0xff]  ;;  %v12248_v23 = vld [vmem:[#allocation25_spill] sm:$0xff] }
 0x109   : > { %v1276_v40 = vadd.f32 %v1244_v28, %v12236_v14  ;;  %v1289_v38 = vrot.slane %v7160_v17, %v12237_v54  ;;  %12238 = vst [vmem:[#allocation13_spill] sm:$0xff] %v7185_v49  ;;  %v1277_v22 = vadd.f32 %v1245_v37, %v12239_v36  ;;  %v12240_v60 = vld [vmem:[#allocation4_spill] sm:$0xff]  ;;  %v1279_v53 = vadd.f32 %v1247_v3, %v12241_v50  ;;  %v12249_v33 = vld [vmem:[#allocation26_spill] sm:$0xff] }
 0x10a   : > { %v1278_v27 = vadd.f32 %v1246_v1, %v12240_v60  ;;  %v1280_v41 = vadd.f32 %v1248_v24, %v12242_v29  ;;  %v1281_v12 = vadd.f32 %v1249_v15, %v12243_v25  ;;  %v1282_v42 = vadd.f32 %v1250_v47, %v12244_v6  ;;  %v4382_v29 = vld [vmem:[%s5411_s20 + $0x19] sm:$0xff]  ;;  %v7303_v6 = vld [vmem:[%s5411_s20 + $0x61] sm:$0xff]  ;;  %v7325_v60 = vld [vmem:[%s5411_s20 + $0xa9] sm:$0xff] }
 0x10b   : > { %v1283_v46 = vadd.f32 %v1251_v44, %v12245_v59  ;;  %v1284_v35 = vadd.f32 %v1252_v45, %v12246_v57  ;;  %v1285_v30 = vadd.f32 %v1253_v34, %v12247_v10  ;;  %v7197_v11 = vrot.slane %v376_v48, %v12237_v54  ;;  %v4384_v59 = vld [vmem:[%s5411_s20 + $0x31] sm:$0xff]  ;;  %v7293_v57 = vld [vmem:[%s5411_s20 + $0x49] sm:$0xff]  ;;  %12286 = vst [vmem:[#allocation90_spill] sm:$0xff] %v7303_v6  ;;  %v7335_v36 = vld [vmem:[%s5411_s20 + $0xc1] sm:$0xff] }
 0x10c   : > { %v7200_v4 = vrot.slane %v376_v48, %v12248_v23  ;;  %v7203_v3 = vrot.slane %v376_v48, %v12249_v33  ;;  %v7205_v0 = vadd.f32 %v1289_v38, %v1254_v31  ;;  %v7207_v61 = vadd.f32 %v1289_v38, %v1255_v55  ;;  %12284 = vst [vmem:[#allocation88_spill] sm:$0xff] %v7293_v57  ;;  %v7344_v50 = vld [vmem:[%s5411_s20 + $0xd9] sm:$0xff]  ;;  %v7347_v10 = vld [vmem:[%s5411_s20 + $0xe1] sm:$0xff]  ;;  %v7353_v8 = vld [vmem:[%s5411_s20 + $0xf1] sm:$0xff] }
 0x10d   : > { %v7209_v47 = vadd.f32 %v1289_v38, %v1256_v58  ;;  %v7213_v28 = vrot.slane %v7185_v49, %v12237_v54  ;;  %v7215_v37 = vadd.f32 %v1289_v38, %v1257_v2  ;;  %v7217_v1 = vadd.f32 %v1289_v38, %v1258_v52  ;;  %12292 = vst [vmem:[#allocation95_spill] sm:$0xff] %v7325_v60  ;;  %v4415_v54 = vld [vmem:[%s5411_s20 + $0x23] sm:$0xff]  ;;  %v4416_v33 = vld [vmem:[%s5411_s20 + $0x33] sm:$0xff]  ;;  %v4417_v49 = vld [vmem:[%s5411_s20 + $0x3b] sm:$0xff] }
 0x10e   : > { %12250 = vst [vmem:[#allocation14_spill] sm:$0xff] %v7203_v3  ;;  %12251 = vst [vmem:[#allocation15_spill] sm:$0xff] %v7205_v0  ;;  %v7219_v24 = vadd.f32 %v1289_v38, %v1259_v16  ;;  %v7221_v15 = vadd.f32 %v1289_v38, %v1260_v56  ;;  %v7223_v44 = vadd.f32 %v1289_v38, %v1261_v21  ;;  %v7634_v3 = vld [vmem:[%s5411_s20 + $0x153] sm:$0xff] }
 0x10f   : > { %12252 = vst [vmem:[#allocation16_spill] sm:$0xff] %v7207_v61  ;;  %12253 = vst [vmem:[#allocation17_spill] sm:$0xff] %v7209_v47  ;;  %v7225_v45 = vadd.f32 %v1289_v38, %v1262_v7  ;;  %v7227_v34 = vadd.f32 %v1289_v38, %v1263_v19  ;;  %v7229_v31 = vadd.f32 %v1289_v38, %v1264_v18 }
 0x110   : > { %12254 = vst [vmem:[#allocation18_spill] sm:$0xff] %v7213_v28  ;;  %12255 = vst [vmem:[#allocation19_spill] sm:$0xff] %v7215_v37  ;;  %v7231_v55 = vadd.f32 %v1289_v38, %v1265_v26  ;;  %v7233_v58 = vadd.f32 %v1289_v38, %v1266_v20  ;;  %v7235_v2 = vadd.f32 %v1289_v38, %v1267_v13  ;;  %v4414_v37 = vld [vmem:[%s5411_s20 + $0x1b] sm:$0xff]  ;;  %v7629_v28 = vld [vmem:[%s5411_s20 + $0x143] sm:$0xff] }
 0x111   : > { %12256 = vst [vmem:[#allocation20_spill] sm:$0xff] %v7217_v1  ;;  %12257 = vst [vmem:[#allocation21_spill] sm:$0xff] %v7219_v24  ;;  %v7237_v52 = vadd.f32 %v1289_v38, %v1268_v62  ;;  %v7239_v16 = vadd.f32 %v1289_v38, %v1269_v43  ;;  %v7241_v56 = vadd.f32 %v1289_v38, %v1270_v51 }
 0x112   : > { %12258 = vst [vmem:[#allocation22_spill] sm:$0xff] %v7221_v15  ;;  %12259 = vst [vmem:[#allocation23_spill] sm:$0xff] %v7223_v44  ;;  %v7243_v21 = vadd.f32 %v1289_v38, %v1271_v9  ;;  %v7245_v7 = vadd.f32 %v1289_v38, %v1272_v5  ;;  %v7247_v19 = vadd.f32 %v1289_v38, %v1273_v32 }
 0x113   : > { %12260 = vst [vmem:[#allocation57_spill] sm:$0xff] %v7225_v45  ;;  %12261 = vst [vmem:[#allocation76_spill] sm:$0xff] %v7227_v34  ;;  %v7249_v18 = vadd.f32 %v1289_v38, %v1274_v63  ;;  %v7251_v26 = vadd.f32 %v1289_v38, %v1275_v39  ;;  %v7253_v20 = vadd.f32 %v1289_v38, %v1276_v40  ;;  %v7356_v40 = vld [vmem:[%s5411_s20 + $0xf9] sm:$0xff]  ;;  %v7450_v34 = vld [vmem:[%s5411_s20 + $0x181] sm:$0xff] }
 0x114   : > { %12262 = vst [vmem:[#allocation77_spill] sm:$0xff] %v7229_v31  ;;  %12263 = vst [vmem:[#allocation78_spill] sm:$0xff] %v7231_v55  ;;  %v7255_v13 = vadd.f32 %v1289_v38, %v1277_v22  ;;  %v7257_v62 = vadd.f32 %v1289_v38, %v1278_v27  ;;  %v7259_v43 = vadd.f32 %v1289_v38, %v1279_v53  ;;  %v7309_v53 = vld [vmem:[%s5411_s20 + $0x79] sm:$0xff]  ;;  %v7319_v27 = vld [vmem:[%s5411_s20 + $0x91] sm:$0xff] }
 0x115   : > { %12264 = vst [vmem:[#allocation79_spill] sm:$0xff] %v7233_v58  ;;  %12265 = vst [vmem:[#allocation83_spill] sm:$0xff] %v7235_v2  ;;  %v7261_v51 = vadd.f32 %v1289_v38, %v1280_v41  ;;  %v7263_v9 = vadd.f32 %v1289_v38, %v1281_v12  ;;  %v7265_v5 = vadd.f32 %v1289_v38, %v1282_v42  ;;  %v4383_v42 = vld [vmem:[%s5411_s20 + $0x21] sm:$0xff]  ;;  %v7300_v12 = vld [vmem:[%s5411_s20 + $0x51] sm:$0xff] }
 0x116   : > { %12266 = vst [vmem:[#allocation84_spill] sm:$0xff] %v7237_v52  ;;  %12267 = vst [vmem:[#allocation85_spill] sm:$0xff] %v7239_v16  ;;  %v7267_v32 = vadd.f32 %v1289_v38, %v1283_v46  ;;  %v7269_v48 = vadd.f32 %v1289_v38, %v1284_v35  ;;  %v7271_v63 = vadd.f32 %v1289_v38, %v1285_v30  ;;  %v4385_v46 = vld [vmem:[%s5411_s20 + $0x39] sm:$0xff]  ;;  %v7306_v41 = vld [vmem:[%s5411_s20 + $0x69] sm:$0xff] }
 0x117   : > { %12268 = vst [vmem:[#allocation86_spill] sm:$0xff] %v7241_v56  ;;  %12269 = vst [vmem:[#allocation27_spill] sm:$0xff] %v7243_v21  ;;  %v7316_v30 = vld [vmem:[%s5411_s20 + $0x81] sm:$0xff]  ;;  %v7322_v38 = vld [vmem:[%s5411_s20 + $0x99] sm:$0xff]  ;;  %v7350_v25 = vmul.f32 %v4382_v29, %v7197_v11  ;;  %v7362_v39 = vmul.f32 %v4383_v42, %v7197_v11  ;;  %v7365_v14 = vmul.f32 %v4384_v59, %v7197_v11 }
 0x118   : > { %12270 = vst [vmem:[#allocation30_spill] sm:$0xff] %v7245_v7  ;;  %12271 = vst [vmem:[#allocation40_spill] sm:$0xff] %v7247_v19  ;;  %v7332_v22 = vld [vmem:[%s5411_s20 + $0xb1] sm:$0xff]  ;;  %v7341_v35 = vld [vmem:[%s5411_s20 + $0xc9] sm:$0xff]  ;;  %v7372_v29 = vmul.f32 %v7293_v57, %v7197_v11  ;;  %v7385_v42 = vmul.f32 %v7300_v12, %v7197_v11  ;;  %v7389_v59 = vmul.f32 %v7303_v6, %v7197_v11 }
 0x119   : > { %12272 = vst [vmem:[#allocation44_spill] sm:$0xff] %v7249_v18  ;;  %12273 = vst [vmem:[#allocation45_spill] sm:$0xff] %v7251_v26  ;;  %v7406_v26 = vld [vmem:[%s5411_s20 + $0x151] sm:$0xff]  ;;  %v7410_v18 = vmul.f32 %v7316_v30, %v7197_v11  ;;  %v7414_v19 = vmul.f32 %v7319_v27, %v7197_v11  ;;  %v7418_v7 = vmul.f32 %v7322_v38, %v7197_v11  ;;  %v7425_v56 = vld [vmem:[%s5411_s20 + $0x159] sm:$0xff] }
 0x11a   : > { %12274 = vst [vmem:[#allocation46_spill] sm:$0xff] %v7253_v20  ;;  %12275 = vst [vmem:[#allocation51_spill] sm:$0xff] %v7255_v13  ;;  %v7400_v13 = vld [vmem:[%s5411_s20 + $0x139] sm:$0xff]  ;;  %v7403_v20 = vld [vmem:[%s5411_s20 + $0x141] sm:$0xff]  ;;  %v7422_v21 = vmul.f32 %v7325_v60, %v7197_v11  ;;  %v7435_v2 = vmul.f32 %v7332_v22, %v7197_v11  ;;  %v7439_v58 = vmul.f32 %v7335_v36, %v7197_v11 }
 0x11b   : > { %12276 = vst [vmem:[#allocation52_spill] sm:$0xff] %v7257_v62  ;;  %12277 = vst [vmem:[#allocation58_spill] sm:$0xff] %v7259_v43  ;;  %v7381_v43 = vld [vmem:[%s5411_s20 + $0x129] sm:$0xff]  ;;  %v7397_v62 = vmul.f32 %v7309_v53, %v7197_v11  ;;  %v7431_v52 = vld [vmem:[%s5411_s20 + $0x171] sm:$0xff]  ;;  %v7443_v55 = vmul.f32 %v7341_v35, %v7197_v11  ;;  %v7447_v31 = vmul.f32 %v7344_v50, %v7197_v11 }
 0x11c   : > { %12278 = vst [vmem:[#allocation65_spill] sm:$0xff] %v7261_v51  ;;  %12279 = vst [vmem:[#allocation66_spill] sm:$0xff] %v7263_v9  ;;  %v7359_v9 = vld [vmem:[%s5411_s20 + $0x109] sm:$0xff]  ;;  %v7378_v51 = vld [vmem:[%s5411_s20 + $0x121] sm:$0xff]  ;;  %v7457_v44 = vmul.f32 %v7347_v10, %v7197_v11  ;;  %v7461_v15 = vmul.f32 %v7353_v8, %v7197_v11  ;;  %v7465_v24 = vmul.f32 %v7356_v40, %v7197_v11 }
 0x11d   : > { %12280 = vst [vmem:[#allocation80_spill] sm:$0xff] %v7265_v5  ;;  %12281 = vst [vmem:[#allocation81_spill] sm:$0xff] %v7267_v32  ;;  %v7368_v32 = vmul.f32 %v4385_v46, %v7197_v11  ;;  %v7375_v5 = vld [vmem:[%s5411_s20 + $0x111] sm:$0xff]  ;;  %v7393_v46 = vmul.f32 %v7306_v41, %v7197_v11  ;;  %v7428_v16 = vld [vmem:[%s5411_s20 + $0x169] sm:$0xff]  ;;  %v7469_v1 = vmul.f32 %v7359_v9, %v7197_v11 }
 0x11e   : > { %12282 = vst [vmem:[#allocation82_spill] sm:$0xff] %v7269_v48  ;;  %12283 = vst [vmem:[#allocation87_spill] sm:$0xff] %v7271_v63  ;;  %v7453_v45 = vld [vmem:[%s5411_s20 + $0x189] sm:$0xff]  ;;  %v7474_v47 = vmul.f32 %v7375_v5, %v7197_v11  ;;  %v7478_v61 = vmul.f32 %v7378_v51, %v7197_v11  ;;  %v7482_v0 = vmul.f32 %v7381_v43, %v7197_v11  ;;  %v7584_v60 = vld [vmem:[%s5411_s20 + $0xdb] sm:$0xff] }
 0x11f   : > { %12285 = vst [vmem:[#allocation89_spill] sm:$0xff] %v7300_v12  ;;  %12287 = vst [vmem:[#allocation91_spill] sm:$0xff] %v7306_v41  ;;  %v7486_v17 = vmul.f32 %v7400_v13, %v7197_v11  ;;  %v7493_v23 = vmul.f32 %v7403_v20, %v7197_v11  ;;  %v7497_v63 = vmul.f32 %v7406_v26, %v7197_v11  ;;  %v7609_v41 = vld [vmem:[%s5411_s20 + $0x113] sm:$0xff]  ;;  %v7614_v6 = vld [vmem:[%s5411_s20 + $0x123] sm:$0xff] }
 0x120   : > { %12288 = vst [vmem:[#allocation92_spill] sm:$0xff] %v7309_v53  ;;  %12289 = vst [vmem:[#allocation29_spill] sm:$0xff] %v7316_v30  ;;  %v7509_v48 = vmul.f32 %v7431_v52, %v7197_v11  ;;  %v7599_v30 = vld [vmem:[%s5411_s20 + $0xfb] sm:$0xff]  ;;  %v7604_v53 = vld [vmem:[%s5411_s20 + $0x10b] sm:$0xff] }
 0x121   : > { %12290 = vst [vmem:[#allocation93_spill] sm:$0xff] %v7319_v27  ;;  %12291 = vst [vmem:[#allocation94_spill] sm:$0xff] %v7322_v38  ;;  %v7589_v38 = vld [vmem:[%s5411_s20 + $0xe3] sm:$0xff]  ;;  %v7594_v27 = vld [vmem:[%s5411_s20 + $0xf3] sm:$0xff] }
 0x122   : > { %12293 = vst [vmem:[#allocation96_spill] sm:$0xff] %v7332_v22  ;;  %12294 = vst [vmem:[#allocation97_spill] sm:$0xff] %v7335_v36  ;;  %v7574_v36 = vld [vmem:[%s5411_s20 + $0xc3] sm:$0xff]  ;;  %v7579_v22 = vld [vmem:[%s5411_s20 + $0xcb] sm:$0xff] }
 0x123   : > { %12295 = vst [vmem:[#allocation98_spill] sm:$0xff] %v7341_v35  ;;  %12296 = vst [vmem:[#allocation99_spill] sm:$0xff] %v7344_v50  ;;  %v7564_v50 = vld [vmem:[%s5411_s20 + $0xab] sm:$0xff]  ;;  %v7569_v35 = vld [vmem:[%s5411_s20 + $0xb3] sm:$0xff] }
 0x124   : > { %12297 = vst [vmem:[#allocation100_spill] sm:$0xff] %v7347_v10  ;;  %12298 = vst [vmem:[#allocation101_spill] sm:$0xff] %v7353_v8  ;;  %v7554_v8 = vld [vmem:[%s5411_s20 + $0x93] sm:$0xff]  ;;  %v7559_v10 = vld [vmem:[%s5411_s20 + $0x9b] sm:$0xff] }
 0x125   : > { %12299 = vst [vmem:[#allocation102_spill] sm:$0xff] %v7356_v40  ;;  %12300 = vst [vmem:[#allocation103_spill] sm:$0xff] %v7359_v9  ;;  %v7529_v9 = vld [vmem:[%s5411_s20 + $0x53] sm:$0xff]  ;;  %v7549_v40 = vld [vmem:[%s5411_s20 + $0x83] sm:$0xff] }
 0x126   : > { %12301 = vst [vmem:[#allocation34_spill] sm:$0xff] %v7375_v5  ;;  %12302 = vst [vmem:[#allocation35_spill] sm:$0xff] %v7378_v51  ;;  %v1493_v51 = vmul.f32 %v4416_v33, %v7200_v4  ;;  %v7524_v5 = vld [vmem:[%s5411_s20 + $0x4b] sm:$0xff]  ;;  %v7624_v57 = vld [vmem:[%s5411_s20 + $0x13b] sm:$0xff] }
 0x127   : > { %12303 = vst [vmem:[#allocation37_spill] sm:$0xff] %v7381_v43  ;;  %12304 = vst [vmem:[#allocation38_spill] sm:$0xff] %v7400_v13  ;;  %v7501_v43 = vmul.f32 %v7425_v56, %v7197_v11  ;;  %v7505_v13 = vmul.f32 %v7428_v16, %v7197_v11  ;;  %v7539_v33 = vld [vmem:[%s5411_s20 + $0x6b] sm:$0xff] }
 0x128   : > { %12305 = vst [vmem:[#allocation39_spill] sm:$0xff] %v7403_v20  ;;  %12306 = vst [vmem:[#allocation42_spill] sm:$0xff] %v7406_v26  ;;  %v7513_v20 = vmul.f32 %v7450_v34, %v7197_v11  ;;  %v7517_v26 = vmul.f32 %v7453_v45, %v7197_v11  ;;  %v1496_v11 = vmul.f32 %v7529_v9, %v7200_v4  ;;  %v7619_v12 = vld [vmem:[%s5411_s20 + $0x12b] sm:$0xff] }
 0x129   : > { %12307 = vst [vmem:[#allocation43_spill] sm:$0xff] %v7425_v56  ;;  %12308 = vst [vmem:[#allocation48_spill] sm:$0xff] %v7428_v16  ;;  %v1491_v56 = vmul.f32 %v4414_v37, %v7200_v4  ;;  %v1492_v16 = vmul.f32 %v4415_v54, %v7200_v4  ;;  %v7534_v37 = vld [vmem:[%s5411_s20 + $0x63] sm:$0xff] }
 0x12a   : > { %12309 = vst [vmem:[#allocation31_spill] sm:$0xff] %v7431_v52  ;;  %12310 = vst [vmem:[#allocation53_spill] sm:$0xff] %v7450_v34  ;;  %v1494_v52 = vmul.f32 %v4417_v49, %v7200_v4  ;;  %v1495_v34 = vmul.f32 %v7524_v5, %v7200_v4  ;;  %v1497_v54 = vmul.f32 %v7534_v37, %v7200_v4 }
 0x12b   : > { %12311 = vst [vmem:[#allocation56_spill] sm:$0xff] %v7453_v45  ;;  %12312 = vst [vmem:[#allocation54_spill] sm:$0xff] %v7493_v23  ;;  %v1498_v49 = vmul.f32 %v7539_v33, %v7200_v4  ;;  %v7544_v45 = vld [vmem:[%s5411_s20 + $0x7b] sm:$0xff]  ;;  %v7670_v23 = vadd.f32 %v1493_v51, %v7365_v14 }
 0x12c   : > { %12313 = vst [vmem:[#allocation55_spill] sm:$0xff] %v7497_v63  ;;  %12314 = vst [vmem:[#allocation60_spill] sm:$0xff] %v7501_v43  ;;  %v7659_v43 = vld [vmem:[%s5411_s20 + $0x18b] sm:$0xff]  ;;  %v7664_v63 = vadd.f32 %v1491_v56, %v7350_v25  ;;  %v7682_v56 = vadd.f32 %v1497_v54, %v7389_v59  ;;  %v4446_v14 = vld [vmem:[%s5411_s20 + $0x1d] sm:$0xff] }
 0x12d   : > { %12315 = vst [vmem:[#allocation61_spill] sm:$0xff] %v7505_v13  ;;  %12316 = vst [vmem:[#allocation62_spill] sm:$0xff] %v7509_v48  ;;  %v7649_v48 = vld [vmem:[%s5411_s20 + $0x173] sm:$0xff]  ;;  %v7654_v13 = vld [vmem:[%s5411_s20 + $0x183] sm:$0xff] }
 0x12e   : > { %12317 = vst [vmem:[#allocation64_spill] sm:$0xff] %v7513_v20  ;;  %12318 = vst [vmem:[#allocation68_spill] sm:$0xff] %v7517_v26  ;;  %v7639_v26 = vld [vmem:[%s5411_s20 + $0x15b] sm:$0xff]  ;;  %v7644_v20 = vld [vmem:[%s5411_s20 + $0x16b] sm:$0xff] }
 0x12f   : > { %12319 = vst [vmem:[#allocation69_spill] sm:$0xff] %v7524_v5  ;;  %12320 = vst [vmem:[#allocation36_spill] sm:$0xff] %v7529_v9  ;;  %v1499_v5 = vmul.f32 %v7544_v45, %v7200_v4  ;;  %v1500_v9 = vmul.f32 %v7549_v40, %v7200_v4 }
 0x130   : > { %12321 = vst [vmem:[#allocation41_spill] sm:$0xff] %v7534_v37  ;;  %12322 = vst [vmem:[#allocation32_spill] sm:$0xff] %v7539_v33  ;;  %v1501_v37 = vmul.f32 %v7554_v8, %v7200_v4  ;;  %v1502_v33 = vmul.f32 %v7559_v10, %v7200_v4 }
 0x131   : > { %12323 = vst [vmem:[#allocation47_spill] sm:$0xff] %v7544_v45  ;;  %12324 = vst [vmem:[#allocation59_spill] sm:$0xff] %v7549_v40  ;;  %v1503_v45 = vmul.f32 %v7564_v50, %v7200_v4  ;;  %v1504_v40 = vmul.f32 %v7569_v35, %v7200_v4  ;;  %v7688_v51 = vadd.f32 %v1499_v5, %v7397_v62  ;;  %v7734_v5 = vld [vmem:[%s5411_s20 + $0x55] sm:$0xff] }
 0x132   : > { %12325 = vst [vmem:[#allocation63_spill] sm:$0xff] %v7554_v8  ;;  %12326 = vst [vmem:[#allocation67_spill] sm:$0xff] %v7559_v10  ;;  %v1505_v8 = vmul.f32 %v7574_v36, %v7200_v4  ;;  %v1506_v10 = vmul.f32 %v7579_v22, %v7200_v4 }
 0x133   : > { %12327 = vst [vmem:[#allocation70_spill] sm:$0xff] %v7564_v50  ;;  %12328 = vst [vmem:[#allocation71_spill] sm:$0xff] %v7569_v35  ;;  %v1507_v50 = vmul.f32 %v7584_v60, %v7200_v4  ;;  %v1508_v35 = vmul.f32 %v7589_v38, %v7200_v4  ;;  %v7704_v25 = vadd.f32 %v1504_v40, %v7435_v2  ;;  %v7740_v40 = vld [vmem:[%s5411_s20 + $0x6d] sm:$0xff] }
 0x134   : > { %12329 = vst [vmem:[#allocation72_spill] sm:$0xff] %v7574_v36  ;;  %12330 = vst [vmem:[#allocation73_spill] sm:$0xff] %v7579_v22  ;;  %v1509_v36 = vmul.f32 %v7594_v27, %v7200_v4  ;;  %v1510_v22 = vmul.f32 %v7599_v30, %v7200_v4  ;;  %v7707_v62 = vadd.f32 %v1505_v8, %v7439_v58  ;;  %v7737_v8 = vld [vmem:[%s5411_s20 + $0x65] sm:$0xff] }
 0x135   : > { %12331 = vst [vmem:[#allocation74_spill] sm:$0xff] %v7584_v60  ;;  %12332 = vst [vmem:[#allocation75_spill] sm:$0xff] %v7589_v38  ;;  %v1511_v60 = vmul.f32 %v7604_v53, %v7200_v4  ;;  %v1512_v38 = vmul.f32 %v7609_v41, %v7200_v4  ;;  %v7722_v2 = vadd.f32 %v1508_v35, %v7457_v44  ;;  %v7776_v35 = vld [vmem:[%s5411_s20 + $0x9d] sm:$0xff] }
 0x136   : > { %12333 = vst [vmem:[#allocation33_spill] sm:$0xff] %v7594_v27  ;;  %12334 = vst [vmem:[#allocation49_spill] sm:$0xff] %v7599_v30  ;;  %v1513_v27 = vmul.f32 %v7614_v6, %v7200_v4  ;;  %v1514_v30 = vmul.f32 %v7619_v12, %v7200_v4  ;;  %v7725_v58 = vadd.f32 %v1509_v36, %v7461_v15  ;;  %v7755_v36 = vld [vmem:[%s5411_s20 + $0x7d] sm:$0xff] }
 0x137   : > { %12335 = vst [vmem:[#allocation50_spill] sm:$0xff] %v7604_v53  ;;  %12336 = vst [vmem:[#allocation28_spill] sm:$0xff] %v7609_v41  ;;  %v1515_v53 = vmul.f32 %v7624_v57, %v7200_v4  ;;  %v1516_v41 = vmul.f32 %v7629_v28, %v7200_v4  ;;  %v7743_v44 = vadd.f32 %v1512_v38, %v7474_v47  ;;  %v12355_v47 = vld [vmem:[#allocation54_spill] sm:$0xff]  ;;  %v12357_v38 = vld [vmem:[#allocation55_spill] sm:$0xff] }
 0x138   : > { %12337 = vst [vmem:[#allocation2_spill] sm:$0xff] %v7614_v6  ;;  %12338 = vst [vmem:[#allocation3_spill] sm:$0xff] %v7619_v12  ;;  %v1517_v6 = vmul.f32 %v7634_v3, %v7200_v4  ;;  %v1518_v12 = vmul.f32 %v7639_v26, %v7200_v4  ;;  %v7746_v15 = vadd.f32 %v1513_v27, %v7478_v61  ;;  %v12359_v27 = vld [vmem:[#allocation60_spill] sm:$0xff] }
 0x139   : > { %12339 = vst [vmem:[#allocation4_spill] sm:$0xff] %v7624_v57  ;;  %12340 = vst [vmem:[#allocation5_spill] sm:$0xff] %v7629_v28  ;;  %v1519_v57 = vmul.f32 %v7644_v20, %v7200_v4  ;;  %v1520_v28 = vmul.f32 %v7649_v48, %v7200_v4  ;;  %v7764_v61 = vadd.f32 %v1516_v41, %v12355_v47 }
 0x13a   : > { %12341 = vst [vmem:[#allocation6_spill] sm:$0xff] %v7634_v3  ;;  %12342 = vst [vmem:[#allocation7_spill] sm:$0xff] %v7639_v26  ;;  %v1521_v3 = vmul.f32 %v7654_v13, %v7200_v4  ;;  %v1522_v26 = vmul.f32 %v7659_v43, %v7200_v4  ;;  %v7679_v4 = vadd.f32 %v1496_v11, %v7385_v42  ;;  %v12368_v42 = vld [vmem:[#allocation64_spill] sm:$0xff]  ;;  %v7800_v11 = vld [vmem:[%s5411_s20 + $0xdd] sm:$0xff] }
 0x13b   : > { %12343 = vst [vmem:[#allocation8_spill] sm:$0xff] %v7644_v20  ;;  %12344 = vst [vmem:[#allocation9_spill] sm:$0xff] %v7649_v48  ;;  %v7667_v20 = vadd.f32 %v1492_v16, %v7362_v39  ;;  %v7673_v48 = vadd.f32 %v1494_v52, %v7368_v32  ;;  %v7685_v16 = vadd.f32 %v1498_v49, %v7393_v46  ;;  %v7797_v46 = vld [vmem:[%s5411_s20 + $0xcd] sm:$0xff] }
 0x13c   : > { %12345 = vst [vmem:[#allocation10_spill] sm:$0xff] %v7654_v13  ;;  %12346 = vst [vmem:[#allocation11_spill] sm:$0xff] %v7659_v43  ;;  %v7676_v13 = vadd.f32 %v1495_v34, %v7372_v29  ;;  %v7691_v52 = vadd.f32 %v1500_v9, %v7410_v18  ;;  %v7694_v34 = vadd.f32 %v1501_v37, %v7414_v19  ;;  %v4448_v9 = vld [vmem:[%s5411_s20 + $0x35] sm:$0xff]  ;;  %v12366_v29 = vld [vmem:[#allocation62_spill] sm:$0xff] }
 0x13d   : > { %v7697_v32 = vadd.f32 %v1502_v33, %v7418_v7  ;;  %v7700_v39 = vadd.f32 %v1503_v45, %v7422_v21  ;;  %v7710_v18 = vadd.f32 %v1506_v10, %v7443_v55  ;;  %v7713_v19 = vadd.f32 %v1507_v50, %v7447_v31  ;;  %v4447_v7 = vld [vmem:[%s5411_s20 + $0x25] sm:$0xff]  ;;  %v4449_v45 = vld [vmem:[%s5411_s20 + $0x3d] sm:$0xff]  ;;  %v7719_v21 = vld [vmem:[%s5411_s20 + $0x4d] sm:$0xff]  ;;  %12348 = vst [vmem:[#allocation105_spill] sm:$0xff] %v7734_v5 }
 0x13e   : > { %12347 = vst [vmem:[#allocation104_spill] sm:$0xff] %v7719_v21  ;;  %v7728_v55 = vadd.f32 %v1510_v22, %v7465_v24  ;;  %v7731_v31 = vadd.f32 %v1511_v60, %v7469_v1  ;;  %12349 = vst [vmem:[#allocation106_spill] sm:$0xff] %v7737_v8  ;;  %v7749_v24 = vadd.f32 %v1514_v30, %v7482_v0  ;;  %v7758_v22 = vld [vmem:[%s5411_s20 + $0x85] sm:$0xff]  ;;  %v7761_v60 = vld [vmem:[%s5411_s20 + $0x95] sm:$0xff] }
 0x13f   : > { %12350 = vst [vmem:[#allocation107_spill] sm:$0xff] %v7740_v40  ;;  %v7752_v1 = vadd.f32 %v1515_v53, %v7486_v17  ;;  %12352 = vst [vmem:[#allocation109_spill] sm:$0xff] %v7755_v36  ;;  %v7767_v0 = vadd.f32 %v1517_v6, %v12357_v38  ;;  %v7770_v50 = vadd.f32 %v1518_v12, %v12359_v27  ;;  %v12361_v17 = vld [vmem:[#allocation61_spill] sm:$0xff]  ;;  %v7779_v10 = vld [vmem:[%s5411_s20 + $0xad] sm:$0xff] }
 0x140   : > { %12353 = vst [vmem:[#allocation110_spill] sm:$0xff] %v7758_v22  ;;  %12354 = vst [vmem:[#allocation111_spill] sm:$0xff] %v7761_v60  ;;  %v7773_v53 = vadd.f32 %v1519_v57, %v12361_v17  ;;  %v7782_v30 = vld [vmem:[%s5411_s20 + $0xb5] sm:$0xff]  ;;  %v7785_v41 = vadd.f32 %v1520_v28, %v12366_v29  ;;  %v7788_v6 = vadd.f32 %v1521_v3, %v12368_v42  ;;  %v7794_v57 = vld [vmem:[%s5411_s20 + $0xc5] sm:$0xff] }
 0x141   : > { %12351 = vst [vmem:[#allocation108_spill] sm:$0xff] %v7752_v1  ;;  %12356 = vst [vmem:[#allocation54_spill] sm:$0xff] %v7764_v61  ;;  %v12370_v12 = vld [vmem:[#allocation68_spill] sm:$0xff]  ;;  %v12375_v37 = vld [vmem:[#allocation14_spill] sm:$0xff] }
 0x142   : > { %12358 = vst [vmem:[#allocation55_spill] sm:$0xff] %v7767_v0  ;;  %12360 = vst [vmem:[#allocation60_spill] sm:$0xff] %v7770_v50  ;;  %v7791_v59 = vadd.f32 %v1522_v26, %v12370_v12  ;;  %v1591_v54 = vmul.f32 %v4446_v14, %v12375_v37  ;;  %v7804_v33 = vld [vmem:[%s5411_s20 + $0xe5] sm:$0xff]  ;;  %v7807_v28 = vld [vmem:[%s5411_s20 + $0xf5] sm:$0xff]  ;;  %v1592_v26 = vmul.f32 %v4447_v7, %v12375_v37 }
 0x143   : > { %12362 = vst [vmem:[#allocation61_spill] sm:$0xff] %v7773_v53  ;;  %12363 = vst [vmem:[#allocation112_spill] sm:$0xff] %v7776_v35  ;;  %v7810_v3 = vld [vmem:[%s5411_s20 + $0xfd] sm:$0xff]  ;;  %v1593_v49 = vmul.f32 %v4448_v9, %v12375_v37  ;;  %v1594_v47 = vmul.f32 %v4449_v45, %v12375_v37  ;;  %v1595_v38 = vmul.f32 %v7719_v21, %v12375_v37  ;;  %v7818_v14 = vld [vmem:[%s5411_s20 + $0x10d] sm:$0xff] }
 0x144   : > { %12364 = vst [vmem:[#allocation113_spill] sm:$0xff] %v7779_v10  ;;  %12365 = vst [vmem:[#allocation114_spill] sm:$0xff] %v7782_v30  ;;  %v7821_v27 = vld [vmem:[%s5411_s20 + $0x115] sm:$0xff]  ;;  %v7824_v17 = vld [vmem:[%s5411_s20 + $0x125] sm:$0xff]  ;;  %v1596_v29 = vmul.f32 %v7734_v5, %v12375_v37  ;;  %v1597_v7 = vmul.f32 %v7737_v8, %v12375_v37  ;;  %v1598_v9 = vmul.f32 %v7740_v40, %v12375_v37 }
 0x145   : > { %12367 = vst [vmem:[#allocation62_spill] sm:$0xff] %v7785_v41  ;;  %12369 = vst [vmem:[#allocation64_spill] sm:$0xff] %v7788_v6  ;;  %v1599_v45 = vmul.f32 %v7755_v36, %v12375_v37  ;;  %v7835_v42 = vld [vmem:[%s5411_s20 + $0x12d] sm:$0xff]  ;;  %v7838_v12 = vld [vmem:[%s5411_s20 + $0x13d] sm:$0xff]  ;;  %v1600_v5 = vmul.f32 %v7758_v22, %v12375_v37  ;;  %v1601_v8 = vmul.f32 %v7761_v60, %v12375_v37 }
 0x146   : > { %12371 = vst [vmem:[#allocation68_spill] sm:$0xff] %v7791_v59  ;;  %12372 = vst [vmem:[#allocation115_spill] sm:$0xff] %v7794_v57  ;;  %v7841_v21 = vld [vmem:[%s5411_s20 + $0x145] sm:$0xff]  ;;  %v1602_v40 = vmul.f32 %v7776_v35, %v12375_v37  ;;  %v1603_v36 = vmul.f32 %v7779_v10, %v12375_v37  ;;  %v7852_v43 = vld [vmem:[%s5411_s20 + $0x155] sm:$0xff]  ;;  %v1604_v41 = vmul.f32 %v7782_v30, %v12375_v37 }
 0x147   : > { %12373 = vst [vmem:[#allocation116_spill] sm:$0xff] %v7797_v46  ;;  %12374 = vst [vmem:[#allocation117_spill] sm:$0xff] %v7800_v11  ;;  %v7855_v59 = vld [vmem:[%s5411_s20 + $0x15d] sm:$0xff]  ;;  %v7858_v6 = vld [vmem:[%s5411_s20 + $0x16d] sm:$0xff]  ;;  %v1605_v22 = vmul.f32 %v7794_v57, %v12375_v37  ;;  %v1606_v60 = vmul.f32 %v7797_v46, %v12375_v37  ;;  %v1607_v35 = vmul.f32 %v7800_v11, %v12375_v37 }
 0x148   : > { %12376 = vst [vmem:[#allocation14_spill] sm:$0xff] %v7804_v33  ;;  %12377 = vst [vmem:[#allocation118_spill] sm:$0xff] %v7807_v28  ;;  %v7869_v53 = vld [vmem:[%s5411_s20 + $0x175] sm:$0xff]  ;;  %v7872_v10 = vld [vmem:[%s5411_s20 + $0x185] sm:$0xff]  ;;  %v1608_v0 = vmul.f32 %v7804_v33, %v12375_v37  ;;  %v1609_v30 = vmul.f32 %v7807_v28, %v12375_v37  ;;  %v1610_v57 = vmul.f32 %v7810_v3, %v12375_v37 }
 0x149   : > { %12378 = vst [vmem:[#allocation119_spill] sm:$0xff] %v7810_v3  ;;  %12379 = vst [vmem:[#allocation120_spill] sm:$0xff] %v7818_v14  ;;  %v7875_v50 = vld [vmem:[%s5411_s20 + $0x18d] sm:$0xff]  ;;  %v1611_v46 = vmul.f32 %v7818_v14, %v12375_v37  ;;  %v1612_v11 = vmul.f32 %v7821_v27, %v12375_v37  ;;  %v1613_v61 = vmul.f32 %v7824_v17, %v12375_v37 }
 0x14a   : > { %12380 = vst [vmem:[#allocation121_spill] sm:$0xff] %v7821_v27  ;;  %12381 = vst [vmem:[#allocation122_spill] sm:$0xff] %v7824_v17  ;;  %v1614_v1 = vmul.f32 %v7835_v42, %v12375_v37  ;;  %v1615_v33 = vmul.f32 %v7838_v12, %v12375_v37  ;;  %v1616_v28 = vmul.f32 %v7841_v21, %v12375_v37 }
 0x14b   : > { %12382 = vst [vmem:[#allocation123_spill] sm:$0xff] %v7835_v42  ;;  %12383 = vst [vmem:[#allocation124_spill] sm:$0xff] %v7838_v12  ;;  %v1617_v3 = vmul.f32 %v7852_v43, %v12375_v37  ;;  %v1618_v14 = vmul.f32 %v7855_v59, %v12375_v37  ;;  %v1619_v27 = vmul.f32 %v7858_v6, %v12375_v37 }
 0x14c   : > { %12384 = vst [vmem:[#allocation125_spill] sm:$0xff] %v7841_v21  ;;  %12385 = vst [vmem:[#allocation126_spill] sm:$0xff] %v7852_v43  ;;  %v1620_v17 = vmul.f32 %v7869_v53, %v12375_v37  ;;  %v1621_v42 = vmul.f32 %v7872_v10, %v12375_v37  ;;  %v1622_v12 = vmul.f32 %v7875_v50, %v12375_v37 }
 0x14d   : > { %12386 = vst [vmem:[#allocation127_spill] sm:$0xff] %v7855_v59  ;;  %12387 = vst [vmem:[#allocation128_spill] sm:$0xff] %v7858_v6  ;;  %v7908_v21 = vadd.f32 %v1591_v54, %v7664_v63  ;;  %v7911_v43 = vadd.f32 %v1592_v26, %v7667_v20  ;;  %v7914_v59 = vadd.f32 %v1593_v49, %v7670_v23  ;;  %v12413_v54 = vld [vmem:[#allocation90_spill] sm:$0xff]  ;;  %v12415_v26 = vld [vmem:[#allocation92_spill] sm:$0xff] }
 0x14e   : > { %12388 = vst [vmem:[#allocation129_spill] sm:$0xff] %v7869_v53  ;;  %12389 = vst [vmem:[#allocation130_spill] sm:$0xff] %v7872_v10  ;;  %v7917_v6 = vadd.f32 %v1594_v47, %v7673_v48  ;;  %v7920_v53 = vadd.f32 %v1595_v38, %v7676_v13  ;;  %v7923_v10 = vadd.f32 %v1596_v29, %v7679_v4  ;;  %v3480_v47 = vpop.f32.mrf.mxu0  ;;  %v12416_v38 = vld [vmem:[#allocation29_spill] sm:$0xff]  ;;  %v12418_v29 = vld [vmem:[#allocation94_spill] sm:$0xff] }
 0x14f   : > { %12390 = vst [vmem:[#allocation131_spill] sm:$0xff] %v7875_v50  ;;  %v7926_v37 = vadd.f32 %v1597_v7, %v7682_v56  ;;  %v7929_v63 = vadd.f32 %v1598_v9, %v7685_v16  ;;  %v7932_v20 = vadd.f32 %v1599_v45, %v7688_v51  ;;  %v7935_v23 = vadd.f32 %v1600_v5, %v7691_v52  ;;  %v12419_v45 = vld [vmem:[#allocation95_spill] sm:$0xff]  ;;  %v8060_v50 = vld [vmem:[%s5411_s20 + $0x1b9] sm:$0xff] }
 0x150   : > { %v7938_v48 = vadd.f32 %v1601_v8, %v7694_v34  ;;  %v7941_v13 = vadd.f32 %v1602_v40, %v7697_v32  ;;  %v7944_v4 = vadd.f32 %v1603_v36, %v7700_v39  ;;  %v7947_v56 = vadd.f32 %v1604_v41, %v7704_v25  ;;  %v12411_v41 = vld [vmem:[#allocation88_spill] sm:$0xff] }
 0x151   : > { %v7950_v16 = vadd.f32 %v1605_v22, %v7707_v62  ;;  %v7953_v51 = vadd.f32 %v1606_v60, %v7710_v18  ;;  %v7956_v52 = vadd.f32 %v1607_v35, %v7713_v19  ;;  %v7959_v34 = vadd.f32 %v1608_v0, %v7722_v2  ;;  %v12394_v2 = vld [vmem:[#allocation108_spill] sm:$0xff] }
 0x152   : > { %v7962_v32 = vadd.f32 %v1609_v30, %v7725_v58  ;;  %v7965_v39 = vadd.f32 %v1610_v57, %v7728_v55  ;;  %v7968_v25 = vadd.f32 %v1611_v46, %v7731_v31  ;;  %v7971_v62 = vadd.f32 %v1612_v11, %v7743_v44  ;;  %v12396_v58 = vld [vmem:[#allocation54_spill] sm:$0xff]  ;;  %v12398_v55 = vld [vmem:[#allocation55_spill] sm:$0xff]  ;;  %v12400_v31 = vld [vmem:[#allocation60_spill] sm:$0xff] }
 0x153   : > { %v7974_v18 = vadd.f32 %v1613_v61, %v7746_v15  ;;  %v7977_v19 = vadd.f32 %v1614_v1, %v7749_v24  ;;  %v7980_v5 = vadd.f32 %v1615_v33, %v12394_v2  ;;  %v7983_v8 = vadd.f32 %v1616_v28, %v12396_v58  ;;  %v12402_v44 = vld [vmem:[#allocation61_spill] sm:$0xff]  ;;  %v3413_v15 = vld [vmem:[%s11490_s6] sm:$0x1]  ;;  %v12406_v60 = vld [vmem:[#allocation64_spill] sm:$0xff] }
 0x154   : > { %12391 = vst [vmem:[#allocation132_spill] sm:$0xff] %v7971_v62  ;;  %v7986_v40 = vadd.f32 %v1617_v3, %v12398_v55  ;;  %v7989_v36 = vadd.f32 %v1618_v14, %v12400_v31  ;;  %v7992_v22 = vadd.f32 %v1619_v27, %v12402_v44  ;;  %v12404_v24 = vld [vmem:[#allocation62_spill] sm:$0xff]  ;;  %v8001_v61 = vadd.f32 %v1621_v42, %v12406_v60  ;;  %v12408_v0 = vld [vmem:[#allocation68_spill] sm:$0xff]  ;;  %v12412_v46 = vld [vmem:[#allocation89_spill] sm:$0xff] }
 0x155   : > { %12392 = vst [vmem:[#allocation133_spill] sm:$0xff] %v7974_v18  ;;  %12393 = vst [vmem:[#allocation134_spill] sm:$0xff] %v7977_v19  ;;  %v7998_v1 = vadd.f32 %v1620_v17, %v12404_v24  ;;  %v8004_v35 = vadd.f32 %v1622_v12, %v12408_v0  ;;  %v12410_v30 = vld [vmem:[#allocation18_spill] sm:$0xff]  ;;  %v12414_v28 = vld [vmem:[#allocation91_spill] sm:$0xff]  ;;  %v3481_v9 = vadd.f32 %v3480_v47, %v3413_v15  ;;  %v4999_v24 = vpop.f32.mrf.mxu0 }
 0x156   : > { %12395 = vst [vmem:[#allocation108_spill] sm:$0xff] %v7980_v5  ;;  %12397 = vst [vmem:[#allocation54_spill] sm:$0xff] %v7983_v8  ;;  %v1692_v57 = vmul.f32 %v12411_v41, %v12410_v30  ;;  %v1693_v11 = vmul.f32 %v12412_v46, %v12410_v30  ;;  %v1694_v33 = vmul.f32 %v12413_v54, %v12410_v30  ;;  %v12417_v27 = vld [vmem:[#allocation93_spill] sm:$0xff]  ;;  %v12420_v12 = vld [vmem:[#allocation96_spill] sm:$0xff] }
 0x157   : > { %12399 = vst [vmem:[#allocation55_spill] sm:$0xff] %v7986_v40  ;;  %12401 = vst [vmem:[#allocation60_spill] sm:$0xff] %v7989_v36  ;;  %v1695_v3 = vmul.f32 %v12414_v28, %v12410_v30  ;;  %v1696_v49 = vmul.f32 %v12415_v26, %v12410_v30  ;;  %v1697_v14 = vmul.f32 %v12416_v38, %v12410_v30  ;;  %v12421_v58 = vld [vmem:[#allocation97_spill] sm:$0xff]  ;;  %v12422_v31 = vld [vmem:[#allocation98_spill] sm:$0xff]  ;;  %v8036_v28 = vmax.f32 %v3481_v9, 0.0 }
 0x158   : > { %12403 = vst [vmem:[#allocation61_spill] sm:$0xff] %v7992_v22  ;;  %12405 = vst [vmem:[#allocation62_spill] sm:$0xff] %v7998_v1  ;;  %v1698_v17 = vmul.f32 %v12417_v27, %v12410_v30  ;;  %v1699_v7 = vmul.f32 %v12418_v29, %v12410_v30  ;;  %v1700_v42 = vmul.f32 %v12419_v45, %v12410_v30  ;;  %v12423_v60 = vld [vmem:[#allocation99_spill] sm:$0xff]  ;;  %v12424_v15 = vld [vmem:[#allocation100_spill] sm:$0xff] }
 0x159   : > { %12407 = vst [vmem:[#allocation64_spill] sm:$0xff] %v8001_v61  ;;  %12409 = vst [vmem:[#allocation68_spill] sm:$0xff] %v8004_v35  ;;  %v1701_v2 = vmul.f32 %v12420_v12, %v12410_v30  ;;  %v1702_v55 = vmul.f32 %v12421_v58, %v12410_v30  ;;  %v1703_v44 = vmul.f32 %v12422_v31, %v12410_v30  ;;  %v12425_v46 = vld [vmem:[#allocation101_spill] sm:$0xff]  ;;  %v8045_v38 = vld [vmem:[%s5411_s20 + $0x1a1] sm:$0xff]  ;;  %5033 = vmatmul.mubr.f32.vlgmr.msra.gmra.mxu1 %v8036_v28 }
 0x15a   : > { %v1704_v0 = vmul.f32 %v12423_v60, %v12410_v30  ;;  %v1705_v41 = vmul.f32 %v12424_v15, %v12410_v30  ;;  %v1706_v54 = vmul.f32 %v12425_v46, %v12410_v30  ;;  %12426 = vst [vmem:[#allocation18_spill] sm:$0xff] %v8036_v28  ;;  %v4893_v26 = vld [vmem:[%s11491_s7 + $0x178] sm:$0xff]  ;;  %12428 = vst [vmem:[#allocation89_spill] sm:$0xff] %v8045_v38  ;;  %v12429_v27 = vld [vmem:[#allocation102_spill] sm:$0xff]  ;;  %5068 = vmatmul.mubr.f32.vlgmr.msra.gmra.mxu0 %v8036_v28 }
 0x15b   : > { %v8042_v47 = vld [vmem:[%s5411_s20 + $0x199] sm:$0xff]  ;;  %v1707_v29 = vmul.f32 %v12429_v27, %v12410_v30  ;;  %v12430_v45 = vld [vmem:[#allocation103_spill] sm:$0xff]  ;;  %v8057_v46 = vld [vmem:[%s5411_s20 + $0x1b1] sm:$0xff]  ;;  %12435 = vst [vmem:[#allocation91_spill] sm:$0xff] %v8060_v50  ;;  %5071 = vmatpush3.msra.mxu1 %v4893_v26  ;;  %v8110_v62 = vadd.f32 %v1695_v3, %v7917_v6  ;;  %v8129_v6 = vadd.f32 %v1700_v42, %v7932_v20 }
 0x15c   : > { %12427 = vst [vmem:[#allocation88_spill] sm:$0xff] %v8042_v47  ;;  %v1708_v12 = vmul.f32 %v12430_v45, %v12410_v30  ;;  %v12431_v58 = vld [vmem:[#allocation34_spill] sm:$0xff]  ;;  %v12432_v9 = vld [vmem:[#allocation35_spill] sm:$0xff]  ;;  %12434 = vst [vmem:[#allocation90_spill] sm:$0xff] %v8057_v46  ;;  %v8151_v20 = vadd.f32 %v1706_v54, %v7950_v16 }
 0x15d   : > { %v1709_v31 = vmul.f32 %v12431_v58, %v12410_v30  ;;  %v1710_v24 = vmul.f32 %v12432_v9, %v12410_v30  ;;  %v12436_v35 = vld [vmem:[#allocation37_spill] sm:$0xff]  ;;  %v12437_v27 = vld [vmem:[#allocation38_spill] sm:$0xff]  ;;  %v12438_v45 = vld [vmem:[#allocation39_spill] sm:$0xff] }
 0x15e   : > { %v1711_v61 = vmul.f32 %v12436_v35, %v12410_v30  ;;  %v1712_v1 = vmul.f32 %v12437_v27, %v12410_v30  ;;  %v1713_v22 = vmul.f32 %v12438_v45, %v12410_v30  ;;  %v4892_v58 = vld [vmem:[%s11491_s7 + $0x170] sm:$0xff]  ;;  %v12440_v60 = vld [vmem:[#allocation42_spill] sm:$0xff]  ;;  %v12441_v35 = vld [vmem:[#allocation43_spill] sm:$0xff]  ;;  %v12443_v45 = vmov 0.0  }
 0x15f   : > { %v1714_v36 = vmul.f32 %v12440_v60, %v12410_v30  ;;  %v1715_v40 = vmul.f32 %v12441_v35, %v12410_v30  ;;  %v12442_v27 = vld [vmem:[#allocation48_spill] sm:$0xff]  ;;  %5102 = vmatprep.mubr.msk.f32.mxu1 %vm5211_vm0, %v12443_v45  ;;  %v12444_v28 = vld [vmem:[#allocation31_spill] sm:$0xff]  ;;  %v12445_v19 = vld [vmem:[#allocation53_spill] sm:$0xff]  ;;  %v1720_v60 = vmul.f32 %v8042_v47, %v12410_v30  ;;  %5072 = vmatprep.subr.mxu1 %v12443_v45 }
 0x160   : > { %v1716_v8 = vmul.f32 %v12442_v27, %v12410_v30  ;;  %v1717_v5 = vmul.f32 %v12444_v28, %v12410_v30  ;;  %v1718_v18 = vmul.f32 %v12445_v19, %v12410_v30  ;;  %v12446_v15 = vld [vmem:[#allocation56_spill] sm:$0xff]  ;;  %v4891_v26 = vld [vmem:[%s11491_s7 + $0x168] sm:$0xff]  ;;  %v1721_v35 = vmul.f32 %v8045_v38, %v12410_v30  ;;  %5073 = vmatpush3.msra.mxu1 %v4892_v58 }
 0x161   : > { %v1719_v9 = vmul.f32 %v12446_v15, %v12410_v30  ;;  %v1722_v28 = vmul.f32 %v8057_v46, %v12410_v30  ;;  %v1723_v19 = vmul.f32 %v8060_v50, %v12410_v30  ;;  %v8101_v15 = vadd.f32 %v1692_v57, %v7908_v21  ;;  %5074 = vmatprep.subr.mxu1 %v12443_v45  ;;  %v4890_v21 = vld [vmem:[%s11491_s7 + $0x160] sm:$0xff]  ;;  %v4888_v16 = vld [vmem:[%s11491_s7 + $0x150] sm:$0xff]  ;;  %v12499_v46 = vld [vmem:[#allocation3_spill] sm:$0xff] }
 0x162   : > { %v8104_v27 = vadd.f32 %v1693_v11, %v7911_v43  ;;  %v8107_v47 = vadd.f32 %v1694_v33, %v7914_v59  ;;  %v8113_v38 = vadd.f32 %v1696_v49, %v7920_v53  ;;  %v8120_v30 = vadd.f32 %v1697_v14, %v7923_v10  ;;  %5075 = vmatpush3.msra.mxu1 %v4891_v26  ;;  %v379_v14 = vld [vmem:[%s11487_s3 + $0x18] sm:$0x7]  ;;  %v12472_v58 = vld [vmem:[#allocation24_spill] sm:$0xff] }
 0x163   : > { %v8123_v43 = vadd.f32 %v1698_v17, %v7926_v37  ;;  %v8126_v59 = vadd.f32 %v1699_v7, %v7929_v63  ;;  %v8132_v53 = vadd.f32 %v1701_v2, %v7935_v23  ;;  %v8135_v57 = vadd.f32 %v1702_v55, %v7938_v48  ;;  %5076 = vmatprep.subr.mxu1 %v12443_v45  ;;  %v4889_v37 = vld [vmem:[%s11491_s7 + $0x158] sm:$0xff]  ;;  %v12454_v17 = vld [vmem:[#allocation108_spill] sm:$0xff] }
 0x164   : > { %v8138_v11 = vadd.f32 %v1703_v44, %v7941_v13  ;;  %v8141_v10 = vadd.f32 %v1704_v0, %v7944_v4  ;;  %v8148_v63 = vadd.f32 %v1705_v41, %v7947_v56  ;;  %v8154_v23 = vadd.f32 %v1707_v29, %v7953_v51  ;;  %5077 = vmatpush3.msra.mxu1 %v4890_v21  ;;  %v378_v51 = vld [vmem:[%s11487_s3 + $0x14] sm:$0x7]  ;;  %v4887_v44 = vld [vmem:[%s11491_s7 + $0x148] sm:$0xff]  ;;  %v12462_v0 = vld [vmem:[#allocation61_spill] sm:$0xff] }
 0x165   : > { %v8157_v48 = vadd.f32 %v1708_v12, %v7956_v52  ;;  %v8160_v13 = vadd.f32 %v1709_v31, %v7959_v34  ;;  %v8163_v4 = vadd.f32 %v1710_v24, %v7962_v32  ;;  %v8166_v33 = vadd.f32 %v1711_v61, %v7965_v39  ;;  %5078 = vmatprep.subr.mxu1 %v12443_v45  ;;  %v12447_v52 = vld [vmem:[#allocation132_spill] sm:$0xff]  ;;  %v12448_v32 = vld [vmem:[#allocation133_spill] sm:$0xff]  ;;  %v12450_v39 = vld [vmem:[#allocation134_spill] sm:$0xff] }
 0x166   : > { %v8169_v56 = vadd.f32 %v1712_v1, %v7968_v25  ;;  %v8179_v34 = vadd.f32 %v1713_v22, %v12447_v52  ;;  %v8182_v3 = vadd.f32 %v1714_v36, %v12448_v32  ;;  %v8185_v61 = vadd.f32 %v1715_v40, %v12450_v39  ;;  %v12452_v25 = vld [vmem:[#allocation25_spill] sm:$0xff]  ;;  %5079 = vmatpush3.msra.mxu1 %v4889_v37  ;;  %v12456_v22 = vld [vmem:[#allocation54_spill] sm:$0xff]  ;;  %v12458_v36 = vld [vmem:[#allocation55_spill] sm:$0xff] }
 0x167   : > { %v12453_v1 = vld [vmem:[#allocation13_spill] sm:$0xff]  ;;  %v8195_v7 = vadd.f32 %v1716_v8, %v12454_v17  ;;  %v8198_v42 = vadd.f32 %v1717_v5, %v12456_v22  ;;  %v8201_v2 = vadd.f32 %v1718_v18, %v12458_v36  ;;  %v12460_v40 = vld [vmem:[#allocation60_spill] sm:$0xff]  ;;  %5080 = vmatprep.subr.mxu1 %v12443_v45  ;;  %v8211_v41 = vadd.f32 %v1720_v60, %v12462_v0  ;;  %v12464_v8 = vld [vmem:[#allocation62_spill] sm:$0xff] }
 0x168   : > { %12449 = vst [vmem:[#allocation92_spill] sm:$0xff] %v8182_v3  ;;  %12451 = vst [vmem:[#allocation29_spill] sm:$0xff] %v8185_v61  ;;  %v8189_v49 = vrot.slane %v12453_v1, %v12452_v25  ;;  %v8204_v55 = vadd.f32 %v1719_v9, %v12460_v40  ;;  %v8214_v54 = vadd.f32 %v1721_v35, %v12464_v8  ;;  %v12466_v5 = vld [vmem:[#allocation64_spill] sm:$0xff]  ;;  %5081 = vmatpush3.msra.mxu1 %v4888_v16  ;;  %v12470_v31 = vld [vmem:[#allocation26_spill] sm:$0xff] }
 0x169   : > { %12455 = vst [vmem:[#allocation93_spill] sm:$0xff] %v8195_v7  ;;  %12457 = vst [vmem:[#allocation94_spill] sm:$0xff] %v8198_v42  ;;  %v8217_v29 = vadd.f32 %v1722_v28, %v12466_v5  ;;  %v12468_v18 = vld [vmem:[#allocation68_spill] sm:$0xff]  ;;  %v8224_v24 = vrot.slane %v12453_v1, %v12470_v31  ;;  %v8227_v9 = vrot.slane %v378_v51, %v12472_v58  ;;  %5082 = vmatprep.subr.mxu1 %v12443_v45  ;;  %v4886_v35 = vld [vmem:[%s11491_s7 + $0x140] sm:$0xff] }
 0x16a   : > { %12459 = vst [vmem:[#allocation95_spill] sm:$0xff] %v8201_v2  ;;  %12461 = vst [vmem:[#allocation96_spill] sm:$0xff] %v8204_v55  ;;  %v8220_v12 = vadd.f32 %v1723_v19, %v12468_v18  ;;  %v8230_v60 = vrot.slane %v378_v51, %v12452_v25  ;;  %v8233_v26 = vrot.slane %v378_v51, %v12470_v31  ;;  %v12476_v28 = vld [vmem:[#allocation69_spill] sm:$0xff]  ;;  %v12477_v21 = vld [vmem:[#allocation12_spill] sm:$0xff]  ;;  %5083 = vmatpush3.msra.mxu1 %v4887_v44 }
 0x16b   : > { %12463 = vst [vmem:[#allocation97_spill] sm:$0xff] %v8211_v41  ;;  %12465 = vst [vmem:[#allocation98_spill] sm:$0xff] %v8214_v54  ;;  %v1792_v19 = vmul.f32 %v12476_v28, %v8189_v49  ;;  %v8243_v37 = vrot.slane %v12477_v21, %v12452_v25  ;;  %v8246_v16 = vrot.slane %v379_v14, %v12472_v58  ;;  %v12481_v51 = vld [vmem:[#allocation36_spill] sm:$0xff]  ;;  %v12482_v39 = vld [vmem:[#allocation41_spill] sm:$0xff]  ;;  %5084 = vmatprep.subr.mxu1 %v12443_v45 }
 0x16c   : > { %12467 = vst [vmem:[#allocation99_spill] sm:$0xff] %v8217_v29  ;;  %12469 = vst [vmem:[#allocation100_spill] sm:$0xff] %v8220_v12  ;;  %v8249_v52 = vrot.slane %v379_v14, %v12452_v25  ;;  %v1793_v32 = vmul.f32 %v12481_v51, %v8189_v49  ;;  %v1794_v1 = vmul.f32 %v12482_v39, %v8189_v49  ;;  %v12483_v17 = vld [vmem:[#allocation32_spill] sm:$0xff]  ;;  %v12484_v36 = vld [vmem:[#allocation47_spill] sm:$0xff]  ;;  %5085 = vmatpush3.msra.mxu1 %v4886_v35 }
 0x16d   : > { %12471 = vst [vmem:[#allocation101_spill] sm:$0xff] %v8224_v24  ;;  %12473 = vst [vmem:[#allocation102_spill] sm:$0xff] %v8227_v9  ;;  %v1795_v22 = vmul.f32 %v12483_v17, %v8189_v49  ;;  %v1796_v40 = vmul.f32 %v12484_v36, %v8189_v49  ;;  %v4885_v14 = vld [vmem:[%s11491_s7 + $0x138] sm:$0xff]  ;;  %v12485_v44 = vld [vmem:[#allocation59_spill] sm:$0xff]  ;;  %5086 = vmatprep.subr.mxu1 %v12443_v45  ;;  %v8342_v7 = vadd.f32 %v1792_v19, %v8101_v15 }
 0x16e   : > { %12474 = vst [vmem:[#allocation103_spill] sm:$0xff] %v8230_v60  ;;  %12475 = vst [vmem:[#allocation34_spill] sm:$0xff] %v8233_v26  ;;  %v1797_v0 = vmul.f32 %v12485_v44, %v8189_v49  ;;  %v12486_v8 = vld [vmem:[#allocation63_spill] sm:$0xff]  ;;  %v12488_v21 = vld [vmem:[#allocation70_spill] sm:$0xff]  ;;  %5087 = vmatpush3.msra.mxu1 %v4885_v14  ;;  %v8345_v61 = vadd.f32 %v1793_v32, %v8104_v27  ;;  %v8348_v3 = vadd.f32 %v1794_v1, %v8107_v47 }
 0x16f   : > { %12478 = vst [vmem:[#allocation35_spill] sm:$0xff] %v8243_v37  ;;  %12479 = vst [vmem:[#allocation37_spill] sm:$0xff] %v8246_v16  ;;  %v1798_v5 = vmul.f32 %v12486_v8, %v8189_v49  ;;  %v12487_v18 = vld [vmem:[#allocation67_spill] sm:$0xff]  ;;  %v1800_v51 = vmul.f32 %v12488_v21, %v8189_v49  ;;  %v12490_v36 = vld [vmem:[#allocation72_spill] sm:$0xff]  ;;  %5088 = vmatprep.subr.mxu1 %v12443_v45 }
 0x170   : > { %12480 = vst [vmem:[#allocation38_spill] sm:$0xff] %v8249_v52  ;;  %v1799_v28 = vmul.f32 %v12487_v18, %v8189_v49  ;;  %v12489_v39 = vld [vmem:[#allocation71_spill] sm:$0xff]  ;;  %v1802_v25 = vmul.f32 %v12490_v36, %v8189_v49  ;;  %v12491_v58 = vld [vmem:[#allocation73_spill] sm:$0xff]  ;;  %v12492_v44 = vld [vmem:[#allocation74_spill] sm:$0xff] }
 0x171   : > { %v1801_v17 = vmul.f32 %v12489_v39, %v8189_v49  ;;  %v1803_v31 = vmul.f32 %v12491_v58, %v8189_v49  ;;  %v1804_v52 = vmul.f32 %v12492_v44, %v8189_v49  ;;  %v4884_v8 = vld [vmem:[%s11491_s7 + $0x130] sm:$0xff]  ;;  %v12493_v35 = vld [vmem:[#allocation75_spill] sm:$0xff]  ;;  %v12494_v21 = vld [vmem:[#allocation33_spill] sm:$0xff]  ;;  %v8364_v27 = vadd.f32 %v1798_v5, %v8123_v43 }
 0x172   : > { %v1805_v18 = vmul.f32 %v12493_v35, %v8189_v49  ;;  %v1806_v39 = vmul.f32 %v12494_v21, %v8189_v49  ;;  %v12495_v36 = vld [vmem:[#allocation49_spill] sm:$0xff]  ;;  %v12496_v58 = vld [vmem:[#allocation50_spill] sm:$0xff]  ;;  %v12497_v44 = vld [vmem:[#allocation28_spill] sm:$0xff]  ;;  %v1811_v35 = vmul.f32 %v12499_v46, %v8189_v49  ;;  %5089 = vmatpush3.msra.mxu1 %v4884_v8  ;;  %v8367_v47 = vadd.f32 %v1799_v28, %v8126_v59 }
 0x173   : > { %v1807_v16 = vmul.f32 %v12495_v36, %v8189_v49  ;;  %v1808_v37 = vmul.f32 %v12496_v58, %v8189_v49  ;;  %v1809_v26 = vmul.f32 %v12497_v44, %v8189_v49  ;;  %v12498_v60 = vld [vmem:[#allocation2_spill] sm:$0xff]  ;;  %v12500_v9 = vld [vmem:[#allocation4_spill] sm:$0xff]  ;;  %v4883_v14 = vld [vmem:[%s11491_s7 + $0x128] sm:$0xff]  ;;  %5090 = vmatprep.subr.mxu1 %v12443_v45  ;;  %v8376_v19 = vadd.f32 %v1802_v25, %v8135_v57 }
 0x174   : > { %v1810_v50 = vmul.f32 %v12498_v60, %v8189_v49  ;;  %v1812_v21 = vmul.f32 %v12500_v9, %v8189_v49  ;;  %v12501_v36 = vld [vmem:[#allocation5_spill] sm:$0xff]  ;;  %v12502_v44 = vld [vmem:[#allocation6_spill] sm:$0xff]  ;;  %v12503_v46 = vld [vmem:[#allocation7_spill] sm:$0xff]  ;;  %5091 = vmatpush3.msra.mxu1 %v4883_v14  ;;  %v8379_v32 = vadd.f32 %v1803_v31, %v8138_v11  ;;  %v8389_v59 = vadd.f32 %v1805_v18, %v8148_v63 }
 0x175   : > { %v1813_v58 = vmul.f32 %v12501_v36, %v8189_v49  ;;  %v1814_v60 = vmul.f32 %v12502_v44, %v8189_v49  ;;  %v1815_v24 = vmul.f32 %v12503_v46, %v8189_v49  ;;  %v12504_v12 = vld [vmem:[#allocation8_spill] sm:$0xff]  ;;  %v12505_v29 = vld [vmem:[#allocation9_spill] sm:$0xff]  ;;  %v12506_v41 = vld [vmem:[#allocation10_spill] sm:$0xff]  ;;  %5092 = vmatprep.subr.mxu1 %v12443_v45  ;;  %v8398_v57 = vadd.f32 %v1808_v37, %v8157_v48 }
 0x176   : > { %v1816_v9 = vmul.f32 %v12504_v12, %v8189_v49  ;;  %v1817_v54 = vmul.f32 %v12505_v29, %v8189_v49  ;;  %v1818_v55 = vmul.f32 %v12506_v41, %v8189_v49  ;;  %v12507_v2 = vld [vmem:[#allocation11_spill] sm:$0xff]  ;;  %v8318_v42 = vld [vmem:[%s5411_s20 + $0x19b] sm:$0xff]  ;;  %v8332_v41 = vld [vmem:[%s5411_s20 + $0x1b3] sm:$0xff]  ;;  %v8401_v11 = vadd.f32 %v1809_v26, %v8160_v13 }
 0x177   : > { %v1819_v36 = vmul.f32 %v12507_v2, %v8189_v49  ;;  %12508 = vst [vmem:[#allocation39_spill] sm:$0xff] %v8318_v42  ;;  %v1820_v44 = vmul.f32 %v8318_v42, %v8189_v49  ;;  %v4882_v12 = vld [vmem:[%s11491_s7 + $0x120] sm:$0xff]  ;;  %12510 = vst [vmem:[#allocation43_spill] sm:$0xff] %v8332_v41  ;;  %v1822_v2 = vmul.f32 %v8332_v41, %v8189_v49  ;;  %v4881_v15 = vld [vmem:[%s11491_s7 + $0x118] sm:$0xff] }
 0x178   : > { %v8327_v8 = vld [vmem:[%s5411_s20 + $0x1a3] sm:$0xff]  ;;  %v8337_v46 = vld [vmem:[%s5411_s20 + $0x1bb] sm:$0xff]  ;;  %v8354_v41 = vadd.f32 %v1796_v40, %v8113_v38  ;;  %5093 = vmatpush3.msra.mxu1 %v4882_v12  ;;  %v8373_v38 = vadd.f32 %v1801_v17, %v8132_v53  ;;  %v4880_v43 = vld [vmem:[%s11491_s7 + $0x110] sm:$0xff]  ;;  %v8395_v53 = vadd.f32 %v1807_v16, %v8154_v23  ;;  %v8407_v25 = vadd.f32 %v1811_v35, %v8166_v33 }
 0x179   : > { %12509 = vst [vmem:[#allocation42_spill] sm:$0xff] %v8327_v8  ;;  %v1821_v29 = vmul.f32 %v8327_v8, %v8189_v49  ;;  %12511 = vst [vmem:[#allocation48_spill] sm:$0xff] %v8337_v46  ;;  %v1823_v42 = vmul.f32 %v8337_v46, %v8189_v49  ;;  %v8351_v8 = vadd.f32 %v1795_v22, %v8110_v62  ;;  %5094 = vmatprep.subr.mxu1 %v12443_v45  ;;  %v12512_v48 = vld [vmem:[#allocation92_spill] sm:$0xff]  ;;  %v12514_v33 = vld [vmem:[#allocation93_spill] sm:$0xff] }
 0x17a   : > { %v8361_v49 = vadd.f32 %v1797_v0, %v8120_v30  ;;  %v8370_v62 = vadd.f32 %v1800_v51, %v8129_v6  ;;  %v8382_v30 = vadd.f32 %v1804_v52, %v8141_v10  ;;  %v8392_v6 = vadd.f32 %v1806_v39, %v8151_v20  ;;  %5095 = vmatpush3.msra.mxu1 %v4881_v15  ;;  %v4879_v20 = vld [vmem:[%s11491_s7 + $0x108] sm:$0xff]  ;;  %v12520_v52 = vld [vmem:[#allocation96_spill] sm:$0xff]  ;;  %v12524_v40 = vld [vmem:[#allocation98_spill] sm:$0xff] }
 0x17b   : > { %v8404_v10 = vadd.f32 %v1810_v50, %v8163_v4  ;;  %v8410_v63 = vadd.f32 %v1812_v21, %v8169_v56  ;;  %5096 = vmatprep.subr.mxu1 %v12443_v45  ;;  %v8417_v23 = vadd.f32 %v1813_v58, %v8179_v34  ;;  %v8420_v13 = vadd.f32 %v1814_v60, %v12512_v48  ;;  %v12513_v50 = vld [vmem:[#allocation29_spill] sm:$0xff]  ;;  %v12516_v56 = vld [vmem:[#allocation94_spill] sm:$0xff]  ;;  %v12518_v37 = vld [vmem:[#allocation95_spill] sm:$0xff] }
 0x17c   : > { %v8423_v4 = vadd.f32 %v1815_v24, %v12513_v50  ;;  %v8426_v31 = vadd.f32 %v1816_v9, %v12514_v33  ;;  %5097 = vmatpush3.msra.mxu1 %v4880_v43  ;;  %v8429_v26 = vadd.f32 %v1817_v54, %v12516_v56  ;;  %v8432_v16 = vadd.f32 %v1818_v55, %v12518_v37  ;;  %v12522_v34 = vld [vmem:[#allocation97_spill] sm:$0xff]  ;;  %v4878_v24 = vld [vmem:[%s11491_s7 + $0x100] sm:$0xff]  ;;  %v12526_v54 = vld [vmem:[#allocation99_spill] sm:$0xff] }
 0x17d   : > { %v8435_v1 = vadd.f32 %v1819_v36, %v12520_v52  ;;  %v8438_v22 = vadd.f32 %v1820_v44, %v12522_v34  ;;  %5098 = vmatprep.subr.mxu1 %v12443_v45  ;;  %v8445_v0 = vadd.f32 %v1821_v29, %v12524_v40  ;;  %v8448_v5 = vadd.f32 %v1822_v2, %v12526_v54  ;;  %v12528_v55 = vld [vmem:[#allocation100_spill] sm:$0xff]  ;;  %v12530_v51 = vld [vmem:[#allocation101_spill] sm:$0xff]  ;;  %v12533_v21 = vld [vmem:[#allocation106_spill] sm:$0xff] }
 0x17e   : > { %12515 = vst [vmem:[#allocation31_spill] sm:$0xff] %v8426_v31  ;;  %12517 = vst [vmem:[#allocation53_spill] sm:$0xff] %v8429_v26  ;;  %v8451_v28 = vadd.f32 %v1823_v42, %v12528_v55  ;;  %v12531_v17 = vld [vmem:[#allocation104_spill] sm:$0xff]  ;;  %5099 = vmatpush3.msra.mxu1 %v4879_v20  ;;  %v12532_v39 = vld [vmem:[#allocation105_spill] sm:$0xff]  ;;  %v1894_v14 = vmul.f32 %v12533_v21, %v12530_v51 }
 0x17f   : > { %12519 = vst [vmem:[#allocation56_spill] sm:$0xff] %v8432_v16  ;;  %12521 = vst [vmem:[#allocation132_spill] sm:$0xff] %v8435_v1  ;;  %v1892_v18 = vmul.f32 %v12531_v17, %v12530_v51  ;;  %v1893_v35 = vmul.f32 %v12532_v39, %v12530_v51  ;;  %v12534_v58 = vld [vmem:[#allocation107_spill] sm:$0xff]  ;;  %v12535_v9 = vld [vmem:[#allocation109_spill] sm:$0xff]  ;;  %5100 = vmatprep.subr.mxu1 %v12443_v45 }
 0x180   : > { %12523 = vst [vmem:[#allocation133_spill] sm:$0xff] %v8438_v22  ;;  %12525 = vst [vmem:[#allocation134_spill] sm:$0xff] %v8445_v0  ;;  %v1895_v60 = vmul.f32 %v12534_v58, %v12530_v51  ;;  %v1896_v36 = vmul.f32 %v12535_v9, %v12530_v51  ;;  %v12536_v42 = vld [vmem:[#allocation110_spill] sm:$0xff]  ;;  %v12537_v12 = vld [vmem:[#allocation111_spill] sm:$0xff]  ;;  %5101 = vmatpush3.msra.mxu1 %v4878_v24 }
 0x181   : > { %12527 = vst [vmem:[#allocation13_spill] sm:$0xff] %v8448_v5  ;;  %12529 = vst [vmem:[#allocation108_spill] sm:$0xff] %v8451_v28  ;;  %v1897_v44 = vmul.f32 %v12536_v42, %v12530_v51  ;;  %v1898_v29 = vmul.f32 %v12537_v12, %v12530_v51  ;;  %v12538_v2 = vld [vmem:[#allocation112_spill] sm:$0xff]  ;;  %v12539_v43 = vld [vmem:[#allocation113_spill] sm:$0xff] }
 0x182   : > { %v1899_v15 = vmul.f32 %v12538_v2, %v12530_v51  ;;  %v1900_v20 = vmul.f32 %v12539_v43, %v12530_v51  ;;  %v12540_v48 = vld [vmem:[#allocation114_spill] sm:$0xff]  ;;  %v12541_v45 = vld [vmem:[#allocation115_spill] sm:$0xff]  ;;  %v12542_v56 = vld [vmem:[#allocation116_spill] sm:$0xff] }
 0x183   : > { %v1901_v50 = vmul.f32 %v12540_v48, %v12530_v51  ;;  %v1902_v33 = vmul.f32 %v12541_v45, %v12530_v51  ;;  %v1903_v37 = vmul.f32 %v12542_v56, %v12530_v51  ;;  %v12543_v52 = vld [vmem:[#allocation117_spill] sm:$0xff]  ;;  %v12544_v40 = vld [vmem:[#allocation18_spill] sm:$0xff]  ;;  %v12548_v21 = vld [vmem:[#allocation119_spill] sm:$0xff] }
 0x184   : > { %v1904_v34 = vmul.f32 %v12543_v52, %v12530_v51  ;;  %5103 = vmatmul.mubr.f32.vlgmr.msra.gmra.mxu1 %v12544_v40  ;;  %v8482_v54 = vld [vmem:[%s5411_s20 + $0x19d] sm:$0xff]  ;;  %v1907_v58 = vmul.f32 %v12548_v21, %v12530_v51  ;;  %v12549_v9 = vld [vmem:[#allocation120_spill] sm:$0xff]  ;;  %v8493_v12 = vld [vmem:[%s5411_s20 + $0x1a5] sm:$0xff] }
 0x185   : > { %12545 = vst [vmem:[#allocation54_spill] sm:$0xff] %v8482_v54  ;;  %v12546_v55 = vld [vmem:[#allocation14_spill] sm:$0xff]  ;;  %v1908_v42 = vmul.f32 %v12549_v9, %v12530_v51  ;;  %12550 = vst [vmem:[#allocation55_spill] sm:$0xff] %v8493_v12  ;;  %v8496_v2 = vld [vmem:[%s5411_s20 + $0x1b5] sm:$0xff] }
 0x186   : > { %v1905_v17 = vmul.f32 %v12546_v55, %v12530_v51  ;;  %v12547_v24 = vld [vmem:[#allocation118_spill] sm:$0xff]  ;;  %12551 = vst [vmem:[#allocation60_spill] sm:$0xff] %v8496_v2  ;;  %v12553_v48 = vld [vmem:[#allocation121_spill] sm:$0xff]  ;;  %v12555_v40 = vld [vmem:[#allocation123_spill] sm:$0xff] }
 0x187   : > { %v1906_v39 = vmul.f32 %v12547_v24, %v12530_v51  ;;  %v8499_v43 = vld [vmem:[%s5411_s20 + $0x1bd] sm:$0xff]  ;;  %v1909_v45 = vmul.f32 %v12553_v48, %v12530_v51  ;;  %v1911_v55 = vmul.f32 %v12555_v40, %v12530_v51  ;;  %v12556_v24 = vld [vmem:[#allocation124_spill] sm:$0xff]  ;;  %v12559_v0 = vld [vmem:[#allocation127_spill] sm:$0xff] }
 0x188   : > { %12552 = vst [vmem:[#allocation61_spill] sm:$0xff] %v8499_v43  ;;  %v12554_v56 = vld [vmem:[#allocation122_spill] sm:$0xff]  ;;  %v1912_v21 = vmul.f32 %v12556_v24, %v12530_v51  ;;  %v12557_v9 = vld [vmem:[#allocation125_spill] sm:$0xff]  ;;  %v1915_v22 = vmul.f32 %v12559_v0, %v12530_v51  ;;  %v12560_v48 = vld [vmem:[#allocation128_spill] sm:$0xff]  ;;  %v1922_v0 = vmul.f32 %v8496_v2, %v12530_v51  ;;  %v8544_v2 = vadd.f32 %v1896_v36, %v8354_v41 }
 0x189   : > { %v1910_v52 = vmul.f32 %v12554_v56, %v12530_v51  ;;  %v1913_v46 = vmul.f32 %v12557_v9, %v12530_v51  ;;  %v12558_v28 = vld [vmem:[#allocation126_spill] sm:$0xff]  ;;  %v1916_v1 = vmul.f32 %v12560_v48, %v12530_v51  ;;  %v12561_v56 = vld [vmem:[#allocation129_spill] sm:$0xff]  ;;  %v12563_v24 = vld [vmem:[#allocation131_spill] sm:$0xff]  ;;  %v1920_v9 = vmul.f32 %v8482_v54, %v12530_v51 }
 0x18a   : > { %v1914_v5 = vmul.f32 %v12558_v28, %v12530_v51  ;;  %v1917_v16 = vmul.f32 %v12561_v56, %v12530_v51  ;;  %v12562_v40 = vld [vmem:[#allocation130_spill] sm:$0xff]  ;;  %v1919_v31 = vmul.f32 %v12563_v24, %v12530_v51  ;;  %v1921_v28 = vmul.f32 %v8493_v12, %v12530_v51 }
 0x18b   : > { %v1918_v26 = vmul.f32 %v12562_v40, %v12530_v51  ;;  %v1923_v48 = vmul.f32 %v8499_v43, %v12530_v51  ;;  %v8532_v56 = vadd.f32 %v1892_v18, %v8342_v7  ;;  %v8535_v40 = vadd.f32 %v1893_v35, %v8345_v61  ;;  %v4574_v18 = vld [vmem:[%s5411_s20 + $0x79] sm:$0xff]  ;;  %v4576_v35 = vld [vmem:[%s5411_s20 + $0x91] sm:$0xff] }
 0x18c   : > { %v8538_v24 = vadd.f32 %v1894_v14, %v8348_v3  ;;  %v8541_v54 = vadd.f32 %v1895_v60, %v8351_v8  ;;  %v8547_v51 = vadd.f32 %v1897_v44, %v8361_v49  ;;  %v8550_v7 = vadd.f32 %v1898_v29, %v8364_v27  ;;  %v4578_v14 = vld [vmem:[%s5411_s20 + $0xa9] sm:$0xff]  ;;  %v4579_v60 = vld [vmem:[%s5411_s20 + $0xb1] sm:$0xff] }
 0x18d   : > { %v8553_v61 = vadd.f32 %v1899_v15, %v8367_v47  ;;  %v8556_v3 = vadd.f32 %v1900_v20, %v8370_v62  ;;  %v8559_v8 = vadd.f32 %v1901_v50, %v8373_v38  ;;  %v8562_v41 = vadd.f32 %v1902_v33, %v8376_v19  ;;  %v4581_v29 = vld [vmem:[%s5411_s20 + $0xc9] sm:$0xff]  ;;  %v4582_v15 = vld [vmem:[%s5411_s20 + $0xd9] sm:$0xff]  ;;  %v4584_v33 = vld [vmem:[%s5411_s20 + $0xf1] sm:$0xff] }
 0x18e   : > { %v8565_v49 = vadd.f32 %v1903_v37, %v8379_v32  ;;  %v8568_v27 = vadd.f32 %v1904_v34, %v8382_v30  ;;  %v8571_v47 = vadd.f32 %v1905_v17, %v8389_v59  ;;  %v8574_v62 = vadd.f32 %v1906_v39, %v8392_v6  ;;  %v4575_v32 = vld [vmem:[%s5411_s20 + $0x81] sm:$0xff]  ;;  %v12568_v20 = vld [vmem:[#allocation53_spill] sm:$0xff] }
 0x18f   : > { %v8577_v38 = vadd.f32 %v1907_v58, %v8395_v53  ;;  %v8580_v19 = vadd.f32 %v1908_v42, %v8398_v57  ;;  %v8586_v30 = vadd.f32 %v1909_v45, %v8401_v11  ;;  %v8589_v59 = vadd.f32 %v1910_v52, %v8404_v10  ;;  %v4577_v57 = vld [vmem:[%s5411_s20 + $0x99] sm:$0xff]  ;;  %v4587_v42 = vld [vmem:[%s5411_s20 + $0x111] sm:$0xff]  ;;  %v4588_v45 = vld [vmem:[%s5411_s20 + $0x121] sm:$0xff] }
 0x190   : > { %v8592_v6 = vadd.f32 %v1911_v55, %v8407_v25  ;;  %v8595_v53 = vadd.f32 %v1912_v21, %v8410_v63  ;;  %v8601_v36 = vadd.f32 %v1913_v46, %v8417_v23  ;;  %v8604_v11 = vadd.f32 %v1914_v5, %v8420_v13  ;;  %v12566_v25 = vld [vmem:[#allocation31_spill] sm:$0xff]  ;;  %v12570_v23 = vld [vmem:[#allocation56_spill] sm:$0xff]  ;;  %v4585_v37 = vld [vmem:[%s5411_s20 + $0xf9] sm:$0xff] }
 0x191   : > { %v8607_v10 = vadd.f32 %v1915_v22, %v8423_v4  ;;  %v8610_v44 = vadd.f32 %v1916_v1, %v12566_v25  ;;  %v4580_v63 = vld [vmem:[%s5411_s20 + $0xc1] sm:$0xff]  ;;  %v8616_v46 = vadd.f32 %v1917_v16, %v12568_v20  ;;  %v8619_v13 = vadd.f32 %v1918_v26, %v12570_v23  ;;  %v12572_v5 = vld [vmem:[#allocation132_spill] sm:$0xff]  ;;  %v12574_v22 = vld [vmem:[#allocation133_spill] sm:$0xff] }
 0x192   : > { %12564 = vst [vmem:[#allocation62_spill] sm:$0xff] %v8604_v11  ;;  %v8622_v4 = vadd.f32 %v1919_v31, %v12572_v5  ;;  %v8625_v50 = vadd.f32 %v1920_v9, %v12574_v22  ;;  %v4583_v1 = vld [vmem:[%s5411_s20 + $0xe1] sm:$0xff]  ;;  %v12578_v16 = vld [vmem:[#allocation13_spill] sm:$0xff]  ;;  %v12580_v26 = vld [vmem:[#allocation108_spill] sm:$0xff] }
 0x193   : > { %12565 = vst [vmem:[#allocation64_spill] sm:$0xff] %v8607_v10  ;;  %12567 = vst [vmem:[#allocation68_spill] sm:$0xff] %v8610_v44  ;;  %v12576_v34 = vld [vmem:[#allocation134_spill] sm:$0xff]  ;;  %v8634_v39 = vadd.f32 %v1922_v0, %v12578_v16  ;;  %v8637_v58 = vadd.f32 %v1923_v48, %v12580_v26  ;;  %v4586_v31 = vld [vmem:[%s5411_s20 + $0x109] sm:$0xff] }
 0x194   : > { %12569 = vst [vmem:[#allocation69_spill] sm:$0xff] %v8616_v46  ;;  %12571 = vst [vmem:[#allocation12_spill] sm:$0xff] %v8619_v13  ;;  %v8631_v17 = vadd.f32 %v1921_v28, %v12576_v34  ;;  %v12582_v52 = vld [vmem:[#allocation102_spill] sm:$0xff]  ;;  %v4589_v21 = vld [vmem:[%s5411_s20 + $0x129] sm:$0xff] }
 0x195   : > { %12573 = vst [vmem:[#allocation36_spill] sm:$0xff] %v8622_v4  ;;  %12575 = vst [vmem:[#allocation41_spill] sm:$0xff] %v8625_v50  ;;  %v1993_v55 = vmul.f32 %v4574_v18, %v12582_v52  ;;  %v4590_v9 = vld [vmem:[%s5411_s20 + $0x139] sm:$0xff]  ;;  %v4591_v25 = vld [vmem:[%s5411_s20 + $0x141] sm:$0xff]  ;;  %v1994_v28 = vmul.f32 %v4575_v32, %v12582_v52  ;;  %v1995_v20 = vmul.f32 %v4576_v35, %v12582_v52 }
 0x196   : > { %12577 = vst [vmem:[#allocation32_spill] sm:$0xff] %v8631_v17  ;;  %12579 = vst [vmem:[#allocation47_spill] sm:$0xff] %v8634_v39  ;;  %v1996_v0 = vmul.f32 %v4577_v57, %v12582_v52  ;;  %v1997_v48 = vmul.f32 %v4578_v14, %v12582_v52  ;;  %v4592_v23 = vld [vmem:[%s5411_s20 + $0x151] sm:$0xff]  ;;  %v4593_v5 = vld [vmem:[%s5411_s20 + $0x159] sm:$0xff]  ;;  %v1998_v34 = vmul.f32 %v4579_v60, %v12582_v52 }
 0x197   : > { %12581 = vst [vmem:[#allocation59_spill] sm:$0xff] %v8637_v58  ;;  %v4594_v22 = vld [vmem:[%s5411_s20 + $0x169] sm:$0xff]  ;;  %v1999_v18 = vmul.f32 %v4580_v63, %v12582_v52  ;;  %v2000_v16 = vmul.f32 %v4581_v29, %v12582_v52  ;;  %v2001_v32 = vmul.f32 %v4582_v15, %v12582_v52  ;;  %v4595_v35 = vld [vmem:[%s5411_s20 + $0x171] sm:$0xff]  ;;  %v4596_v26 = vld [vmem:[%s5411_s20 + $0x181] sm:$0xff]  ;;  %v2002_v43 = vmul.f32 %v4583_v1, %v12582_v52 }
 0x198   : > { %v4597_v57 = vld [vmem:[%s5411_s20 + $0x189] sm:$0xff]  ;;  %v2003_v14 = vmul.f32 %v4584_v33, %v12582_v52  ;;  %v2004_v12 = vmul.f32 %v4585_v37, %v12582_v52  ;;  %v2005_v60 = vmul.f32 %v4586_v31, %v12582_v52  ;;  %v2006_v63 = vmul.f32 %v4587_v42, %v12582_v52  ;;  %v4603_v17 = vld [vmem:[%s5411_s20 + $0x1d1] sm:$0xff]  ;;  %v4604_v50 = vld [vmem:[%s5411_s20 + $0x1e1] sm:$0xff] }
 0x199   : > { %v4602_v58 = vld [vmem:[%s5411_s20 + $0x1c9] sm:$0xff]  ;;  %v2007_v39 = vmul.f32 %v4588_v45, %v12582_v52  ;;  %v2008_v29 = vmul.f32 %v4589_v21, %v12582_v52  ;;  %v2009_v15 = vmul.f32 %v4590_v9, %v12582_v52  ;;  %v2010_v1 = vmul.f32 %v4591_v25, %v12582_v52  ;;  %v12584_v46 = vld [vmem:[#allocation89_spill] sm:$0xff]  ;;  %v12585_v25 = vld [vmem:[#allocation90_spill] sm:$0xff] }
 0x19a   : > { %v4605_v4 = vld [vmem:[%s5411_s20 + $0x1e9] sm:$0xff]  ;;  %v2011_v33 = vmul.f32 %v4592_v23, %v12582_v52  ;;  %v2012_v37 = vmul.f32 %v4593_v5, %v12582_v52  ;;  %v2013_v31 = vmul.f32 %v4594_v22, %v12582_v52  ;;  %v2014_v13 = vmul.f32 %v4595_v35, %v12582_v52 }
 0x19b   : > { %v2015_v42 = vmul.f32 %v4596_v26, %v12582_v52  ;;  %v2016_v45 = vmul.f32 %v4597_v57, %v12582_v52  ;;  %v12583_v21 = vld [vmem:[#allocation88_spill] sm:$0xff]  ;;  %v2018_v44 = vmul.f32 %v12584_v46, %v12582_v52  ;;  %v2019_v10 = vmul.f32 %v12585_v25, %v12582_v52  ;;  %v12586_v23 = vld [vmem:[#allocation91_spill] sm:$0xff] }
 0x19c   : > { %v2017_v9 = vmul.f32 %v12583_v21, %v12582_v52  ;;  %v2020_v5 = vmul.f32 %v12586_v23, %v12582_v52  ;;  %v2021_v22 = vmul.f32 %v4602_v58, %v12582_v52  ;;  %v2022_v35 = vmul.f32 %v4603_v17, %v12582_v52 }
 0x19d   : > { %v2023_v26 = vmul.f32 %v4604_v50, %v12582_v52  ;;  %v2024_v57 = vmul.f32 %v4605_v4, %v12582_v52  ;;  %v8692_v11 = vadd.f32 %v1993_v55, %v8532_v56  ;;  %v8695_v21 = vadd.f32 %v1994_v28, %v8535_v40  ;;  %v4610_v50 = vld [vmem:[%s5411_s20 + $0xab] sm:$0xff] }
 0x19e   : > { %v8698_v46 = vadd.f32 %v1995_v20, %v8538_v24  ;;  %v8701_v25 = vadd.f32 %v1996_v0, %v8541_v54  ;;  %v8704_v17 = vadd.f32 %v1997_v48, %v8544_v2  ;;  %v8707_v4 = vadd.f32 %v1998_v34, %v8547_v51  ;;  %v4613_v20 = vld [vmem:[%s5411_s20 + $0xcb] sm:$0xff]  ;;  %v4614_v0 = vld [vmem:[%s5411_s20 + $0xdb] sm:$0xff] }
 0x19f   : > { %v8710_v56 = vadd.f32 %v1999_v18, %v8550_v7  ;;  %v8713_v40 = vadd.f32 %v2000_v16, %v8553_v61  ;;  %v8716_v24 = vadd.f32 %v2001_v32, %v8556_v3  ;;  %v8719_v54 = vadd.f32 %v2002_v43, %v8559_v8  ;;  %v12593_v48 = vld [vmem:[#allocation69_spill] sm:$0xff]  ;;  %v12597_v18 = vld [vmem:[#allocation36_spill] sm:$0xff] }
 0x1a0   : > { %v8722_v2 = vadd.f32 %v2003_v14, %v8562_v41  ;;  %v8725_v51 = vadd.f32 %v2004_v12, %v8565_v49  ;;  %v8728_v7 = vadd.f32 %v2005_v60, %v8568_v27  ;;  %v8731_v61 = vadd.f32 %v2006_v63, %v8571_v47  ;;  %v4606_v41 = vld [vmem:[%s5411_s20 + $0x7b] sm:$0xff]  ;;  %v4607_v12 = vld [vmem:[%s5411_s20 + $0x83] sm:$0xff]  ;;  %v4608_v49 = vld [vmem:[%s5411_s20 + $0x93] sm:$0xff] }
 0x1a1   : > { %v8734_v3 = vadd.f32 %v2007_v39, %v8574_v62  ;;  %v8737_v43 = vadd.f32 %v2008_v29, %v8577_v38  ;;  %v8740_v8 = vadd.f32 %v2009_v15, %v8580_v19  ;;  %v8746_v27 = vadd.f32 %v2010_v1, %v8586_v30  ;;  %v4609_v19 = vld [vmem:[%s5411_s20 + $0x9b] sm:$0xff]  ;;  %v4611_v39 = vld [vmem:[%s5411_s20 + $0xb3] sm:$0xff]  ;;  %v4615_v60 = vld [vmem:[%s5411_s20 + $0xe3] sm:$0xff] }
 0x1a2   : > { %v8749_v47 = vadd.f32 %v2011_v33, %v8589_v59  ;;  %v8752_v62 = vadd.f32 %v2012_v37, %v8592_v6  ;;  %v8755_v38 = vadd.f32 %v2013_v31, %v8595_v53  ;;  %v8761_v58 = vadd.f32 %v2014_v13, %v8601_v36  ;;  %v12587_v30 = vld [vmem:[#allocation62_spill] sm:$0xff]  ;;  %v12589_v59 = vld [vmem:[#allocation64_spill] sm:$0xff]  ;;  %v12599_v32 = vld [vmem:[#allocation41_spill] sm:$0xff] }
 0x1a3   : > { %v8764_v52 = vadd.f32 %v2015_v42, %v12587_v30  ;;  %v8767_v55 = vadd.f32 %v2016_v45, %v12589_v59  ;;  %v12591_v6 = vld [vmem:[#allocation68_spill] sm:$0xff]  ;;  %v4612_v53 = vld [vmem:[%s5411_s20 + $0xc3] sm:$0xff]  ;;  %v8776_v36 = vadd.f32 %v2018_v44, %v12593_v48  ;;  %v8782_v16 = vadd.f32 %v2020_v5, %v12597_v18  ;;  %v4617_v29 = vld [vmem:[%s5411_s20 + $0xfb] sm:$0xff] }
 0x1a4   : > { %v8770_v28 = vadd.f32 %v2017_v9, %v12591_v6  ;;  %v12595_v13 = vld [vmem:[#allocation12_spill] sm:$0xff]  ;;  %v8785_v14 = vadd.f32 %v2021_v22, %v12599_v32  ;;  %v12603_v44 = vld [vmem:[#allocation47_spill] sm:$0xff]  ;;  %v4622_v22 = vld [vmem:[%s5411_s20 + $0x13b] sm:$0xff] }
 0x1a5   : > { %12588 = vst [vmem:[#allocation63_spill] sm:$0xff] %v8764_v52  ;;  %12590 = vst [vmem:[#allocation67_spill] sm:$0xff] %v8767_v55  ;;  %v8779_v34 = vadd.f32 %v2019_v10, %v12595_v13  ;;  %v4616_v63 = vld [vmem:[%s5411_s20 + $0xf3] sm:$0xff]  ;;  %v8794_v33 = vadd.f32 %v2023_v26, %v12603_v44  ;;  %v12605_v10 = vld [vmem:[#allocation59_spill] sm:$0xff] }
 0x1a6   : > { %12592 = vst [vmem:[#allocation70_spill] sm:$0xff] %v8770_v28  ;;  %12594 = vst [vmem:[#allocation71_spill] sm:$0xff] %v8776_v36  ;;  %v12601_v15 = vld [vmem:[#allocation32_spill] sm:$0xff]  ;;  %v8797_v37 = vadd.f32 %v2024_v57, %v12605_v10  ;;  %v4620_v45 = vld [vmem:[%s5411_s20 + $0x123] sm:$0xff] }
 0x1a7   : > { %12596 = vst [vmem:[#allocation72_spill] sm:$0xff] %v8779_v34  ;;  %12598 = vst [vmem:[#allocation73_spill] sm:$0xff] %v8782_v16  ;;  %v8791_v1 = vadd.f32 %v2022_v35, %v12601_v15  ;;  %v4618_v31 = vld [vmem:[%s5411_s20 + $0x10b] sm:$0xff]  ;;  %v4619_v42 = vld [vmem:[%s5411_s20 + $0x113] sm:$0xff] }
 0x1a8   : > { %12600 = vst [vmem:[#allocation74_spill] sm:$0xff] %v8785_v14  ;;  %12604 = vst [vmem:[#allocation33_spill] sm:$0xff] %v8794_v33  ;;  %v12607_v9 = vld [vmem:[#allocation103_spill] sm:$0xff]  ;;  %v4624_v6 = vld [vmem:[%s5411_s20 + $0x153] sm:$0xff] }
 0x1a9   : > { %12602 = vst [vmem:[#allocation75_spill] sm:$0xff] %v8791_v1  ;;  %12606 = vst [vmem:[#allocation49_spill] sm:$0xff] %v8797_v37  ;;  %v2093_v23 = vmul.f32 %v4606_v41, %v12607_v9  ;;  %v4621_v5 = vld [vmem:[%s5411_s20 + $0x12b] sm:$0xff]  ;;  %v4623_v30 = vld [vmem:[%s5411_s20 + $0x143] sm:$0xff]  ;;  %v2094_v35 = vmul.f32 %v4607_v12, %v12607_v9  ;;  %v2095_v59 = vmul.f32 %v4608_v49, %v12607_v9 }
 0x1aa   : > { %v2096_v26 = vmul.f32 %v4609_v19, %v12607_v9  ;;  %v2097_v57 = vmul.f32 %v4610_v50, %v12607_v9  ;;  %v4625_v48 = vld [vmem:[%s5411_s20 + $0x15b] sm:$0xff]  ;;  %v4626_v13 = vld [vmem:[%s5411_s20 + $0x16b] sm:$0xff]  ;;  %v2098_v18 = vmul.f32 %v4611_v39, %v12607_v9  ;;  %v2099_v41 = vmul.f32 %v4612_v53, %v12607_v9  ;;  %v4627_v49 = vld [vmem:[%s5411_s20 + $0x173] sm:$0xff] }
 0x1ab   : > { %v2100_v32 = vmul.f32 %v4613_v20, %v12607_v9  ;;  %v2101_v12 = vmul.f32 %v4614_v0, %v12607_v9  ;;  %v4628_v15 = vld [vmem:[%s5411_s20 + $0x183] sm:$0xff]  ;;  %v4629_v19 = vld [vmem:[%s5411_s20 + $0x18b] sm:$0xff]  ;;  %v2102_v44 = vmul.f32 %v4615_v60, %v12607_v9  ;;  %v2103_v50 = vmul.f32 %v4616_v63, %v12607_v9  ;;  %v4635_v1 = vld [vmem:[%s5411_s20 + $0x1d3] sm:$0xff] }
 0x1ac   : > { %v2104_v10 = vmul.f32 %v4617_v29, %v12607_v9  ;;  %v2105_v39 = vmul.f32 %v4618_v31, %v12607_v9  ;;  %v4634_v37 = vld [vmem:[%s5411_s20 + $0x1cb] sm:$0xff]  ;;  %v2106_v53 = vmul.f32 %v4619_v42, %v12607_v9  ;;  %v2107_v33 = vmul.f32 %v4620_v45, %v12607_v9  ;;  %v4636_v14 = vld [vmem:[%s5411_s20 + $0x1e3] sm:$0xff] }
 0x1ad   : > { %v2108_v20 = vmul.f32 %v4621_v5, %v12607_v9  ;;  %v2109_v0 = vmul.f32 %v4622_v22, %v12607_v9  ;;  %v4637_v16 = vld [vmem:[%s5411_s20 + $0x1eb] sm:$0xff]  ;;  %v2110_v60 = vmul.f32 %v4623_v30, %v12607_v9  ;;  %v2111_v63 = vmul.f32 %v4624_v6, %v12607_v9  ;;  %v12609_v36 = vld [vmem:[#allocation42_spill] sm:$0xff] }
 0x1ae   : > { %v2112_v29 = vmul.f32 %v4625_v48, %v12607_v9  ;;  %v2113_v31 = vmul.f32 %v4626_v13, %v12607_v9  ;;  %v2114_v34 = vmul.f32 %v4627_v49, %v12607_v9  ;;  %v2115_v42 = vmul.f32 %v4628_v15, %v12607_v9  ;;  %v12608_v5 = vld [vmem:[#allocation39_spill] sm:$0xff]  ;;  %v12611_v6 = vld [vmem:[#allocation48_spill] sm:$0xff] }
 0x1af   : > { %v2116_v45 = vmul.f32 %v4629_v19, %v12607_v9  ;;  %v2117_v22 = vmul.f32 %v12608_v5, %v12607_v9  ;;  %v2118_v28 = vmul.f32 %v12609_v36, %v12607_v9  ;;  %v12610_v30 = vld [vmem:[#allocation43_spill] sm:$0xff]  ;;  %v2120_v48 = vmul.f32 %v12611_v6, %v12607_v9 }
 0x1b0   : > { %v2119_v55 = vmul.f32 %v12610_v30, %v12607_v9  ;;  %v2121_v13 = vmul.f32 %v4634_v37, %v12607_v9  ;;  %v2122_v49 = vmul.f32 %v4635_v1, %v12607_v9  ;;  %v2123_v15 = vmul.f32 %v4636_v14, %v12607_v9  ;;  %v4638_v14 = vld [vmem:[%s5411_s20 + $0x7d] sm:$0xff]  ;;  %v4640_v37 = vld [vmem:[%s5411_s20 + $0x95] sm:$0xff] }
 0x1b1   : > { %v2124_v19 = vmul.f32 %v4637_v16, %v12607_v9  ;;  %v8852_v52 = vadd.f32 %v2093_v23, %v8692_v11  ;;  %v8855_v5 = vadd.f32 %v2094_v35, %v8695_v21  ;;  %v8858_v36 = vadd.f32 %v2095_v59, %v8698_v46  ;;  %v4643_v9 = vld [vmem:[%s5411_s20 + $0xb5] sm:$0xff] }
 0x1b2   : > { %v8861_v30 = vadd.f32 %v2096_v26, %v8701_v25  ;;  %v8864_v1 = vadd.f32 %v2097_v57, %v8704_v17  ;;  %v8867_v16 = vadd.f32 %v2098_v18, %v8707_v4  ;;  %v8870_v11 = vadd.f32 %v2099_v41, %v8710_v56  ;;  %v4645_v57 = vld [vmem:[%s5411_s20 + $0xcd] sm:$0xff]  ;;  %v4646_v18 = vld [vmem:[%s5411_s20 + $0xdd] sm:$0xff] }
 0x1b3   : > { %v8873_v21 = vadd.f32 %v2100_v32, %v8713_v40  ;;  %v8876_v46 = vadd.f32 %v2101_v12, %v8716_v24  ;;  %v8879_v25 = vadd.f32 %v2102_v44, %v8719_v54  ;;  %v8882_v17 = vadd.f32 %v2103_v50, %v8722_v2  ;;  %v12619_v41 = vld [vmem:[#allocation71_spill] sm:$0xff]  ;;  %v12623_v12 = vld [vmem:[#allocation73_spill] sm:$0xff]  ;;  %v12625_v50 = vld [vmem:[#allocation74_spill] sm:$0xff] }
 0x1b4   : > { %v8885_v4 = vadd.f32 %v2104_v10, %v8725_v51  ;;  %v8888_v56 = vadd.f32 %v2105_v39, %v8728_v7  ;;  %v8891_v40 = vadd.f32 %v2106_v53, %v8731_v61  ;;  %v8894_v24 = vadd.f32 %v2107_v33, %v8734_v3  ;;  %v4639_v51 = vld [vmem:[%s5411_s20 + $0x85] sm:$0xff]  ;;  %v4642_v33 = vld [vmem:[%s5411_s20 + $0xad] sm:$0xff]  ;;  %v4648_v53 = vld [vmem:[%s5411_s20 + $0xf5] sm:$0xff] }
 0x1b5   : > { %v8897_v54 = vadd.f32 %v2108_v20, %v8737_v43  ;;  %v8900_v2 = vadd.f32 %v2109_v0, %v8740_v8  ;;  %v8906_v7 = vadd.f32 %v2110_v60, %v8746_v27  ;;  %v8909_v61 = vadd.f32 %v2111_v63, %v8749_v47  ;;  %v4641_v8 = vld [vmem:[%s5411_s20 + $0x9d] sm:$0xff]  ;;  %v12613_v27 = vld [vmem:[#allocation63_spill] sm:$0xff] }
 0x1b6   : > { %v8912_v3 = vadd.f32 %v2112_v29, %v8752_v62  ;;  %v8915_v43 = vadd.f32 %v2113_v31, %v8755_v38  ;;  %v8921_v23 = vadd.f32 %v2114_v34, %v8761_v58  ;;  %v8924_v35 = vadd.f32 %v2115_v42, %v12613_v27  ;;  %v12615_v47 = vld [vmem:[#allocation67_spill] sm:$0xff]  ;;  %v12617_v62 = vld [vmem:[#allocation70_spill] sm:$0xff]  ;;  %v12621_v34 = vld [vmem:[#allocation72_spill] sm:$0xff] }
 0x1b7   : > { %v8927_v59 = vadd.f32 %v2116_v45, %v12615_v47  ;;  %v8930_v26 = vadd.f32 %v2117_v22, %v12617_v62  ;;  %v4644_v38 = vld [vmem:[%s5411_s20 + $0xc5] sm:$0xff]  ;;  %v8936_v58 = vadd.f32 %v2118_v28, %v12619_v41  ;;  %v8939_v32 = vadd.f32 %v2119_v55, %v12621_v34  ;;  %v4649_v20 = vld [vmem:[%s5411_s20 + $0xfd] sm:$0xff]  ;;  %v4650_v31 = vld [vmem:[%s5411_s20 + $0x10d] sm:$0xff] }
 0x1b8   : > { %12612 = vst [vmem:[#allocation50_spill] sm:$0xff] %v8921_v23  ;;  %12614 = vst [vmem:[#allocation28_spill] sm:$0xff] %v8924_v35  ;;  %v8942_v44 = vadd.f32 %v2120_v48, %v12623_v12  ;;  %v8945_v10 = vadd.f32 %v2121_v13, %v12625_v50  ;;  %v4647_v39 = vld [vmem:[%s5411_s20 + $0xe5] sm:$0xff]  ;;  %v12629_v28 = vld [vmem:[#allocation33_spill] sm:$0xff] }
 0x1b9   : > { %12616 = vst [vmem:[#allocation2_spill] sm:$0xff] %v8927_v59  ;;  %12618 = vst [vmem:[#allocation3_spill] sm:$0xff] %v8930_v26  ;;  %v12627_v0 = vld [vmem:[#allocation75_spill] sm:$0xff]  ;;  %v8954_v63 = vadd.f32 %v2123_v15, %v12629_v28  ;;  %v12631_v55 = vld [vmem:[#allocation49_spill] sm:$0xff] }
 0x1ba   : > { %12620 = vst [vmem:[#allocation4_spill] sm:$0xff] %v8936_v58  ;;  %12622 = vst [vmem:[#allocation5_spill] sm:$0xff] %v8939_v32  ;;  %v8951_v60 = vadd.f32 %v2122_v49, %v12627_v0  ;;  %v8957_v29 = vadd.f32 %v2124_v19, %v12631_v55  ;;  %v4651_v42 = vld [vmem:[%s5411_s20 + $0x115] sm:$0xff]  ;;  %v4652_v45 = vld [vmem:[%s5411_s20 + $0x125] sm:$0xff] }
 0x1bb   : > { %12624 = vst [vmem:[#allocation6_spill] sm:$0xff] %v8942_v44  ;;  %12626 = vst [vmem:[#allocation7_spill] sm:$0xff] %v8945_v10  ;;  %v12633_v22 = vld [vmem:[#allocation34_spill] sm:$0xff]  ;;  %v4653_v48 = vld [vmem:[%s5411_s20 + $0x12d] sm:$0xff] }
 0x1bc   : > { %12628 = vst [vmem:[#allocation8_spill] sm:$0xff] %v8951_v60  ;;  %12630 = vst [vmem:[#allocation9_spill] sm:$0xff] %v8954_v63  ;;  %v2193_v6 = vmul.f32 %v4638_v14, %v12633_v22  ;;  %v4654_v13 = vld [vmem:[%s5411_s20 + $0x13d] sm:$0xff]  ;;  %v4655_v27 = vld [vmem:[%s5411_s20 + $0x145] sm:$0xff]  ;;  %v2194_v49 = vmul.f32 %v4639_v51, %v12633_v22  ;;  %v2195_v47 = vmul.f32 %v4640_v37, %v12633_v22 }
 0x1bd   : > { %12632 = vst [vmem:[#allocation10_spill] sm:$0xff] %v8957_v29  ;;  %v2196_v15 = vmul.f32 %v4641_v8, %v12633_v22  ;;  %v2197_v19 = vmul.f32 %v4642_v33, %v12633_v22  ;;  %v4656_v62 = vld [vmem:[%s5411_s20 + $0x155] sm:$0xff]  ;;  %v4657_v41 = vld [vmem:[%s5411_s20 + $0x15d] sm:$0xff]  ;;  %v4658_v34 = vld [vmem:[%s5411_s20 + $0x16d] sm:$0xff]  ;;  %v2198_v12 = vmul.f32 %v4643_v9, %v12633_v22  ;;  %v2199_v14 = vmul.f32 %v4644_v38, %v12633_v22 }
 0x1be   : > { %v2200_v50 = vmul.f32 %v4645_v57, %v12633_v22  ;;  %v2201_v51 = vmul.f32 %v4646_v18, %v12633_v22  ;;  %v4659_v37 = vld [vmem:[%s5411_s20 + $0x175] sm:$0xff]  ;;  %v4660_v0 = vld [vmem:[%s5411_s20 + $0x185] sm:$0xff]  ;;  %v4661_v8 = vld [vmem:[%s5411_s20 + $0x18d] sm:$0xff]  ;;  %v2202_v28 = vmul.f32 %v4647_v39, %v12633_v22  ;;  %v2203_v33 = vmul.f32 %v4648_v53, %v12633_v22 }
 0x1bf   : > { %v2204_v55 = vmul.f32 %v4649_v20, %v12633_v22  ;;  %v2205_v9 = vmul.f32 %v4650_v31, %v12633_v22  ;;  %v4666_v29 = vld [vmem:[%s5411_s20 + $0x1cd] sm:$0xff]  ;;  %v2206_v38 = vmul.f32 %v4651_v42, %v12633_v22  ;;  %v2207_v63 = vmul.f32 %v4652_v45, %v12633_v22  ;;  %v4667_v60 = vld [vmem:[%s5411_s20 + $0x1d5] sm:$0xff]  ;;  %v4668_v10 = vld [vmem:[%s5411_s20 + $0x1e5] sm:$0xff] }
 0x1c0   : > { %v2208_v57 = vmul.f32 %v4653_v48, %v12633_v22  ;;  %v2209_v18 = vmul.f32 %v4654_v13, %v12633_v22  ;;  %v4669_v44 = vld [vmem:[%s5411_s20 + $0x1ed] sm:$0xff]  ;;  %v2210_v39 = vmul.f32 %v4655_v27, %v12633_v22  ;;  %v2211_v53 = vmul.f32 %v4656_v62, %v12633_v22  ;;  %v12634_v48 = vld [vmem:[#allocation54_spill] sm:$0xff]  ;;  %v12637_v62 = vld [vmem:[#allocation61_spill] sm:$0xff] }
 0x1c1   : > { %v2212_v20 = vmul.f32 %v4657_v41, %v12633_v22  ;;  %v2213_v31 = vmul.f32 %v4658_v34, %v12633_v22  ;;  %v2214_v32 = vmul.f32 %v4659_v37, %v12633_v22  ;;  %v2215_v42 = vmul.f32 %v4660_v0, %v12633_v22  ;;  %v12635_v58 = vld [vmem:[#allocation55_spill] sm:$0xff]  ;;  %v12636_v27 = vld [vmem:[#allocation60_spill] sm:$0xff] }
 0x1c2   : > { %v2216_v45 = vmul.f32 %v4661_v8, %v12633_v22  ;;  %v2217_v13 = vmul.f32 %v12634_v48, %v12633_v22  ;;  %v2218_v26 = vmul.f32 %v12635_v58, %v12633_v22  ;;  %v2219_v59 = vmul.f32 %v12636_v27, %v12633_v22 }
 0x1c3   : > { %v2220_v41 = vmul.f32 %v12637_v62, %v12633_v22  ;;  %v2221_v34 = vmul.f32 %v4666_v29, %v12633_v22  ;;  %v2222_v37 = vmul.f32 %v4667_v60, %v12633_v22  ;;  %v2223_v0 = vmul.f32 %v4668_v10, %v12633_v22 }
 0x1c4   : > { %v2224_v8 = vmul.f32 %v4669_v44, %v12633_v22  ;;  %v2225_v35 = vadd.f32 %v2193_v6, %v8852_v52  ;;  %v2226_v48 = vadd.f32 %v2194_v49, %v8855_v5  ;;  %v2227_v58 = vadd.f32 %v2195_v47, %v8858_v36  ;;  %v12638_v22 = vld [vmem:[#allocation50_spill] sm:$0xff]  ;;  %v12639_v6 = vld [vmem:[#allocation28_spill] sm:$0xff]  ;;  %v12641_v47 = vld [vmem:[#allocation3_spill] sm:$0xff] }
 0x1c5   : > { %v2228_v23 = vadd.f32 %v2196_v15, %v8861_v30  ;;  %v2229_v27 = vadd.f32 %v2197_v19, %v8864_v1  ;;  %v2230_v62 = vadd.f32 %v2198_v12, %v8867_v16  ;;  %v2231_v29 = vadd.f32 %v2199_v14, %v8870_v11  ;;  %v12640_v49 = vld [vmem:[#allocation2_spill] sm:$0xff]  ;;  %v12643_v15 = vld [vmem:[#allocation5_spill] sm:$0xff]  ;;  %v12645_v12 = vld [vmem:[#allocation7_spill] sm:$0xff] }
 0x1c6   : > { %v2232_v60 = vadd.f32 %v2200_v50, %v8873_v21  ;;  %v2233_v10 = vadd.f32 %v2201_v51, %v8876_v46  ;;  %v2234_v44 = vadd.f32 %v2202_v28, %v8879_v25  ;;  %v2235_v52 = vadd.f32 %v2203_v33, %v8882_v17  ;;  %v12644_v19 = vld [vmem:[#allocation6_spill] sm:$0xff]  ;;  %v12646_v14 = vld [vmem:[#allocation8_spill] sm:$0xff]  ;;  %v12647_v50 = vld [vmem:[#allocation9_spill] sm:$0xff] }
 0x1c7   : > { %v2236_v5 = vadd.f32 %v2204_v55, %v8885_v4  ;;  %v2237_v36 = vadd.f32 %v2205_v9, %v8888_v56  ;;  %v2238_v30 = vadd.f32 %v2206_v38, %v8891_v40  ;;  %v2239_v1 = vadd.f32 %v2207_v63, %v8894_v24  ;;  %v12642_v63 = vld [vmem:[#allocation4_spill] sm:$0xff]  ;;  %v12648_v51 = vld [vmem:[#allocation10_spill] sm:$0xff]  ;;  %v12649_v28 = vld [vmem:[#allocation35_spill] sm:$0xff] }
 0x1c8   : > { %v2240_v16 = vadd.f32 %v2208_v57, %v8897_v54  ;;  %v2241_v11 = vadd.f32 %v2209_v18, %v8900_v2  ;;  %v2242_v21 = vadd.f32 %v2210_v39, %v8906_v7  ;;  %v2243_v46 = vadd.f32 %v2211_v53, %v8909_v61 }
 0x1c9   : > { %v2244_v25 = vadd.f32 %v2212_v20, %v8912_v3  ;;  %v2245_v17 = vadd.f32 %v2213_v31, %v8915_v43  ;;  %v2246_v4 = vadd.f32 %v2214_v32, %v12638_v22  ;;  %v2247_v56 = vadd.f32 %v2215_v42, %v12639_v6  ;;  %v12695_v22 = vld [vmem:[#allocation37_spill] sm:$0xff]  ;;  %v9223_v6 = vld [vmem:[%s5424_s23 + $0xf0] sm:$0xff] }
 0x1ca   : > { %v2248_v40 = vadd.f32 %v2216_v45, %v12640_v49  ;;  %v2249_v24 = vadd.f32 %v2217_v13, %v12641_v47  ;;  %v2250_v54 = vadd.f32 %v2218_v26, %v12642_v63  ;;  %v2251_v2 = vadd.f32 %v2219_v59, %v12643_v15  ;;  %v2325_v49 = vld [vmem:[%s5424_s23] sm:$0xff]  ;;  %v2327_v15 = vld [vmem:[%s5424_s23 + $0x18] sm:$0xff]  ;;  %12697 = vst [vmem:[#allocation134_spill] sm:$0xff] %v9223_v6 }
 0x1cb   : > { %v2252_v7 = vadd.f32 %v2220_v41, %v12644_v19  ;;  %v2253_v61 = vadd.f32 %v2221_v34, %v12645_v12  ;;  %v2254_v3 = vadd.f32 %v2222_v37, %v12646_v14  ;;  %v2255_v43 = vadd.f32 %v2223_v0, %v12647_v50  ;;  %v2329_v19 = vld [vmem:[%s5424_s23 + $0x30] sm:$0xff]  ;;  %v9167_v50 = vld [vmem:[%s5424_s23 + $0x48] sm:$0xff]  ;;  %v9186_v63 = vld [vmem:[%s5424_s23 + $0x80] sm:$0xff] }
 0x1cc   : > { %v2256_v32 = vadd.f32 %v2224_v8, %v12648_v51  ;;  %v9044_v33 = vadd.f32 %v12649_v28, %v2225_v35  ;;  %v9047_v55 = vadd.f32 %v12649_v28, %v2226_v48  ;;  %v9050_v26 = vadd.f32 %v12649_v28, %v2227_v58  ;;  %12682 = vst [vmem:[#allocation123_spill] sm:$0xff] %v9167_v50  ;;  %v9173_v51 = vld [vmem:[%s5424_s23 + $0x60] sm:$0xff]  ;;  %v9180_v14 = vld [vmem:[%s5424_s23 + $0x68] sm:$0xff]  ;;  %v9196_v47 = vld [vmem:[%s5424_s23 + $0x98] sm:$0xff] }
 0x1cd   : > { %v9053_v59 = vadd.f32 %v12649_v28, %v2228_v23  ;;  %v9056_v9 = vadd.f32 %v12649_v28, %v2229_v27  ;;  %v9059_v38 = vadd.f32 %v12649_v28, %v2230_v62  ;;  %v9062_v57 = vadd.f32 %v12649_v28, %v2231_v29  ;;  %12684 = vst [vmem:[#allocation125_spill] sm:$0xff] %v9173_v51  ;;  %v9208_v12 = vld [vmem:[%s5424_s23 + $0xc0] sm:$0xff] }
 0x1ce   : > { %12650 = vst [vmem:[#allocation11_spill] sm:$0xff] %v9044_v33  ;;  %12651 = vst [vmem:[#allocation92_spill] sm:$0xff] %v9047_v55  ;;  %v9065_v35 = vadd.f32 %v12649_v28, %v2232_v60  ;;  %v9068_v18 = vadd.f32 %v12649_v28, %v2233_v10  ;;  %v9071_v39 = vadd.f32 %v12649_v28, %v2234_v44 }
 0x1cf   : > { %12652 = vst [vmem:[#allocation29_spill] sm:$0xff] %v9050_v26  ;;  %12653 = vst [vmem:[#allocation93_spill] sm:$0xff] %v9053_v59  ;;  %v9074_v23 = vadd.f32 %v12649_v28, %v2235_v52  ;;  %v9077_v53 = vadd.f32 %v12649_v28, %v2236_v5  ;;  %v9080_v20 = vadd.f32 %v12649_v28, %v2237_v36  ;;  %v9268_v36 = vld [vmem:[%s5424_s23 + $0x138] sm:$0xff] }
 0x1d0   : > { %12654 = vst [vmem:[#allocation94_spill] sm:$0xff] %v9056_v9  ;;  %12655 = vst [vmem:[#allocation95_spill] sm:$0xff] %v9059_v38  ;;  %v9083_v31 = vadd.f32 %v12649_v28, %v2238_v30  ;;  %v9086_v42 = vadd.f32 %v12649_v28, %v2239_v1  ;;  %v9089_v45 = vadd.f32 %v12649_v28, %v2240_v16  ;;  %v9244_v16 = vld [vmem:[%s5424_s23 + $0x110] sm:$0xff]  ;;  %v9247_v1 = vld [vmem:[%s5424_s23 + $0x120] sm:$0xff] }
 0x1d1   : > { %12656 = vst [vmem:[#allocation96_spill] sm:$0xff] %v9062_v57  ;;  %12657 = vst [vmem:[#allocation97_spill] sm:$0xff] %v9065_v35  ;;  %v9092_v13 = vadd.f32 %v12649_v28, %v2241_v11  ;;  %v9095_v41 = vadd.f32 %v12649_v28, %v2242_v21  ;;  %v9098_v34 = vadd.f32 %v12649_v28, %v2243_v46  ;;  %v9226_v46 = vld [vmem:[%s5424_s23 + $0xf8] sm:$0xff]  ;;  %v9241_v11 = vld [vmem:[%s5424_s23 + $0x108] sm:$0xff] }
 0x1d2   : > { %12658 = vst [vmem:[#allocation98_spill] sm:$0xff] %v9068_v18  ;;  %12659 = vst [vmem:[#allocation99_spill] sm:$0xff] %v9071_v39  ;;  %v9101_v37 = vadd.f32 %v12649_v28, %v2244_v25  ;;  %v9104_v0 = vadd.f32 %v12649_v28, %v2245_v17  ;;  %v9107_v8 = vadd.f32 %v12649_v28, %v2246_v4  ;;  %v9220_v25 = vld [vmem:[%s5424_s23 + $0xe0] sm:$0xff]  ;;  %v9265_v30 = vld [vmem:[%s5424_s23 + $0x128] sm:$0xff] }
 0x1d3   : > { %12660 = vst [vmem:[#allocation100_spill] sm:$0xff] %v9074_v23  ;;  %12661 = vst [vmem:[#allocation101_spill] sm:$0xff] %v9077_v53  ;;  %v9110_v48 = vadd.f32 %v12649_v28, %v2247_v56  ;;  %v9113_v58 = vadd.f32 %v12649_v28, %v2248_v40  ;;  %v9116_v27 = vadd.f32 %v12649_v28, %v2249_v24  ;;  %v9189_v24 = vld [vmem:[%s5424_s23 + $0x90] sm:$0xff]  ;;  %v9199_v40 = vld [vmem:[%s5424_s23 + $0xa8] sm:$0xff] }
 0x1d4   : > { %12662 = vst [vmem:[#allocation104_spill] sm:$0xff] %v9080_v20  ;;  %12663 = vst [vmem:[#allocation105_spill] sm:$0xff] %v9083_v31  ;;  %v9119_v62 = vadd.f32 %v12649_v28, %v2250_v54  ;;  %v9122_v29 = vadd.f32 %v12649_v28, %v2251_v2  ;;  %v9125_v60 = vadd.f32 %v12649_v28, %v2252_v7  ;;  %v2326_v54 = vld [vmem:[%s5424_s23 + $0x8] sm:$0xff]  ;;  %v2328_v2 = vld [vmem:[%s5424_s23 + $0x20] sm:$0xff] }
 0x1d5   : > { %12664 = vst [vmem:[#allocation106_spill] sm:$0xff] %v9086_v42  ;;  %12665 = vst [vmem:[#allocation107_spill] sm:$0xff] %v9089_v45  ;;  %v9128_v10 = vadd.f32 %v12649_v28, %v2253_v61  ;;  %v9131_v44 = vadd.f32 %v12649_v28, %v2254_v3  ;;  %v9134_v52 = vadd.f32 %v12649_v28, %v2255_v43  ;;  %v2330_v3 = vld [vmem:[%s5424_s23 + $0x38] sm:$0xff]  ;;  %v9170_v43 = vld [vmem:[%s5424_s23 + $0x50] sm:$0xff] }
 0x1d6   : > { %12666 = vst [vmem:[#allocation109_spill] sm:$0xff] %v9092_v13  ;;  %12667 = vst [vmem:[#allocation110_spill] sm:$0xff] %v9095_v41  ;;  %v9137_v5 = vadd.f32 %v12649_v28, %v2256_v32  ;;  %v9183_v7 = vld [vmem:[%s5424_s23 + $0x78] sm:$0xff]  ;;  %v9202_v56 = vld [vmem:[%s5424_s23 + $0xb0] sm:$0xff]  ;;  %v9217_v17 = vmul.f32 %v12695_v22, %v2325_v49  ;;  %v9229_v4 = vmul.f32 %v12695_v22, %v2326_v54 }
 0x1d7   : > { %12668 = vst [vmem:[#allocation111_spill] sm:$0xff] %v9098_v34  ;;  %12669 = vst [vmem:[#allocation112_spill] sm:$0xff] %v9101_v37  ;;  %v9211_v28 = vld [vmem:[%s5424_s23 + $0xc8] sm:$0xff]  ;;  %v9214_v61 = vld [vmem:[%s5424_s23 + $0xd8] sm:$0xff]  ;;  %v9232_v32 = vmul.f32 %v12695_v22, %v2327_v15  ;;  %v9235_v21 = vmul.f32 %v12695_v22, %v2328_v2  ;;  %v9238_v49 = vmul.f32 %v12695_v22, %v2329_v19 }
 0x1d8   : > { %12670 = vst [vmem:[#allocation113_spill] sm:$0xff] %v9104_v0  ;;  %12671 = vst [vmem:[#allocation114_spill] sm:$0xff] %v9107_v8  ;;  %v9250_v54 = vmul.f32 %v12695_v22, %v2330_v3  ;;  %v9254_v15 = vmul.f32 %v12695_v22, %v9167_v50  ;;  %v9258_v2 = vmul.f32 %v12695_v22, %v9170_v43  ;;  %v9315_v0 = vld [vmem:[%s5424_s23 + $0x170] sm:$0xff]  ;;  %v2425_v45 = vld [vmem:[%s5424_s23 + $0x3] sm:$0xff] }
 0x1d9   : > { %12672 = vst [vmem:[#allocation115_spill] sm:$0xff] %v9110_v48  ;;  %12673 = vst [vmem:[#allocation116_spill] sm:$0xff] %v9113_v58  ;;  %v9262_v19 = vmul.f32 %v12695_v22, %v9173_v51  ;;  %v9275_v3 = vmul.f32 %v12695_v22, %v9180_v14  ;;  %v9304_v58 = vmul.f32 %v12695_v22, %v9199_v40  ;;  %v2426_v42 = vld [vmem:[%s5424_s23 + $0xb] sm:$0xff]  ;;  %v2427_v39 = vld [vmem:[%s5424_s23 + $0x1b] sm:$0xff] }
 0x1da   : > { %12674 = vst [vmem:[#allocation117_spill] sm:$0xff] %v9116_v27  ;;  %12675 = vst [vmem:[#allocation18_spill] sm:$0xff] %v9119_v62  ;;  %v9296_v62 = vld [vmem:[%s5424_s23 + $0x168] sm:$0xff]  ;;  %v9300_v27 = vmul.f32 %v12695_v22, %v9196_v47  ;;  %v9308_v48 = vmul.f32 %v12695_v22, %v9202_v56  ;;  %v9312_v8 = vmul.f32 %v12695_v22, %v9208_v12  ;;  %v2429_v35 = vld [vmem:[%s5424_s23 + $0x33] sm:$0xff] }
 0x1db   : > { %12676 = vst [vmem:[#allocation14_spill] sm:$0xff] %v9122_v29  ;;  %12677 = vst [vmem:[#allocation118_spill] sm:$0xff] %v9125_v60  ;;  %v9290_v60 = vld [vmem:[%s5424_s23 + $0x150] sm:$0xff]  ;;  %v9293_v29 = vld [vmem:[%s5424_s23 + $0x158] sm:$0xff]  ;;  %v9319_v37 = vmul.f32 %v12695_v22, %v9211_v28  ;;  %v9323_v34 = vmul.f32 %v12695_v22, %v9214_v61  ;;  %v9327_v41 = vmul.f32 %v12695_v22, %v9220_v25 }
 0x1dc   : > { %12678 = vst [vmem:[#allocation119_spill] sm:$0xff] %v9128_v10  ;;  %12679 = vst [vmem:[#allocation120_spill] sm:$0xff] %v9131_v44  ;;  %v9283_v44 = vmul.f32 %v12695_v22, %v9186_v63  ;;  %v9287_v10 = vmul.f32 %v12695_v22, %v9189_v24  ;;  %v9331_v13 = vmul.f32 %v12695_v22, %v9223_v6  ;;  %v2428_v18 = vld [vmem:[%s5424_s23 + $0x23] sm:$0xff]  ;;  %v2430_v26 = vld [vmem:[%s5424_s23 + $0x3b] sm:$0xff] }
 0x1dd   : > { %12680 = vst [vmem:[#allocation121_spill] sm:$0xff] %v9134_v52  ;;  %12681 = vst [vmem:[#allocation122_spill] sm:$0xff] %v9137_v5  ;;  %v9271_v5 = vld [vmem:[%s5424_s23 + $0x140] sm:$0xff]  ;;  %v9279_v52 = vmul.f32 %v12695_v22, %v9183_v7  ;;  %v9337_v31 = vmul.f32 %v12695_v22, %v9226_v46  ;;  %v9341_v20 = vmul.f32 %v12695_v22, %v9241_v11  ;;  %v9420_v6 = vld [vmem:[%s5424_s23 + $0x93] sm:$0xff] }
 0x1de   : > { %12683 = vst [vmem:[#allocation124_spill] sm:$0xff] %v9170_v43  ;;  %12685 = vst [vmem:[#allocation126_spill] sm:$0xff] %v9180_v14  ;;  %v9345_v53 = vmul.f32 %v12695_v22, %v9244_v16  ;;  %v9349_v23 = vmul.f32 %v12695_v22, %v9247_v1  ;;  %v9356_v57 = vmul.f32 %v12695_v22, %v9265_v30  ;;  %v9475_v14 = vld [vmem:[%s5424_s23 + $0x113] sm:$0xff]  ;;  %v9480_v51 = vld [vmem:[%s5424_s23 + $0x123] sm:$0xff] }
 0x1df   : > { %12686 = vst [vmem:[#allocation127_spill] sm:$0xff] %v9183_v7  ;;  %12687 = vst [vmem:[#allocation128_spill] sm:$0xff] %v9186_v63  ;;  %v9360_v38 = vmul.f32 %v12695_v22, %v9268_v36  ;;  %v9364_v9 = vmul.f32 %v12695_v22, %v9271_v5  ;;  %v9368_v59 = vmul.f32 %v12695_v22, %v9290_v60  ;;  %v9465_v63 = vld [vmem:[%s5424_s23 + $0xfb] sm:$0xff]  ;;  %v9470_v7 = vld [vmem:[%s5424_s23 + $0x10b] sm:$0xff] }
 0x1e0   : > { %12688 = vst [vmem:[#allocation129_spill] sm:$0xff] %v9189_v24  ;;  %12689 = vst [vmem:[#allocation130_spill] sm:$0xff] %v9196_v47  ;;  %v9373_v55 = vmul.f32 %v12695_v22, %v9293_v29  ;;  %v9377_v33 = vmul.f32 %v12695_v22, %v9296_v62  ;;  %v9455_v47 = vld [vmem:[%s5424_s23 + $0xe3] sm:$0xff]  ;;  %v9460_v24 = vld [vmem:[%s5424_s23 + $0xf3] sm:$0xff] }
 0x1e1   : > { %12690 = vst [vmem:[#allocation131_spill] sm:$0xff] %v9199_v40  ;;  %12691 = vst [vmem:[#allocation31_spill] sm:$0xff] %v9202_v56  ;;  %v9445_v56 = vld [vmem:[%s5424_s23 + $0xcb] sm:$0xff]  ;;  %v9450_v40 = vld [vmem:[%s5424_s23 + $0xdb] sm:$0xff] }
 0x1e2   : > { %12692 = vst [vmem:[#allocation53_spill] sm:$0xff] %v9208_v12  ;;  %12693 = vst [vmem:[#allocation56_spill] sm:$0xff] %v9211_v28  ;;  %v9435_v28 = vld [vmem:[%s5424_s23 + $0xb3] sm:$0xff]  ;;  %v9440_v12 = vld [vmem:[%s5424_s23 + $0xc3] sm:$0xff] }
 0x1e3   : > { %12694 = vst [vmem:[#allocation132_spill] sm:$0xff] %v9214_v61  ;;  %12696 = vst [vmem:[#allocation133_spill] sm:$0xff] %v9220_v25  ;;  %v9425_v25 = vld [vmem:[%s5424_s23 + $0x9b] sm:$0xff]  ;;  %v9430_v61 = vld [vmem:[%s5424_s23 + $0xab] sm:$0xff] }
 0x1e4   : > { %12698 = vst [vmem:[#allocation13_spill] sm:$0xff] %v9226_v46  ;;  %12699 = vst [vmem:[#allocation108_spill] sm:$0xff] %v9241_v11  ;;  %v9390_v11 = vld [vmem:[%s5424_s23 + $0x4b] sm:$0xff]  ;;  %v9415_v46 = vld [vmem:[%s5424_s23 + $0x83] sm:$0xff] }
 0x1e5   : > { %12700 = vst [vmem:[#allocation102_spill] sm:$0xff] %v9244_v16  ;;  %12701 = vst [vmem:[#allocation88_spill] sm:$0xff] %v9247_v1  ;;  %v9485_v43 = vld [vmem:[%s5424_s23 + $0x12b] sm:$0xff]  ;;  %v9490_v50 = vld [vmem:[%s5424_s23 + $0x13b] sm:$0xff] }
 0x1e6   : > { %12702 = vst [vmem:[#allocation89_spill] sm:$0xff] %v9265_v30  ;;  %12703 = vst [vmem:[#allocation90_spill] sm:$0xff] %v9268_v36  ;;  %v12717_v36 = vld [vmem:[#allocation38_spill] sm:$0xff] }
 0x1e7   : > { %12704 = vst [vmem:[#allocation91_spill] sm:$0xff] %v9271_v5  ;;  %12705 = vst [vmem:[#allocation62_spill] sm:$0xff] %v9290_v60  ;;  %v9381_v5 = vmul.f32 %v12695_v22, %v9315_v0  ;;  %v2461_v30 = vmul.f32 %v12717_v36, %v2425_v45  ;;  %v2462_v60 = vmul.f32 %v12717_v36, %v2426_v42  ;;  %v9395_v45 = vld [vmem:[%s5424_s23 + $0x53] sm:$0xff]  ;;  %v9400_v42 = vld [vmem:[%s5424_s23 + $0x63] sm:$0xff] }
 0x1e8   : > { %12706 = vst [vmem:[#allocation64_spill] sm:$0xff] %v9293_v29  ;;  %12707 = vst [vmem:[#allocation68_spill] sm:$0xff] %v9296_v62  ;;  %v2463_v1 = vmul.f32 %v12717_v36, %v2427_v39  ;;  %v2464_v29 = vmul.f32 %v12717_v36, %v2428_v18  ;;  %v2465_v16 = vmul.f32 %v12717_v36, %v2429_v35  ;;  %v9405_v18 = vld [vmem:[%s5424_s23 + $0x6b] sm:$0xff] }
 0x1e9   : > { %12708 = vst [vmem:[#allocation69_spill] sm:$0xff] %v9315_v0  ;;  %12709 = vst [vmem:[#allocation12_spill] sm:$0xff] %v9349_v23  ;;  %v2466_v62 = vmul.f32 %v12717_v36, %v2430_v26  ;;  %v2467_v22 = vmul.f32 %v9390_v11, %v12717_v36  ;;  %v2468_v39 = vmul.f32 %v9395_v45, %v12717_v36  ;;  %v9410_v0 = vld [vmem:[%s5424_s23 + $0x7b] sm:$0xff] }
 0x1ea   : > { %12710 = vst [vmem:[#allocation36_spill] sm:$0xff] %v9356_v57  ;;  %12711 = vst [vmem:[#allocation41_spill] sm:$0xff] %v9360_v38  ;;  %v2469_v35 = vmul.f32 %v9400_v42, %v12717_v36  ;;  %v2470_v26 = vmul.f32 %v9405_v18, %v12717_v36  ;;  %v9520_v38 = vadd.f32 %v2461_v30, %v9217_v17 }
 0x1eb   : > { %12712 = vst [vmem:[#allocation32_spill] sm:$0xff] %v9364_v9  ;;  %12713 = vst [vmem:[#allocation47_spill] sm:$0xff] %v9368_v59  ;;  %v9510_v59 = vld [vmem:[%s5424_s23 + $0x16b] sm:$0xff]  ;;  %v9515_v9 = vld [vmem:[%s5424_s23 + $0x173] sm:$0xff]  ;;  %v9526_v57 = vadd.f32 %v2463_v1, %v9232_v32  ;;  %v9532_v23 = vadd.f32 %v2465_v16, %v9238_v49  ;;  %v9541_v30 = vadd.f32 %v2468_v39, %v9258_v2 }
 0x1ec   : > { %12714 = vst [vmem:[#allocation59_spill] sm:$0xff] %v9373_v55  ;;  %12715 = vst [vmem:[#allocation103_spill] sm:$0xff] %v9377_v33  ;;  %v9500_v33 = vld [vmem:[%s5424_s23 + $0x153] sm:$0xff]  ;;  %v9505_v55 = vld [vmem:[%s5424_s23 + $0x15b] sm:$0xff]  ;;  %v9547_v1 = vadd.f32 %v2470_v26, %v9275_v3 }
 0x1ed   : > { %12716 = vst [vmem:[#allocation39_spill] sm:$0xff] %v9381_v5  ;;  %12718 = vst [vmem:[#allocation42_spill] sm:$0xff] %v9390_v11  ;;  %v2471_v11 = vmul.f32 %v9410_v0, %v12717_v36  ;;  %v9495_v5 = vld [vmem:[%s5424_s23 + $0x143] sm:$0xff]  ;;  %v9643_v39 = vld [vmem:[%s5424_s23 + $0x6e] sm:$0xff] }
 0x1ee   : > { %12719 = vst [vmem:[#allocation43_spill] sm:$0xff] %v9395_v45  ;;  %12720 = vst [vmem:[#allocation48_spill] sm:$0xff] %v9400_v42  ;;  %v2472_v45 = vmul.f32 %v9415_v46, %v12717_v36  ;;  %v2473_v42 = vmul.f32 %v9420_v6, %v12717_v36  ;;  %v2530_v49 = vld [vmem:[%s5424_s23 + $0x3e] sm:$0xff] }
 0x1ef   : > { %12721 = vst [vmem:[#allocation63_spill] sm:$0xff] %v9405_v18  ;;  %12722 = vst [vmem:[#allocation67_spill] sm:$0xff] %v9410_v0  ;;  %v2474_v18 = vmul.f32 %v9425_v25, %v12717_v36  ;;  %v2475_v0 = vmul.f32 %v9430_v61, %v12717_v36 }
 0x1f0   : > { %12723 = vst [vmem:[#allocation70_spill] sm:$0xff] %v9415_v46  ;;  %12724 = vst [vmem:[#allocation71_spill] sm:$0xff] %v9420_v6  ;;  %v2476_v46 = vmul.f32 %v9435_v28, %v12717_v36  ;;  %v2477_v6 = vmul.f32 %v9440_v12, %v12717_v36  ;;  %v9553_v16 = vadd.f32 %v2472_v45, %v9283_v44  ;;  %v9640_v45 = vld [vmem:[%s5424_s23 + $0x66] sm:$0xff] }
 0x1f1   : > { %12725 = vst [vmem:[#allocation72_spill] sm:$0xff] %v9425_v25  ;;  %12726 = vst [vmem:[#allocation73_spill] sm:$0xff] %v9430_v61  ;;  %v2478_v25 = vmul.f32 %v9445_v56, %v12717_v36  ;;  %v2479_v61 = vmul.f32 %v9450_v40, %v12717_v36  ;;  %v9562_v17 = vadd.f32 %v2475_v0, %v9304_v58  ;;  %v2525_v58 = vld [vmem:[%s5424_s23 + $0x6] sm:$0xff] }
 0x1f2   : > { %12727 = vst [vmem:[#allocation74_spill] sm:$0xff] %v9435_v28  ;;  %12728 = vst [vmem:[#allocation75_spill] sm:$0xff] %v9440_v12  ;;  %v2480_v28 = vmul.f32 %v9455_v47, %v12717_v36  ;;  %v2481_v12 = vmul.f32 %v9460_v24, %v12717_v36  ;;  %v12751_v32 = vld [vmem:[#allocation32_spill] sm:$0xff]  ;;  %v12755_v2 = vld [vmem:[#allocation47_spill] sm:$0xff] }
 0x1f3   : > { %12729 = vst [vmem:[#allocation33_spill] sm:$0xff] %v9445_v56  ;;  %12730 = vst [vmem:[#allocation49_spill] sm:$0xff] %v9450_v40  ;;  %v2482_v56 = vmul.f32 %v9465_v63, %v12717_v36  ;;  %v2483_v40 = vmul.f32 %v9470_v7, %v12717_v36  ;;  %v9577_v44 = vadd.f32 %v2478_v25, %v9319_v37  ;;  %v2527_v25 = vld [vmem:[%s5424_s23 + $0x1e] sm:$0xff]  ;;  %v12759_v3 = vld [vmem:[#allocation103_spill] sm:$0xff] }
 0x1f4   : > { %12731 = vst [vmem:[#allocation34_spill] sm:$0xff] %v9455_v47  ;;  %12732 = vst [vmem:[#allocation54_spill] sm:$0xff] %v9460_v24  ;;  %v2484_v47 = vmul.f32 %v9475_v14, %v12717_v36  ;;  %v2485_v24 = vmul.f32 %v9480_v51, %v12717_v36  ;;  %v9580_v0 = vadd.f32 %v2479_v61, %v9323_v34  ;;  %v2526_v34 = vld [vmem:[%s5424_s23 + $0xe] sm:$0xff] }
 0x1f5   : > { %12733 = vst [vmem:[#allocation55_spill] sm:$0xff] %v9465_v63  ;;  %12734 = vst [vmem:[#allocation60_spill] sm:$0xff] %v9470_v7  ;;  %v2486_v63 = vmul.f32 %v9485_v43, %v12717_v36  ;;  %v2487_v7 = vmul.f32 %v9490_v50, %v12717_v36 }
 0x1f6   : > { %12735 = vst [vmem:[#allocation61_spill] sm:$0xff] %v9475_v14  ;;  %12736 = vst [vmem:[#allocation50_spill] sm:$0xff] %v9480_v51  ;;  %v2488_v14 = vmul.f32 %v9495_v5, %v12717_v36  ;;  %v2489_v51 = vmul.f32 %v9500_v33, %v12717_v36  ;;  %v9596_v37 = vadd.f32 %v2484_v47, %v9345_v53  ;;  %v12747_v53 = vld [vmem:[#allocation36_spill] sm:$0xff]  ;;  %v12749_v47 = vld [vmem:[#allocation41_spill] sm:$0xff] }
 0x1f7   : > { %12737 = vst [vmem:[#allocation28_spill] sm:$0xff] %v9485_v43  ;;  %12738 = vst [vmem:[#allocation2_spill] sm:$0xff] %v9490_v50  ;;  %v2490_v43 = vmul.f32 %v9505_v55, %v12717_v36  ;;  %v2491_v50 = vmul.f32 %v9510_v59, %v12717_v36  ;;  %v9615_v61 = vadd.f32 %v2487_v7, %v12749_v47  ;;  %v9673_v47 = vld [vmem:[%s5424_s23 + $0xb6] sm:$0xff] }
 0x1f8   : > { %12739 = vst [vmem:[#allocation3_spill] sm:$0xff] %v9495_v5  ;;  %12740 = vst [vmem:[#allocation4_spill] sm:$0xff] %v9500_v33  ;;  %v2492_v5 = vmul.f32 %v9515_v9, %v12717_v36  ;;  %v9523_v33 = vadd.f32 %v2462_v60, %v9229_v4  ;;  %v9538_v36 = vadd.f32 %v2467_v22, %v9254_v15  ;;  %v9625_v15 = vld [vmem:[%s5424_s23 + $0x56] sm:$0xff]  ;;  %v12761_v22 = vld [vmem:[#allocation39_spill] sm:$0xff] }
 0x1f9   : > { %12741 = vst [vmem:[#allocation5_spill] sm:$0xff] %v9505_v55  ;;  %12742 = vst [vmem:[#allocation6_spill] sm:$0xff] %v9510_v59  ;;  %v9529_v55 = vadd.f32 %v2464_v29, %v9235_v21  ;;  %v9535_v59 = vadd.f32 %v2466_v62, %v9250_v54  ;;  %v9544_v60 = vadd.f32 %v2469_v35, %v9262_v19  ;;  %v9622_v54 = vld [vmem:[%s5424_s23 + $0x4e] sm:$0xff]  ;;  %v9649_v35 = vld [vmem:[%s5424_s23 + $0x86] sm:$0xff] }
 0x1fa   : > { %12743 = vst [vmem:[#allocation7_spill] sm:$0xff] %v9515_v9  ;;  %v9550_v29 = vadd.f32 %v2471_v11, %v9279_v52  ;;  %v9556_v62 = vadd.f32 %v2473_v42, %v9287_v10  ;;  %v9559_v21 = vadd.f32 %v2474_v18, %v9300_v27  ;;  %v9565_v4 = vadd.f32 %v2476_v46, %v9308_v48  ;;  %v380_v10 = vld [vmem:[%s11487_s3 + $0x1c] sm:$0x7]  ;;  %v381_v27 = vld [vmem:[%s11487_s3 + $0x20] sm:$0x7]  ;;  %v12757_v19 = vld [vmem:[#allocation59_spill] sm:$0xff] }
 0x1fb   : > { %v9568_v52 = vadd.f32 %v2477_v6, %v9312_v8  ;;  %v9583_v48 = vadd.f32 %v2480_v28, %v9327_v41  ;;  %v9586_v8 = vadd.f32 %v2481_v12, %v9331_v13  ;;  %v9590_v11 = vadd.f32 %v2482_v56, %v9337_v31  ;;  %v2528_v41 = vld [vmem:[%s5424_s23 + $0x26] sm:$0xff]  ;;  %v2529_v6 = vld [vmem:[%s5424_s23 + $0x36] sm:$0xff]  ;;  %12750 = vst [vmem:[#allocation10_spill] sm:$0xff] %v9615_v61  ;;  %v9646_v42 = vld [vmem:[%s5424_s23 + $0x7e] sm:$0xff] }
 0x1fc   : > { %v9593_v46 = vadd.f32 %v2483_v40, %v9341_v20  ;;  %v5194_v13 = vld [vmem:[%s11487_s3 + $0x18] sm:$0x7]  ;;  %v12744_v12 = vld [vmem:[#allocation26_spill] sm:$0xff]  ;;  %v12745_v20 = vld [vmem:[#allocation12_spill] sm:$0xff]  ;;  %v9612_v40 = vadd.f32 %v2486_v63, %v12747_v53  ;;  %v9618_v28 = vadd.f32 %v2488_v14, %v12751_v32  ;;  %12753 = vst [vmem:[#allocation37_spill] sm:$0xff] %v9622_v54  ;;  %v9631_v63 = vadd.f32 %v2490_v43, %v12757_v19 }
 0x1fd   : > { %v9606_v31 = vrot.slane %v5194_v13, %v12744_v12  ;;  %v9609_v56 = vadd.f32 %v2485_v24, %v12745_v20  ;;  %12754 = vst [vmem:[#allocation38_spill] sm:$0xff] %v9625_v15  ;;  %v9628_v24 = vadd.f32 %v2489_v51, %v12755_v2  ;;  %v9634_v7 = vadd.f32 %v2491_v50, %v12759_v3  ;;  %v9652_v51 = vld [vmem:[%s5424_s23 + $0x96] sm:$0xff]  ;;  %v9655_v43 = vld [vmem:[%s5424_s23 + $0x9e] sm:$0xff]  ;;  %v9670_v53 = vld [vmem:[%s5424_s23 + $0xae] sm:$0xff] }
 0x1fe   : > { %12748 = vst [vmem:[#allocation9_spill] sm:$0xff] %v9612_v40  ;;  %12752 = vst [vmem:[#allocation35_spill] sm:$0xff] %v9618_v28  ;;  %v9637_v14 = vadd.f32 %v2492_v5, %v12761_v22  ;;  %v12769_v50 = vld [vmem:[#allocation24_spill] sm:$0xff]  ;;  %v12771_v5 = vld [vmem:[#allocation25_spill] sm:$0xff]  ;;  %v9664_v13 = vrot.slane %v380_v10, %v12744_v12 }
 0x1ff   : > { %12746 = vst [vmem:[#allocation8_spill] sm:$0xff] %v9609_v56  ;;  %12756 = vst [vmem:[#allocation26_spill] sm:$0xff] %v9628_v24  ;;  %v9658_v18 = vrot.slane %v380_v10, %v12769_v50  ;;  %v9661_v26 = vrot.slane %v380_v10, %v12771_v5  ;;  %v9667_v20 = vrot.slane %v381_v27, %v12769_v50  ;;  %v9676_v32 = vld [vmem:[%s5424_s23 + $0xc6] sm:$0xff]  ;;  %v5195_v3 = vld [vmem:[%s11488_s4] sm:$0x7] }
 0x200   : > { %12758 = vst [vmem:[#allocation12_spill] sm:$0xff] %v9631_v63  ;;  %12760 = vst [vmem:[#allocation36_spill] sm:$0xff] %v9634_v7  ;;  %v2561_v2 = vmul.f32 %v9606_v31, %v2525_v58  ;;  %v9680_v19 = vrot.slane %v381_v27, %v12771_v5  ;;  %v9683_v10 = vrot.slane %v381_v27, %v12744_v12  ;;  %v9692_v50 = vld [vmem:[%s5424_s23 + $0xce] sm:$0xff]  ;;  %v9698_v58 = vld [vmem:[%s5424_s23 + $0xe6] sm:$0xff] }
 0x201   : > { %12762 = vst [vmem:[#allocation41_spill] sm:$0xff] %v9637_v14  ;;  %12763 = vst [vmem:[#allocation32_spill] sm:$0xff] %v9640_v45  ;;  %v9689_v22 = vrot.slane %v5195_v3, %v12744_v12  ;;  %v2562_v5 = vmul.f32 %v9606_v31, %v2526_v34  ;;  %v2563_v27 = vmul.f32 %v9606_v31, %v2527_v25  ;;  %v9705_v12 = vld [vmem:[%s5424_s23 + $0xf6] sm:$0xff]  ;;  %v9708_v3 = vld [vmem:[%s5424_s23 + $0xfe] sm:$0xff] }
 0x202   : > { %12764 = vst [vmem:[#allocation47_spill] sm:$0xff] %v9643_v39  ;;  %12765 = vst [vmem:[#allocation59_spill] sm:$0xff] %v9646_v42  ;;  %v2567_v34 = vmul.f32 %v9606_v31, %v9622_v54  ;;  %v2568_v25 = vmul.f32 %v9606_v31, %v9625_v15  ;;  %v9724_v9 = vld [vmem:[%s5424_s23 + $0x126] sm:$0xff]  ;;  %v2571_v54 = vmul.f32 %v9606_v31, %v9646_v42  ;;  %v9744_v7 = vld [vmem:[%s5424_s23 + $0x156] sm:$0xff] }
 0x203   : > { %12766 = vst [vmem:[#allocation103_spill] sm:$0xff] %v9649_v35  ;;  %12767 = vst [vmem:[#allocation39_spill] sm:$0xff] %v9652_v51  ;;  %v2572_v15 = vmul.f32 %v9606_v31, %v9649_v35  ;;  %v9741_v14 = vld [vmem:[%s5424_s23 + $0x146] sm:$0xff]  ;;  %v2574_v63 = vmul.f32 %v9606_v31, %v9655_v43  ;;  %v2576_v42 = vmul.f32 %v9606_v31, %v9673_v47  ;;  %v9755_v24 = vld [vmem:[%s5424_s23 + $0x15e] sm:$0xff] }
 0x204   : > { %12768 = vst [vmem:[#allocation135_spill] sm:$0xff] %v9655_v43  ;;  %12770 = vst [vmem:[#allocation136_spill] sm:$0xff] %v9658_v18  ;;  %v9738_v18 = vld [vmem:[%s5424_s23 + $0x13e] sm:$0xff]  ;;  %v2577_v35 = vmul.f32 %v9606_v31, %v9676_v32  ;;  %v9761_v28 = vld [vmem:[%s5424_s23 + $0x176] sm:$0xff]  ;;  %v2578_v61 = vmul.f32 %v9606_v31, %v9692_v50 }
 0x205   : > { %12772 = vst [vmem:[#allocation25_spill] sm:$0xff] %v9661_v26  ;;  %12773 = vst [vmem:[#allocation137_spill] sm:$0xff] %v9664_v13  ;;  %v2566_v13 = vmul.f32 %v9606_v31, %v2530_v49  ;;  %v9727_v26 = vld [vmem:[%s5424_s23 + $0x12e] sm:$0xff]  ;;  %v2570_v49 = vmul.f32 %v9606_v31, %v9643_v39  ;;  %v2575_v39 = vmul.f32 %v9606_v31, %v9670_v53 }
 0x206   : > { %12774 = vst [vmem:[#allocation138_spill] sm:$0xff] %v9667_v20  ;;  %12775 = vst [vmem:[#allocation139_spill] sm:$0xff] %v9670_v53  ;;  %v9695_v20 = vld [vmem:[%s5424_s23 + $0xde] sm:$0xff]  ;;  %v2580_v53 = vmul.f32 %v9606_v31, %v9698_v58 }
 0x207   : > { %12776 = vst [vmem:[#allocation140_spill] sm:$0xff] %v9673_v47  ;;  %12777 = vst [vmem:[#allocation141_spill] sm:$0xff] %v9676_v32  ;;  %v2579_v43 = vmul.f32 %v9606_v31, %v9695_v20  ;;  %v2581_v47 = vmul.f32 %v9606_v31, %v9705_v12  ;;  %v2582_v32 = vmul.f32 %v9606_v31, %v9708_v3 }
 0x208   : > { %12778 = vst [vmem:[#allocation142_spill] sm:$0xff] %v9680_v19  ;;  %12779 = vst [vmem:[#allocation143_spill] sm:$0xff] %v9683_v10  ;;  %v2564_v10 = vmul.f32 %v9606_v31, %v2528_v41  ;;  %v2565_v19 = vmul.f32 %v9606_v31, %v2529_v6  ;;  %v2569_v41 = vmul.f32 %v9606_v31, %v9640_v45  ;;  %v9721_v6 = vld [vmem:[%s5424_s23 + $0x116] sm:$0xff] }
 0x209   : > { %12780 = vst [vmem:[#allocation144_spill] sm:$0xff] %v9689_v22  ;;  %12781 = vst [vmem:[#allocation145_spill] sm:$0xff] %v9692_v50  ;;  %v9711_v22 = vld [vmem:[%s5424_s23 + $0x10e] sm:$0xff]  ;;  %v2573_v45 = vmul.f32 %v9606_v31, %v9652_v51  ;;  %v2584_v56 = vmul.f32 %v9606_v31, %v9721_v6  ;;  %v2585_v50 = vmul.f32 %v9606_v31, %v9724_v9 }
 0x20a   : > { %12782 = vst [vmem:[#allocation146_spill] sm:$0xff] %v9695_v20  ;;  %12783 = vst [vmem:[#allocation147_spill] sm:$0xff] %v9698_v58  ;;  %v9758_v51 = vld [vmem:[%s5424_s23 + $0x16e] sm:$0xff]  ;;  %v2583_v40 = vmul.f32 %v9606_v31, %v9711_v22  ;;  %v2586_v20 = vmul.f32 %v9606_v31, %v9727_v26  ;;  %v2587_v58 = vmul.f32 %v9606_v31, %v9738_v18 }
 0x20b   : > { %12784 = vst [vmem:[#allocation148_spill] sm:$0xff] %v9705_v12  ;;  %12785 = vst [vmem:[#allocation149_spill] sm:$0xff] %v9708_v3  ;;  %v2588_v12 = vmul.f32 %v9606_v31, %v9741_v14  ;;  %v2589_v3 = vmul.f32 %v9606_v31, %v9744_v7 }
 0x20c   : > { %12786 = vst [vmem:[#allocation150_spill] sm:$0xff] %v9711_v22  ;;  %12787 = vst [vmem:[#allocation151_spill] sm:$0xff] %v9721_v6  ;;  %v2590_v22 = vmul.f32 %v9606_v31, %v9755_v24  ;;  %v2591_v6 = vmul.f32 %v9606_v31, %v9758_v51 }
 0x20d   : > { %12788 = vst [vmem:[#allocation152_spill] sm:$0xff] %v9724_v9  ;;  %12789 = vst [vmem:[#allocation153_spill] sm:$0xff] %v9727_v26  ;;  %v2592_v9 = vmul.f32 %v9606_v31, %v9761_v28  ;;  %v9794_v26 = vadd.f32 %v2561_v2, %v9520_v38  ;;  %v9812_v31 = vadd.f32 %v2567_v34, %v9538_v36 }
 0x20e   : > { %12790 = vst [vmem:[#allocation154_spill] sm:$0xff] %v9738_v18  ;;  %12791 = vst [vmem:[#allocation155_spill] sm:$0xff] %v9741_v14  ;;  %v9797_v18 = vadd.f32 %v2562_v5, %v9523_v33  ;;  %v9800_v14 = vadd.f32 %v2563_v27, %v9526_v57  ;;  %v9815_v38 = vadd.f32 %v2568_v25, %v9541_v30  ;;  %v12820_v27 = vld [vmem:[#allocation130_spill] sm:$0xff]  ;;  %v12822_v25 = vld [vmem:[#allocation31_spill] sm:$0xff] }
 0x20f   : > { %12792 = vst [vmem:[#allocation156_spill] sm:$0xff] %v9744_v7  ;;  %12793 = vst [vmem:[#allocation157_spill] sm:$0xff] %v9755_v24  ;;  %v9803_v7 = vadd.f32 %v2564_v10, %v9529_v55  ;;  %v9806_v24 = vadd.f32 %v2565_v19, %v9532_v23  ;;  %v9818_v33 = vadd.f32 %v2569_v41, %v9544_v60  ;;  %v12817_v19 = vld [vmem:[#allocation127_spill] sm:$0xff] }
 0x210   : > { %12794 = vst [vmem:[#allocation158_spill] sm:$0xff] %v9758_v51  ;;  %12795 = vst [vmem:[#allocation159_spill] sm:$0xff] %v9761_v28  ;;  %v9809_v51 = vadd.f32 %v2566_v13, %v9535_v59  ;;  %v9821_v57 = vadd.f32 %v2570_v49, %v9547_v1  ;;  %v9824_v55 = vadd.f32 %v2571_v54, %v9550_v29  ;;  %v12814_v13 = vld [vmem:[#allocation124_spill] sm:$0xff]  ;;  %v12838_v28 = vld [vmem:[#allocation89_spill] sm:$0xff] }
 0x211   : > { %v9827_v23 = vadd.f32 %v2572_v15, %v9553_v16  ;;  %v9830_v59 = vadd.f32 %v2573_v45, %v9556_v62  ;;  %v9833_v36 = vadd.f32 %v2574_v63, %v9559_v21  ;;  %v9836_v30 = vadd.f32 %v2575_v39, %v9562_v17  ;;  %v12810_v39 = vld [vmem:[#allocation41_spill] sm:$0xff] }
 0x212   : > { %v9839_v60 = vadd.f32 %v2576_v42, %v9565_v4  ;;  %v9842_v1 = vadd.f32 %v2577_v35, %v9568_v52  ;;  %v9845_v29 = vadd.f32 %v2578_v61, %v9577_v44  ;;  %v9848_v16 = vadd.f32 %v2579_v43, %v9580_v0  ;;  %v12796_v44 = vld [vmem:[#allocation8_spill] sm:$0xff]  ;;  %v12798_v0 = vld [vmem:[#allocation9_spill] sm:$0xff]  ;;  %v12812_v35 = vld [vmem:[#allocation123_spill] sm:$0xff] }
 0x213   : > { %v9851_v62 = vadd.f32 %v2580_v53, %v9583_v48  ;;  %v9854_v21 = vadd.f32 %v2581_v47, %v9586_v8  ;;  %v9857_v17 = vadd.f32 %v2582_v32, %v9590_v11  ;;  %v9860_v4 = vadd.f32 %v2583_v40, %v9593_v46  ;;  %v12800_v48 = vld [vmem:[#allocation10_spill] sm:$0xff]  ;;  %v12802_v8 = vld [vmem:[#allocation35_spill] sm:$0xff]  ;;  %v12806_v46 = vld [vmem:[#allocation12_spill] sm:$0xff] }
 0x214   : > { %v9863_v52 = vadd.f32 %v2584_v56, %v9596_v37  ;;  %v9866_v61 = vadd.f32 %v2585_v50, %v12796_v44  ;;  %v9869_v54 = vadd.f32 %v2586_v20, %v12798_v0  ;;  %v9872_v15 = vadd.f32 %v2587_v58, %v12800_v48  ;;  %v12804_v11 = vld [vmem:[#allocation26_spill] sm:$0xff]  ;;  %v12808_v37 = vld [vmem:[#allocation36_spill] sm:$0xff]  ;;  %v12815_v53 = vld [vmem:[#allocation125_spill] sm:$0xff] }
 0x215   : > { %v9875_v63 = vadd.f32 %v2588_v12, %v12802_v8  ;;  %v9878_v45 = vadd.f32 %v2589_v3, %v12804_v11  ;;  %v9881_v40 = vadd.f32 %v2590_v22, %v12806_v46  ;;  %v9884_v56 = vadd.f32 %v2591_v6, %v12808_v37  ;;  %v12813_v43 = vld [vmem:[#allocation136_spill] sm:$0xff]  ;;  %v12816_v32 = vld [vmem:[#allocation126_spill] sm:$0xff]  ;;  %v12819_v58 = vld [vmem:[#allocation129_spill] sm:$0xff] }
 0x216   : > { %12797 = vst [vmem:[#allocation8_spill] sm:$0xff] %v9866_v61  ;;  %12799 = vst [vmem:[#allocation9_spill] sm:$0xff] %v9869_v54  ;;  %v9887_v42 = vadd.f32 %v2592_v9, %v12810_v39  ;;  %v2662_v50 = vmul.f32 %v12813_v43, %v12812_v35  ;;  %v2663_v20 = vmul.f32 %v12813_v43, %v12814_v13  ;;  %v12818_v22 = vld [vmem:[#allocation128_spill] sm:$0xff]  ;;  %v12821_v3 = vld [vmem:[#allocation131_spill] sm:$0xff] }
 0x217   : > { %12801 = vst [vmem:[#allocation10_spill] sm:$0xff] %v9872_v15  ;;  %12803 = vst [vmem:[#allocation35_spill] sm:$0xff] %v9875_v63  ;;  %v2664_v47 = vmul.f32 %v12813_v43, %v12815_v53  ;;  %v2665_v2 = vmul.f32 %v12813_v43, %v12816_v32  ;;  %v2666_v10 = vmul.f32 %v12813_v43, %v12817_v19  ;;  %v12823_v6 = vld [vmem:[#allocation53_spill] sm:$0xff]  ;;  %v12824_v44 = vld [vmem:[#allocation56_spill] sm:$0xff] }
 0x218   : > { %12805 = vst [vmem:[#allocation26_spill] sm:$0xff] %v9878_v45  ;;  %12807 = vst [vmem:[#allocation12_spill] sm:$0xff] %v9881_v40  ;;  %v2667_v9 = vmul.f32 %v12813_v43, %v12818_v22  ;;  %v2668_v5 = vmul.f32 %v12813_v43, %v12819_v58  ;;  %v2669_v12 = vmul.f32 %v12813_v43, %v12820_v27  ;;  %v12825_v48 = vld [vmem:[#allocation132_spill] sm:$0xff]  ;;  %v9916_v11 = vld [vmem:[%s5424_s23 + $0x180] sm:$0xff] }
 0x219   : > { %12809 = vst [vmem:[#allocation36_spill] sm:$0xff] %v9884_v56  ;;  %12811 = vst [vmem:[#allocation41_spill] sm:$0xff] %v9887_v42  ;;  %v2670_v34 = vmul.f32 %v12813_v43, %v12821_v3  ;;  %v2671_v41 = vmul.f32 %v12813_v43, %v12822_v25  ;;  %v2672_v49 = vmul.f32 %v12813_v43, %v12823_v6  ;;  %v9919_v46 = vld [vmem:[%s5424_s23 + $0x188] sm:$0xff]  ;;  %v9922_v37 = vld [vmem:[%s5424_s23 + $0x198] sm:$0xff] }
 0x21a   : > { %v2673_v0 = vmul.f32 %v12813_v43, %v12824_v44  ;;  %v2674_v8 = vmul.f32 %v12813_v43, %v12825_v48  ;;  %12826 = vst [vmem:[#allocation123_spill] sm:$0xff] %v9916_v11  ;;  %12827 = vst [vmem:[#allocation136_spill] sm:$0xff] %v9919_v46  ;;  %v12829_v39 = vld [vmem:[#allocation133_spill] sm:$0xff]  ;;  %v12830_v13 = vld [vmem:[#allocation134_spill] sm:$0xff] }
 0x21b   : > { %12828 = vst [vmem:[#allocation124_spill] sm:$0xff] %v9922_v37  ;;  %v2675_v35 = vmul.f32 %v12813_v43, %v12829_v39  ;;  %v2676_v53 = vmul.f32 %v12813_v43, %v12830_v13  ;;  %v12831_v32 = vld [vmem:[#allocation13_spill] sm:$0xff]  ;;  %v12832_v22 = vld [vmem:[#allocation108_spill] sm:$0xff]  ;;  %v9933_v27 = vld [vmem:[%s5424_s23 + $0x1a0] sm:$0xff]  ;;  %v2681_v13 = vmul.f32 %v12813_v43, %v12838_v28  ;;  %v2688_v28 = vmul.f32 %v9916_v11, %v12813_v43 }
 0x21c   : > { %v2677_v19 = vmul.f32 %v12813_v43, %v12831_v32  ;;  %v2678_v58 = vmul.f32 %v12813_v43, %v12832_v22  ;;  %12833 = vst [vmem:[#allocation125_spill] sm:$0xff] %v9933_v27  ;;  %v9936_v3 = vld [vmem:[%s5424_s23 + $0x1b0] sm:$0xff]  ;;  %v9939_v25 = vld [vmem:[%s5424_s23 + $0x1b8] sm:$0xff]  ;;  %v12836_v6 = vld [vmem:[#allocation102_spill] sm:$0xff]  ;;  %v9975_v11 = vadd.f32 %v2663_v20, %v9797_v18  ;;  %v9996_v18 = vadd.f32 %v2670_v34, %v9818_v33 }
 0x21d   : > { %12834 = vst [vmem:[#allocation126_spill] sm:$0xff] %v9936_v3  ;;  %12835 = vst [vmem:[#allocation127_spill] sm:$0xff] %v9939_v25  ;;  %v2679_v44 = vmul.f32 %v12813_v43, %v12836_v6  ;;  %v12837_v48 = vld [vmem:[#allocation88_spill] sm:$0xff]  ;;  %v12839_v42 = vld [vmem:[#allocation90_spill] sm:$0xff] }
 0x21e   : > { %v2680_v39 = vmul.f32 %v12813_v43, %v12837_v48  ;;  %v2682_v32 = vmul.f32 %v12813_v43, %v12839_v42  ;;  %v12840_v56 = vld [vmem:[#allocation91_spill] sm:$0xff]  ;;  %v12841_v40 = vld [vmem:[#allocation62_spill] sm:$0xff]  ;;  %v12842_v63 = vld [vmem:[#allocation64_spill] sm:$0xff]  ;;  %v2689_v42 = vmul.f32 %v9919_v46, %v12813_v43  ;;  %v9978_v46 = vadd.f32 %v2664_v47, %v9800_v14 }
 0x21f   : > { %v2683_v22 = vmul.f32 %v12813_v43, %v12840_v56  ;;  %v2684_v45 = vmul.f32 %v12813_v43, %v12841_v40  ;;  %v2685_v15 = vmul.f32 %v12813_v43, %v12842_v63  ;;  %v12843_v54 = vld [vmem:[#allocation68_spill] sm:$0xff]  ;;  %v12844_v61 = vld [vmem:[#allocation69_spill] sm:$0xff]  ;;  %v2690_v56 = vmul.f32 %v9922_v37, %v12813_v43  ;;  %v12862_v34 = vld [vmem:[#allocation42_spill] sm:$0xff] }
 0x220   : > { %v2686_v6 = vmul.f32 %v12813_v43, %v12843_v54  ;;  %v2687_v48 = vmul.f32 %v12813_v43, %v12844_v61  ;;  %v2691_v40 = vmul.f32 %v9933_v27, %v12813_v43  ;;  %v2692_v63 = vmul.f32 %v9936_v3, %v12813_v43 }
 0x221   : > { %v2693_v54 = vmul.f32 %v9939_v25, %v12813_v43  ;;  %v9972_v61 = vadd.f32 %v2662_v50, %v9794_v26  ;;  %v9981_v37 = vadd.f32 %v2665_v2, %v9803_v7  ;;  %v9984_v27 = vadd.f32 %v2666_v10, %v9806_v24  ;;  %v12886_v25 = vld [vmem:[#allocation6_spill] sm:$0xff] }
 0x222   : > { %v9987_v3 = vadd.f32 %v2667_v9, %v9809_v51  ;;  %v9990_v43 = vadd.f32 %v2668_v5, %v9812_v31  ;;  %v9993_v26 = vadd.f32 %v2669_v12, %v9815_v38  ;;  %v9999_v14 = vadd.f32 %v2671_v41, %v9821_v57  ;;  %v12859_v9 = vld [vmem:[#allocation41_spill] sm:$0xff] }
 0x223   : > { %v10002_v7 = vadd.f32 %v2672_v49, %v9824_v55  ;;  %v10005_v24 = vadd.f32 %v2673_v0, %v9827_v23  ;;  %v10008_v51 = vadd.f32 %v2674_v8, %v9830_v59  ;;  %v10011_v31 = vadd.f32 %v2675_v35, %v9833_v36  ;;  %v12861_v12 = vld [vmem:[#allocation25_spill] sm:$0xff]  ;;  %v12863_v49 = vld [vmem:[#allocation43_spill] sm:$0xff]  ;;  %v12864_v8 = vld [vmem:[#allocation48_spill] sm:$0xff] }
 0x224   : > { %v10014_v38 = vadd.f32 %v2676_v53, %v9836_v30  ;;  %v10017_v33 = vadd.f32 %v2677_v19, %v9839_v60  ;;  %v10020_v57 = vadd.f32 %v2678_v58, %v9842_v1  ;;  %v10023_v55 = vadd.f32 %v2679_v44, %v9845_v29  ;;  %v12845_v29 = vld [vmem:[#allocation8_spill] sm:$0xff]  ;;  %v12865_v53 = vld [vmem:[#allocation63_spill] sm:$0xff] }
 0x225   : > { %v10026_v23 = vadd.f32 %v2680_v39, %v9848_v16  ;;  %v10029_v59 = vadd.f32 %v2681_v13, %v9851_v62  ;;  %v10032_v36 = vadd.f32 %v2682_v32, %v9854_v21  ;;  %v10035_v30 = vadd.f32 %v2683_v22, %v9857_v17  ;;  %v12847_v16 = vld [vmem:[#allocation9_spill] sm:$0xff]  ;;  %v12849_v62 = vld [vmem:[#allocation10_spill] sm:$0xff]  ;;  %v12851_v21 = vld [vmem:[#allocation35_spill] sm:$0xff] }
 0x226   : > { %v10038_v60 = vadd.f32 %v2684_v45, %v9860_v4  ;;  %v10041_v1 = vadd.f32 %v2685_v15, %v9863_v52  ;;  %v10044_v50 = vadd.f32 %v2686_v6, %v12845_v29  ;;  %v10047_v20 = vadd.f32 %v2687_v48, %v12847_v16  ;;  %v12853_v17 = vld [vmem:[#allocation26_spill] sm:$0xff]  ;;  %v12855_v4 = vld [vmem:[#allocation12_spill] sm:$0xff]  ;;  %v12866_v58 = vld [vmem:[#allocation67_spill] sm:$0xff] }
 0x227   : > { %v10050_v47 = vadd.f32 %v2688_v28, %v12849_v62  ;;  %v10053_v2 = vadd.f32 %v2689_v42, %v12851_v21  ;;  %v10056_v10 = vadd.f32 %v2690_v56, %v12853_v17  ;;  %v10059_v45 = vadd.f32 %v2691_v40, %v12855_v4  ;;  %v12857_v52 = vld [vmem:[#allocation36_spill] sm:$0xff]  ;;  %v12867_v39 = vld [vmem:[#allocation70_spill] sm:$0xff]  ;;  %v12868_v32 = vld [vmem:[#allocation71_spill] sm:$0xff] }
 0x228   : > { %12846 = vst [vmem:[#allocation128_spill] sm:$0xff] %v10044_v50  ;;  %12848 = vst [vmem:[#allocation129_spill] sm:$0xff] %v10047_v20  ;;  %v10062_v15 = vadd.f32 %v2692_v63, %v12857_v52  ;;  %v10065_v5 = vadd.f32 %v2693_v54, %v12859_v9  ;;  %v2762_v41 = vmul.f32 %v12862_v34, %v12861_v12  ;;  %v12869_v6 = vld [vmem:[#allocation72_spill] sm:$0xff]  ;;  %v12870_v28 = vld [vmem:[#allocation73_spill] sm:$0xff] }
 0x229   : > { %12850 = vst [vmem:[#allocation130_spill] sm:$0xff] %v10050_v47  ;;  %12852 = vst [vmem:[#allocation131_spill] sm:$0xff] %v10053_v2  ;;  %v2763_v0 = vmul.f32 %v12863_v49, %v12861_v12  ;;  %v2764_v35 = vmul.f32 %v12864_v8, %v12861_v12  ;;  %v2765_v19 = vmul.f32 %v12865_v53, %v12861_v12  ;;  %v12871_v56 = vld [vmem:[#allocation74_spill] sm:$0xff]  ;;  %v12872_v63 = vld [vmem:[#allocation75_spill] sm:$0xff] }
 0x22a   : > { %12854 = vst [vmem:[#allocation31_spill] sm:$0xff] %v10056_v10  ;;  %12856 = vst [vmem:[#allocation53_spill] sm:$0xff] %v10059_v45  ;;  %v2766_v44 = vmul.f32 %v12866_v58, %v12861_v12  ;;  %v2767_v13 = vmul.f32 %v12867_v39, %v12861_v12  ;;  %v2768_v22 = vmul.f32 %v12868_v32, %v12861_v12  ;;  %v12873_v29 = vld [vmem:[#allocation33_spill] sm:$0xff]  ;;  %v12875_v17 = vld [vmem:[#allocation34_spill] sm:$0xff] }
 0x22b   : > { %12858 = vst [vmem:[#allocation56_spill] sm:$0xff] %v10062_v15  ;;  %12860 = vst [vmem:[#allocation132_spill] sm:$0xff] %v10065_v5  ;;  %v2769_v48 = vmul.f32 %v12869_v6, %v12861_v12  ;;  %v2770_v42 = vmul.f32 %v12870_v28, %v12861_v12  ;;  %v2771_v40 = vmul.f32 %v12871_v56, %v12861_v12  ;;  %v12874_v62 = vld [vmem:[#allocation49_spill] sm:$0xff]  ;;  %v12876_v52 = vld [vmem:[#allocation54_spill] sm:$0xff] }
 0x22c   : > { %v2772_v54 = vmul.f32 %v12872_v63, %v12861_v12  ;;  %v2773_v16 = vmul.f32 %v12873_v29, %v12861_v12  ;;  %v2774_v21 = vmul.f32 %v12874_v62, %v12861_v12  ;;  %v2775_v4 = vmul.f32 %v12875_v17, %v12861_v12  ;;  %v12877_v34 = vld [vmem:[#allocation55_spill] sm:$0xff]  ;;  %v12878_v8 = vld [vmem:[#allocation60_spill] sm:$0xff]  ;;  %v12879_v58 = vld [vmem:[#allocation61_spill] sm:$0xff] }
 0x22d   : > { %v2776_v9 = vmul.f32 %v12876_v52, %v12861_v12  ;;  %v2777_v49 = vmul.f32 %v12877_v34, %v12861_v12  ;;  %v2778_v53 = vmul.f32 %v12878_v8, %v12861_v12  ;;  %v2779_v39 = vmul.f32 %v12879_v58, %v12861_v12  ;;  %v12880_v32 = vld [vmem:[#allocation50_spill] sm:$0xff]  ;;  %v12881_v28 = vld [vmem:[#allocation28_spill] sm:$0xff]  ;;  %v12883_v62 = vld [vmem:[#allocation3_spill] sm:$0xff] }
 0x22e   : > { %v2780_v6 = vmul.f32 %v12880_v32, %v12861_v12  ;;  %v2781_v56 = vmul.f32 %v12881_v28, %v12861_v12  ;;  %v12882_v63 = vld [vmem:[#allocation2_spill] sm:$0xff]  ;;  %v2783_v17 = vmul.f32 %v12883_v62, %v12861_v12  ;;  %v12884_v52 = vld [vmem:[#allocation4_spill] sm:$0xff]  ;;  %v12885_v8 = vld [vmem:[#allocation5_spill] sm:$0xff]  ;;  %v2786_v32 = vmul.f32 %v12886_v25, %v12861_v12 }
 0x22f   : > { %v2782_v29 = vmul.f32 %v12882_v63, %v12861_v12  ;;  %v2784_v34 = vmul.f32 %v12884_v52, %v12861_v12  ;;  %v2785_v58 = vmul.f32 %v12885_v8, %v12861_v12  ;;  %v12887_v5 = vld [vmem:[#allocation7_spill] sm:$0xff]  ;;  %v10130_v52 = vld [vmem:[%s5424_s23 + $0x19b] sm:$0xff]  ;;  %v10150_v47 = vadd.f32 %v2762_v41, %v9972_v61 }
 0x230   : > { %v2787_v15 = vmul.f32 %v12887_v5, %v12861_v12  ;;  %v10120_v28 = vld [vmem:[%s5424_s23 + $0x183] sm:$0xff]  ;;  %v10125_v45 = vld [vmem:[%s5424_s23 + $0x18b] sm:$0xff]  ;;  %12890 = vst [vmem:[#allocation13_spill] sm:$0xff] %v10130_v52  ;;  %v2790_v8 = vmul.f32 %v10130_v52, %v12861_v12  ;;  %v10140_v5 = vld [vmem:[%s5424_s23 + $0x1b3] sm:$0xff]  ;;  %v10153_v52 = vadd.f32 %v2763_v0, %v9975_v11  ;;  %v10156_v20 = vadd.f32 %v2764_v35, %v9978_v46 }
 0x231   : > { %12888 = vst [vmem:[#allocation133_spill] sm:$0xff] %v10120_v28  ;;  %v2788_v63 = vmul.f32 %v10120_v28, %v12861_v12  ;;  %12889 = vst [vmem:[#allocation134_spill] sm:$0xff] %v10125_v45  ;;  %v2789_v62 = vmul.f32 %v10125_v45, %v12861_v12  ;;  %v10135_v10 = vld [vmem:[%s5424_s23 + $0x1a3] sm:$0xff]  ;;  %v2792_v28 = vmul.f32 %v10140_v5, %v12861_v12  ;;  %v10145_v2 = vld [vmem:[%s5424_s23 + $0x1bb] sm:$0xff] }
 0x232   : > { %12891 = vst [vmem:[#allocation108_spill] sm:$0xff] %v10135_v10  ;;  %v2791_v25 = vmul.f32 %v10135_v10, %v12861_v12  ;;  %12892 = vst [vmem:[#allocation102_spill] sm:$0xff] %v10140_v5  ;;  %v2793_v45 = vmul.f32 %v10145_v2, %v12861_v12  ;;  %v10159_v10 = vadd.f32 %v2765_v19, %v9981_v37 }
 0x233   : > { %12893 = vst [vmem:[#allocation88_spill] sm:$0xff] %v10145_v2  ;;  %v10162_v50 = vadd.f32 %v2766_v44, %v9984_v27  ;;  %v10165_v5 = vadd.f32 %v2767_v13, %v9987_v3  ;;  %v10168_v12 = vadd.f32 %v2768_v22, %v9990_v43  ;;  %v10171_v61 = vadd.f32 %v2769_v48, %v9993_v26  ;;  %v12909_v48 = vld [vmem:[#allocation132_spill] sm:$0xff]  ;;  %v12937_v2 = vld [vmem:[#allocation153_spill] sm:$0xff] }
 0x234   : > { %v10174_v11 = vadd.f32 %v2770_v42, %v9996_v18  ;;  %v10177_v46 = vadd.f32 %v2771_v40, %v9999_v14  ;;  %v10180_v37 = vadd.f32 %v2772_v54, %v10002_v7  ;;  %v10183_v27 = vadd.f32 %v2773_v16, %v10005_v24  ;;  %v12911_v42 = vld [vmem:[#allocation37_spill] sm:$0xff]  ;;  %v12913_v16 = vld [vmem:[#allocation38_spill] sm:$0xff] }
 0x235   : > { %v10186_v3 = vadd.f32 %v2774_v21, %v10008_v51  ;;  %v10189_v43 = vadd.f32 %v2775_v4, %v10011_v31  ;;  %v10192_v26 = vadd.f32 %v2776_v9, %v10014_v38  ;;  %v10195_v18 = vadd.f32 %v2777_v49, %v10017_v33  ;;  %v12912_v40 = vld [vmem:[#allocation137_spill] sm:$0xff]  ;;  %v12914_v4 = vld [vmem:[#allocation32_spill] sm:$0xff]  ;;  %v12915_v49 = vld [vmem:[#allocation47_spill] sm:$0xff] }
 0x236   : > { %v10198_v14 = vadd.f32 %v2778_v53, %v10020_v57  ;;  %v10201_v7 = vadd.f32 %v2779_v39, %v10023_v55  ;;  %v10204_v24 = vadd.f32 %v2780_v6, %v10026_v23  ;;  %v10207_v51 = vadd.f32 %v2781_v56, %v10029_v59  ;;  %v12895_v55 = vld [vmem:[#allocation128_spill] sm:$0xff]  ;;  %v12897_v23 = vld [vmem:[#allocation129_spill] sm:$0xff]  ;;  %v12899_v59 = vld [vmem:[#allocation130_spill] sm:$0xff] }
 0x237   : > { %v10210_v31 = vadd.f32 %v2782_v29, %v10032_v36  ;;  %v10213_v38 = vadd.f32 %v2783_v17, %v10035_v30  ;;  %v10216_v33 = vadd.f32 %v2784_v34, %v10038_v60  ;;  %v10219_v57 = vadd.f32 %v2785_v58, %v10041_v1  ;;  %v12901_v36 = vld [vmem:[#allocation131_spill] sm:$0xff]  ;;  %v12905_v60 = vld [vmem:[#allocation53_spill] sm:$0xff]  ;;  %v12907_v1 = vld [vmem:[#allocation56_spill] sm:$0xff] }
 0x238   : > { %v10222_v41 = vadd.f32 %v2786_v32, %v12895_v55  ;;  %v10225_v0 = vadd.f32 %v2787_v15, %v12897_v23  ;;  %v10228_v35 = vadd.f32 %v2788_v63, %v12899_v59  ;;  %v10231_v19 = vadd.f32 %v2789_v62, %v12901_v36  ;;  %v12903_v30 = vld [vmem:[#allocation31_spill] sm:$0xff]  ;;  %v12921_v63 = vld [vmem:[#allocation140_spill] sm:$0xff]  ;;  %v12923_v55 = vld [vmem:[#allocation145_spill] sm:$0xff] }
 0x239   : > { %12894 = vst [vmem:[#allocation89_spill] sm:$0xff] %v10219_v57  ;;  %v10234_v44 = vadd.f32 %v2790_v8, %v12903_v30  ;;  %v10237_v13 = vadd.f32 %v2791_v25, %v12905_v60  ;;  %v10240_v22 = vadd.f32 %v2792_v28, %v12907_v1  ;;  %v10243_v15 = vadd.f32 %v2793_v45, %v12909_v48  ;;  %v12916_v39 = vld [vmem:[#allocation59_spill] sm:$0xff]  ;;  %v12922_v8 = vld [vmem:[#allocation141_spill] sm:$0xff]  ;;  %v12924_v59 = vld [vmem:[#allocation146_spill] sm:$0xff]  ;;  %v10342_v57 = vpop.f32.mrf.mxu1 }
 0x23a   : > { %12896 = vst [vmem:[#allocation90_spill] sm:$0xff] %v10222_v41  ;;  %12898 = vst [vmem:[#allocation91_spill] sm:$0xff] %v10225_v0  ;;  %v2862_v54 = vmul.f32 %v12912_v40, %v12911_v42  ;;  %v2863_v21 = vmul.f32 %v12912_v40, %v12913_v16  ;;  %v2864_v9 = vmul.f32 %v12912_v40, %v12914_v4  ;;  %v12917_v56 = vld [vmem:[#allocation103_spill] sm:$0xff]  ;;  %v10278_v1 = vld [vmem:[%s5424_s23 + $0x19e] sm:$0xff] }
 0x23b   : > { %12900 = vst [vmem:[#allocation62_spill] sm:$0xff] %v10228_v35  ;;  %12902 = vst [vmem:[#allocation64_spill] sm:$0xff] %v10231_v19  ;;  %v2865_v53 = vmul.f32 %v12912_v40, %v12915_v49  ;;  %v2866_v6 = vmul.f32 %v12912_v40, %v12916_v39  ;;  %v2867_v45 = vmul.f32 %v12912_v40, %v12917_v56  ;;  %v12918_v29 = vld [vmem:[#allocation39_spill] sm:$0xff]  ;;  %v12929_v16 = vld [vmem:[#allocation148_spill] sm:$0xff] }
 0x23c   : > { %12904 = vst [vmem:[#allocation68_spill] sm:$0xff] %v10234_v44  ;;  %12906 = vst [vmem:[#allocation69_spill] sm:$0xff] %v10237_v13  ;;  %v2868_v17 = vmul.f32 %v12912_v40, %v12918_v29  ;;  %v12919_v34 = vld [vmem:[#allocation135_spill] sm:$0xff]  ;;  %v2871_v62 = vmul.f32 %v12912_v40, %v12921_v63  ;;  %v2872_v25 = vmul.f32 %v12912_v40, %v12922_v8  ;;  %v12930_v49 = vld [vmem:[#allocation149_spill] sm:$0xff] }
 0x23d   : > { %12908 = vst [vmem:[#allocation8_spill] sm:$0xff] %v10240_v22  ;;  %12910 = vst [vmem:[#allocation9_spill] sm:$0xff] %v10243_v15  ;;  %v2869_v58 = vmul.f32 %v12912_v40, %v12919_v34  ;;  %v12920_v32 = vld [vmem:[#allocation139_spill] sm:$0xff]  ;;  %v2873_v23 = vmul.f32 %v12912_v40, %v12923_v55  ;;  %v2874_v36 = vmul.f32 %v12912_v40, %v12924_v59  ;;  %v12931_v56 = vld [vmem:[#allocation150_spill] sm:$0xff] }
 0x23e   : > { %v2870_v28 = vmul.f32 %v12912_v40, %v12920_v32  ;;  %v10272_v30 = vld [vmem:[%s5424_s23 + $0x186] sm:$0xff]  ;;  %v10275_v60 = vld [vmem:[%s5424_s23 + $0x18e] sm:$0xff]  ;;  %12927 = vst [vmem:[#allocation26_spill] sm:$0xff] %v10278_v1  ;;  %v2876_v4 = vmul.f32 %v12912_v40, %v12929_v16  ;;  %v2877_v39 = vmul.f32 %v12912_v40, %v12930_v49  ;;  %v2878_v29 = vmul.f32 %v12912_v40, %v12931_v56  ;;  %v10292_v32 = vld [vmem:[%s5424_s23 + $0x1b6] sm:$0xff] }
 0x23f   : > { %12925 = vst [vmem:[#allocation10_spill] sm:$0xff] %v10272_v30  ;;  %12926 = vst [vmem:[#allocation35_spill] sm:$0xff] %v10275_v60  ;;  %v12928_v48 = vld [vmem:[#allocation147_spill] sm:$0xff]  ;;  %v10295_v63 = vld [vmem:[%s5424_s23 + $0x1be] sm:$0xff]  ;;  %v2881_v16 = vmul.f32 %v12912_v40, %v12937_v2  ;;  %v2888_v2 = vmul.f32 %v10272_v30, %v12912_v40  ;;  %v10331_v30 = vadd.f32 %v2863_v21, %v10153_v52 }
 0x240   : > { %v2875_v42 = vmul.f32 %v12912_v40, %v12928_v48  ;;  %v10289_v34 = vld [vmem:[%s5424_s23 + $0x1a6] sm:$0xff]  ;;  %12933 = vst [vmem:[#allocation36_spill] sm:$0xff] %v10292_v32  ;;  %12934 = vst [vmem:[#allocation41_spill] sm:$0xff] %v10295_v63  ;;  %v12936_v59 = vld [vmem:[#allocation152_spill] sm:$0xff]  ;;  %v10350_v52 = vadd.f32 %v2868_v17, %v10168_v12  ;;  %v10368_v12 = vadd.f32 %v2874_v36, %v10186_v3 }
 0x241   : > { %12932 = vst [vmem:[#allocation12_spill] sm:$0xff] %v10289_v34  ;;  %v12935_v8 = vld [vmem:[#allocation151_spill] sm:$0xff]  ;;  %v2880_v48 = vmul.f32 %v12912_v40, %v12936_v59  ;;  %v12938_v15 = vld [vmem:[#allocation154_spill] sm:$0xff]  ;;  %v12940_v13 = vld [vmem:[#allocation156_spill] sm:$0xff] }
 0x242   : > { %v2879_v55 = vmul.f32 %v12912_v40, %v12935_v8  ;;  %v2882_v49 = vmul.f32 %v12912_v40, %v12938_v15  ;;  %v12939_v22 = vld [vmem:[#allocation155_spill] sm:$0xff]  ;;  %v2884_v44 = vmul.f32 %v12912_v40, %v12940_v13  ;;  %v12941_v19 = vld [vmem:[#allocation157_spill] sm:$0xff]  ;;  %v12942_v0 = vld [vmem:[#allocation158_spill] sm:$0xff]  ;;  %v2889_v15 = vmul.f32 %v10275_v60, %v12912_v40  ;;  %12944 = vst [vmem:[#allocation25_spill] sm:$0xff] %v10342_v57 }
 0x243   : > { %v2883_v56 = vmul.f32 %v12912_v40, %v12939_v22  ;;  %v2885_v35 = vmul.f32 %v12912_v40, %v12941_v19  ;;  %v2886_v8 = vmul.f32 %v12912_v40, %v12942_v0  ;;  %v12943_v41 = vld [vmem:[#allocation159_spill] sm:$0xff]  ;;  %v2890_v22 = vmul.f32 %v10278_v1, %v12912_v40  ;;  %v4766_v21 = vld [vmem:[%s5424_s23 + $0x90] sm:$0xff]  ;;  %v4767_v3 = vld [vmem:[%s5424_s23 + $0x98] sm:$0xff] }
 0x244   : > { %v2887_v59 = vmul.f32 %v12912_v40, %v12943_v41  ;;  %v2891_v13 = vmul.f32 %v10289_v34, %v12912_v40  ;;  %v2892_v19 = vmul.f32 %v10292_v32, %v12912_v40  ;;  %v2893_v0 = vmul.f32 %v10295_v63, %v12912_v40  ;;  %v10344_v32 = vpop.f32.mrf.mxu0  ;;  %v12957_v36 = vld [vmem:[#allocation68_spill] sm:$0xff]  ;;  %v4792_v63 = vld [vmem:[%s5424_s23 + $0x1c8] sm:$0xff]  ;;  %v4794_v57 = vld [vmem:[%s5424_s23 + $0x1e0] sm:$0xff] }
 0x245   : > { %v10328_v41 = vadd.f32 %v2862_v54, %v10150_v47  ;;  %v10334_v60 = vadd.f32 %v2864_v9, %v10156_v20  ;;  %v10337_v1 = vadd.f32 %v2865_v53, %v10159_v10  ;;  %v10340_v34 = vadd.f32 %v2866_v6, %v10162_v50  ;;  %12945 = vst [vmem:[#allocation42_spill] sm:$0xff] %v10344_v32  ;;  %v4768_v53 = vld [vmem:[%s5424_s23 + $0xa8] sm:$0xff]  ;;  %v4770_v6 = vld [vmem:[%s5424_s23 + $0xc0] sm:$0xff]  ;;  %v4793_v32 = vld [vmem:[%s5424_s23 + $0x1d0] sm:$0xff] }
 0x246   : > { %v10347_v47 = vadd.f32 %v2867_v45, %v10165_v5  ;;  %v10353_v20 = vadd.f32 %v2869_v58, %v10171_v61  ;;  %v10356_v10 = vadd.f32 %v2870_v28, %v10174_v11  ;;  %v10359_v50 = vadd.f32 %v2871_v62, %v10177_v46  ;;  %v5034_v61 = vpop.f32.mrf.mxu1  ;;  %v5069_v54 = vpop.f32.mrf.mxu0  ;;  %v4772_v28 = vld [vmem:[%s5424_s23 + $0xd8] sm:$0xff]  ;;  %v4773_v62 = vld [vmem:[%s5424_s23 + $0xe0] sm:$0xff] }
 0x247   : > { %v10362_v40 = vadd.f32 %v2872_v25, %v10180_v37  ;;  %v10365_v5 = vadd.f32 %v2873_v23, %v10183_v27  ;;  %v10371_v11 = vadd.f32 %v2875_v42, %v10189_v43  ;;  %v10374_v46 = vadd.f32 %v2876_v4, %v10192_v26  ;;  %v12951_v25 = vld [vmem:[#allocation91_spill] sm:$0xff]  ;;  %v12953_v23 = vld [vmem:[#allocation62_spill] sm:$0xff]  ;;  %v4774_v4 = vld [vmem:[%s5424_s23 + $0xf0] sm:$0xff] }
 0x248   : > { %v10377_v37 = vadd.f32 %v2877_v39, %v10195_v18  ;;  %v10380_v27 = vadd.f32 %v2878_v29, %v10198_v14  ;;  %v10385_v9 = vadd.f32 %v2879_v55, %v10201_v7  ;;  %v10388_v43 = vadd.f32 %v2880_v48, %v10204_v24  ;;  %v4769_v14 = vld [vmem:[%s5424_s23 + $0xb0] sm:$0xff]  ;;  %v12947_v24 = vld [vmem:[#allocation89_spill] sm:$0xff]  ;;  %v4776_v29 = vld [vmem:[%s5424_s23 + $0x108] sm:$0xff] }
 0x249   : > { %v10391_v26 = vadd.f32 %v2881_v16, %v10207_v51  ;;  %v10394_v18 = vadd.f32 %v2882_v49, %v10210_v31  ;;  %v10400_v45 = vadd.f32 %v2883_v56, %v10213_v38  ;;  %v10403_v7 = vadd.f32 %v2884_v44, %v10216_v33  ;;  %v12949_v51 = vld [vmem:[#allocation90_spill] sm:$0xff]  ;;  %v4771_v31 = vld [vmem:[%s5424_s23 + $0xc8] sm:$0xff]  ;;  %v12955_v44 = vld [vmem:[#allocation64_spill] sm:$0xff] }
 0x24a   : > { %v10406_v17 = vadd.f32 %v2885_v35, %v12947_v24  ;;  %v10409_v58 = vadd.f32 %v2886_v8, %v12949_v51  ;;  %v10415_v38 = vadd.f32 %v2887_v59, %v12951_v25  ;;  %v10418_v33 = vadd.f32 %v2888_v2, %v12953_v23  ;;  %v4775_v39 = vld [vmem:[%s5424_s23 + $0xf8] sm:$0xff]  ;;  %v12961_v16 = vld [vmem:[#allocation8_spill] sm:$0xff]  ;;  %v4778_v2 = vld [vmem:[%s5424_s23 + $0x120] sm:$0xff] }
 0x24b   : > { %12946 = vst [vmem:[#allocation43_spill] sm:$0xff] %v10403_v7  ;;  %v10421_v35 = vadd.f32 %v2889_v15, %v12955_v44  ;;  %v10424_v42 = vadd.f32 %v2890_v22, %v12957_v36  ;;  %v12959_v55 = vld [vmem:[#allocation69_spill] sm:$0xff]  ;;  %v10433_v49 = vadd.f32 %v2892_v19, %v12961_v16  ;;  %v4777_v59 = vld [vmem:[%s5424_s23 + $0x110] sm:$0xff]  ;;  %v4779_v15 = vld [vmem:[%s5424_s23 + $0x128] sm:$0xff] }
 0x24c   : > { %12948 = vst [vmem:[#allocation48_spill] sm:$0xff] %v10406_v17  ;;  %12950 = vst [vmem:[#allocation63_spill] sm:$0xff] %v10409_v58  ;;  %v10430_v48 = vadd.f32 %v2891_v13, %v12959_v55  ;;  %v12963_v56 = vld [vmem:[#allocation9_spill] sm:$0xff]  ;;  %v12965_v22 = vld [vmem:[#allocation138_spill] sm:$0xff] }
 0x24d   : > { %12952 = vst [vmem:[#allocation67_spill] sm:$0xff] %v10415_v38  ;;  %12954 = vst [vmem:[#allocation70_spill] sm:$0xff] %v10418_v33  ;;  %v10436_v8 = vadd.f32 %v2893_v0, %v12963_v56  ;;  %v2963_v61 = vmul.f32 %v4766_v21, %v12965_v22  ;;  %v4780_v54 = vld [vmem:[%s5424_s23 + $0x138] sm:$0xff]  ;;  %v4781_v24 = vld [vmem:[%s5424_s23 + $0x140] sm:$0xff]  ;;  %v2964_v25 = vmul.f32 %v4767_v3, %v12965_v22 }
 0x24e   : > { %12956 = vst [vmem:[#allocation71_spill] sm:$0xff] %v10421_v35  ;;  %12958 = vst [vmem:[#allocation72_spill] sm:$0xff] %v10424_v42  ;;  %v4782_v51 = vld [vmem:[%s5424_s23 + $0x150] sm:$0xff]  ;;  %v2965_v13 = vmul.f32 %v4768_v53, %v12965_v22  ;;  %v2966_v19 = vmul.f32 %v4769_v14, %v12965_v22  ;;  %v2967_v0 = vmul.f32 %v4770_v6, %v12965_v22  ;;  %v4783_v23 = vld [vmem:[%s5424_s23 + $0x158] sm:$0xff] }
 0x24f   : > { %12960 = vst [vmem:[#allocation73_spill] sm:$0xff] %v10430_v48  ;;  %12962 = vst [vmem:[#allocation74_spill] sm:$0xff] %v10433_v49  ;;  %v4784_v44 = vld [vmem:[%s5424_s23 + $0x168] sm:$0xff]  ;;  %v4785_v36 = vld [vmem:[%s5424_s23 + $0x170] sm:$0xff]  ;;  %v2968_v21 = vmul.f32 %v4771_v31, %v12965_v22  ;;  %v2969_v55 = vmul.f32 %v4772_v28, %v12965_v22  ;;  %v2970_v3 = vmul.f32 %v4773_v62, %v12965_v22 }
 0x250   : > { %12964 = vst [vmem:[#allocation75_spill] sm:$0xff] %v10436_v8  ;;  %v2971_v16 = vmul.f32 %v4774_v4, %v12965_v22  ;;  %v2972_v53 = vmul.f32 %v4775_v39, %v12965_v22  ;;  %v2973_v14 = vmul.f32 %v4776_v29, %v12965_v22  ;;  %v2974_v6 = vmul.f32 %v4777_v59, %v12965_v22  ;;  %v4795_v4 = vld [vmem:[%s5424_s23 + $0x1e8] sm:$0xff]  ;;  %v4796_v49 = vld [vmem:[%s5424_s23 + $0x1f8] sm:$0xff]  ;;  %v4797_v39 = vld [vmem:[%s5424_s23 + $0x200] sm:$0xff] }
 0x251   : > { %v2975_v56 = vmul.f32 %v4778_v2, %v12965_v22  ;;  %v2976_v31 = vmul.f32 %v4779_v15, %v12965_v22  ;;  %v2977_v28 = vmul.f32 %v4780_v54, %v12965_v22  ;;  %v2978_v8 = vmul.f32 %v4781_v24, %v12965_v22  ;;  %v12966_v48 = vld [vmem:[#allocation123_spill] sm:$0xff]  ;;  %v12967_v15 = vld [vmem:[#allocation136_spill] sm:$0xff]  ;;  %v12970_v38 = vld [vmem:[#allocation126_spill] sm:$0xff] }
 0x252   : > { %v2979_v62 = vmul.f32 %v4782_v51, %v12965_v22  ;;  %v2980_v29 = vmul.f32 %v4783_v23, %v12965_v22  ;;  %v2981_v59 = vmul.f32 %v4784_v44, %v12965_v22  ;;  %v2982_v2 = vmul.f32 %v4785_v36, %v12965_v22  ;;  %v12968_v54 = vld [vmem:[#allocation124_spill] sm:$0xff]  ;;  %v12969_v51 = vld [vmem:[#allocation125_spill] sm:$0xff]  ;;  %v12971_v23 = vld [vmem:[#allocation127_spill] sm:$0xff] }
 0x253   : > { %v2983_v42 = vmul.f32 %v12966_v48, %v12965_v22  ;;  %v2984_v35 = vmul.f32 %v12967_v15, %v12965_v22  ;;  %v2985_v24 = vmul.f32 %v12968_v54, %v12965_v22  ;;  %v2986_v33 = vmul.f32 %v12969_v51, %v12965_v22 }
 0x254   : > { %v2987_v58 = vmul.f32 %v12970_v38, %v12965_v22  ;;  %v2988_v44 = vmul.f32 %v12971_v23, %v12965_v22  ;;  %v2989_v36 = vmul.f32 %v4792_v63, %v12965_v22  ;;  %v2990_v17 = vmul.f32 %v4793_v32, %v12965_v22 }
 0x255   : > { %v2991_v48 = vmul.f32 %v4794_v57, %v12965_v22  ;;  %v2992_v15 = vmul.f32 %v4795_v4, %v12965_v22  ;;  %v2993_v7 = vmul.f32 %v4796_v49, %v12965_v22  ;;  %v2994_v54 = vmul.f32 %v4797_v39, %v12965_v22  ;;  %v4798_v49 = vld [vmem:[%s5424_s23 + $0x93] sm:$0xff]  ;;  %v4800_v22 = vld [vmem:[%s5424_s23 + $0xab] sm:$0xff] }
 0x256   : > { %v10492_v51 = vadd.f32 %v2963_v61, %v10328_v41  ;;  %v10495_v38 = vadd.f32 %v2964_v25, %v10331_v30  ;;  %v10498_v23 = vadd.f32 %v2965_v13, %v10334_v60  ;;  %v10501_v32 = vadd.f32 %v2966_v19, %v10337_v1  ;;  %v4803_v61 = vld [vmem:[%s5424_s23 + $0xcb] sm:$0xff] }
 0x257   : > { %v10504_v57 = vadd.f32 %v2967_v0, %v10340_v34  ;;  %v10507_v63 = vadd.f32 %v2968_v21, %v10347_v47  ;;  %v10510_v41 = vadd.f32 %v2969_v55, %v10350_v52  ;;  %v10513_v30 = vadd.f32 %v2970_v3, %v10353_v20  ;;  %v12976_v13 = vld [vmem:[#allocation43_spill] sm:$0xff]  ;;  %v12978_v19 = vld [vmem:[#allocation48_spill] sm:$0xff] }
 0x258   : > { %v10516_v60 = vadd.f32 %v2971_v16, %v10356_v10  ;;  %v10519_v1 = vadd.f32 %v2972_v53, %v10359_v50  ;;  %v10522_v34 = vadd.f32 %v2973_v14, %v10362_v40  ;;  %v10525_v47 = vadd.f32 %v2974_v6, %v10365_v5  ;;  %v4799_v5 = vld [vmem:[%s5424_s23 + $0x9b] sm:$0xff]  ;;  %v4806_v21 = vld [vmem:[%s5424_s23 + $0xf3] sm:$0xff]  ;;  %v12982_v55 = vld [vmem:[#allocation67_spill] sm:$0xff] }
 0x259   : > { %v10528_v52 = vadd.f32 %v2975_v56, %v10368_v12  ;;  %v10531_v20 = vadd.f32 %v2976_v31, %v10371_v11  ;;  %v10534_v10 = vadd.f32 %v2977_v28, %v10374_v46  ;;  %v10537_v50 = vadd.f32 %v2978_v8, %v10377_v37  ;;  %v4802_v8 = vld [vmem:[%s5424_s23 + $0xc3] sm:$0xff]  ;;  %v12988_v53 = vld [vmem:[#allocation72_spill] sm:$0xff]  ;;  %v3485_v56 = vld [vmem:[%s11492_s8] sm:$0x7] }
 0x25a   : > { %v10540_v40 = vadd.f32 %v2979_v62, %v10380_v27  ;;  %v10546_v12 = vadd.f32 %v2980_v29, %v10385_v9  ;;  %v10549_v11 = vadd.f32 %v2981_v59, %v10388_v43  ;;  %v10552_v46 = vadd.f32 %v2982_v2, %v10391_v26  ;;  %v4801_v27 = vld [vmem:[%s5424_s23 + $0xb3] sm:$0xff]  ;;  %v12980_v26 = vld [vmem:[#allocation63_spill] sm:$0xff]  ;;  %v12992_v62 = vld [vmem:[#allocation74_spill] sm:$0xff] }
 0x25b   : > { %v10555_v37 = vadd.f32 %v2983_v42, %v10394_v18  ;;  %v10561_v25 = vadd.f32 %v2984_v35, %v10400_v45  ;;  %v10564_v9 = vadd.f32 %v2985_v24, %v12976_v13  ;;  %v10567_v43 = vadd.f32 %v2986_v33, %v12978_v19  ;;  %v4804_v18 = vld [vmem:[%s5424_s23 + $0xdb] sm:$0xff]  ;;  %v4805_v42 = vld [vmem:[%s5424_s23 + $0xe3] sm:$0xff]  ;;  %v4808_v6 = vld [vmem:[%s5424_s23 + $0x10b] sm:$0xff] }
 0x25c   : > { %12972 = vst [vmem:[#allocation33_spill] sm:$0xff] %v10549_v11  ;;  %12973 = vst [vmem:[#allocation49_spill] sm:$0xff] %v10552_v46  ;;  %v10570_v0 = vadd.f32 %v2987_v58, %v12980_v26  ;;  %v10576_v45 = vadd.f32 %v2988_v44, %v12982_v55  ;;  %v12984_v35 = vld [vmem:[#allocation70_spill] sm:$0xff]  ;;  %v12986_v16 = vld [vmem:[#allocation71_spill] sm:$0xff]  ;;  %v10585_v14 = vadd.f32 %v2991_v48, %v12988_v53  ;;  %v3747_v11 = vpop.f32.mrf.mxu1 }
 0x25d   : > { %12974 = vst [vmem:[#allocation34_spill] sm:$0xff] %v10555_v37  ;;  %12975 = vst [vmem:[#allocation54_spill] sm:$0xff] %v10561_v25  ;;  %v10579_v3 = vadd.f32 %v2989_v36, %v12984_v35  ;;  %v10582_v33 = vadd.f32 %v2990_v17, %v12986_v16  ;;  %v4807_v58 = vld [vmem:[%s5424_s23 + $0xfb] sm:$0xff]  ;;  %v10596_v4 = vadd.f32 %v2993_v7, %v12992_v62  ;;  %v12994_v17 = vld [vmem:[#allocation75_spill] sm:$0xff] }
 0x25e   : > { %12977 = vst [vmem:[#allocation55_spill] sm:$0xff] %v10564_v9  ;;  %12979 = vst [vmem:[#allocation60_spill] sm:$0xff] %v10567_v43  ;;  %v12990_v31 = vld [vmem:[#allocation73_spill] sm:$0xff]  ;;  %v10599_v39 = vadd.f32 %v2994_v54, %v12994_v17  ;;  %v4810_v59 = vld [vmem:[%s5424_s23 + $0x123] sm:$0xff] }
 0x25f   : > { %12981 = vst [vmem:[#allocation61_spill] sm:$0xff] %v10570_v0  ;;  %12983 = vst [vmem:[#allocation50_spill] sm:$0xff] %v10576_v45  ;;  %v10593_v28 = vadd.f32 %v2992_v15, %v12990_v31  ;;  %v4809_v29 = vld [vmem:[%s5424_s23 + $0x113] sm:$0xff]  ;;  %v4811_v2 = vld [vmem:[%s5424_s23 + $0x12b] sm:$0xff]  ;;  %v3590_v31 = vrot.slane %v3485_v56, 1  ;;  %v3679_v0 = vrot.slane %v3485_v56, 2 }
 0x260   : > { %12985 = vst [vmem:[#allocation28_spill] sm:$0xff] %v10579_v3  ;;  %12987 = vst [vmem:[#allocation2_spill] sm:$0xff] %v10582_v33  ;;  %v12996_v24 = vld [vmem:[#allocation142_spill] sm:$0xff]  ;;  %v4814_v13 = vld [vmem:[%s5424_s23 + $0x153] sm:$0xff] }
 0x261   : > { %12989 = vst [vmem:[#allocation3_spill] sm:$0xff] %v10585_v14  ;;  %12991 = vst [vmem:[#allocation4_spill] sm:$0xff] %v10593_v28  ;;  %v3063_v44 = vmul.f32 %v4798_v49, %v12996_v24  ;;  %v4812_v36 = vld [vmem:[%s5424_s23 + $0x13b] sm:$0xff]  ;;  %v4813_v48 = vld [vmem:[%s5424_s23 + $0x143] sm:$0xff]  ;;  %v3064_v19 = vmul.f32 %v4799_v5, %v12996_v24  ;;  %v3065_v15 = vmul.f32 %v4800_v22, %v12996_v24 }
 0x262   : > { %12993 = vst [vmem:[#allocation5_spill] sm:$0xff] %v10596_v4  ;;  %12995 = vst [vmem:[#allocation6_spill] sm:$0xff] %v10599_v39  ;;  %v3066_v26 = vmul.f32 %v4801_v27, %v12996_v24  ;;  %v3067_v7 = vmul.f32 %v4802_v8, %v12996_v24  ;;  %v4815_v55 = vld [vmem:[%s5424_s23 + $0x15b] sm:$0xff]  ;;  %v4816_v54 = vld [vmem:[%s5424_s23 + $0x16b] sm:$0xff]  ;;  %v3068_v16 = vmul.f32 %v4803_v61, %v12996_v24 }
 0x263   : > { %v4817_v35 = vld [vmem:[%s5424_s23 + $0x173] sm:$0xff]  ;;  %v3069_v49 = vmul.f32 %v4804_v18, %v12996_v24  ;;  %v3070_v53 = vmul.f32 %v4805_v42, %v12996_v24  ;;  %v3071_v5 = vmul.f32 %v4806_v21, %v12996_v24  ;;  %v3072_v22 = vmul.f32 %v4807_v58, %v12996_v24  ;;  %v4824_v17 = vld [vmem:[%s5424_s23 + $0x1cb] sm:$0xff]  ;;  %v4826_v4 = vld [vmem:[%s5424_s23 + $0x1e3] sm:$0xff] }
 0x264   : > { %v3073_v27 = vmul.f32 %v4808_v6, %v12996_v24  ;;  %v3074_v8 = vmul.f32 %v4809_v29, %v12996_v24  ;;  %v3075_v62 = vmul.f32 %v4810_v59, %v12996_v24  ;;  %v3076_v61 = vmul.f32 %v4811_v2, %v12996_v24  ;;  %v4825_v39 = vld [vmem:[%s5424_s23 + $0x1d3] sm:$0xff]  ;;  %v4827_v29 = vld [vmem:[%s5424_s23 + $0x1eb] sm:$0xff]  ;;  %v4828_v14 = vld [vmem:[%s5424_s23 + $0x1fb] sm:$0xff] }
 0x265   : > { %v3077_v18 = vmul.f32 %v4812_v36, %v12996_v24  ;;  %v3078_v42 = vmul.f32 %v4813_v48, %v12996_v24  ;;  %v3079_v21 = vmul.f32 %v4814_v13, %v12996_v24  ;;  %v3080_v58 = vmul.f32 %v4815_v55, %v12996_v24  ;;  %v4829_v59 = vld [vmem:[%s5424_s23 + $0x203] sm:$0xff]  ;;  %v12997_v2 = vld [vmem:[#allocation133_spill] sm:$0xff]  ;;  %v13004_v46 = vld [vmem:[#allocation88_spill] sm:$0xff] }
 0x266   : > { %v3081_v28 = vmul.f32 %v4816_v54, %v12996_v24  ;;  %v3082_v6 = vmul.f32 %v4817_v35, %v12996_v24  ;;  %v3083_v33 = vmul.f32 %v12997_v2, %v12996_v24  ;;  %v12998_v36 = vld [vmem:[#allocation25_spill] sm:$0xff]  ;;  %v12999_v48 = vld [vmem:[#allocation42_spill] sm:$0xff]  ;;  %v13002_v54 = vld [vmem:[#allocation108_spill] sm:$0xff]  ;;  %v3088_v2 = vmul.f32 %v13004_v46, %v12996_v24 }
 0x267   : > { %v3569_v3 = vadd.f32 %v12998_v36, %v3485_v56  ;;  %v3659_v45 = vadd.f32 %v12999_v48, %v3590_v31  ;;  %v13000_v43 = vld [vmem:[#allocation134_spill] sm:$0xff]  ;;  %v13001_v55 = vld [vmem:[#allocation13_spill] sm:$0xff]  ;;  %v3086_v35 = vmul.f32 %v13002_v54, %v12996_v24  ;;  %v3089_v36 = vmul.f32 %v4824_v17, %v12996_v24 }
 0x268   : > { %v3084_v13 = vmul.f32 %v13000_v43, %v12996_v24  ;;  %v3085_v9 = vmul.f32 %v13001_v55, %v12996_v24  ;;  %v13003_v25 = vld [vmem:[#allocation102_spill] sm:$0xff]  ;;  %v3090_v31 = vmul.f32 %v4825_v39, %v12996_v24  ;;  %v3091_v56 = vmul.f32 %v4826_v4, %v12996_v24 }
 0x269   : > { %v3087_v37 = vmul.f32 %v13003_v25, %v12996_v24  ;;  %v3092_v43 = vmul.f32 %v4827_v29, %v12996_v24  ;;  %v3093_v48 = vmul.f32 %v4828_v14, %v12996_v24  ;;  %v3094_v55 = vmul.f32 %v4829_v59, %v12996_v24  ;;  %v5104_v24 = vpop.f32.mrf.mxu1  ;;  %v4837_v59 = vld [vmem:[%s5424_s23 + $0xe6] sm:$0xff] }
 0x26a   : > { %v10657_v54 = vadd.f32 %v3063_v44, %v10492_v51  ;;  %v10660_v25 = vadd.f32 %v3064_v19, %v10495_v38  ;;  %v10663_v46 = vadd.f32 %v3065_v15, %v10498_v23  ;;  %v3751_v17 = vmax.f32 %v3569_v3, %v3659_v45  ;;  %v4838_v24 = vld [vmem:[%s5424_s23 + $0xf6] sm:$0xff] }
 0x26b   : > { %v3748_v39 = vadd.f32 %v3747_v11, %v3679_v0  ;;  %v10666_v4 = vadd.f32 %v3066_v26, %v10501_v32  ;;  %v10669_v29 = vadd.f32 %v3067_v7, %v10504_v57  ;;  %v10672_v14 = vadd.f32 %v3068_v16, %v10507_v63  ;;  %v4830_v26 = vld [vmem:[%s5424_s23 + $0x96] sm:$0xff]  ;;  %v13009_v16 = vld [vmem:[#allocation54_spill] sm:$0xff] }
 0x26c   : > { %v10675_v51 = vadd.f32 %v3069_v49, %v10510_v41  ;;  %v10678_v38 = vadd.f32 %v3070_v53, %v10513_v30  ;;  %v10681_v23 = vadd.f32 %v3071_v5, %v10516_v60  ;;  %v10684_v11 = vadd.f32 %v3072_v22, %v10519_v1  ;;  %v4832_v22 = vld [vmem:[%s5424_s23 + $0xae] sm:$0xff] }
 0x26d   : > { %v3752_v32 = vmax.f32 %v3751_v17, %v3748_v39  ;;  %v10687_v57 = vadd.f32 %v3073_v27, %v10522_v34  ;;  %v10690_v63 = vadd.f32 %v3074_v8, %v10525_v47  ;;  %v10693_v41 = vadd.f32 %v3075_v62, %v10528_v52  ;;  %v4834_v27 = vld [vmem:[%s5424_s23 + $0xc6] sm:$0xff]  ;;  %v13015_v62 = vld [vmem:[#allocation61_spill] sm:$0xff] }
 0x26e   : > { %v10696_v30 = vadd.f32 %v3076_v61, %v10531_v20  ;;  %v10699_v60 = vadd.f32 %v3077_v18, %v10534_v10  ;;  %v10702_v34 = vadd.f32 %v3078_v42, %v10537_v50  ;;  %v10705_v47 = vadd.f32 %v3079_v21, %v10540_v40  ;;  %v13005_v20 = vld [vmem:[#allocation33_spill] sm:$0xff]  ;;  %v13017_v18 = vld [vmem:[#allocation50_spill] sm:$0xff]  ;;  %v13019_v21 = vld [vmem:[#allocation28_spill] sm:$0xff] }
 0x26f   : > { %v3753_v1 = vsub.f32 %v3569_v3, %v3752_v32  ;;  %v3756_v0 = vsub.f32 %v3659_v45, %v3752_v32  ;;  %v3759_v44 = vsub.f32 %v3748_v39, %v3752_v32  ;;  %v10708_v52 = vadd.f32 %v3080_v58, %v10546_v12  ;;  %v13006_v10 = vld [vmem:[#allocation49_spill] sm:$0xff]  ;;  %v13007_v3 = vld [vmem:[#allocation34_spill] sm:$0xff]  ;;  %v13011_v12 = vld [vmem:[#allocation55_spill] sm:$0xff] }
 0x270   : > { %v10711_v19 = vadd.f32 %v3081_v28, %v13005_v20  ;;  %v10714_v15 = vadd.f32 %v3082_v6, %v13006_v10  ;;  %v10717_v45 = vadd.f32 %v3083_v33, %v13007_v3  ;;  %v4831_v50 = vld [vmem:[%s5424_s23 + $0x9e] sm:$0xff]  ;;  %v10722_v49 = vadd.f32 %v3084_v13, %v13009_v16  ;;  %v13013_v28 = vld [vmem:[#allocation60_spill] sm:$0xff]  ;;  %v4842_v10 = vld [vmem:[%s5424_s23 + $0x126] sm:$0xff] }
 0x271   : > { %v3754_v7 = vmul.f32 1.442695, %v3753_v1  ;;  %v3757_v40 = vmul.f32 1.442695, %v3756_v0  ;;  %v10725_v53 = vadd.f32 %v3085_v9, %v13011_v12  ;;  %v10728_v5 = vadd.f32 %v3086_v35, %v13013_v28  ;;  %v4833_v33 = vld [vmem:[%s5424_s23 + $0xb6] sm:$0xff]  ;;  %v4835_v58 = vld [vmem:[%s5424_s23 + $0xce] sm:$0xff] }
 0x272   : > { %13008 = vst [vmem:[#allocation7_spill] sm:$0xff] %v10717_v45  ;;  %13010 = vst [vmem:[#allocation128_spill] sm:$0xff] %v10722_v49  ;;  %v3760_v8 = vmul.f32 1.442695, %v3759_v44  ;;  %v10734_v61 = vadd.f32 %v3087_v37, %v13015_v62  ;;  %v10737_v42 = vadd.f32 %v3088_v2, %v13017_v18  ;;  %v10740_v9 = vadd.f32 %v3089_v36, %v13019_v21  ;;  %v4836_v6 = vld [vmem:[%s5424_s23 + $0xde] sm:$0xff]  ;;  %v13023_v37 = vld [vmem:[#allocation3_spill] sm:$0xff] }
 0x273   : > { %13012 = vst [vmem:[#allocation129_spill] sm:$0xff] %v10725_v53  ;;  %13014 = vst [vmem:[#allocation130_spill] sm:$0xff] %v10728_v5  ;;  %5116 = vpow2.f32 %v3754_v7  ;;  %v13021_v13 = vld [vmem:[#allocation2_spill] sm:$0xff]  ;;  %v10749_v17 = vadd.f32 %v3091_v56, %v13023_v37  ;;  %v13025_v2 = vld [vmem:[#allocation4_spill] sm:$0xff] }
 0x274   : > { %13016 = vst [vmem:[#allocation131_spill] sm:$0xff] %v10734_v61  ;;  %13018 = vst [vmem:[#allocation31_spill] sm:$0xff] %v10737_v42  ;;  %v10746_v35 = vadd.f32 %v3090_v31, %v13021_v13  ;;  %v10752_v39 = vadd.f32 %v3092_v43, %v13025_v2  ;;  %v4839_v36 = vld [vmem:[%s5424_s23 + $0xfe] sm:$0xff]  ;;  %v4840_v32 = vld [vmem:[%s5424_s23 + $0x10e] sm:$0xff]  ;;  %5118 = vpow2.f32 %v3757_v40 }
 0x275   : > { %13020 = vst [vmem:[#allocation53_spill] sm:$0xff] %v10740_v9  ;;  %13024 = vst [vmem:[#allocation132_spill] sm:$0xff] %v10749_v17  ;;  %v13027_v1 = vld [vmem:[#allocation5_spill] sm:$0xff]  ;;  %v13029_v44 = vld [vmem:[#allocation6_spill] sm:$0xff]  ;;  %5120 = vpow2.f32 %v3760_v8 }
 0x276   : > { %13022 = vst [vmem:[#allocation56_spill] sm:$0xff] %v10746_v35  ;;  %13026 = vst [vmem:[#allocation37_spill] sm:$0xff] %v10752_v39  ;;  %v10758_v0 = vadd.f32 %v3093_v48, %v13027_v1  ;;  %v10761_v31 = vadd.f32 %v3094_v55, %v13029_v44  ;;  %v4841_v20 = vld [vmem:[%s5424_s23 + $0x116] sm:$0xff]  ;;  %v4843_v56 = vld [vmem:[%s5424_s23 + $0x12e] sm:$0xff] }
 0x277   : > { %v13031_v3 = vld [vmem:[#allocation143_spill] sm:$0xff]  ;;  %v4844_v16 = vld [vmem:[%s5424_s23 + $0x13e] sm:$0xff]  ;;  %v4846_v28 = vld [vmem:[%s5424_s23 + $0x156] sm:$0xff] }
 0x278   : > { %13028 = vst [vmem:[#allocation137_spill] sm:$0xff] %v10758_v0  ;;  %13030 = vst [vmem:[#allocation38_spill] sm:$0xff] %v10761_v31  ;;  %v3163_v7 = vmul.f32 %v4830_v26, %v13031_v3  ;;  %v3164_v43 = vmul.f32 %v4831_v50, %v13031_v3  ;;  %v4845_v12 = vld [vmem:[%s5424_s23 + $0x146] sm:$0xff]  ;;  %v3165_v40 = vmul.f32 %v4832_v22, %v13031_v3  ;;  %v4847_v62 = vld [vmem:[%s5424_s23 + $0x15e] sm:$0xff] }
 0x279   : > { %v3166_v48 = vmul.f32 %v4833_v33, %v13031_v3  ;;  %v3167_v55 = vmul.f32 %v4834_v27, %v13031_v3  ;;  %v4848_v18 = vld [vmem:[%s5424_s23 + $0x16e] sm:$0xff]  ;;  %v4849_v21 = vld [vmem:[%s5424_s23 + $0x176] sm:$0xff]  ;;  %v3168_v26 = vmul.f32 %v4835_v58, %v13031_v3  ;;  %v3169_v50 = vmul.f32 %v4836_v6, %v13031_v3  ;;  %v4858_v44 = vld [vmem:[%s5424_s23 + $0x1e6] sm:$0xff] }
 0x27a   : > { %v3170_v13 = vmul.f32 %v4837_v59, %v13031_v3  ;;  %v3171_v22 = vmul.f32 %v4838_v24, %v13031_v3  ;;  %v3172_v33 = vmul.f32 %v4839_v36, %v13031_v3  ;;  %v3173_v37 = vmul.f32 %v4840_v32, %v13031_v3  ;;  %v4856_v2 = vld [vmem:[%s5424_s23 + $0x1ce] sm:$0xff]  ;;  %v4857_v1 = vld [vmem:[%s5424_s23 + $0x1d6] sm:$0xff]  ;;  %v4860_v0 = vld [vmem:[%s5424_s23 + $0x1fe] sm:$0xff] }
 0x27b   : > { %v3174_v27 = vmul.f32 %v4841_v20, %v13031_v3  ;;  %v3175_v8 = vmul.f32 %v4842_v10, %v13031_v3  ;;  %v3176_v58 = vmul.f32 %v4843_v56, %v13031_v3  ;;  %v3177_v6 = vmul.f32 %v4844_v16, %v13031_v3  ;;  %v4859_v24 = vld [vmem:[%s5424_s23 + $0x1ee] sm:$0xff]  ;;  %v4861_v36 = vld [vmem:[%s5424_s23 + $0x206] sm:$0xff]  ;;  %s4896_s23 = sshll.u32 %s13321_s10, 8 }
 0x27c   : > { %v3178_v31 = vmul.f32 %v4845_v12, %v13031_v3  ;;  %v3179_v59 = vmul.f32 %v4846_v28, %v13031_v3  ;;  %v3180_v32 = vmul.f32 %v4847_v62, %v13031_v3  ;;  %v3181_v20 = vmul.f32 %v4848_v18, %v13031_v3  ;;  %v13032_v39 = vld [vmem:[#allocation10_spill] sm:$0xff]  ;;  %v13033_v56 = vld [vmem:[#allocation35_spill] sm:$0xff]  ;;  %v13035_v28 = vld [vmem:[#allocation12_spill] sm:$0xff]  ;;  %s11403_s18 = scalar_lea.vmem %s11493_s9, %s4896_s23 }
 0x27d   : > { %v3182_v10 = vmul.f32 %v4849_v21, %v13031_v3  ;;  %v3183_v17 = vmul.f32 %v13032_v39, %v13031_v3  ;;  %v3184_v35 = vmul.f32 %v13033_v56, %v13031_v3  ;;  %v13034_v16 = vld [vmem:[#allocation26_spill] sm:$0xff]  ;;  %v3186_v9 = vmul.f32 %v13035_v28, %v13031_v3  ;;  %v13036_v42 = vld [vmem:[#allocation36_spill] sm:$0xff]  ;;  %v13037_v62 = vld [vmem:[#allocation41_spill] sm:$0xff] }
 0x27e   : > { %v3185_v12 = vmul.f32 %v13034_v16, %v13031_v3  ;;  %v3187_v61 = vmul.f32 %v13036_v42, %v13031_v3  ;;  %v3188_v18 = vmul.f32 %v13037_v62, %v13031_v3  ;;  %v3189_v21 = vmul.f32 %v4856_v2, %v13031_v3 }
 0x27f   : > { %v3190_v5 = vmul.f32 %v4857_v1, %v13031_v3  ;;  %v3191_v39 = vmul.f32 %v4858_v44, %v13031_v3  ;;  %v3192_v56 = vmul.f32 %v4859_v24, %v13031_v3  ;;  %v3193_v53 = vmul.f32 %v4860_v0, %v13031_v3 }
 0x280   : > { %v3194_v16 = vmul.f32 %v4861_v36, %v13031_v3  ;;  %v3195_v28 = vadd.f32 %v3163_v7, %v10657_v54  ;;  %v3196_v49 = vadd.f32 %v3164_v43, %v10660_v25  ;;  %v3197_v42 = vadd.f32 %v3165_v40, %v10663_v46  ;;  %v10825_v45 = vpop.eup %5116  ;;  %v13038_v7 = vld [vmem:[#allocation7_spill] sm:$0xff] }
 0x281   : > { %v3198_v62 = vadd.f32 %v3166_v48, %v10666_v4  ;;  %v3199_v2 = vadd.f32 %v3167_v55, %v10669_v29  ;;  %v3200_v1 = vadd.f32 %v3168_v26, %v10672_v14  ;;  %v3201_v44 = vadd.f32 %v3169_v50, %v10675_v51  ;;  %v10831_v3 = vpop.eup %5118 }
 0x282   : > { %v3202_v24 = vadd.f32 %v3170_v13, %v10678_v38  ;;  %v3203_v0 = vadd.f32 %v3171_v22, %v10681_v23  ;;  %v3204_v54 = vadd.f32 %v3172_v33, %v10684_v11  ;;  %v3205_v25 = vadd.f32 %v3173_v37, %v10687_v57  ;;  %v13045_v13 = vld [vmem:[#allocation56_spill] sm:$0xff] }
 0x283   : > { %v3206_v46 = vadd.f32 %v3174_v27, %v10690_v63  ;;  %v3207_v4 = vadd.f32 %v3175_v8, %v10693_v41  ;;  %v3208_v29 = vadd.f32 %v3176_v58, %v10696_v30  ;;  %v3209_v14 = vadd.f32 %v3177_v6, %v10699_v60  ;;  %v10842_v41 = vpop.eup %5120  ;;  %v13039_v30 = vld [vmem:[#allocation128_spill] sm:$0xff]  ;;  %v13040_v60 = vld [vmem:[#allocation129_spill] sm:$0xff]  ;;  %v13049_v58 = vld [vmem:[#allocation38_spill] sm:$0xff] }
 0x284   : > { %v3210_v51 = vadd.f32 %v3178_v31, %v10702_v34  ;;  %v3211_v38 = vadd.f32 %v3179_v59, %v10705_v47  ;;  %v3212_v23 = vadd.f32 %v3180_v32, %v10708_v52  ;;  %v3213_v11 = vadd.f32 %v3181_v20, %v10711_v19  ;;  %v13041_v34 = vld [vmem:[#allocation130_spill] sm:$0xff]  ;;  %v13042_v47 = vld [vmem:[#allocation131_spill] sm:$0xff]  ;;  %v13044_v19 = vld [vmem:[#allocation53_spill] sm:$0xff] }
 0x285   : > { %v3214_v57 = vadd.f32 %v3182_v10, %v10714_v15  ;;  %v3762_v63 = vadd.f32 %v10831_v3, %v10825_v45  ;;  %v3215_v43 = vadd.f32 %v3183_v17, %v13038_v7  ;;  %v3216_v40 = vadd.f32 %v3184_v35, %v13039_v30  ;;  %v13043_v52 = vld [vmem:[#allocation31_spill] sm:$0xff]  ;;  %v13046_v33 = vld [vmem:[#allocation132_spill] sm:$0xff]  ;;  %v13047_v27 = vld [vmem:[#allocation37_spill] sm:$0xff] }
 0x286   : > { %v3217_v48 = vadd.f32 %v3185_v12, %v13040_v60  ;;  %v3218_v31 = vadd.f32 %v3186_v9, %v13041_v34  ;;  %v3219_v55 = vadd.f32 %v3187_v61, %v13042_v47  ;;  %v3220_v26 = vadd.f32 %v3188_v18, %v13043_v52  ;;  %v13048_v8 = vld [vmem:[#allocation137_spill] sm:$0xff]  ;;  %v13050_v59 = vld [vmem:[#allocation144_spill] sm:$0xff]  ;;  %v13099_v47 = vld [vmem:[#allocation23_spill] sm:$0xff] }
 0x287   : > { %v3221_v50 = vadd.f32 %v3189_v21, %v13044_v19  ;;  %v3763_v15 = vadd.f32 %v10842_v41, %v3762_v63  ;;  %v3222_v22 = vadd.f32 %v3190_v5, %v13045_v13  ;;  %v3223_v37 = vadd.f32 %v3191_v39, %v13046_v33  ;;  %v13103_v34 = vld [vmem:[#allocation76_spill] sm:$0xff]  ;;  %v13107_v60 = vld [vmem:[#allocation78_spill] sm:$0xff]  ;;  %v13111_v30 = vld [vmem:[#allocation83_spill] sm:$0xff] }
 0x288   : > { %v3224_v17 = vadd.f32 %v3192_v56, %v13047_v27  ;;  %v3225_v35 = vadd.f32 %v3193_v53, %v13048_v8  ;;  %v3226_v6 = vadd.f32 %v3194_v16, %v13049_v58  ;;  %v10858_v9 = vadd.f32 %v13050_v59, %v3195_v28  ;;  %v13115_v7 = vld [vmem:[#allocation85_spill] sm:$0xff]  ;;  %v13117_v63 = vld [vmem:[#allocation86_spill] sm:$0xff] }
 0x289   : > { %v10861_v61 = vadd.f32 %v13050_v59, %v3196_v49  ;;  %5122 = vrcp.f32 %v3763_v15  ;;  %v10864_v36 = vadd.f32 %v13050_v59, %v3197_v42  ;;  %v10867_v5 = vadd.f32 %v13050_v59, %v3198_v62  ;;  %v13083_v15 = vld [vmem:[#allocation24_spill] sm:$0xff] }
 0x28a   : > { %13051 = vst [vmem:[#allocation32_spill] sm:$0xff] %v10858_v9  ;;  %v10870_v32 = vadd.f32 %v13050_v59, %v3199_v2  ;;  %v10873_v53 = vadd.f32 %v13050_v59, %v3200_v1  ;;  %v10876_v20 = vadd.f32 %v13050_v59, %v3201_v44  ;;  %v10879_v10 = vadd.f32 %v13050_v59, %v3202_v24  ;;  %v13200_v9 = vld [vmem:[#allocation113_spill] sm:$0xff] }
 0x28b   : > { %13052 = vst [vmem:[#allocation47_spill] sm:$0xff] %v10861_v61  ;;  %13053 = vst [vmem:[#allocation59_spill] sm:$0xff] %v10864_v36  ;;  %v10882_v49 = vadd.f32 %v13050_v59, %v3203_v0  ;;  %v10885_v12 = vadd.f32 %v13050_v59, %v3204_v54  ;;  %v10888_v18 = vadd.f32 %v13050_v59, %v3205_v25  ;;  %v13194_v36 = vld [vmem:[#allocation110_spill] sm:$0xff]  ;;  %v13196_v61 = vld [vmem:[#allocation111_spill] sm:$0xff] }
 0x28c   : > { %13054 = vst [vmem:[#allocation103_spill] sm:$0xff] %v10867_v5  ;;  %13055 = vst [vmem:[#allocation39_spill] sm:$0xff] %v10870_v32  ;;  %v10891_v21 = vadd.f32 %v13050_v59, %v3206_v46  ;;  %v10894_v39 = vadd.f32 %v13050_v59, %v3207_v4  ;;  %v10897_v56 = vadd.f32 %v13050_v59, %v3208_v29  ;;  %v13190_v32 = vld [vmem:[#allocation107_spill] sm:$0xff]  ;;  %v13192_v5 = vld [vmem:[#allocation109_spill] sm:$0xff] }
 0x28d   : > { %13056 = vst [vmem:[#allocation135_spill] sm:$0xff] %v10873_v53  ;;  %13057 = vst [vmem:[#allocation139_spill] sm:$0xff] %v10876_v20  ;;  %v10900_v16 = vadd.f32 %v13050_v59, %v3209_v14  ;;  %v10903_v28 = vadd.f32 %v13050_v59, %v3210_v51  ;;  %v10906_v42 = vadd.f32 %v13050_v59, %v3211_v38  ;;  %v13186_v20 = vld [vmem:[#allocation105_spill] sm:$0xff]  ;;  %v13188_v53 = vld [vmem:[#allocation106_spill] sm:$0xff] }
 0x28e   : > { %13058 = vst [vmem:[#allocation140_spill] sm:$0xff] %v10879_v10  ;;  %13059 = vst [vmem:[#allocation141_spill] sm:$0xff] %v10882_v49  ;;  %v10909_v62 = vadd.f32 %v13050_v59, %v3212_v23  ;;  %v10912_v2 = vadd.f32 %v13050_v59, %v3213_v11  ;;  %v10915_v1 = vadd.f32 %v13050_v59, %v3214_v57  ;;  %v13119_v57 = vld [vmem:[#allocation27_spill] sm:$0xff]  ;;  %v13121_v11 = vld [vmem:[#allocation30_spill] sm:$0xff] }
 0x28f   : > { %13060 = vst [vmem:[#allocation145_spill] sm:$0xff] %v10885_v12  ;;  %13061 = vst [vmem:[#allocation146_spill] sm:$0xff] %v10888_v18  ;;  %v10918_v44 = vadd.f32 %v13050_v59, %v3215_v43  ;;  %v10921_v24 = vadd.f32 %v13050_v59, %v3216_v40  ;;  %v10924_v0 = vadd.f32 %v13050_v59, %v3217_v48  ;;  %v13105_v48 = vld [vmem:[#allocation77_spill] sm:$0xff]  ;;  %v13109_v40 = vld [vmem:[#allocation79_spill] sm:$0xff] }
 0x290   : > { %13062 = vst [vmem:[#allocation147_spill] sm:$0xff] %v10891_v21  ;;  %13063 = vst [vmem:[#allocation148_spill] sm:$0xff] %v10894_v39  ;;  %v10927_v54 = vadd.f32 %v13050_v59, %v3218_v31  ;;  %v10930_v25 = vadd.f32 %v13050_v59, %v3219_v55  ;;  %v10933_v46 = vadd.f32 %v13050_v59, %v3220_v26  ;;  %v13097_v55 = vld [vmem:[#allocation22_spill] sm:$0xff]  ;;  %v13101_v31 = vld [vmem:[#allocation57_spill] sm:$0xff] }
 0x291   : > { %13064 = vst [vmem:[#allocation149_spill] sm:$0xff] %v10897_v56  ;;  %13065 = vst [vmem:[#allocation150_spill] sm:$0xff] %v10900_v16  ;;  %v10936_v4 = vadd.f32 %v13050_v59, %v3221_v50  ;;  %v10939_v29 = vadd.f32 %v13050_v59, %v3222_v22  ;;  %v10942_v14 = vadd.f32 %v13050_v59, %v3223_v37  ;;  %v13085_v22 = vld [vmem:[#allocation15_spill] sm:$0xff]  ;;  %v13087_v37 = vld [vmem:[#allocation16_spill] sm:$0xff] }
 0x292   : > { %13066 = vst [vmem:[#allocation151_spill] sm:$0xff] %v10903_v28  ;;  %13067 = vst [vmem:[#allocation152_spill] sm:$0xff] %v10906_v42  ;;  %v10945_v51 = vadd.f32 %v13050_v59, %v3224_v17  ;;  %v10948_v38 = vadd.f32 %v13050_v59, %v3225_v35  ;;  %v10951_v23 = vadd.f32 %v13050_v59, %v3226_v6  ;;  %v13086_v33 = vmax.f32 %v13085_v22, 0.0  ;;  %v13089_v17 = vld [vmem:[#allocation17_spill] sm:$0xff]  ;;  %v13113_v43 = vld [vmem:[#allocation84_spill] sm:$0xff] }
 0x293   : > { %13068 = vst [vmem:[#allocation153_spill] sm:$0xff] %v10909_v62  ;;  %13069 = vst [vmem:[#allocation154_spill] sm:$0xff] %v10912_v2  ;;  %v13088_v27 = vmax.f32 %v13087_v37, 0.0  ;;  %v13098_v37 = vmax.f32 %v13097_v55, 0.0  ;;  %v13108_v55 = vmax.f32 %v13107_v60, 0.0  ;;  %v13118_v60 = vmax.f32 %v13117_v63, 0.0 }
 0x294   : > { %13070 = vst [vmem:[#allocation155_spill] sm:$0xff] %v10915_v1  ;;  %13071 = vst [vmem:[#allocation156_spill] sm:$0xff] %v10918_v44  ;;  %v13154_v44 = vld [vmem:[#allocation82_spill] sm:$0xff]  ;;  %v13157_v1 = vld [vmem:[#allocation87_spill] sm:$0xff] }
 0x295   : > { %13072 = vst [vmem:[#allocation157_spill] sm:$0xff] %v10921_v24  ;;  %13073 = vst [vmem:[#allocation158_spill] sm:$0xff] %v10924_v0  ;;  %v13148_v0 = vld [vmem:[#allocation80_spill] sm:$0xff]  ;;  %v13151_v24 = vld [vmem:[#allocation81_spill] sm:$0xff] }
 0x296   : > { %13074 = vst [vmem:[#allocation159_spill] sm:$0xff] %v10927_v54  ;;  %13075 = vst [vmem:[#allocation89_spill] sm:$0xff] %v10930_v25  ;;  %v5123_v13 = vpop.eup %5122  ;;  %v13142_v25 = vld [vmem:[#allocation65_spill] sm:$0xff]  ;;  %v13145_v54 = vld [vmem:[#allocation66_spill] sm:$0xff] }
 0x297   : > { %13076 = vst [vmem:[#allocation90_spill] sm:$0xff] %v10933_v46  ;;  %13077 = vst [vmem:[#allocation91_spill] sm:$0xff] %v10936_v4  ;;  %v3766_v8 = vmul.f32 %v5123_v13, %v10825_v45  ;;  %v3835_v35 = vmul.f32 %v5123_v13, %v10831_v3  ;;  %v3904_v58 = vmul.f32 %v5123_v13, %v10842_v41  ;;  %v13091_v3 = vld [vmem:[#allocation19_spill] sm:$0xff]  ;;  %v13136_v4 = vld [vmem:[#allocation52_spill] sm:$0xff] }
 0x298   : > { %13078 = vst [vmem:[#allocation62_spill] sm:$0xff] %v10939_v29  ;;  %13079 = vst [vmem:[#allocation64_spill] sm:$0xff] %v10942_v14  ;;  %v13092_v41 = vmax.f32 %v13091_v3, 0.0  ;;  %v13102_v3 = vmax.f32 %v13101_v31, 0.0  ;;  %v13112_v31 = vmax.f32 %v13111_v30, 0.0  ;;  %v13122_v30 = vmax.f32 %v13121_v11, 0.0 }
 0x299   : > { %13080 = vst [vmem:[#allocation68_spill] sm:$0xff] %v10945_v51  ;;  %13081 = vst [vmem:[#allocation69_spill] sm:$0xff] %v10948_v38  ;;  %v3770_v45 = vrot.slane %v3766_v8, %v13083_v15  ;;  %v10990_v13 = vrot.slane %v3835_v35, %v13083_v15  ;;  %v10993_v59 = vrot.slane %v3904_v58, %v13083_v15  ;;  %v13090_v8 = vmax.f32 %v13089_v17, 0.0  ;;  %v13093_v35 = vld [vmem:[#allocation20_spill] sm:$0xff]  ;;  %v13095_v58 = vld [vmem:[#allocation21_spill] sm:$0xff] }
 0x29a   : > { %13082 = vst [vmem:[#allocation8_spill] sm:$0xff] %v10951_v23  ;;  %v13094_v52 = vmax.f32 %v13093_v35, 0.0  ;;  %v13096_v22 = vmax.f32 %v13095_v58, 0.0  ;;  %v13100_v17 = vmax.f32 %v13099_v47, 0.0  ;;  %v13104_v35 = vmax.f32 %v13103_v34, 0.0  ;;  %v13123_v23 = vld [vmem:[#allocation40_spill] sm:$0xff] }
 0x29b   : > { %13084 = vst [vmem:[#allocation9_spill] sm:$0xff] %v10993_v59  ;;  %v10997_v6 = vmul.f32 %v3770_v45, %v13086_v33  ;;  %v11001_v50 = vmul.f32 %v3770_v45, %v13088_v27  ;;  %v11005_v19 = vmul.f32 %v3770_v45, %v13090_v8  ;;  %v11009_v26 = vmul.f32 %v3770_v45, %v13092_v41  ;;  %v13125_v38 = vld [vmem:[#allocation44_spill] sm:$0xff]  ;;  %v13127_v51 = vld [vmem:[#allocation45_spill] sm:$0xff]  ;;  %v13130_v14 = vld [vmem:[#allocation46_spill] sm:$0xff] }
 0x29c   : > { %v11013_v15 = vmul.f32 %v3770_v45, %v13094_v52  ;;  %v11017_v33 = vmul.f32 %v3770_v45, %v13096_v22  ;;  %v11021_v27 = vmul.f32 %v3770_v45, %v13098_v37  ;;  %v11025_v8 = vmul.f32 %v3770_v45, %v13100_v17  ;;  %v13133_v29 = vld [vmem:[#allocation51_spill] sm:$0xff]  ;;  %v13139_v46 = vld [vmem:[#allocation58_spill] sm:$0xff]  ;;  %v13162_v62 = vld [vmem:[#allocation92_spill] sm:$0xff] }
 0x29d   : > { %v11029_v41 = vmul.f32 %v3770_v45, %v13102_v3  ;;  %v11033_v52 = vmul.f32 %v3770_v45, %v13104_v35  ;;  %v13106_v58 = vmax.f32 %v13105_v48, 0.0  ;;  %v11041_v37 = vmul.f32 %v3770_v45, %v13108_v55  ;;  %v13160_v2 = vld [vmem:[#allocation11_spill] sm:$0xff]  ;;  %v13164_v42 = vld [vmem:[#allocation29_spill] sm:$0xff]  ;;  %v13168_v16 = vld [vmem:[#allocation94_spill] sm:$0xff] }
 0x29e   : > { %v13110_v47 = vmax.f32 %v13109_v40, 0.0  ;;  %v11049_v3 = vmul.f32 %v3770_v45, %v13112_v31  ;;  %v13114_v34 = vmax.f32 %v13113_v43, 0.0  ;;  %v13116_v48 = vmax.f32 %v13115_v7, 0.0  ;;  %v13166_v28 = vld [vmem:[#allocation93_spill] sm:$0xff]  ;;  %v13172_v56 = vld [vmem:[#allocation96_spill] sm:$0xff]  ;;  %v13176_v21 = vld [vmem:[#allocation98_spill] sm:$0xff] }
 0x29f   : > { %v11037_v22 = vmul.f32 %v3770_v45, %v13106_v58  ;;  %v11061_v55 = vmul.f32 %v3770_v45, %v13118_v60  ;;  %v13120_v40 = vmax.f32 %v13119_v57, 0.0  ;;  %v11069_v31 = vmul.f32 %v3770_v45, %v13122_v30  ;;  %v13174_v39 = vld [vmem:[#allocation97_spill] sm:$0xff]  ;;  %v13178_v18 = vld [vmem:[#allocation99_spill] sm:$0xff]  ;;  %v13180_v12 = vld [vmem:[#allocation100_spill] sm:$0xff] }
 0x2a0   : > { %v11045_v17 = vmul.f32 %v3770_v45, %v13110_v47  ;;  %v11053_v35 = vmul.f32 %v3770_v45, %v13114_v34  ;;  %v11057_v58 = vmul.f32 %v3770_v45, %v13116_v48  ;;  %v13124_v43 = vmax.f32 %v13123_v23, 0.0  ;;  %v13182_v49 = vld [vmem:[#allocation101_spill] sm:$0xff]  ;;  %v13184_v10 = vld [vmem:[#allocation104_spill] sm:$0xff] }
 0x2a1   : > { %v11065_v47 = vmul.f32 %v3770_v45, %v13120_v40  ;;  %v13126_v7 = vmax.f32 %v13125_v38, 0.0  ;;  %v13128_v63 = vmax.f32 %v13127_v51, 0.0  ;;  %v13131_v57 = vmax.f32 %v13130_v14, 0.0  ;;  %v13198_v59 = vld [vmem:[#allocation112_spill] sm:$0xff] }
 0x2a2   : > { %v11073_v34 = vmul.f32 %v3770_v45, %v13124_v43  ;;  %v13134_v11 = vmax.f32 %v13133_v29, 0.0  ;;  %v13137_v23 = vmax.f32 %v13136_v4, 0.0  ;;  %v13140_v38 = vmax.f32 %v13139_v46, 0.0 }
 0x2a3   : > { %v11077_v48 = vmul.f32 %v3770_v45, %v13126_v7  ;;  %v11081_v60 = vmul.f32 %v3770_v45, %v13128_v63  ;;  %v11085_v40 = vmul.f32 %v3770_v45, %v13131_v57  ;;  %v13143_v51 = vmax.f32 %v13142_v25, 0.0 }
 0x2a4   : > { %v11089_v30 = vmul.f32 %v3770_v45, %v13134_v11  ;;  %v11093_v43 = vmul.f32 %v3770_v45, %v13137_v23  ;;  %v11097_v7 = vmul.f32 %v3770_v45, %v13140_v38  ;;  %v13146_v14 = vmax.f32 %v13145_v54, 0.0 }
 0x2a5   : > { %13129 = vst [vmem:[#allocation138_spill] sm:$0xff] %v11081_v60  ;;  %13132 = vst [vmem:[#allocation123_spill] sm:$0xff] %v11085_v40  ;;  %v11101_v63 = vmul.f32 %v3770_v45, %v13143_v51  ;;  %v13149_v29 = vmax.f32 %v13148_v0, 0.0  ;;  %v13152_v4 = vmax.f32 %v13151_v24, 0.0  ;;  %v13155_v46 = vmax.f32 %v13154_v44, 0.0  ;;  %v13220_v40 = vld [vmem:[#allocation121_spill] sm:$0xff] }
 0x2a6   : > { %13135 = vst [vmem:[#allocation136_spill] sm:$0xff] %v11089_v30  ;;  %13138 = vst [vmem:[#allocation124_spill] sm:$0xff] %v11093_v43  ;;  %v11105_v57 = vmul.f32 %v3770_v45, %v13146_v14  ;;  %v13158_v25 = vmax.f32 %v13157_v1, 0.0  ;;  %v13161_v54 = vmax.f32 %v13160_v2, 0.0  ;;  %v13163_v0 = vmax.f32 %v13162_v62, 0.0  ;;  %v13216_v43 = vld [vmem:[#allocation119_spill] sm:$0xff] }
 0x2a7   : > { %13141 = vst [vmem:[#allocation125_spill] sm:$0xff] %v11097_v7  ;;  %13144 = vst [vmem:[#allocation126_spill] sm:$0xff] %v11101_v63  ;;  %v11109_v11 = vmul.f32 %v3770_v45, %v13149_v29  ;;  %v11113_v23 = vmul.f32 %v3770_v45, %v13152_v4  ;;  %v11117_v38 = vmul.f32 %v3770_v45, %v13155_v46  ;;  %v13165_v24 = vmax.f32 %v13164_v42, 0.0  ;;  %v13212_v63 = vld [vmem:[#allocation14_spill] sm:$0xff]  ;;  %v13218_v30 = vld [vmem:[#allocation120_spill] sm:$0xff] }
 0x2a8   : > { %13147 = vst [vmem:[#allocation127_spill] sm:$0xff] %v11105_v57  ;;  %v11121_v51 = vmul.f32 %v3770_v45, %v13158_v25  ;;  %v3840_v14 = vmul.f32 %v10990_v13, %v13161_v54  ;;  %v3841_v29 = vmul.f32 %v10990_v13, %v13163_v0  ;;  %v13167_v44 = vmax.f32 %v13166_v28, 0.0  ;;  %v13170_v25 = vld [vmem:[#allocation95_spill] sm:$0xff]  ;;  %v13210_v57 = vld [vmem:[#allocation18_spill] sm:$0xff] }
 0x2a9   : > { %13150 = vst [vmem:[#allocation43_spill] sm:$0xff] %v11109_v11  ;;  %13153 = vst [vmem:[#allocation48_spill] sm:$0xff] %v11113_v23  ;;  %v3842_v4 = vmul.f32 %v10990_v13, %v13165_v24  ;;  %v13169_v1 = vmax.f32 %v13168_v16, 0.0  ;;  %v13171_v2 = vmax.f32 %v13170_v25, 0.0  ;;  %v13173_v62 = vmax.f32 %v13172_v56, 0.0  ;;  %v13206_v23 = vld [vmem:[#allocation116_spill] sm:$0xff] }
 0x2aa   : > { %13156 = vst [vmem:[#allocation63_spill] sm:$0xff] %v11117_v38  ;;  %13159 = vst [vmem:[#allocation67_spill] sm:$0xff] %v11121_v51  ;;  %v3843_v46 = vmul.f32 %v10990_v13, %v13167_v44  ;;  %v13175_v42 = vmax.f32 %v13174_v39, 0.0  ;;  %v13177_v28 = vmax.f32 %v13176_v21, 0.0  ;;  %v13179_v16 = vmax.f32 %v13178_v18, 0.0  ;;  %v13202_v51 = vld [vmem:[#allocation114_spill] sm:$0xff] }
 0x2ab   : > { %v3844_v45 = vmul.f32 %v10990_v13, %v13169_v1  ;;  %v3845_v54 = vmul.f32 %v10990_v13, %v13171_v2  ;;  %v3846_v0 = vmul.f32 %v10990_v13, %v13173_v62  ;;  %v13181_v25 = vmax.f32 %v13180_v12, 0.0  ;;  %v13204_v38 = vld [vmem:[#allocation115_spill] sm:$0xff]  ;;  %v13208_v11 = vld [vmem:[#allocation117_spill] sm:$0xff]  ;;  %v13214_v7 = vld [vmem:[#allocation118_spill] sm:$0xff] }
 0x2ac   : > { %v3847_v24 = vmul.f32 %v10990_v13, %v13175_v42  ;;  %v3848_v44 = vmul.f32 %v10990_v13, %v13177_v28  ;;  %v3849_v1 = vmul.f32 %v10990_v13, %v13179_v16  ;;  %v13183_v56 = vmax.f32 %v13182_v49, 0.0  ;;  %v13222_v60 = vld [vmem:[#allocation122_spill] sm:$0xff] }
 0x2ad   : > { %v3850_v2 = vmul.f32 %v10990_v13, %v13181_v25  ;;  %v13185_v39 = vmax.f32 %v13184_v10, 0.0  ;;  %v13187_v21 = vmax.f32 %v13186_v20, 0.0  ;;  %v13189_v18 = vmax.f32 %v13188_v53, 0.0 }
 0x2ae   : > { %v3851_v62 = vmul.f32 %v10990_v13, %v13183_v56  ;;  %v13191_v12 = vmax.f32 %v13190_v32, 0.0  ;;  %v13193_v49 = vmax.f32 %v13192_v5, 0.0  ;;  %v13195_v10 = vmax.f32 %v13194_v36, 0.0 }
 0x2af   : > { %v3852_v42 = vmul.f32 %v10990_v13, %v13185_v39  ;;  %v3853_v28 = vmul.f32 %v10990_v13, %v13187_v21  ;;  %v3854_v16 = vmul.f32 %v10990_v13, %v13189_v18  ;;  %v13197_v20 = vmax.f32 %v13196_v61, 0.0 }
 0x2b0   : > { %v3855_v25 = vmul.f32 %v10990_v13, %v13191_v12  ;;  %v3856_v56 = vmul.f32 %v10990_v13, %v13193_v49  ;;  %v3857_v39 = vmul.f32 %v10990_v13, %v13195_v10  ;;  %v13199_v53 = vmax.f32 %v13198_v59, 0.0 }
 0x2b1   : > { %v3858_v21 = vmul.f32 %v10990_v13, %v13197_v20  ;;  %v13201_v32 = vmax.f32 %v13200_v9, 0.0  ;;  %v13203_v5 = vmax.f32 %v13202_v51, 0.0  ;;  %v13205_v36 = vmax.f32 %v13204_v38, 0.0 }
 0x2b2   : > { %v3859_v18 = vmul.f32 %v10990_v13, %v13199_v53  ;;  %v13207_v61 = vmax.f32 %v13206_v23, 0.0  ;;  %v13209_v59 = vmax.f32 %v13208_v11, 0.0  ;;  %v13211_v9 = vmax.f32 %v13210_v57, 0.0 }
 0x2b3   : > { %v3860_v12 = vmul.f32 %v10990_v13, %v13201_v32  ;;  %v3861_v49 = vmul.f32 %v10990_v13, %v13203_v5  ;;  %v3862_v10 = vmul.f32 %v10990_v13, %v13205_v36  ;;  %v13213_v51 = vmax.f32 %v13212_v63, 0.0 }
 0x2b4   : > { %v3863_v20 = vmul.f32 %v10990_v13, %v13207_v61  ;;  %v3864_v53 = vmul.f32 %v10990_v13, %v13209_v59  ;;  %v3865_v32 = vmul.f32 %v10990_v13, %v13211_v9  ;;  %v13215_v38 = vmax.f32 %v13214_v7, 0.0 }
 0x2b5   : > { %v3866_v5 = vmul.f32 %v10990_v13, %v13213_v51  ;;  %v13217_v23 = vmax.f32 %v13216_v43, 0.0  ;;  %v13219_v11 = vmax.f32 %v13218_v30, 0.0  ;;  %v13221_v57 = vmax.f32 %v13220_v40, 0.0 }
 0x2b6   : > { %v3867_v36 = vmul.f32 %v10990_v13, %v13215_v38  ;;  %v13223_v63 = vmax.f32 %v13222_v60, 0.0  ;;  %v11220_v7 = vadd.f32 %v3840_v14, %v10997_v6  ;;  %v11223_v38 = vadd.f32 %v3841_v29, %v11001_v50 }
 0x2b7   : > { %v3868_v61 = vmul.f32 %v10990_v13, %v13217_v23  ;;  %v3869_v59 = vmul.f32 %v10990_v13, %v13219_v11  ;;  %v3870_v9 = vmul.f32 %v10990_v13, %v13221_v57  ;;  %v11226_v43 = vadd.f32 %v3842_v4, %v11005_v19 }
 0x2b8   : > { %v3871_v51 = vmul.f32 %v10990_v13, %v13223_v63  ;;  %v11229_v30 = vadd.f32 %v3843_v46, %v11009_v26  ;;  %v11232_v40 = vadd.f32 %v3844_v45, %v11013_v15  ;;  %v11235_v23 = vadd.f32 %v3845_v54, %v11017_v33  ;;  %v13258_v63 = vld [vmem:[#allocation139_spill] sm:$0xff] }
 0x2b9   : > { %v11238_v13 = vadd.f32 %v3846_v0, %v11021_v27  ;;  %v11241_v6 = vadd.f32 %v3847_v24, %v11025_v8  ;;  %v11244_v50 = vadd.f32 %v3848_v44, %v11029_v41  ;;  %v11247_v19 = vadd.f32 %v3849_v1, %v11033_v52  ;;  %v13237_v0 = vld [vmem:[#allocation43_spill] sm:$0xff]  ;;  %v13239_v44 = vld [vmem:[#allocation48_spill] sm:$0xff] }
 0x2ba   : > { %v11250_v26 = vadd.f32 %v3850_v2, %v11037_v22  ;;  %v11253_v15 = vadd.f32 %v3851_v62, %v11041_v37  ;;  %v11256_v33 = vadd.f32 %v3852_v42, %v11045_v17  ;;  %v11259_v27 = vadd.f32 %v3853_v28, %v11049_v3  ;;  %v13241_v2 = vld [vmem:[#allocation63_spill] sm:$0xff] }
 0x2bb   : > { %v11262_v8 = vadd.f32 %v3854_v16, %v11053_v35  ;;  %v11265_v41 = vadd.f32 %v3855_v25, %v11057_v58  ;;  %v11268_v52 = vadd.f32 %v3856_v56, %v11061_v55  ;;  %v11271_v22 = vadd.f32 %v3857_v39, %v11065_v47  ;;  %v13224_v35 = vld [vmem:[#allocation138_spill] sm:$0xff]  ;;  %v13225_v58 = vld [vmem:[#allocation123_spill] sm:$0xff]  ;;  %v13227_v55 = vld [vmem:[#allocation136_spill] sm:$0xff] }
 0x2bc   : > { %v11274_v37 = vadd.f32 %v3858_v21, %v11069_v31  ;;  %v11277_v17 = vadd.f32 %v3859_v18, %v11073_v34  ;;  %v11280_v3 = vadd.f32 %v3860_v12, %v11077_v48  ;;  %v11283_v60 = vadd.f32 %v3861_v49, %v13224_v35  ;;  %v13229_v47 = vld [vmem:[#allocation124_spill] sm:$0xff]  ;;  %v13231_v31 = vld [vmem:[#allocation125_spill] sm:$0xff]  ;;  %v13233_v34 = vld [vmem:[#allocation126_spill] sm:$0xff] }
 0x2bd   : > { %v11286_v14 = vadd.f32 %v3862_v10, %v13225_v58  ;;  %v11289_v29 = vadd.f32 %v3863_v20, %v13227_v55  ;;  %v11292_v4 = vadd.f32 %v3864_v53, %v13229_v47  ;;  %v11295_v46 = vadd.f32 %v3865_v32, %v13231_v31  ;;  %v13235_v48 = vld [vmem:[#allocation127_spill] sm:$0xff]  ;;  %v13245_v16 = vld [vmem:[#allocation32_spill] sm:$0xff]  ;;  %v13247_v56 = vld [vmem:[#allocation9_spill] sm:$0xff] }
 0x2be   : > { %v11298_v45 = vadd.f32 %v3866_v5, %v13233_v34  ;;  %v11301_v54 = vadd.f32 %v3867_v36, %v13235_v48  ;;  %v11304_v24 = vadd.f32 %v3868_v61, %v13237_v0  ;;  %v11307_v1 = vadd.f32 %v3869_v59, %v13239_v44  ;;  %v13243_v42 = vld [vmem:[#allocation67_spill] sm:$0xff]  ;;  %v13260_v58 = vld [vmem:[#allocation140_spill] sm:$0xff]  ;;  %v13262_v31 = vld [vmem:[#allocation141_spill] sm:$0xff] }
 0x2bf   : > { %13226 = vst [vmem:[#allocation70_spill] sm:$0xff] %v11286_v14  ;;  %13228 = vst [vmem:[#allocation71_spill] sm:$0xff] %v11289_v29  ;;  %v11310_v62 = vadd.f32 %v3870_v9, %v13241_v2  ;;  %v11313_v28 = vadd.f32 %v3871_v51, %v13243_v42  ;;  %v13246_v25 = vmax.f32 %v13245_v16, 0.0  ;;  %v13248_v21 = vld [vmem:[#allocation47_spill] sm:$0xff]  ;;  %v13259_v51 = vmax.f32 %v13258_v63, 0.0  ;;  %v13264_v0 = vld [vmem:[#allocation145_spill] sm:$0xff] }
 0x2c0   : > { %13230 = vst [vmem:[#allocation72_spill] sm:$0xff] %v11292_v4  ;;  %13232 = vst [vmem:[#allocation73_spill] sm:$0xff] %v11295_v46  ;;  %v13249_v18 = vmax.f32 %v13248_v21, 0.0  ;;  %v13250_v49 = vld [vmem:[#allocation59_spill] sm:$0xff]  ;;  %v13261_v55 = vmax.f32 %v13260_v58, 0.0  ;;  %v13263_v34 = vmax.f32 %v13262_v31, 0.0 }
 0x2c1   : > { %13234 = vst [vmem:[#allocation74_spill] sm:$0xff] %v11298_v45  ;;  %13236 = vst [vmem:[#allocation75_spill] sm:$0xff] %v11301_v54  ;;  %v3909_v39 = vmul.f32 %v13247_v56, %v13246_v25  ;;  %v13251_v10 = vmax.f32 %v13250_v49, 0.0  ;;  %v13252_v53 = vld [vmem:[#allocation103_spill] sm:$0xff]  ;;  %v3915_v35 = vmul.f32 %v13247_v56, %v13259_v51  ;;  %v13265_v44 = vmax.f32 %v13264_v0, 0.0  ;;  %v13266_v42 = vld [vmem:[#allocation146_spill] sm:$0xff] }
 0x2c2   : > { %13238 = vst [vmem:[#allocation142_spill] sm:$0xff] %v11304_v24  ;;  %13240 = vst [vmem:[#allocation133_spill] sm:$0xff] %v11307_v1  ;;  %v3910_v12 = vmul.f32 %v13247_v56, %v13249_v18  ;;  %v13253_v32 = vmax.f32 %v13252_v53, 0.0  ;;  %v13254_v36 = vld [vmem:[#allocation39_spill] sm:$0xff]  ;;  %v3916_v47 = vmul.f32 %v13247_v56, %v13261_v55  ;;  %v3917_v48 = vmul.f32 %v13247_v56, %v13263_v34  ;;  %v13278_v34 = vld [vmem:[#allocation152_spill] sm:$0xff] }
 0x2c3   : > { %13242 = vst [vmem:[#allocation25_spill] sm:$0xff] %v11310_v62  ;;  %13244 = vst [vmem:[#allocation42_spill] sm:$0xff] %v11313_v28  ;;  %v3911_v20 = vmul.f32 %v13247_v56, %v13251_v10  ;;  %v13255_v61 = vmax.f32 %v13254_v36, 0.0  ;;  %v13256_v59 = vld [vmem:[#allocation135_spill] sm:$0xff]  ;;  %v3918_v2 = vmul.f32 %v13247_v56, %v13265_v44  ;;  %v13267_v16 = vmax.f32 %v13266_v42, 0.0  ;;  %v13270_v10 = vld [vmem:[#allocation148_spill] sm:$0xff] }
 0x2c4   : > { %v3912_v5 = vmul.f32 %v13247_v56, %v13253_v32  ;;  %v13257_v57 = vmax.f32 %v13256_v59, 0.0  ;;  %v13268_v21 = vld [vmem:[#allocation147_spill] sm:$0xff]  ;;  %v13271_v53 = vmax.f32 %v13270_v10, 0.0  ;;  %v13272_v36 = vld [vmem:[#allocation149_spill] sm:$0xff]  ;;  %v13279_v0 = vmax.f32 %v13278_v34, 0.0  ;;  %v13290_v62 = vld [vmem:[#allocation158_spill] sm:$0xff] }
 0x2c5   : > { %v3913_v11 = vmul.f32 %v13247_v56, %v13255_v61  ;;  %v3919_v25 = vmul.f32 %v13247_v56, %v13267_v16  ;;  %v13269_v18 = vmax.f32 %v13268_v21, 0.0  ;;  %v13273_v61 = vmax.f32 %v13272_v36, 0.0  ;;  %v13276_v58 = vld [vmem:[#allocation151_spill] sm:$0xff]  ;;  %v13280_v42 = vld [vmem:[#allocation153_spill] sm:$0xff]  ;;  %v13296_v54 = vld [vmem:[#allocation90_spill] sm:$0xff] }
 0x2c6   : > { %v3914_v9 = vmul.f32 %v13247_v56, %v13257_v57  ;;  %v3921_v32 = vmul.f32 %v13247_v56, %v13271_v53  ;;  %v13274_v57 = vld [vmem:[#allocation150_spill] sm:$0xff]  ;;  %v13277_v55 = vmax.f32 %v13276_v58, 0.0  ;;  %v3925_v44 = vmul.f32 %v13247_v56, %v13279_v0  ;;  %v13284_v36 = vld [vmem:[#allocation155_spill] sm:$0xff]  ;;  %v13288_v28 = vld [vmem:[#allocation157_spill] sm:$0xff] }
 0x2c7   : > { %v3920_v49 = vmul.f32 %v13247_v56, %v13269_v18  ;;  %v3922_v59 = vmul.f32 %v13247_v56, %v13273_v61  ;;  %v13275_v63 = vmax.f32 %v13274_v57, 0.0  ;;  %v13281_v16 = vmax.f32 %v13280_v42, 0.0  ;;  %v13282_v18 = vld [vmem:[#allocation154_spill] sm:$0xff]  ;;  %v13292_v1 = vld [vmem:[#allocation159_spill] sm:$0xff]  ;;  %v13294_v24 = vld [vmem:[#allocation89_spill] sm:$0xff] }
 0x2c8   : > { %v3924_v31 = vmul.f32 %v13247_v56, %v13277_v55  ;;  %v13283_v10 = vmax.f32 %v13282_v18, 0.0  ;;  %v13285_v61 = vmax.f32 %v13284_v36, 0.0  ;;  %v13289_v34 = vmax.f32 %v13288_v28, 0.0  ;;  %v13298_v45 = vld [vmem:[#allocation91_spill] sm:$0xff]  ;;  %v13300_v46 = vld [vmem:[#allocation62_spill] sm:$0xff] }
 0x2c9   : > { %v3923_v51 = vmul.f32 %v13247_v56, %v13275_v63  ;;  %v3926_v21 = vmul.f32 %v13247_v56, %v13281_v16  ;;  %v13286_v63 = vld [vmem:[#allocation156_spill] sm:$0xff]  ;;  %v13291_v42 = vmax.f32 %v13290_v62, 0.0  ;;  %v13293_v18 = vmax.f32 %v13292_v1, 0.0 }
 0x2ca   : > { %v3927_v53 = vmul.f32 %v13247_v56, %v13283_v10  ;;  %v3928_v57 = vmul.f32 %v13247_v56, %v13285_v61  ;;  %v13287_v58 = vmax.f32 %v13286_v63, 0.0  ;;  %v3930_v0 = vmul.f32 %v13247_v56, %v13289_v34 }
 0x2cb   : > { %v3931_v16 = vmul.f32 %v13247_v56, %v13291_v42  ;;  %v3932_v10 = vmul.f32 %v13247_v56, %v13293_v18  ;;  %v13295_v36 = vmax.f32 %v13294_v24, 0.0  ;;  %v13297_v63 = vmax.f32 %v13296_v54, 0.0  ;;  %v13302_v24 = vld [vmem:[#allocation64_spill] sm:$0xff] }
 0x2cc   : > { %v3929_v55 = vmul.f32 %v13247_v56, %v13287_v58  ;;  %v13299_v28 = vmax.f32 %v13298_v45, 0.0  ;;  %v13301_v62 = vmax.f32 %v13300_v46, 0.0  ;;  %v13303_v1 = vmax.f32 %v13302_v24, 0.0  ;;  %v13304_v54 = vld [vmem:[#allocation68_spill] sm:$0xff] }
 0x2cd   : > { %v3933_v61 = vmul.f32 %v13247_v56, %v13295_v36  ;;  %v3934_v58 = vmul.f32 %v13247_v56, %v13297_v63  ;;  %v13305_v36 = vmax.f32 %v13304_v54, 0.0  ;;  %v13306_v63 = vld [vmem:[#allocation69_spill] sm:$0xff]  ;;  %v3941_v24 = vadd.f32 %v3909_v39, %v11220_v7  ;;  %v13315_v39 = vld [vmem:[#allocation75_spill] sm:$0xff] }
 0x2ce   : > { %v3935_v34 = vmul.f32 %v13247_v56, %v13299_v28  ;;  %v3936_v42 = vmul.f32 %v13247_v56, %v13301_v62  ;;  %v3937_v18 = vmul.f32 %v13247_v56, %v13303_v1  ;;  %v13307_v28 = vmax.f32 %v13306_v63, 0.0  ;;  %v13308_v62 = vld [vmem:[#allocation8_spill] sm:$0xff] }
 0x2cf   : > { %v3938_v45 = vmul.f32 %v13247_v56, %v13305_v36  ;;  %v13309_v4 = vmax.f32 %v13308_v62, 0.0  ;;  %v3942_v1 = vadd.f32 %v3910_v12, %v11223_v38  ;;  %v3943_v54 = vadd.f32 %v3911_v20, %v11226_v43  ;;  %3973 = vst [vmem:[%s11403_s18] sm:$0xff] %v3941_v24  ;;  %v13316_v20 = vld [vmem:[#allocation142_spill] sm:$0xff] }
 0x2d0   : > { %v3939_v46 = vmul.f32 %v13247_v56, %v13307_v28  ;;  %v3944_v14 = vadd.f32 %v3912_v5, %v11229_v30  ;;  %v3945_v36 = vadd.f32 %v3913_v11, %v11232_v40  ;;  %v3946_v63 = vadd.f32 %v3914_v9, %v11235_v23  ;;  %v13317_v11 = vld [vmem:[#allocation133_spill] sm:$0xff] }
 0x2d1   : > { %v3940_v29 = vmul.f32 %v13247_v56, %v13309_v4  ;;  %v3947_v28 = vadd.f32 %v3915_v35, %v11238_v13  ;;  %v3948_v4 = vadd.f32 %v3916_v47, %v11241_v6  ;;  %v3949_v7 = vadd.f32 %v3917_v48, %v11244_v50  ;;  %3974 = vst [vmem:[%s11403_s18 + $0x8] sm:$0xff] %v3942_v1  ;;  %v13318_v35 = vld [vmem:[#allocation25_spill] sm:$0xff]  ;;  %v13319_v48 = vld [vmem:[#allocation42_spill] sm:$0xff] }
 0x2d2   : > { %v3950_v38 = vadd.f32 %v3918_v2, %v11247_v19  ;;  %v3951_v43 = vadd.f32 %v3919_v25, %v11250_v26  ;;  %v3952_v30 = vadd.f32 %v3920_v49, %v11253_v15  ;;  %3975 = vst [vmem:[%s11403_s18 + $0x10] sm:$0xff] %v3943_v54  ;;  %3976 = vst [vmem:[%s11403_s18 + $0x18] sm:$0xff] %v3944_v14  ;;  %v13313_v14 = vld [vmem:[#allocation73_spill] sm:$0xff] }
 0x2d3   : > { %v3953_v40 = vadd.f32 %v3921_v32, %v11256_v33  ;;  %v3954_v23 = vadd.f32 %v3922_v59, %v11259_v27  ;;  %v3955_v13 = vadd.f32 %v3923_v51, %v11262_v8  ;;  %v3956_v6 = vadd.f32 %v3924_v31, %v11265_v41  ;;  %3977 = vst [vmem:[%s11403_s18 + $0x20] sm:$0xff] %v3945_v36  ;;  %v13310_v8 = vld [vmem:[#allocation70_spill] sm:$0xff] }
 0x2d4   : > { %3978 = vst [vmem:[%s11403_s18 + $0x28] sm:$0xff] %v3946_v63  ;;  %3979 = vst [vmem:[%s11403_s18 + $0x30] sm:$0xff] %v3947_v28  ;;  %v3957_v50 = vadd.f32 %v3925_v44, %v11268_v52  ;;  %v3958_v19 = vadd.f32 %v3926_v21, %v11271_v22  ;;  %v3959_v26 = vadd.f32 %v3927_v53, %v11274_v37  ;;  %v13311_v52 = vld [vmem:[#allocation71_spill] sm:$0xff]  ;;  %v13312_v37 = vld [vmem:[#allocation72_spill] sm:$0xff] }
 0x2d5   : > { %3980 = vst [vmem:[%s11403_s18 + $0x38] sm:$0xff] %v3948_v4  ;;  %v3960_v15 = vadd.f32 %v3928_v57, %v11277_v17  ;;  %3981 = vst [vmem:[%s11403_s18 + $0x40] sm:$0xff] %v3949_v7  ;;  %v3961_v33 = vadd.f32 %v3929_v55, %v11280_v3  ;;  %v3962_v27 = vadd.f32 %v3930_v0, %v11283_v60  ;;  %v13314_v3 = vld [vmem:[#allocation74_spill] sm:$0xff] }
 0x2d6   : > { %3982 = vst [vmem:[%s11403_s18 + $0x48] sm:$0xff] %v3950_v38  ;;  %3983 = vst [vmem:[%s11403_s18 + $0x50] sm:$0xff] %v3951_v43  ;;  %v3963_v41 = vadd.f32 %v3931_v16, %v13310_v8  ;;  %v3964_v22 = vadd.f32 %v3932_v10, %v13311_v52  ;;  %v3965_v17 = vadd.f32 %v3933_v61, %v13312_v37 }
 0x2d7   : > { %3984 = vst [vmem:[%s11403_s18 + $0x58] sm:$0xff] %v3952_v30  ;;  %3985 = vst [vmem:[%s11403_s18 + $0x60] sm:$0xff] %v3953_v40  ;;  %v3966_v56 = vadd.f32 %v3934_v58, %v13313_v14  ;;  %v3967_v60 = vadd.f32 %v3935_v34, %v13314_v3  ;;  %v3968_v12 = vadd.f32 %v3936_v42, %v13315_v39 }
 0x2d8   : > { %3986 = vst [vmem:[%s11403_s18 + $0x68] sm:$0xff] %v3954_v23  ;;  %3987 = vst [vmem:[%s11403_s18 + $0x70] sm:$0xff] %v3955_v13  ;;  %v3969_v5 = vadd.f32 %v3937_v18, %v13316_v20  ;;  %v3970_v9 = vadd.f32 %v3938_v45, %v13317_v11  ;;  %v3971_v47 = vadd.f32 %v3939_v46, %v13318_v35 }
 0x2d9   : > { %3988 = vst [vmem:[%s11403_s18 + $0x78] sm:$0xff] %v3956_v6  ;;  %3989 = vst [vmem:[%s11403_s18 + $0x80] sm:$0xff] %v3957_v50  ;;  %v3972_v2 = vadd.f32 %v3940_v29, %v13319_v48 }
 0x2da   : > { %3990 = vst [vmem:[%s11403_s18 + $0x88] sm:$0xff] %v3958_v19  ;;  %3991 = vst [vmem:[%s11403_s18 + $0x90] sm:$0xff] %v3959_v26 }
 0x2db   : > { %3992 = vst [vmem:[%s11403_s18 + $0x98] sm:$0xff] %v3960_v15  ;;  %3993 = vst [vmem:[%s11403_s18 + $0xa0] sm:$0xff] %v3961_v33 }
 0x2dc   : > { %3994 = vst [vmem:[%s11403_s18 + $0xa8] sm:$0xff] %v3962_v27  ;;  %3995 = vst [vmem:[%s11403_s18 + $0xb0] sm:$0xff] %v3963_v41 }
 0x2dd   : > { %3996 = vst [vmem:[%s11403_s18 + $0xb8] sm:$0xff] %v3964_v22  ;;  %3997 = vst [vmem:[%s11403_s18 + $0xc0] sm:$0xff] %v3965_v17 }
 0x2de   : > { %3998 = vst [vmem:[%s11403_s18 + $0xc8] sm:$0xff] %v3966_v56  ;;  %3999 = vst [vmem:[%s11403_s18 + $0xd0] sm:$0xff] %v3967_v60 }
 0x2df   : > { %4000 = vst [vmem:[%s11403_s18 + $0xd8] sm:$0xff] %v3968_v12  ;;  %4001 = vst [vmem:[%s11403_s18 + $0xe0] sm:$0xff] %v3969_v5 }
 0x2e0   : > { %4002 = vst [vmem:[%s11403_s18 + $0xe8] sm:$0xff] %v3970_v9  ;;  %4003 = vst [vmem:[%s11403_s18 + $0xf0] sm:$0xff] %v3971_v47 }
 0x2e1   : > { %4004 = vst [vmem:[%s11403_s18 + $0xf8] sm:$0xff] %v3972_v2 }
 0x2e2 PF: > { %s19_s30 = sadd.s32 1, %s5208_s30  }
 0x2e3   : > { %p16_p4 = scmp.ge.s32.totalorder %s19_s30, 4  }
 0x2e5   :  { %18 = sbr.rel (!%p16_p4) target bundleno = 1 (0x1), region = 102 }

</bundles_post_ra>
